<compile_context>
chip_gen: v5e
topology: v5e:2x2
jax: 0.10.0
libtpu: 0.0.40
codegen_flags: <defaults>
</compile_context>

<pallas_src>
import jax
import jax.numpy as jnp
from jax import lax
from jax.experimental import pallas as pl
from jax.experimental.pallas import tpu as pltpu

EPS = 1e-5
LEFT = 8   # left-halo width so the interior starts at a multiple-of-8 W offset


def _residual_block_kernel(x_ref, w1_ref, g1_ref, be1_ref,
                           w2_ref, g2_ref, be2_ref,
                           o_ref, pad_ref):
    N, H, W, C = x_ref.shape              # C == CP (lane-dense, multiple of 128)
    NHW = N * H * W
    inv_nhw = 1.0 / NHW
    ZW = pad_ref.shape[2]                  # padded width (multiple of 8)

    # ---- halo-only zeroing (interior is always overwritten before any read).
    # Top / bottom halo rows: full-width, sublane-aligned stores.
    zero_row = jnp.zeros((N, 1, ZW, C), jnp.float32)
    pad_ref[:, 0:1, :, :] = zero_row
    pad_ref[:, H + 1:H + 2, :, :] = zero_row
    # Left / right 8-wide slabs: cover the only halo columns actually read
    # (LEFT-1 and LEFT+W) with aligned, unmasked stores.
    zero_col = jnp.zeros((N, H, 8, C), jnp.float32)
    pad_ref[:, 1:H + 1, 0:8, :] = zero_col
    pad_ref[:, 1:H + 1, LEFT + W:LEFT + W + 8, :] = zero_col

    def conv3x3(w_ref):
        # 9 accumulating K=C matmuls straight from the padded buffer — no
        # im2col scratch, no tap-copy store traffic.  Conv bias intentionally
        # omitted: training-mode BN subtracts the batch mean, so it cancels.
        acc = None
        for ky in range(3):
            for kx in range(3):
                t = ky * 3 + kx
                win = pad_ref[:, ky:ky + H, LEFT - 1 + kx:LEFT - 1 + kx + W, :]
                part = jnp.dot(win.reshape(NHW, C), w_ref[t],
                               preferred_element_type=jnp.float32)
                acc = part if acc is None else acc + part
        return acc

    def batchnorm(y, g_ref, be_ref):
        # Training-mode BN, centered two-pass variance (safer than E[y^2]-m^2).
        # gamma/beta are zero-padded on dead lanes, so padded channels stay 0.
        mean = jnp.sum(y, axis=0, keepdims=True) * inv_nhw
        d = y - mean
        var = jnp.sum(d * d, axis=0, keepdims=True) * inv_nhw
        scale = g_ref[...] * lax.rsqrt(var + EPS)       # (1, C)
        return d * scale + be_ref[...]                  # single fused pass

    # conv1 -> bn1 -> relu
    pad_ref[:, 1:H + 1, LEFT:LEFT + W, :] = x_ref[...]          # aligned write
    h1 = jnp.maximum(batchnorm(conv3x3(w1_ref), g1_ref, be1_ref), 0.0)

    # conv2 -> bn2 (same padded scratch; halo is still zero)
    pad_ref[:, 1:H + 1, LEFT:LEFT + W, :] = h1.reshape(N, H, W, C)
    h2 = batchnorm(conv3x3(w2_ref), g2_ref, be2_ref)

    # residual add (re-read x_ref here to keep its live range short) + relu
    out = jnp.maximum(h2 + x_ref[...].reshape(NHW, C), 0.0)
    o_ref[...] = out.reshape(N, H, W, C).astype(o_ref.dtype)


def residual_block(x_nchw, params):
    """Pallas forward. x_nchw: (N, C, H, W) float32 (PyTorch convention)."""
    w1, b1, g1, be1, w2, b2, g2, be2 = params
    del b1, b2   # conv biases cancel exactly under training-mode BatchNorm
    N, C, H, W = x_nchw.shape
    assert W % 8 == 0, "W must be a multiple of 8 for layout-free reshapes"

    CP = ((C + 127) // 128) * 128            # lane-dense channel count
    W_PAD = ((LEFT + W + 1 + 7) // 8) * 8    # aligned padded width

    x_nhwc = jnp.transpose(x_nchw, (0, 2, 3, 1)).astype(jnp.float32)
    x_pad = jnp.pad(x_nhwc, ((0, 0), (0, 0), (0, 0), (0, CP - C)))

    def to_kernel_w(w):
        # PyTorch (Cout, Cin, 3, 3) -> (kH, kW, Cin, Cout) -> zero-pad -> (9, CP, CP)
        wt = jnp.transpose(w, (2, 3, 1, 0)).astype(jnp.float32)
        wt = jnp.pad(wt, ((0, 0), (0, 0), (0, CP - C), (0, CP - C)))
        return wt.reshape(9, CP, CP)

    def to_vec(v):
        # NOTE: zero-padding gamma (not one-padding) is what keeps dead lanes
        # exactly zero: var=0 there makes rsqrt(eps) large, but gamma=0 kills it.
        return jnp.pad(v.astype(jnp.float32), (0, CP - C)).reshape(1, CP)

    args = (x_pad,
            to_kernel_w(w1), to_vec(g1), to_vec(be1),
            to_kernel_w(w2), to_vec(g2), to_vec(be2))

    out_nhwc = pl.pallas_call(
        _residual_block_kernel,
        out_shape=jax.ShapeDtypeStruct((N, H, W, CP), jnp.float32),
        in_specs=[pl.BlockSpec(memory_space=pltpu.MemorySpace.VMEM)] * len(args),
        out_specs=pl.BlockSpec(memory_space=pltpu.MemorySpace.VMEM),
        scratch_shapes=[
            pltpu.VMEM((N, H + 2, W_PAD, CP), jnp.float32),   # padded activations
        ],
        compiler_params=pltpu.CompilerParams(
            vmem_limit_bytes=32 * 1024 * 1024),
    )(*args)

    # drop padded channels, back to NCHW
    return jnp.transpose(out_nhwc[..., :C], (0, 3, 1, 2))


def residual_block_ref(x_nchw, params):
    """Pure-JAX reference matching the PyTorch module's training-mode forward."""
    w1, b1, g1, be1, w2, b2, g2, be2 = params

    def conv(x, w, b):
        y = lax.conv_general_dilated(
            x, w, window_strides=(1, 1), padding=((1, 1), (1, 1)),
            dimension_numbers=('NCHW', 'OIHW', 'NCHW'))
        return y + b[None, :, None, None]

    def bn(y, g, be):
        mean = jnp.mean(y, axis=(0, 2, 3), keepdims=True)
        var = jnp.mean((y - mean) ** 2, axis=(0, 2, 3), keepdims=True)
        return ((y - mean) / jnp.sqrt(var + EPS)) * g[None, :, None, None] \
            + be[None, :, None, None]

    h = jax.nn.relu(bn(conv(x_nchw, w1, b1), g1, be1))
    h = bn(conv(h, w2, b2), g2, be2)
    return jax.nn.relu(h + x_nchw)


if __name__ == "__main__":
    N, C, H, W = 2, 4, 16, 16
    key = jax.random.PRNGKey(0)
    kx, kw1, kb1, kw2, kb2 = jax.random.split(key, 5)

    x = jax.random.normal(kx, (N, C, H, W), jnp.float32)

    # deterministic synthetic parameters (PyTorch shapes: conv weight (Cout,Cin,3,3))
    w1 = jax.random.normal(kw1, (C, C, 3, 3), jnp.float32) * 0.1
    b1 = jax.random.normal(kb1, (C,), jnp.float32) * 0.1
    w2 = jax.random.normal(kw2, (C, C, 3, 3), jnp.float32) * 0.1
    b2 = jax.random.normal(kb2, (C,), jnp.float32) * 0.1
    g1 = jnp.ones((C,), jnp.float32)    # BatchNorm2d default weight
    be1 = jnp.zeros((C,), jnp.float32)  # BatchNorm2d default bias
    g2 = jnp.ones((C,), jnp.float32)
    be2 = jnp.zeros((C,), jnp.float32)

    params = (w1, b1, g1, be1, w2, b2, g2, be2)

    out = jax.block_until_ready(residual_block(x, params))
    ref = jax.block_until_ready(residual_block_ref(x, params))

    assert out.shape == (N, C, H, W)
    assert jnp.allclose(out, ref, rtol=1e-4, atol=1e-4), \
        f"max abs diff {jnp.max(jnp.abs(out - ref))}"

    print("KERNEL_OK")
</pallas_src>

<mosaic_0001>
module attributes {stable_mosaic.version = 11 : i64} {
  func.func @_residual_block_kernel(%arg0: memref<2x16x16x128xf32, #tpu.memory_space<vmem>>, %arg1: memref<9x128x128xf32, #tpu.memory_space<vmem>>, %arg2: memref<1x128xf32, #tpu.memory_space<vmem>>, %arg3: memref<1x128xf32, #tpu.memory_space<vmem>>, %arg4: memref<9x128x128xf32, #tpu.memory_space<vmem>>, %arg5: memref<1x128xf32, #tpu.memory_space<vmem>>, %arg6: memref<1x128xf32, #tpu.memory_space<vmem>>, %arg7: memref<2x16x16x128xf32, #tpu.memory_space<vmem>>, %arg8: memref<2x18x32x128xf32, #tpu.memory_space<vmem>>) attributes {dimension_semantics = [], scalar_prefetch = 0 : i64, scratch_operands = 1 : i64, tpu.core_type = #tpu.core_type<tc>} {
    %cst = arith.constant 0.000000e+00 : f32
    %0 = vector.broadcast %cst : f32 to vector<2x1x32x128xf32>
    %c0 = arith.constant 0 : index
    %c0_0 = arith.constant 0 : index
    %c0_1 = arith.constant 0 : index
    %c0_2 = arith.constant 0 : index
    %1 = vector.load %arg8[%c0, %c0_0, %c0_1, %c0_2] : memref<2x18x32x128xf32, #tpu.memory_space<vmem>>, vector<2x1x32x128xf32>
    tpu.vector_store %arg8[%c0, %c0_0, %c0_1, %c0_2], %0 {strides = array<i32>} : memref<2x18x32x128xf32, #tpu.memory_space<vmem>>, vector<2x1x32x128xf32>,
    %c0_3 = arith.constant 0 : index
    %c17 = arith.constant 17 : index
    %c0_4 = arith.constant 0 : index
    %c0_5 = arith.constant 0 : index
    %2 = vector.load %arg8[%c0_3, %c17, %c0_4, %c0_5] : memref<2x18x32x128xf32, #tpu.memory_space<vmem>>, vector<2x1x32x128xf32>
    tpu.vector_store %arg8[%c0_3, %c17, %c0_4, %c0_5], %0 {strides = array<i32>} : memref<2x18x32x128xf32, #tpu.memory_space<vmem>>, vector<2x1x32x128xf32>,
    %cst_6 = arith.constant 0.000000e+00 : f32
    %3 = vector.broadcast %cst_6 : f32 to vector<2x16x8x128xf32>
    %c0_7 = arith.constant 0 : index
    %c1 = arith.constant 1 : index
    %c0_8 = arith.constant 0 : index
    %c0_9 = arith.constant 0 : index
    %4 = vector.load %arg8[%c0_7, %c1, %c0_8, %c0_9] : memref<2x18x32x128xf32, #tpu.memory_space<vmem>>, vector<2x16x8x128xf32>
    tpu.vector_store %arg8[%c0_7, %c1, %c0_8, %c0_9], %3 {strides = array<i32>} : memref<2x18x32x128xf32, #tpu.memory_space<vmem>>, vector<2x16x8x128xf32>,
    %c0_10 = arith.constant 0 : index
    %c1_11 = arith.constant 1 : index
    %c24 = arith.constant 24 : index
    %c0_12 = arith.constant 0 : index
    %5 = vector.load %arg8[%c0_10, %c1_11, %c24, %c0_12] : memref<2x18x32x128xf32, #tpu.memory_space<vmem>>, vector<2x16x8x128xf32>
    tpu.vector_store %arg8[%c0_10, %c1_11, %c24, %c0_12], %3 {strides = array<i32>} : memref<2x18x32x128xf32, #tpu.memory_space<vmem>>, vector<2x16x8x128xf32>,
    %c0_13 = arith.constant 0 : index
    %c0_14 = arith.constant 0 : index
    %c0_15 = arith.constant 0 : index
    %c0_16 = arith.constant 0 : index
    %6 = vector.load %arg0[%c0_13, %c0_14, %c0_15, %c0_16] : memref<2x16x16x128xf32, #tpu.memory_space<vmem>>, vector<2x16x16x128xf32>
    %c0_17 = arith.constant 0 : index
    %c1_18 = arith.constant 1 : index
    %c8 = arith.constant 8 : index
    %c0_19 = arith.constant 0 : index
    %7 = vector.load %arg8[%c0_17, %c1_18, %c8, %c0_19] : memref<2x18x32x128xf32, #tpu.memory_space<vmem>>, vector<2x16x16x128xf32>
    tpu.vector_store %arg8[%c0_17, %c1_18, %c8, %c0_19], %6 {strides = array<i32>} : memref<2x18x32x128xf32, #tpu.memory_space<vmem>>, vector<2x16x16x128xf32>,
    %c0_20 = arith.constant 0 : index
    %c0_21 = arith.constant 0 : index
    %c7 = arith.constant 7 : index
    %c0_22 = arith.constant 0 : index
    %8 = vector.load %arg8[%c0_20, %c0_21, %c7, %c0_22] : memref<2x18x32x128xf32, #tpu.memory_space<vmem>>, vector<2x16x16x128xf32>
    %9 = vector.shape_cast %8 : vector<2x16x16x128xf32> to vector<512x128xf32>
    %c0_23 = arith.constant 0 : index
    %c0_24 = arith.constant 0 : index
    %c0_25 = arith.constant 0 : index
    %10 = vector.load %arg1[%c0_23, %c0_24, %c0_25] : memref<9x128x128xf32, #tpu.memory_space<vmem>>, vector<1x128x128xf32>
    %11 = vector.shape_cast %10 : vector<1x128x128xf32> to vector<128x128xf32>
    %cst_26 = arith.constant dense<0.000000e+00> : vector<512x128xf32>
    %12 = tpu.matmul %9, %11, %cst_26 {dimension_numbers = #tpu.dot_dimension_numbers<[1], [0], [0], [1], [0, 0, 1, 1], [], []>} : vector<512x128xf32>, vector<128x128xf32>, vector<512x128xf32> -> vector<512x128xf32>
    %c0_27 = arith.constant 0 : index
    %c0_28 = arith.constant 0 : index
    %c8_29 = arith.constant 8 : index
    %c0_30 = arith.constant 0 : index
    %13 = vector.load %arg8[%c0_27, %c0_28, %c8_29, %c0_30] : memref<2x18x32x128xf32, #tpu.memory_space<vmem>>, vector<2x16x16x128xf32>
    %14 = vector.shape_cast %13 : vector<2x16x16x128xf32> to vector<512x128xf32>
    %c1_31 = arith.constant 1 : index
    %c0_32 = arith.constant 0 : index
    %c0_33 = arith.constant 0 : index
    %15 = vector.load %arg1[%c1_31, %c0_32, %c0_33] : memref<9x128x128xf32, #tpu.memory_space<vmem>>, vector<1x128x128xf32>
    %16 = vector.shape_cast %15 : vector<1x128x128xf32> to vector<128x128xf32>
    %cst_34 = arith.constant dense<0.000000e+00> : vector<512x128xf32>
    %17 = tpu.matmul %14, %16, %cst_34 {dimension_numbers = #tpu.dot_dimension_numbers<[1], [0], [0], [1], [0, 0, 1, 1], [], []>} : vector<512x128xf32>, vector<128x128xf32>, vector<512x128xf32> -> vector<512x128xf32>
    %18 = arith.addf %12, %17 : vector<512x128xf32>
    %c0_35 = arith.constant 0 : index
    %c0_36 = arith.constant 0 : index
    %c9 = arith.constant 9 : index
    %c0_37 = arith.constant 0 : index
    %19 = vector.load %arg8[%c0_35, %c0_36, %c9, %c0_37] : memref<2x18x32x128xf32, #tpu.memory_space<vmem>>, vector<2x16x16x128xf32>
    %20 = vector.shape_cast %19 : vector<2x16x16x128xf32> to vector<512x128xf32>
    %c2 = arith.constant 2 : index
    %c0_38 = arith.constant 0 : index
    %c0_39 = arith.constant 0 : index
    %21 = vector.load %arg1[%c2, %c0_38, %c0_39] : memref<9x128x128xf32, #tpu.memory_space<vmem>>, vector<1x128x128xf32>
    %22 = vector.shape_cast %21 : vector<1x128x128xf32> to vector<128x128xf32>
    %cst_40 = arith.constant dense<0.000000e+00> : vector<512x128xf32>
    %23 = tpu.matmul %20, %22, %cst_40 {dimension_numbers = #tpu.dot_dimension_numbers<[1], [0], [0], [1], [0, 0, 1, 1], [], []>} : vector<512x128xf32>, vector<128x128xf32>, vector<512x128xf32> -> vector<512x128xf32>
    %24 = arith.addf %18, %23 : vector<512x128xf32>
    %c0_41 = arith.constant 0 : index
    %c1_42 = arith.constant 1 : index
    %c7_43 = arith.constant 7 : index
    %c0_44 = arith.constant 0 : index
    %25 = vector.load %arg8[%c0_41, %c1_42, %c7_43, %c0_44] : memref<2x18x32x128xf32, #tpu.memory_space<vmem>>, vector<2x16x16x128xf32>
    %26 = vector.shape_cast %25 : vector<2x16x16x128xf32> to vector<512x128xf32>
    %c3 = arith.constant 3 : index
    %c0_45 = arith.constant 0 : index
    %c0_46 = arith.constant 0 : index
    %27 = vector.load %arg1[%c3, %c0_45, %c0_46] : memref<9x128x128xf32, #tpu.memory_space<vmem>>, vector<1x128x128xf32>
    %28 = vector.shape_cast %27 : vector<1x128x128xf32> to vector<128x128xf32>
    %cst_47 = arith.constant dense<0.000000e+00> : vector<512x128xf32>
    %29 = tpu.matmul %26, %28, %cst_47 {dimension_numbers = #tpu.dot_dimension_numbers<[1], [0], [0], [1], [0, 0, 1, 1], [], []>} : vector<512x128xf32>, vector<128x128xf32>, vector<512x128xf32> -> vector<512x128xf32>
    %30 = arith.addf %24, %29 : vector<512x128xf32>
    %c0_48 = arith.constant 0 : index
    %c1_49 = arith.constant 1 : index
    %c8_50 = arith.constant 8 : index
    %c0_51 = arith.constant 0 : index
    %31 = vector.load %arg8[%c0_48, %c1_49, %c8_50, %c0_51] : memref<2x18x32x128xf32, #tpu.memory_space<vmem>>, vector<2x16x16x128xf32>
    %32 = vector.shape_cast %31 : vector<2x16x16x128xf32> to vector<512x128xf32>
    %c4 = arith.constant 4 : index
    %c0_52 = arith.constant 0 : index
    %c0_53 = arith.constant 0 : index
    %33 = vector.load %arg1[%c4, %c0_52, %c0_53] : memref<9x128x128xf32, #tpu.memory_space<vmem>>, vector<1x128x128xf32>
    %34 = vector.shape_cast %33 : vector<1x128x128xf32> to vector<128x128xf32>
    %cst_54 = arith.constant dense<0.000000e+00> : vector<512x128xf32>
    %35 = tpu.matmul %32, %34, %cst_54 {dimension_numbers = #tpu.dot_dimension_numbers<[1], [0], [0], [1], [0, 0, 1, 1], [], []>} : vector<512x128xf32>, vector<128x128xf32>, vector<512x128xf32> -> vector<512x128xf32>
    %36 = arith.addf %30, %35 : vector<512x128xf32>
    %c0_55 = arith.constant 0 : index
    %c1_56 = arith.constant 1 : index
    %c9_57 = arith.constant 9 : index
    %c0_58 = arith.constant 0 : index
    %37 = vector.load %arg8[%c0_55, %c1_56, %c9_57, %c0_58] : memref<2x18x32x128xf32, #tpu.memory_space<vmem>>, vector<2x16x16x128xf32>
    %38 = vector.shape_cast %37 : vector<2x16x16x128xf32> to vector<512x128xf32>
    %c5 = arith.constant 5 : index
    %c0_59 = arith.constant 0 : index
    %c0_60 = arith.constant 0 : index
    %39 = vector.load %arg1[%c5, %c0_59, %c0_60] : memref<9x128x128xf32, #tpu.memory_space<vmem>>, vector<1x128x128xf32>
    %40 = vector.shape_cast %39 : vector<1x128x128xf32> to vector<128x128xf32>
    %cst_61 = arith.constant dense<0.000000e+00> : vector<512x128xf32>
    %41 = tpu.matmul %38, %40, %cst_61 {dimension_numbers = #tpu.dot_dimension_numbers<[1], [0], [0], [1], [0, 0, 1, 1], [], []>} : vector<512x128xf32>, vector<128x128xf32>, vector<512x128xf32> -> vector<512x128xf32>
    %42 = arith.addf %36, %41 : vector<512x128xf32>
    %c0_62 = arith.constant 0 : index
    %c2_63 = arith.constant 2 : index
    %c7_64 = arith.constant 7 : index
    %c0_65 = arith.constant 0 : index
    %43 = vector.load %arg8[%c0_62, %c2_63, %c7_64, %c0_65] : memref<2x18x32x128xf32, #tpu.memory_space<vmem>>, vector<2x16x16x128xf32>
    %44 = vector.shape_cast %43 : vector<2x16x16x128xf32> to vector<512x128xf32>
    %c6 = arith.constant 6 : index
    %c0_66 = arith.constant 0 : index
    %c0_67 = arith.constant 0 : index
    %45 = vector.load %arg1[%c6, %c0_66, %c0_67] : memref<9x128x128xf32, #tpu.memory_space<vmem>>, vector<1x128x128xf32>
    %46 = vector.shape_cast %45 : vector<1x128x128xf32> to vector<128x128xf32>
    %cst_68 = arith.constant dense<0.000000e+00> : vector<512x128xf32>
    %47 = tpu.matmul %44, %46, %cst_68 {dimension_numbers = #tpu.dot_dimension_numbers<[1], [0], [0], [1], [0, 0, 1, 1], [], []>} : vector<512x128xf32>, vector<128x128xf32>, vector<512x128xf32> -> vector<512x128xf32>
    %48 = arith.addf %42, %47 : vector<512x128xf32>
    %c0_69 = arith.constant 0 : index
    %c2_70 = arith.constant 2 : index
    %c8_71 = arith.constant 8 : index
    %c0_72 = arith.constant 0 : index
    %49 = vector.load %arg8[%c0_69, %c2_70, %c8_71, %c0_72] : memref<2x18x32x128xf32, #tpu.memory_space<vmem>>, vector<2x16x16x128xf32>
    %50 = vector.shape_cast %49 : vector<2x16x16x128xf32> to vector<512x128xf32>
    %c7_73 = arith.constant 7 : index
    %c0_74 = arith.constant 0 : index
    %c0_75 = arith.constant 0 : index
    %51 = vector.load %arg1[%c7_73, %c0_74, %c0_75] : memref<9x128x128xf32, #tpu.memory_space<vmem>>, vector<1x128x128xf32>
    %52 = vector.shape_cast %51 : vector<1x128x128xf32> to vector<128x128xf32>
    %cst_76 = arith.constant dense<0.000000e+00> : vector<512x128xf32>
    %53 = tpu.matmul %50, %52, %cst_76 {dimension_numbers = #tpu.dot_dimension_numbers<[1], [0], [0], [1], [0, 0, 1, 1], [], []>} : vector<512x128xf32>, vector<128x128xf32>, vector<512x128xf32> -> vector<512x128xf32>
    %54 = arith.addf %48, %53 : vector<512x128xf32>
    %c0_77 = arith.constant 0 : index
    %c2_78 = arith.constant 2 : index
    %c9_79 = arith.constant 9 : index
    %c0_80 = arith.constant 0 : index
    %55 = vector.load %arg8[%c0_77, %c2_78, %c9_79, %c0_80] : memref<2x18x32x128xf32, #tpu.memory_space<vmem>>, vector<2x16x16x128xf32>
    %56 = vector.shape_cast %55 : vector<2x16x16x128xf32> to vector<512x128xf32>
    %c8_81 = arith.constant 8 : index
    %c0_82 = arith.constant 0 : index
    %c0_83 = arith.constant 0 : index
    %57 = vector.load %arg1[%c8_81, %c0_82, %c0_83] : memref<9x128x128xf32, #tpu.memory_space<vmem>>, vector<1x128x128xf32>
    %58 = vector.shape_cast %57 : vector<1x128x128xf32> to vector<128x128xf32>
    %cst_84 = arith.constant dense<0.000000e+00> : vector<512x128xf32>
    %59 = tpu.matmul %56, %58, %cst_84 {dimension_numbers = #tpu.dot_dimension_numbers<[1], [0], [0], [1], [0, 0, 1, 1], [], []>} : vector<512x128xf32>, vector<128x128xf32>, vector<512x128xf32> -> vector<512x128xf32>
    %60 = arith.addf %54, %59 : vector<512x128xf32>
    %cst_85 = arith.constant dense<0.000000e+00> : vector<128xf32>
    %61 = vector.multi_reduction <add>, %60, %cst_85 [0] : vector<512x128xf32> to vector<128xf32>
    %62 = vector.shape_cast %61 : vector<128xf32> to vector<1x128xf32>
    %cst_86 = arith.constant 0.001953125 : f32
    %63 = vector.broadcast %cst_86 : f32 to vector<1x128xf32>
    %64 = arith.mulf %62, %63 : vector<1x128xf32>
    %65 = vector.broadcast %64 : vector<1x128xf32> to vector<512x128xf32>
    %66 = arith.subf %60, %65 : vector<512x128xf32>
    %67 = arith.mulf %66, %66 : vector<512x128xf32>
    %cst_87 = arith.constant dense<0.000000e+00> : vector<128xf32>
    %68 = vector.multi_reduction <add>, %67, %cst_87 [0] : vector<512x128xf32> to vector<128xf32>
    %69 = vector.shape_cast %68 : vector<128xf32> to vector<1x128xf32>
    %cst_88 = arith.constant 0.001953125 : f32
    %70 = vector.broadcast %cst_88 : f32 to vector<1x128xf32>
    %71 = arith.mulf %69, %70 : vector<1x128xf32>
    %c0_89 = arith.constant 0 : index
    %c0_90 = arith.constant 0 : index
    %72 = vector.load %arg2[%c0_89, %c0_90] : memref<1x128xf32, #tpu.memory_space<vmem>>, vector<1x128xf32>
    %cst_91 = arith.constant 9.99999974E-6 : f32
    %73 = vector.broadcast %cst_91 : f32 to vector<1x128xf32>
    %74 = arith.addf %71, %73 : vector<1x128xf32>
    %75 = math.rsqrt %74 : vector<1x128xf32>
    %76 = arith.mulf %72, %75 : vector<1x128xf32>
    %77 = vector.broadcast %76 : vector<1x128xf32> to vector<512x128xf32>
    %78 = arith.mulf %66, %77 : vector<512x128xf32>
    %c0_92 = arith.constant 0 : index
    %c0_93 = arith.constant 0 : index
    %79 = vector.load %arg3[%c0_92, %c0_93] : memref<1x128xf32, #tpu.memory_space<vmem>>, vector<1x128xf32>
    %80 = vector.broadcast %79 : vector<1x128xf32> to vector<512x128xf32>
    %81 = arith.addf %78, %80 : vector<512x128xf32>
    %cst_94 = arith.constant 0.000000e+00 : f32
    %82 = vector.broadcast %cst_94 : f32 to vector<512x128xf32>
    %83 = arith.maximumf %81, %82 : vector<512x128xf32>
    %84 = vector.shape_cast %83 : vector<512x128xf32> to vector<2x16x16x128xf32>
    %c0_95 = arith.constant 0 : index
    %c1_96 = arith.constant 1 : index
    %c8_97 = arith.constant 8 : index
    %c0_98 = arith.constant 0 : index
    %85 = vector.load %arg8[%c0_95, %c1_96, %c8_97, %c0_98] : memref<2x18x32x128xf32, #tpu.memory_space<vmem>>, vector<2x16x16x128xf32>
    tpu.vector_store %arg8[%c0_95, %c1_96, %c8_97, %c0_98], %84 {strides = array<i32>} : memref<2x18x32x128xf32, #tpu.memory_space<vmem>>, vector<2x16x16x128xf32>,
    %c0_99 = arith.constant 0 : index
    %c0_100 = arith.constant 0 : index
    %c7_101 = arith.constant 7 : index
    %c0_102 = arith.constant 0 : index
    %86 = vector.load %arg8[%c0_99, %c0_100, %c7_101, %c0_102] : memref<2x18x32x128xf32, #tpu.memory_space<vmem>>, vector<2x16x16x128xf32>
    %87 = vector.shape_cast %86 : vector<2x16x16x128xf32> to vector<512x128xf32>
    %c0_103 = arith.constant 0 : index
    %c0_104 = arith.constant 0 : index
    %c0_105 = arith.constant 0 : index
    %88 = vector.load %arg4[%c0_103, %c0_104, %c0_105] : memref<9x128x128xf32, #tpu.memory_space<vmem>>, vector<1x128x128xf32>
    %89 = vector.shape_cast %88 : vector<1x128x128xf32> to vector<128x128xf32>
    %cst_106 = arith.constant dense<0.000000e+00> : vector<512x128xf32>
    %90 = tpu.matmul %87, %89, %cst_106 {dimension_numbers = #tpu.dot_dimension_numbers<[1], [0], [0], [1], [0, 0, 1, 1], [], []>} : vector<512x128xf32>, vector<128x128xf32>, vector<512x128xf32> -> vector<512x128xf32>
    %c0_107 = arith.constant 0 : index
    %c0_108 = arith.constant 0 : index
    %c8_109 = arith.constant 8 : index
    %c0_110 = arith.constant 0 : index
    %91 = vector.load %arg8[%c0_107, %c0_108, %c8_109, %c0_110] : memref<2x18x32x128xf32, #tpu.memory_space<vmem>>, vector<2x16x16x128xf32>
    %92 = vector.shape_cast %91 : vector<2x16x16x128xf32> to vector<512x128xf32>
    %c1_111 = arith.constant 1 : index
    %c0_112 = arith.constant 0 : index
    %c0_113 = arith.constant 0 : index
    %93 = vector.load %arg4[%c1_111, %c0_112, %c0_113] : memref<9x128x128xf32, #tpu.memory_space<vmem>>, vector<1x128x128xf32>
    %94 = vector.shape_cast %93 : vector<1x128x128xf32> to vector<128x128xf32>
    %cst_114 = arith.constant dense<0.000000e+00> : vector<512x128xf32>
    %95 = tpu.matmul %92, %94, %cst_114 {dimension_numbers = #tpu.dot_dimension_numbers<[1], [0], [0], [1], [0, 0, 1, 1], [], []>} : vector<512x128xf32>, vector<128x128xf32>, vector<512x128xf32> -> vector<512x128xf32>
    %96 = arith.addf %90, %95 : vector<512x128xf32>
    %c0_115 = arith.constant 0 : index
    %c0_116 = arith.constant 0 : index
    %c9_117 = arith.constant 9 : index
    %c0_118 = arith.constant 0 : index
    %97 = vector.load %arg8[%c0_115, %c0_116, %c9_117, %c0_118] : memref<2x18x32x128xf32, #tpu.memory_space<vmem>>, vector<2x16x16x128xf32>
    %98 = vector.shape_cast %97 : vector<2x16x16x128xf32> to vector<512x128xf32>
    %c2_119 = arith.constant 2 : index
    %c0_120 = arith.constant 0 : index
    %c0_121 = arith.constant 0 : index
    %99 = vector.load %arg4[%c2_119, %c0_120, %c0_121] : memref<9x128x128xf32, #tpu.memory_space<vmem>>, vector<1x128x128xf32>
    %100 = vector.shape_cast %99 : vector<1x128x128xf32> to vector<128x128xf32>
    %cst_122 = arith.constant dense<0.000000e+00> : vector<512x128xf32>
    %101 = tpu.matmul %98, %100, %cst_122 {dimension_numbers = #tpu.dot_dimension_numbers<[1], [0], [0], [1], [0, 0, 1, 1], [], []>} : vector<512x128xf32>, vector<128x128xf32>, vector<512x128xf32> -> vector<512x128xf32>
    %102 = arith.addf %96, %101 : vector<512x128xf32>
    %c0_123 = arith.constant 0 : index
    %c1_124 = arith.constant 1 : index
    %c7_125 = arith.constant 7 : index
    %c0_126 = arith.constant 0 : index
    %103 = vector.load %arg8[%c0_123, %c1_124, %c7_125, %c0_126] : memref<2x18x32x128xf32, #tpu.memory_space<vmem>>, vector<2x16x16x128xf32>
    %104 = vector.shape_cast %103 : vector<2x16x16x128xf32> to vector<512x128xf32>
    %c3_127 = arith.constant 3 : index
    %c0_128 = arith.constant 0 : index
    %c0_129 = arith.constant 0 : index
    %105 = vector.load %arg4[%c3_127, %c0_128, %c0_129] : memref<9x128x128xf32, #tpu.memory_space<vmem>>, vector<1x128x128xf32>
    %106 = vector.shape_cast %105 : vector<1x128x128xf32> to vector<128x128xf32>
    %cst_130 = arith.constant dense<0.000000e+00> : vector<512x128xf32>
    %107 = tpu.matmul %104, %106, %cst_130 {dimension_numbers = #tpu.dot_dimension_numbers<[1], [0], [0], [1], [0, 0, 1, 1], [], []>} : vector<512x128xf32>, vector<128x128xf32>, vector<512x128xf32> -> vector<512x128xf32>
    %108 = arith.addf %102, %107 : vector<512x128xf32>
    %c0_131 = arith.constant 0 : index
    %c1_132 = arith.constant 1 : index
    %c8_133 = arith.constant 8 : index
    %c0_134 = arith.constant 0 : index
    %109 = vector.load %arg8[%c0_131, %c1_132, %c8_133, %c0_134] : memref<2x18x32x128xf32, #tpu.memory_space<vmem>>, vector<2x16x16x128xf32>
    %110 = vector.shape_cast %109 : vector<2x16x16x128xf32> to vector<512x128xf32>
    %c4_135 = arith.constant 4 : index
    %c0_136 = arith.constant 0 : index
    %c0_137 = arith.constant 0 : index
    %111 = vector.load %arg4[%c4_135, %c0_136, %c0_137] : memref<9x128x128xf32, #tpu.memory_space<vmem>>, vector<1x128x128xf32>
    %112 = vector.shape_cast %111 : vector<1x128x128xf32> to vector<128x128xf32>
    %cst_138 = arith.constant dense<0.000000e+00> : vector<512x128xf32>
    %113 = tpu.matmul %110, %112, %cst_138 {dimension_numbers = #tpu.dot_dimension_numbers<[1], [0], [0], [1], [0, 0, 1, 1], [], []>} : vector<512x128xf32>, vector<128x128xf32>, vector<512x128xf32> -> vector<512x128xf32>
    %114 = arith.addf %108, %113 : vector<512x128xf32>
    %c0_139 = arith.constant 0 : index
    %c1_140 = arith.constant 1 : index
    %c9_141 = arith.constant 9 : index
    %c0_142 = arith.constant 0 : index
    %115 = vector.load %arg8[%c0_139, %c1_140, %c9_141, %c0_142] : memref<2x18x32x128xf32, #tpu.memory_space<vmem>>, vector<2x16x16x128xf32>
    %116 = vector.shape_cast %115 : vector<2x16x16x128xf32> to vector<512x128xf32>
    %c5_143 = arith.constant 5 : index
    %c0_144 = arith.constant 0 : index
    %c0_145 = arith.constant 0 : index
    %117 = vector.load %arg4[%c5_143, %c0_144, %c0_145] : memref<9x128x128xf32, #tpu.memory_space<vmem>>, vector<1x128x128xf32>
    %118 = vector.shape_cast %117 : vector<1x128x128xf32> to vector<128x128xf32>
    %cst_146 = arith.constant dense<0.000000e+00> : vector<512x128xf32>
    %119 = tpu.matmul %116, %118, %cst_146 {dimension_numbers = #tpu.dot_dimension_numbers<[1], [0], [0], [1], [0, 0, 1, 1], [], []>} : vector<512x128xf32>, vector<128x128xf32>, vector<512x128xf32> -> vector<512x128xf32>
    %120 = arith.addf %114, %119 : vector<512x128xf32>
    %c0_147 = arith.constant 0 : index
    %c2_148 = arith.constant 2 : index
    %c7_149 = arith.constant 7 : index
    %c0_150 = arith.constant 0 : index
    %121 = vector.load %arg8[%c0_147, %c2_148, %c7_149, %c0_150] : memref<2x18x32x128xf32, #tpu.memory_space<vmem>>, vector<2x16x16x128xf32>
    %122 = vector.shape_cast %121 : vector<2x16x16x128xf32> to vector<512x128xf32>
    %c6_151 = arith.constant 6 : index
    %c0_152 = arith.constant 0 : index
    %c0_153 = arith.constant 0 : index
    %123 = vector.load %arg4[%c6_151, %c0_152, %c0_153] : memref<9x128x128xf32, #tpu.memory_space<vmem>>, vector<1x128x128xf32>
    %124 = vector.shape_cast %123 : vector<1x128x128xf32> to vector<128x128xf32>
    %cst_154 = arith.constant dense<0.000000e+00> : vector<512x128xf32>
    %125 = tpu.matmul %122, %124, %cst_154 {dimension_numbers = #tpu.dot_dimension_numbers<[1], [0], [0], [1], [0, 0, 1, 1], [], []>} : vector<512x128xf32>, vector<128x128xf32>, vector<512x128xf32> -> vector<512x128xf32>
    %126 = arith.addf %120, %125 : vector<512x128xf32>
    %c0_155 = arith.constant 0 : index
    %c2_156 = arith.constant 2 : index
    %c8_157 = arith.constant 8 : index
    %c0_158 = arith.constant 0 : index
    %127 = vector.load %arg8[%c0_155, %c2_156, %c8_157, %c0_158] : memref<2x18x32x128xf32, #tpu.memory_space<vmem>>, vector<2x16x16x128xf32>
    %128 = vector.shape_cast %127 : vector<2x16x16x128xf32> to vector<512x128xf32>
    %c7_159 = arith.constant 7 : index
    %c0_160 = arith.constant 0 : index
    %c0_161 = arith.constant 0 : index
    %129 = vector.load %arg4[%c7_159, %c0_160, %c0_161] : memref<9x128x128xf32, #tpu.memory_space<vmem>>, vector<1x128x128xf32>
    %130 = vector.shape_cast %129 : vector<1x128x128xf32> to vector<128x128xf32>
    %cst_162 = arith.constant dense<0.000000e+00> : vector<512x128xf32>
    %131 = tpu.matmul %128, %130, %cst_162 {dimension_numbers = #tpu.dot_dimension_numbers<[1], [0], [0], [1], [0, 0, 1, 1], [], []>} : vector<512x128xf32>, vector<128x128xf32>, vector<512x128xf32> -> vector<512x128xf32>
    %132 = arith.addf %126, %131 : vector<512x128xf32>
    %c0_163 = arith.constant 0 : index
    %c2_164 = arith.constant 2 : index
    %c9_165 = arith.constant 9 : index
    %c0_166 = arith.constant 0 : index
    %133 = vector.load %arg8[%c0_163, %c2_164, %c9_165, %c0_166] : memref<2x18x32x128xf32, #tpu.memory_space<vmem>>, vector<2x16x16x128xf32>
    %134 = vector.shape_cast %133 : vector<2x16x16x128xf32> to vector<512x128xf32>
    %c8_167 = arith.constant 8 : index
    %c0_168 = arith.constant 0 : index
    %c0_169 = arith.constant 0 : index
    %135 = vector.load %arg4[%c8_167, %c0_168, %c0_169] : memref<9x128x128xf32, #tpu.memory_space<vmem>>, vector<1x128x128xf32>
    %136 = vector.shape_cast %135 : vector<1x128x128xf32> to vector<128x128xf32>
    %cst_170 = arith.constant dense<0.000000e+00> : vector<512x128xf32>
    %137 = tpu.matmul %134, %136, %cst_170 {dimension_numbers = #tpu.dot_dimension_numbers<[1], [0], [0], [1], [0, 0, 1, 1], [], []>} : vector<512x128xf32>, vector<128x128xf32>, vector<512x128xf32> -> vector<512x128xf32>
    %138 = arith.addf %132, %137 : vector<512x128xf32>
    %cst_171 = arith.constant dense<0.000000e+00> : vector<128xf32>
    %139 = vector.multi_reduction <add>, %138, %cst_171 [0] : vector<512x128xf32> to vector<128xf32>
    %140 = vector.shape_cast %139 : vector<128xf32> to vector<1x128xf32>
    %cst_172 = arith.constant 0.001953125 : f32
    %141 = vector.broadcast %cst_172 : f32 to vector<1x128xf32>
    %142 = arith.mulf %140, %141 : vector<1x128xf32>
    %143 = vector.broadcast %142 : vector<1x128xf32> to vector<512x128xf32>
    %144 = arith.subf %138, %143 : vector<512x128xf32>
    %145 = arith.mulf %144, %144 : vector<512x128xf32>
    %cst_173 = arith.constant dense<0.000000e+00> : vector<128xf32>
    %146 = vector.multi_reduction <add>, %145, %cst_173 [0] : vector<512x128xf32> to vector<128xf32>
    %147 = vector.shape_cast %146 : vector<128xf32> to vector<1x128xf32>
    %cst_174 = arith.constant 0.001953125 : f32
    %148 = vector.broadcast %cst_174 : f32 to vector<1x128xf32>
    %149 = arith.mulf %147, %148 : vector<1x128xf32>
    %c0_175 = arith.constant 0 : index
    %c0_176 = arith.constant 0 : index
    %150 = vector.load %arg5[%c0_175, %c0_176] : memref<1x128xf32, #tpu.memory_space<vmem>>, vector<1x128xf32>
    %cst_177 = arith.constant 9.99999974E-6 : f32
    %151 = vector.broadcast %cst_177 : f32 to vector<1x128xf32>
    %152 = arith.addf %149, %151 : vector<1x128xf32>
    %153 = math.rsqrt %152 : vector<1x128xf32>
    %154 = arith.mulf %150, %153 : vector<1x128xf32>
    %155 = vector.broadcast %154 : vector<1x128xf32> to vector<512x128xf32>
    %156 = arith.mulf %144, %155 : vector<512x128xf32>
    %c0_178 = arith.constant 0 : index
    %c0_179 = arith.constant 0 : index
    %157 = vector.load %arg6[%c0_178, %c0_179] : memref<1x128xf32, #tpu.memory_space<vmem>>, vector<1x128xf32>
    %158 = vector.broadcast %157 : vector<1x128xf32> to vector<512x128xf32>
    %159 = arith.addf %156, %158 : vector<512x128xf32>
    %c0_180 = arith.constant 0 : index
    %c0_181 = arith.constant 0 : index
    %c0_182 = arith.constant 0 : index
    %c0_183 = arith.constant 0 : index
    %160 = vector.load %arg0[%c0_180, %c0_181, %c0_182, %c0_183] : memref<2x16x16x128xf32, #tpu.memory_space<vmem>>, vector<2x16x16x128xf32>
    %161 = vector.shape_cast %160 : vector<2x16x16x128xf32> to vector<512x128xf32>
    %162 = arith.addf %159, %161 : vector<512x128xf32>
    %cst_184 = arith.constant 0.000000e+00 : f32
    %163 = vector.broadcast %cst_184 : f32 to vector<512x128xf32>
    %164 = arith.maximumf %162, %163 : vector<512x128xf32>
    %165 = vector.shape_cast %164 : vector<512x128xf32> to vector<2x16x16x128xf32>
    %c0_185 = arith.constant 0 : index
    %c0_186 = arith.constant 0 : index
    %c0_187 = arith.constant 0 : index
    %c0_188 = arith.constant 0 : index
    %166 = vector.load %arg7[%c0_185, %c0_186, %c0_187, %c0_188] : memref<2x16x16x128xf32, #tpu.memory_space<vmem>>, vector<2x16x16x128xf32>
    tpu.vector_store %arg7[%c0_185, %c0_186, %c0_187, %c0_188], %165 {strides = array<i32>} : memref<2x16x16x128xf32, #tpu.memory_space<vmem>>, vector<2x16x16x128xf32>,
    return
  }
}

</mosaic_0001>

<bundles_post_ra>
// kernel: tpu_custom_call.1
= control target key start
LH: loop header
LB: loop body
LE: loop exit
PB: predicated region body
PF: predicated region fallthrough
CT: control target
= control target key end

     0   :  { %12 = vsyncpa [#allocation4], 0  ;;  %s11817_s0 = inlined_call_operand.hbm [shape: f32[2,16,16,128], index: 0, kind: input, shape index: {}]   ;;  %s11818_s1 = inlined_call_operand.hbm [shape: f32[9,128,128], index: 1, kind: input, shape index: {}]   ;;  %s11819_s2 = inlined_call_operand.vmem [shape: f32[1,128], index: 2, kind: input, shape index: {}]   ;;  %s11820_s3 = inlined_call_operand.vmem [shape: f32[1,128], index: 3, kind: input, shape index: {}]   ;;  %s11821_s4 = inlined_call_operand.hbm [shape: f32[9,128,128], index: 4, kind: input, shape index: {}]   ;;  %s11822_s5 = inlined_call_operand.vmem [shape: f32[1,128], index: 5, kind: input, shape index: {}]   ;;  %s11823_s6 = inlined_call_operand.vmem [shape: f32[1,128], index: 6, kind: input, shape index: {}]   ;;  %s11824_s7 = inlined_call_operand.hbm [shape: f32[2,16,16,128], index: 7, kind: output, shape index: {}]  }
   0x1   :  { %13 = vsyncpa [#allocation7], 0 }
   0x2   :  { %14 = vsyncpa [#allocation5], 0  ;;  %s32_s26 = sshll.u32 %s11818_s1, 4  ;;  %s7785_s27 = smov [#allocation6]   ;;  %s33_s26 = int_to_ptr.hbm [resolvable:$true] %s32_s26 }
   0x3   :  { %s34_s28 = sshll.u32 %s7785_s27, 4  ;;  %s19_s8 = sshll.u32 %s11817_s0, 4  ;;  %s35_s28 = int_to_ptr.vmem [resolvable:$true] %s34_s28  ;;  %s20_s8 = int_to_ptr.hbm [resolvable:$true] %s19_s8 }
   0x4   :  { %s7786_s9 = smov 128   ;;  %s7787_s10 = smov 8  }
   0x5   :  { %40 = dma.hbm_to_vmem [thread:$0]  %s33_s26, 18432, %s35_s28, [#allocation7], %s7786_s9, %s7786_s9, %s7787_s10  }
   0x6   :  { %s7788_s11 = smov [#allocation3]   ;;  %s49_s1 = sshll.u32 %s11821_s4, 4  ;;  %s50_s1 = int_to_ptr.hbm [resolvable:$true] %s49_s1 }
   0x7   :  { %s21_s12 = sshll.u32 %s7788_s11, 4  ;;  %s7789_s0 = smov [#allocation8]   ;;  %s22_s12 = int_to_ptr.vmem [resolvable:$true] %s21_s12 }
   0x8   :  { %27 = dma.hbm_to_vmem [thread:$0]  %s20_s8, 8192, %s22_s12, [#allocation4], %s7786_s9, %s7786_s9, %s7787_s10  }
   0x9   :  { %s51_s15 = sshll.u32 %s7789_s0, 4  ;;  %s52_s15 = int_to_ptr.vmem [resolvable:$true] %s51_s15 }
   0xa   :  { %57 = dma.hbm_to_vmem [thread:$0]  %s50_s1, 18432, %s52_s15, [#allocation7], %s7786_s9, %s7786_s9, %s7787_s10  }
   0xb   :  { %7779 = dma.done.wait [#allocation4], 8192  }
   0xc   :  { %7780 = vsyncadd [#allocation4], 4294959104 }
   0xd   :  { %7781 = dma.done.wait [#allocation7], 36864  }
   0xe   :  { %7782 = vsyncadd [#allocation7], 4294930432  ;;  %v7790_v0 = vmov 0.0   ;;  %v444_v1 = vld [vmem:[#allocation6 + $0xf8] sm:$0xff]  ;;  %v443_v3 = vld [vmem:[#allocation6 + $0xf0] sm:$0xff]  ;;  %s7621_s23 = sshll.u32 %s11824_s7, 4  ;;  %s7622_s23 = int_to_ptr.hbm [resolvable:$true] %s7621_s23 }
   0xf   :  { %79 = vst [vmem:[#allocation2 + $0x248] sm:$0xff] %v7790_v0  ;;  %v363_v2 = vld [vmem:[#allocation6 + $0x78] sm:$0xff]  ;;  %7635 = vmatpush.msra.mxu2 %v444_v1  ;;  %v362_v4 = vld [vmem:[#allocation6 + $0x70] sm:$0xff]  ;;  %v442_v5 = vld [vmem:[#allocation6 + $0xe8] sm:$0xff]  ;;  %445 = vmatpush.msra.mxu0 %v444_v1 }
  0x10   :  { %74 = vst [vmem:[#allocation2] sm:$0xff] %v7790_v0  ;;  %7651 = vmatpush.msra.mxu3 %v363_v2  ;;  %v361_v6 = vld [vmem:[#allocation6 + $0x68] sm:$0xff]  ;;  %654 = vmatpush.msra.mxu1 %v363_v2  ;;  %v441_v7 = vld [vmem:[#allocation6 + $0xe0] sm:$0xff]  ;;  %v440_v9 = vld [vmem:[#allocation6 + $0xd8] sm:$0xff] }
  0x11   :  { %75 = vst [vmem:[#allocation2 + $0x8] sm:$0xff] %v7790_v0  ;;  %7636 = vmatpush.msra.mxu2 %v443_v3  ;;  %v360_v8 = vld [vmem:[#allocation6 + $0x60] sm:$0xff]  ;;  %446 = vmatpush.msra.mxu0 %v443_v3  ;;  %v359_v10 = vld [vmem:[#allocation6 + $0x58] sm:$0xff]  ;;  %v439_v11 = vld [vmem:[#allocation6 + $0xd0] sm:$0xff] }
  0x12   :  { %76 = vst [vmem:[#allocation2 + $0x10] sm:$0xff] %v7790_v0  ;;  %7652 = vmatpush.msra.mxu3 %v362_v4  ;;  %655 = vmatpush.msra.mxu1 %v362_v4  ;;  %v358_v12 = vld [vmem:[#allocation6 + $0x50] sm:$0xff]  ;;  %v438_v13 = vld [vmem:[#allocation6 + $0xc8] sm:$0xff]  ;;  %v437_v15 = vld [vmem:[#allocation6 + $0xc0] sm:$0xff] }
  0x13   :  { %77 = vst [vmem:[#allocation2 + $0x18] sm:$0xff] %v7790_v0  ;;  %7637 = vmatpush.msra.mxu2 %v442_v5  ;;  %447 = vmatpush.msra.mxu0 %v442_v5  ;;  %v357_v14 = vld [vmem:[#allocation6 + $0x48] sm:$0xff]  ;;  %v356_v16 = vld [vmem:[#allocation6 + $0x40] sm:$0xff]  ;;  %v436_v17 = vld [vmem:[#allocation6 + $0xb8] sm:$0xff] }
  0x14   :  { %78 = vst [vmem:[#allocation2 + $0x240] sm:$0xff] %v7790_v0  ;;  %7653 = vmatpush.msra.mxu3 %v361_v6  ;;  %656 = vmatpush.msra.mxu1 %v361_v6  ;;  %v355_v18 = vld [vmem:[#allocation6 + $0x38] sm:$0xff]  ;;  %v435_v19 = vld [vmem:[#allocation6 + $0xb0] sm:$0xff]  ;;  %v434_v21 = vld [vmem:[#allocation6 + $0xa8] sm:$0xff] }
  0x15   :  { %80 = vst [vmem:[#allocation2 + $0x250] sm:$0xff] %v7790_v0  ;;  %7638 = vmatpush.msra.mxu2 %v441_v7  ;;  %448 = vmatpush.msra.mxu0 %v441_v7  ;;  %v354_v20 = vld [vmem:[#allocation6 + $0x30] sm:$0xff]  ;;  %v353_v22 = vld [vmem:[#allocation6 + $0x28] sm:$0xff]  ;;  %v433_v23 = vld [vmem:[#allocation6 + $0xa0] sm:$0xff] }
  0x16   :  { %81 = vst [vmem:[#allocation2 + $0x258] sm:$0xff] %v7790_v0  ;;  %7654 = vmatpush.msra.mxu3 %v360_v8  ;;  %657 = vmatpush.msra.mxu1 %v360_v8  ;;  %v352_v24 = vld [vmem:[#allocation6 + $0x20] sm:$0xff]  ;;  %v432_v25 = vld [vmem:[#allocation6 + $0x98] sm:$0xff]  ;;  %v431_v27 = vld [vmem:[#allocation6 + $0x90] sm:$0xff] }
  0x17   :  { %83 = vst [vmem:[#allocation2 + $0x220] sm:$0xff] %v7790_v0  ;;  %7639 = vmatpush.msra.mxu2 %v440_v9  ;;  %449 = vmatpush.msra.mxu0 %v440_v9  ;;  %v351_v26 = vld [vmem:[#allocation6 + $0x18] sm:$0xff]  ;;  %v350_v28 = vld [vmem:[#allocation6 + $0x10] sm:$0xff]  ;;  %v430_v29 = vld [vmem:[#allocation6 + $0x88] sm:$0xff] }
  0x18   :  { %84 = vst [vmem:[#allocation2 + $0x228] sm:$0xff] %v7790_v0  ;;  %7655 = vmatpush.msra.mxu3 %v359_v10  ;;  %658 = vmatpush.msra.mxu1 %v359_v10  ;;  %v349_v30 = vld [vmem:[#allocation6 + $0x8] sm:$0xff]  ;;  %v429_v31 = vld [vmem:[#allocation6 + $0x80] sm:$0xff]  ;;  %v943_v36 = vld [vmem:[#allocation6 + $0x178] sm:$0xff] }
  0x19   :  { %85 = vst [vmem:[#allocation2 + $0x230] sm:$0xff] %v7790_v0  ;;  %7640 = vmatpush.msra.mxu2 %v439_v11  ;;  %450 = vmatpush.msra.mxu0 %v439_v11  ;;  %v348_v32 = vld [vmem:[#allocation6] sm:$0xff]  ;;  %v1297_v37 = vld [vmem:[#allocation6 + $0x1f8] sm:$0xff]  ;;  %v942_v40 = vld [vmem:[#allocation6 + $0x170] sm:$0xff] }
  0x1a   :  { %86 = vst [vmem:[#allocation2 + $0x238] sm:$0xff] %v7790_v0  ;;  %7656 = vmatpush.msra.mxu3 %v358_v12  ;;  %659 = vmatpush.msra.mxu1 %v358_v12  ;;  %v284_v34 = vld [vmem:[#allocation2 + $0x7] sm:$0xff]  ;;  %v1651_v38 = vld [vmem:[#allocation6 + $0x278] sm:$0xff]  ;;  %v285_v41 = vld [vmem:[#allocation2 + $0xf] sm:$0xff] }
  0x1b   :  { %87 = vst [vmem:[#allocation2 + $0x460] sm:$0xff] %v7790_v0  ;;  %7641 = vmatpush.msra.mxu2 %v438_v13  ;;  %451 = vmatpush.msra.mxu0 %v438_v13  ;;  %v316_v33 = vld [vmem:[#allocation2 + $0x247] sm:$0xff]  ;;  %v1296_v42 = vld [vmem:[#allocation6 + $0x1f0] sm:$0xff]  ;;  %v191_v51 = vld [vmem:[#allocation3 + $0x118] sm:$0xff] }
  0x1c   :  { %88 = vst [vmem:[#allocation2 + $0x468] sm:$0xff] %v7790_v0  ;;  %7657 = vmatpush.msra.mxu3 %v357_v14  ;;  %660 = vmatpush.msra.mxu1 %v357_v14  ;;  %v317_v35 = vld [vmem:[#allocation2 + $0x24f] sm:$0xff]  ;;  %v188_v39 = vld [vmem:[#allocation3 + $0x100] sm:$0xff]  ;;  %v159_v53 = vld [vmem:[#allocation3 + $0x18] sm:$0xff] }
  0x1d   :  { %89 = vst [vmem:[#allocation2 + $0x470] sm:$0xff] %v7790_v0  ;;  %7642 = vmatpush.msra.mxu2 %v437_v15  ;;  %452 = vmatpush.msra.mxu0 %v437_v15  ;;  %v156_v43 = vld [vmem:[#allocation3] sm:$0xff]  ;;  %v189_v44 = vld [vmem:[#allocation3 + $0x108] sm:$0xff]  ;;  %v1650_v45 = vld [vmem:[#allocation6 + $0x270] sm:$0xff] }
  0x1e   :  { %90 = vst [vmem:[#allocation2 + $0x478] sm:$0xff] %v7790_v0  ;;  %7658 = vmatpush.msra.mxu3 %v356_v16  ;;  %661 = vmatpush.msra.mxu1 %v356_v16  ;;  %v157_v46 = vld [vmem:[#allocation3 + $0x8] sm:$0xff]  ;;  %v190_v47 = vld [vmem:[#allocation3 + $0x110] sm:$0xff]  ;;  %v192_v54 = vld [vmem:[#allocation3 + $0x120] sm:$0xff] }
  0x1f   :  { %92 = vst [vmem:[#allocation2 + $0x20] sm:$0xff] %v7790_v0  ;;  %7643 = vmatpush.msra.mxu2 %v436_v17  ;;  %453 = vmatpush.msra.mxu0 %v436_v17  ;;  %v941_v48 = vld [vmem:[#allocation6 + $0x168] sm:$0xff]  ;;  %v158_v50 = vld [vmem:[#allocation3 + $0x10] sm:$0xff]  ;;  %v940_v57 = vld [vmem:[#allocation6 + $0x160] sm:$0xff] }
  0x20   :  { %93 = vst [vmem:[#allocation2 + $0x40] sm:$0xff] %v7790_v0  ;;  %7659 = vmatpush.msra.mxu3 %v355_v18  ;;  %662 = vmatpush.msra.mxu1 %v355_v18  ;;  %v1295_v49 = vld [vmem:[#allocation6 + $0x1e8] sm:$0xff]  ;;  %v1294_v58 = vld [vmem:[#allocation6 + $0x1e0] sm:$0xff]  ;;  %v194_v63 = vld [vmem:[#allocation3 + $0x130] sm:$0xff] }
  0x21   :  { %94 = vst [vmem:[#allocation2 + $0x60] sm:$0xff] %v7790_v0  ;;  %7644 = vmatpush.msra.mxu2 %v435_v19  ;;  %454 = vmatpush.msra.mxu0 %v435_v19  ;;  %v1649_v52 = vld [vmem:[#allocation6 + $0x268] sm:$0xff]  ;;  %v160_v60 = vld [vmem:[#allocation3 + $0x20] sm:$0xff]  ;;  %v195_v4 = vld [vmem:[#allocation3 + $0x138] sm:$0xff] }
  0x22   :  { %95 = vst [vmem:[#allocation2 + $0x80] sm:$0xff] %v7790_v0  ;;  %7660 = vmatpush.msra.mxu3 %v354_v20  ;;  %663 = vmatpush.msra.mxu1 %v354_v20  ;;  %v193_v56 = vld [vmem:[#allocation3 + $0x128] sm:$0xff]  ;;  %v939_v5 = vld [vmem:[#allocation6 + $0x158] sm:$0xff]  ;;  %v162_v7 = vld [vmem:[#allocation3 + $0x30] sm:$0xff] }
  0x23   :  { %96 = vst [vmem:[#allocation2 + $0xa0] sm:$0xff] %v7790_v0  ;;  %7645 = vmatpush.msra.mxu2 %v434_v21  ;;  %455 = vmatpush.msra.mxu0 %v434_v21  ;;  %v161_v1 = vld [vmem:[#allocation3 + $0x28] sm:$0xff]  ;;  %v1293_v6 = vld [vmem:[#allocation6 + $0x1d8] sm:$0xff]  ;;  %v196_v10 = vld [vmem:[#allocation3 + $0x140] sm:$0xff] }
  0x24   :  { %97 = vst [vmem:[#allocation2 + $0xc0] sm:$0xff] %v7790_v0  ;;  %7661 = vmatpush.msra.mxu3 %v353_v22  ;;  %664 = vmatpush.msra.mxu1 %v353_v22  ;;  %v1647_v11 = vld [vmem:[#allocation6 + $0x258] sm:$0xff]  ;;  %v197_v15 = vld [vmem:[#allocation3 + $0x148] sm:$0xff]  ;;  %v938_v16 = vld [vmem:[#allocation6 + $0x150] sm:$0xff] }
  0x25   :  { %98 = vst [vmem:[#allocation2 + $0xe0] sm:$0xff] %v7790_v0  ;;  %7646 = vmatpush.msra.mxu2 %v433_v23  ;;  %456 = vmatpush.msra.mxu0 %v433_v23  ;;  %v163_v12 = vld [vmem:[#allocation3 + $0x38] sm:$0xff]  ;;  %v1292_v17 = vld [vmem:[#allocation6 + $0x1d0] sm:$0xff]  ;;  %v164_v18 = vld [vmem:[#allocation3 + $0x40] sm:$0xff] }
  0x26   :  { %99 = vst [vmem:[#allocation2 + $0x100] sm:$0xff] %v7790_v0  ;;  %7662 = vmatpush.msra.mxu3 %v352_v24  ;;  %665 = vmatpush.msra.mxu1 %v352_v24  ;;  %v198_v21 = vld [vmem:[#allocation3 + $0x150] sm:$0xff]  ;;  %v165_v23 = vld [vmem:[#allocation3 + $0x48] sm:$0xff] }
  0x27   :  { %100 = vst [vmem:[#allocation2 + $0x120] sm:$0xff] %v7790_v0  ;;  %7647 = vmatpush.msra.mxu2 %v432_v25  ;;  %457 = vmatpush.msra.mxu0 %v432_v25  ;;  %v1646_v22 = vld [vmem:[#allocation6 + $0x250] sm:$0xff] }
  0x28   :  { %101 = vst [vmem:[#allocation2 + $0x140] sm:$0xff] %v7790_v0  ;;  %7663 = vmatpush.msra.mxu3 %v351_v26  ;;  %666 = vmatpush.msra.mxu1 %v351_v26  ;;  %v199_v26 = vld [vmem:[#allocation3 + $0x158] sm:$0xff] }
  0x29   :  { %102 = vst [vmem:[#allocation2 + $0x160] sm:$0xff] %v7790_v0  ;;  %7648 = vmatpush.msra.mxu2 %v431_v27  ;;  %458 = vmatpush.msra.mxu0 %v431_v27  ;;  %v937_v27 = vld [vmem:[#allocation6 + $0x148] sm:$0xff] }
  0x2a   :  { %103 = vst [vmem:[#allocation2 + $0x180] sm:$0xff] %v7790_v0  ;;  %7664 = vmatpush.msra.mxu3 %v350_v28  ;;  %667 = vmatpush.msra.mxu1 %v350_v28  ;;  %v1291_v28 = vld [vmem:[#allocation6 + $0x1c8] sm:$0xff] }
  0x2b   :  { %104 = vst [vmem:[#allocation2 + $0x1a0] sm:$0xff] %v7790_v0  ;;  %7649 = vmatpush.msra.mxu2 %v430_v29  ;;  %459 = vmatpush.msra.mxu0 %v430_v29  ;;  %v166_v29 = vld [vmem:[#allocation3 + $0x50] sm:$0xff] }
  0x2c   :  { %105 = vst [vmem:[#allocation2 + $0x1c0] sm:$0xff] %v7790_v0  ;;  %7665 = vmatpush.msra.mxu3 %v349_v30  ;;  %668 = vmatpush.msra.mxu1 %v349_v30 }
  0x2d   :  { %106 = vst [vmem:[#allocation2 + $0x1e0] sm:$0xff] %v7790_v0  ;;  %7650 = vmatpush.msra.mxu2 %v429_v31  ;;  %460 = vmatpush.msra.mxu0 %v429_v31 }
  0x2e   :  { %107 = vst [vmem:[#allocation2 + $0x200] sm:$0xff] %v7790_v0  ;;  %7666 = vmatpush.msra.mxu3 %v348_v32  ;;  %557 = vmatmul.f32.vlgmr.msra.gmra.mxu2 %v7790_v0 }
  0x2f   :  { %108 = vst [vmem:[#allocation2 + $0x260] sm:$0xff] %v7790_v0  ;;  %766 = vmatmul.f32.vlgmr.msra.gmra.mxu3 %v316_v33  ;;  %669 = vmatpush.msra.mxu1 %v348_v32  ;;  %v200_v32 = vld [vmem:[#allocation3 + $0x160] sm:$0xff]  ;;  %v1645_v33 = vld [vmem:[#allocation6 + $0x248] sm:$0xff] }
  0x30   :  { %109 = vst [vmem:[#allocation2 + $0x280] sm:$0xff] %v7790_v0  ;;  %461 = vmatmul.f32.vlgmr.msra.gmra.mxu0 %v7790_v0  ;;  %670 = vmatmul.f32.vlgmr.msra.gmra.mxu1 %v284_v34  ;;  %v167_v34 = vld [vmem:[#allocation3 + $0x58] sm:$0xff] }
  0x31   :  { %110 = vst [vmem:[#allocation2 + $0x2a0] sm:$0xff] %v7790_v0  ;;  %944 = vmatpush.msrb.mxu2 %v943_v36  ;;  %1298 = vmatpush.msrb.mxu3 %v1297_v37  ;;  %v201_v37 = vld [vmem:[#allocation3 + $0x168] sm:$0xff] }
  0x32   :  { %111 = vst [vmem:[#allocation2 + $0x2c0] sm:$0xff] %v7790_v0  ;;  %1652 = vmatpush.msrb.mxu0 %v1651_v38  ;;  %v936_v38 = vld [vmem:[#allocation6 + $0x140] sm:$0xff] }
  0x33   :  { %112 = vst [vmem:[#allocation2 + $0x2e0] sm:$0xff] %v7790_v0  ;;  %945 = vmatpush.msrb.mxu2 %v942_v40  ;;  %1299 = vmatpush.msrb.mxu3 %v1296_v42  ;;  %v168_v40 = vld [vmem:[#allocation3 + $0x60] sm:$0xff] }
  0x34   :  { %113 = vst [vmem:[#allocation2 + $0x300] sm:$0xff] %v7790_v0  ;;  %1653 = vmatpush.msrb.mxu0 %v1650_v45  ;;  %v169_v45 = vld [vmem:[#allocation3 + $0x68] sm:$0xff] }
  0x35   :  { %114 = vst [vmem:[#allocation2 + $0x320] sm:$0xff] %v7790_v0  ;;  %946 = vmatpush.msrb.mxu2 %v941_v48  ;;  %1300 = vmatpush.msrb.mxu3 %v1295_v49  ;;  %v203_v48 = vld [vmem:[#allocation3 + $0x178] sm:$0xff] }
  0x36   :  { %115 = vst [vmem:[#allocation2 + $0x340] sm:$0xff] %v7790_v0  ;;  %560 = vmatmul.f32.gmra.mxu2 %v7790_v0  ;;  %1654 = vmatpush.msrb.mxu0 %v1649_v52  ;;  %v935_v49 = vld [vmem:[#allocation6 + $0x138] sm:$0xff] }
  0x37   :  { %116 = vst [vmem:[#allocation2 + $0x360] sm:$0xff] %v7790_v0  ;;  %769 = vmatmul.f32.gmra.mxu3 %v317_v35  ;;  %947 = vmatpush.msrb.mxu2 %v940_v57  ;;  %v1643_v57 = vld [vmem:[#allocation6 + $0x238] sm:$0xff] }
  0x38   :  { %117 = vst [vmem:[#allocation2 + $0x380] sm:$0xff] %v7790_v0  ;;  %464 = vmatmul.f32.gmra.mxu0 %v7790_v0  ;;  %673 = vmatmul.f32.gmra.mxu1 %v285_v41 }
  0x39   :  { %118 = vst [vmem:[#allocation2 + $0x3a0] sm:$0xff] %v7790_v0  ;;  %1301 = vmatpush.msrb.mxu3 %v1294_v58  ;;  %948 = vmatpush.msrb.mxu2 %v939_v5 }
  0x3a   :  { %119 = vst [vmem:[#allocation2 + $0x3c0] sm:$0xff] %v7790_v0 }
  0x3b   :  { %120 = vst [vmem:[#allocation2 + $0x3e0] sm:$0xff] %v7790_v0  ;;  %1302 = vmatpush.msrb.mxu3 %v1293_v6  ;;  %949 = vmatpush.msrb.mxu2 %v938_v16  ;;  %v207_v16 = vld [vmem:[#allocation3 + $0x198] sm:$0xff] }
  0x3c   :  { %121 = vst [vmem:[#allocation2 + $0x400] sm:$0xff] %v7790_v0 }
  0x3d   :  { %122 = vst [vmem:[#allocation2 + $0x420] sm:$0xff] %v7790_v0  ;;  %1303 = vmatpush.msrb.mxu3 %v1292_v17  ;;  %950 = vmatpush.msrb.mxu2 %v937_v27  ;;  %v933_v17 = vld [vmem:[#allocation6 + $0x128] sm:$0xff] }
  0x3e   :  { %123 = vst [vmem:[#allocation2 + $0x440] sm:$0xff] %v7790_v0  ;;  %563 = vmatmul.f32.gmra.mxu2 %v188_v39 }
  0x3f   :  { %124 = vst [vmem:[#allocation2 + $0x38] sm:$0xff] %v7790_v0  ;;  %1304 = vmatpush.msrb.mxu3 %v1291_v28  ;;  %951 = vmatpush.msrb.mxu2 %v936_v38  ;;  %v176_v38 = vld [vmem:[#allocation3 + $0xa0] sm:$0xff] }
  0x40   :  { %125 = vst [vmem:[#allocation2 + $0x58] sm:$0xff] %v7790_v0  ;;  %467 = vmatmul.f32.gmra.mxu0 %v156_v43 }
  0x41   :  { %126 = vst [vmem:[#allocation2 + $0x78] sm:$0xff] %v7790_v0  ;;  %952 = vmatpush.msrb.mxu2 %v935_v49 }
  0x42   :  { %127 = vst [vmem:[#allocation2 + $0x98] sm:$0xff] %v7790_v0 }
  0x43   :  { %128 = vst [vmem:[#allocation2 + $0xb8] sm:$0xff] %v7790_v0 }
  0x44   :  { %129 = vst [vmem:[#allocation2 + $0xd8] sm:$0xff] %v7790_v0 }
  0x45   :  { %130 = vst [vmem:[#allocation2 + $0xf8] sm:$0xff] %v7790_v0 }
  0x46   :  { %131 = vst [vmem:[#allocation2 + $0x118] sm:$0xff] %v7790_v0  ;;  %566 = vmatmul.f32.gmra.mxu2 %v189_v44 }
  0x47   :  { %132 = vst [vmem:[#allocation2 + $0x138] sm:$0xff] %v7790_v0 }
  0x48   :  { %133 = vst [vmem:[#allocation2 + $0x158] sm:$0xff] %v7790_v0  ;;  %470 = vmatmul.f32.gmra.mxu0 %v157_v46 }
  0x49   :  { %134 = vst [vmem:[#allocation2 + $0x178] sm:$0xff] %v7790_v0 }
  0x4a   :  { %135 = vst [vmem:[#allocation2 + $0x198] sm:$0xff] %v7790_v0 }
  0x4b   :  { %136 = vst [vmem:[#allocation2 + $0x1b8] sm:$0xff] %v7790_v0 }
  0x4c   :  { %137 = vst [vmem:[#allocation2 + $0x1d8] sm:$0xff] %v7790_v0 }
  0x4d   :  { %138 = vst [vmem:[#allocation2 + $0x1f8] sm:$0xff] %v7790_v0 }
  0x4e   :  { %139 = vst [vmem:[#allocation2 + $0x218] sm:$0xff] %v7790_v0  ;;  %569 = vmatmul.f32.gmra.mxu2 %v190_v47 }
  0x4f   :  { %140 = vst [vmem:[#allocation2 + $0x278] sm:$0xff] %v7790_v0 }
  0x50   :  { %141 = vst [vmem:[#allocation2 + $0x298] sm:$0xff] %v7790_v0  ;;  %473 = vmatmul.f32.gmra.mxu0 %v158_v50 }
  0x51   :  { %142 = vst [vmem:[#allocation2 + $0x2b8] sm:$0xff] %v7790_v0 }
  0x52   :  { %143 = vst [vmem:[#allocation2 + $0x2d8] sm:$0xff] %v7790_v0 }
  0x53   :  { %144 = vst [vmem:[#allocation2 + $0x2f8] sm:$0xff] %v7790_v0 }
  0x54   :  { %145 = vst [vmem:[#allocation2 + $0x318] sm:$0xff] %v7790_v0 }
  0x55   :  { %146 = vst [vmem:[#allocation2 + $0x338] sm:$0xff] %v7790_v0 }
  0x56   :  { %147 = vst [vmem:[#allocation2 + $0x358] sm:$0xff] %v7790_v0  ;;  %572 = vmatmul.f32.gmra.mxu2 %v191_v51 }
  0x57   :  { %148 = vst [vmem:[#allocation2 + $0x378] sm:$0xff] %v7790_v0 }
  0x58   :  { %149 = vst [vmem:[#allocation2 + $0x398] sm:$0xff] %v7790_v0  ;;  %476 = vmatmul.f32.gmra.mxu0 %v159_v53 }
  0x59   :  { %150 = vst [vmem:[#allocation2 + $0x3b8] sm:$0xff] %v7790_v0 }
  0x5a   :  { %151 = vst [vmem:[#allocation2 + $0x3d8] sm:$0xff] %v7790_v0 }
  0x5b   :  { %152 = vst [vmem:[#allocation2 + $0x3f8] sm:$0xff] %v7790_v0 }
  0x5c   :  { %153 = vst [vmem:[#allocation2 + $0x418] sm:$0xff] %v7790_v0 }
  0x5d   :  { %154 = vst [vmem:[#allocation2 + $0x438] sm:$0xff] %v7790_v0 }
  0x5e   :  { %155 = vst [vmem:[#allocation2 + $0x458] sm:$0xff] %v7790_v0  ;;  %575 = vmatmul.f32.gmra.mxu2 %v192_v54  ;;  %v1648_v0 = vld [vmem:[#allocation6 + $0x260] sm:$0xff] }
  0x5f   :  { %252 = vst [vmem:[#allocation2 + $0x268] sm:$0xff] %v188_v39  ;;  %1655 = vmatpush.msrb.mxu0 %v1648_v0  ;;  %v1290_v39 = vld [vmem:[#allocation6 + $0x1c0] sm:$0xff]  ;;  %v934_v0 = vld [vmem:[#allocation6 + $0x130] sm:$0xff] }
  0x60   :  { %253 = vst [vmem:[#allocation2 + $0x270] sm:$0xff] %v189_v44  ;;  %479 = vmatmul.f32.gmra.mxu0 %v160_v60  ;;  %1305 = vmatpush.msrb.mxu3 %v1290_v39  ;;  %v1644_v44 = vld [vmem:[#allocation6 + $0x240] sm:$0xff] }
  0x61   :  { %220 = vst [vmem:[#allocation2 + $0x28] sm:$0xff] %v156_v43  ;;  %1656 = vmatpush.msrb.mxu0 %v1647_v11  ;;  %v202_v43 = vld [vmem:[#allocation3 + $0x170] sm:$0xff]  ;;  %953 = vmatpush.msrb.mxu2 %v934_v0 }
  0x62   :  { %254 = vst [vmem:[#allocation2 + $0x288] sm:$0xff] %v190_v47 }
  0x63   :  { %221 = vst [vmem:[#allocation2 + $0x30] sm:$0xff] %v157_v46  ;;  %1657 = vmatpush.msrb.mxu0 %v1646_v22  ;;  %954 = vmatpush.msrb.mxu2 %v933_v17 }
  0x64   :  { %255 = vst [vmem:[#allocation2 + $0x290] sm:$0xff] %v191_v51 }
  0x65   :  { %222 = vst [vmem:[#allocation2 + $0x48] sm:$0xff] %v158_v50  ;;  %1658 = vmatpush.msrb.mxu0 %v1645_v33  ;;  %v1289_v50 = vld [vmem:[#allocation6 + $0x1b8] sm:$0xff] }
  0x66   :  { %v318_v55 = vld [vmem:[#allocation2 + $0x267] sm:$0xff]  ;;  %256 = vst [vmem:[#allocation2 + $0x2a8] sm:$0xff] %v192_v54  ;;  %578 = vmatmul.f32.gmra.mxu2 %v193_v56  ;;  %1306 = vmatpush.msrb.mxu3 %v1289_v50 }
  0x67   :  { %772 = vmatmul.f32.gmra.mxu3 %v318_v55  ;;  %223 = vst [vmem:[#allocation2 + $0x50] sm:$0xff] %v159_v53  ;;  %v319_v61 = vld [vmem:[#allocation2 + $0x26f] sm:$0xff]  ;;  %1659 = vmatpush.msrb.mxu0 %v1644_v44 }
  0x68   :  { %v286_v59 = vld [vmem:[#allocation2 + $0x27] sm:$0xff]  ;;  %257 = vst [vmem:[#allocation2 + $0x2b0] sm:$0xff] %v193_v56  ;;  %482 = vmatmul.f32.gmra.mxu0 %v161_v1  ;;  %v170_v53 = vld [vmem:[#allocation3 + $0x70] sm:$0xff] }
  0x69   :  { %676 = vmatmul.f32.gmra.mxu1 %v286_v59  ;;  %224 = vst [vmem:[#allocation2 + $0x68] sm:$0xff] %v160_v60  ;;  %v320_v2 = vld [vmem:[#allocation2 + $0x287] sm:$0xff]  ;;  %1660 = vmatpush.msrb.mxu0 %v1643_v57  ;;  %v171_v59 = vld [vmem:[#allocation3 + $0x78] sm:$0xff] }
  0x6a   :  { %v287_v62 = vld [vmem:[#allocation2 + $0x2f] sm:$0xff]  ;;  %258 = vst [vmem:[#allocation2 + $0x2c8] sm:$0xff] %v194_v63  ;;  %v204_v56 = vld [vmem:[#allocation3 + $0x180] sm:$0xff]  ;;  %v211_v57 = vld [vmem:[#allocation3 + $0x1b8] sm:$0xff] }
  0x6b   :  { %225 = vst [vmem:[#allocation2 + $0x70] sm:$0xff] %v161_v1  ;;  %v321_v8 = vld [vmem:[#allocation2 + $0x28f] sm:$0xff] }
  0x6c   :  { %v288_v3 = vld [vmem:[#allocation2 + $0x47] sm:$0xff]  ;;  %259 = vst [vmem:[#allocation2 + $0x2d0] sm:$0xff] %v195_v4  ;;  %v1288_v1 = vld [vmem:[#allocation6 + $0x1b0] sm:$0xff] }
  0x6d   :  { %226 = vst [vmem:[#allocation2 + $0x88] sm:$0xff] %v162_v7  ;;  %v322_v13 = vld [vmem:[#allocation2 + $0x2a7] sm:$0xff]  ;;  %1307 = vmatpush.msrb.mxu3 %v1288_v1 }
  0x6e   :  { %581 = vmatmul.f32.gmra.mxu2 %v194_v63  ;;  %v289_v9 = vld [vmem:[#allocation2 + $0x4f] sm:$0xff]  ;;  %260 = vst [vmem:[#allocation2 + $0x2e8] sm:$0xff] %v196_v10 }
  0x6f   :  { %775 = vmatmul.f32.gmra.mxu3 %v319_v61  ;;  %227 = vst [vmem:[#allocation2 + $0x90] sm:$0xff] %v163_v12  ;;  %v323_v19 = vld [vmem:[#allocation2 + $0x2af] sm:$0xff] }
  0x70   :  { %485 = vmatmul.f32.gmra.mxu0 %v162_v7  ;;  %v290_v14 = vld [vmem:[#allocation2 + $0x67] sm:$0xff]  ;;  %261 = vst [vmem:[#allocation2 + $0x2f0] sm:$0xff] %v197_v15  ;;  %v206_v7 = vld [vmem:[#allocation3 + $0x190] sm:$0xff] }
  0x71   :  { %679 = vmatmul.f32.gmra.mxu1 %v287_v62  ;;  %228 = vst [vmem:[#allocation2 + $0xa8] sm:$0xff] %v164_v18  ;;  %v324_v24 = vld [vmem:[#allocation2 + $0x2c7] sm:$0xff] }
  0x72   :  { %v291_v20 = vld [vmem:[#allocation2 + $0x6f] sm:$0xff]  ;;  %262 = vst [vmem:[#allocation2 + $0x308] sm:$0xff] %v198_v21 }
  0x73   :  { %229 = vst [vmem:[#allocation2 + $0xb0] sm:$0xff] %v165_v23  ;;  %v325_v30 = vld [vmem:[#allocation2 + $0x2cf] sm:$0xff] }
  0x74   :  { %v292_v25 = vld [vmem:[#allocation2 + $0x87] sm:$0xff]  ;;  %263 = vst [vmem:[#allocation2 + $0x310] sm:$0xff] %v199_v26 }
  0x75   :  { %230 = vst [vmem:[#allocation2 + $0xc8] sm:$0xff] %v166_v29  ;;  %v326_v35 = vld [vmem:[#allocation2 + $0x2e7] sm:$0xff] }
  0x76   :  { %584 = vmatmul.f32.gmra.mxu2 %v195_v4  ;;  %v293_v31 = vld [vmem:[#allocation2 + $0x8f] sm:$0xff]  ;;  %264 = vst [vmem:[#allocation2 + $0x328] sm:$0xff] %v200_v32 }
  0x77   :  { %778 = vmatmul.f32.gmra.mxu3 %v320_v2  ;;  %231 = vst [vmem:[#allocation2 + $0xd0] sm:$0xff] %v167_v34  ;;  %v327_v41 = vld [vmem:[#allocation2 + $0x2ef] sm:$0xff] }
  0x78   :  { %488 = vmatmul.f32.gmra.mxu0 %v163_v12  ;;  %v294_v36 = vld [vmem:[#allocation2 + $0xa7] sm:$0xff]  ;;  %265 = vst [vmem:[#allocation2 + $0x330] sm:$0xff] %v201_v37 }
  0x79   :  { %682 = vmatmul.f32.gmra.mxu1 %v288_v3  ;;  %232 = vst [vmem:[#allocation2 + $0xe8] sm:$0xff] %v168_v40  ;;  %v328_v46 = vld [vmem:[#allocation2 + $0x307] sm:$0xff] }
  0x7a   :  { %v295_v42 = vld [vmem:[#allocation2 + $0xaf] sm:$0xff]  ;;  %266 = vst [vmem:[#allocation2 + $0x348] sm:$0xff] %v202_v43  ;;  %v172_v3 = vld [vmem:[#allocation3 + $0x80] sm:$0xff] }
  0x7b   :  { %233 = vst [vmem:[#allocation2 + $0xf0] sm:$0xff] %v169_v45  ;;  %v329_v54 = vld [vmem:[#allocation2 + $0x30f] sm:$0xff] }
  0x7c   :  { %v296_v47 = vld [vmem:[#allocation2 + $0xc7] sm:$0xff]  ;;  %267 = vst [vmem:[#allocation2 + $0x350] sm:$0xff] %v203_v48 }
  0x7d   :  { %234 = vst [vmem:[#allocation2 + $0x108] sm:$0xff] %v170_v53  ;;  %v330_v61 = vld [vmem:[#allocation2 + $0x327] sm:$0xff] }
  0x7e   :  { %587 = vmatmul.f32.gmra.mxu2 %v196_v10  ;;  %v297_v55 = vld [vmem:[#allocation2 + $0xcf] sm:$0xff]  ;;  %268 = vst [vmem:[#allocation2 + $0x368] sm:$0xff] %v204_v56 }
  0x7f   :  { %781 = vmatmul.f32.gmra.mxu3 %v321_v8  ;;  %235 = vst [vmem:[#allocation2 + $0x110] sm:$0xff] %v171_v59  ;;  %v205_v63 = vld [vmem:[#allocation3 + $0x188] sm:$0xff]  ;;  %v1642_v8 = vld [vmem:[#allocation6 + $0x230] sm:$0xff] }
  0x80   :  { %491 = vmatmul.f32.gmra.mxu0 %v164_v18  ;;  %v298_v62 = vld [vmem:[#allocation2 + $0xe7] sm:$0xff]  ;;  %269 = vst [vmem:[#allocation2 + $0x370] sm:$0xff] %v205_v63  ;;  %v331_v5 = vld [vmem:[#allocation2 + $0x32f] sm:$0xff] }
  0x81   :  { %685 = vmatmul.f32.gmra.mxu1 %v289_v9  ;;  %236 = vst [vmem:[#allocation2 + $0x128] sm:$0xff] %v172_v3  ;;  %1661 = vmatpush.msrb.mxu0 %v1642_v8  ;;  %v173_v10 = vld [vmem:[#allocation3 + $0x88] sm:$0xff]  ;;  %v1639_v8 = vld [vmem:[#allocation6 + $0x218] sm:$0xff] }
  0x82   :  { %v299_v6 = vld [vmem:[#allocation2 + $0xef] sm:$0xff]  ;;  %270 = vst [vmem:[#allocation2 + $0x388] sm:$0xff] %v206_v7 }
  0x83   :  { %237 = vst [vmem:[#allocation2 + $0x130] sm:$0xff] %v173_v10  ;;  %v1287_v18 = vld [vmem:[#allocation6 + $0x1a8] sm:$0xff] }
  0x84   :  { %271 = vst [vmem:[#allocation2 + $0x390] sm:$0xff] %v207_v16  ;;  %1308 = vmatpush.msrb.mxu3 %v1287_v18  ;;  %v333_v22 = vld [vmem:[#allocation2 + $0x34f] sm:$0xff] }
  0x85   :  { %240 = vst [vmem:[#allocation2 + $0x168] sm:$0xff] %v176_v38 }
  0x86   :  { %590 = vmatmul.f32.gmra.mxu2 %v197_v15  ;;  %v300_v15 = vld [vmem:[#allocation2 + $0x107] sm:$0xff]  ;;  %275 = vst [vmem:[#allocation2 + $0x3d0] sm:$0xff] %v211_v57 }
  0x87   :  { %784 = vmatmul.f32.gmra.mxu3 %v322_v13  ;;  %v332_v13 = vld [vmem:[#allocation2 + $0x347] sm:$0xff] }
  0x88   :  { %494 = vmatmul.f32.gmra.mxu0 %v165_v23  ;;  %v302_v33 = vld [vmem:[#allocation2 + $0x127] sm:$0xff] }
  0x89   :  { %688 = vmatmul.f32.gmra.mxu1 %v290_v14 }
  0x8a   :  { %v303_v44 = vld [vmem:[#allocation2 + $0x12f] sm:$0xff] }
  0x8e   :  { %593 = vmatmul.f32.gmra.mxu2 %v198_v21 }
  0x8f   :  { %787 = vmatmul.f32.gmra.mxu3 %v323_v19 }
  0x90   :  { %497 = vmatmul.f32.gmra.mxu0 %v166_v29  ;;  %v175_v29 = vld [vmem:[#allocation3 + $0x98] sm:$0xff] }
  0x91   :  { %691 = vmatmul.f32.gmra.mxu1 %v291_v20  ;;  %v174_v20 = vld [vmem:[#allocation3 + $0x90] sm:$0xff]  ;;  %239 = vst [vmem:[#allocation2 + $0x150] sm:$0xff] %v175_v29 }
  0x92   :  { %238 = vst [vmem:[#allocation2 + $0x148] sm:$0xff] %v174_v20 }
  0x96   :  { %596 = vmatmul.f32.gmra.mxu2 %v199_v26  ;;  %v1641_v26 = vld [vmem:[#allocation6 + $0x228] sm:$0xff] }
  0x97   :  { %790 = vmatmul.f32.gmra.mxu3 %v324_v24  ;;  %v301_v24 = vld [vmem:[#allocation2 + $0x10f] sm:$0xff]  ;;  %1662 = vmatpush.msrb.mxu0 %v1641_v26  ;;  %v180_v26 = vld [vmem:[#allocation3 + $0xc0] sm:$0xff] }
  0x98   :  { %500 = vmatmul.f32.gmra.mxu0 %v167_v34  ;;  %v209_v34 = vld [vmem:[#allocation3 + $0x1a8] sm:$0xff]  ;;  %244 = vst [vmem:[#allocation2 + $0x1a8] sm:$0xff] %v180_v26 }
  0x99   :  { %694 = vmatmul.f32.gmra.mxu1 %v292_v25  ;;  %v208_v25 = vld [vmem:[#allocation3 + $0x1a0] sm:$0xff]  ;;  %273 = vst [vmem:[#allocation2 + $0x3b0] sm:$0xff] %v209_v34 }
  0x9a   :  { %272 = vst [vmem:[#allocation2 + $0x3a8] sm:$0xff] %v208_v25 }
  0x9e   :  { %599 = vmatmul.f32.gmra.mxu2 %v200_v32 }
  0x9f   :  { %793 = vmatmul.f32.gmra.mxu3 %v325_v30 }
  0xa0   :  { %503 = vmatmul.f32.gmra.mxu0 %v168_v40 }
  0xa1   :  { %697 = vmatmul.f32.gmra.mxu1 %v293_v31  ;;  %v334_v31 = vld [vmem:[#allocation2 + $0x367] sm:$0xff] }
  0xa2   :  { %v338_v17 = vld [vmem:[#allocation2 + $0x3a7] sm:$0xff] }
  0xa6   :  { %602 = vmatmul.f32.gmra.mxu2 %v201_v37 }
  0xa7   :  { %796 = vmatmul.f32.gmra.mxu3 %v326_v35  ;;  %v932_v35 = vld [vmem:[#allocation6 + $0x120] sm:$0xff] }
  0xa8   :  { %506 = vmatmul.f32.gmra.mxu0 %v169_v45  ;;  %955 = vmatpush.msrb.mxu2 %v932_v35  ;;  %v210_v45 = vld [vmem:[#allocation3 + $0x1b0] sm:$0xff] }
  0xa9   :  { %700 = vmatmul.f32.gmra.mxu1 %v294_v36  ;;  %v1286_v36 = vld [vmem:[#allocation6 + $0x1a0] sm:$0xff]  ;;  %274 = vst [vmem:[#allocation2 + $0x3c8] sm:$0xff] %v210_v45 }
  0xaa   :  { %1309 = vmatpush.msrb.mxu3 %v1286_v36  ;;  %v214_v36 = vld [vmem:[#allocation3 + $0x1d0] sm:$0xff] }
  0xab   :  { %278 = vst [vmem:[#allocation2 + $0x408] sm:$0xff] %v214_v36 }
  0xad   :  { %v7934_v51 = vpop.f32.mrf.mxu0  ;;  %v7948_v11 = vpop.f32.mrf.mxu1 }
  0xae   :  { %605 = vmatmul.f32.gmra.mxu2 %v202_v43 }
  0xaf   :  { %799 = vmatmul.f32.gmra.mxu3 %v327_v41 }
  0xb0   :  { %509 = vmatmul.f32.gmra.mxu0 %v170_v53 }
  0xb1   :  { %703 = vmatmul.f32.gmra.mxu1 %v295_v42  ;;  %v7936_v52 = vpop.f32.mrf.mxu2  ;;  %v335_v42 = vld [vmem:[#allocation2 + $0x36f] sm:$0xff] }
  0xb2   :  { %11961 = vst [vmem:[#allocation13_spill] sm:$0xff] %v7936_v52  ;;  %v7952_v14 = vpop.f32.mrf.mxu3 }
  0xb3   :  { %11963 = vst [vmem:[#allocation15_spill] sm:$0xff] %v7952_v14 }
  0xb5   :  { %v7940_v60 = vpop.f32.mrf.mxu0  ;;  %v7958_v23 = vpop.f32.mrf.mxu1 }
  0xb6   :  { %608 = vmatmul.f32.gmra.mxu2 %v203_v48  ;;  %v177_v48 = vld [vmem:[#allocation3 + $0xa8] sm:$0xff] }
  0xb7   :  { %802 = vmatmul.f32.gmra.mxu3 %v328_v46  ;;  %v1640_v46 = vld [vmem:[#allocation6 + $0x220] sm:$0xff]  ;;  %241 = vst [vmem:[#allocation2 + $0x170] sm:$0xff] %v177_v48 }
  0xb8   :  { %512 = vmatmul.f32.gmra.mxu0 %v171_v59  ;;  %v931_v59 = vld [vmem:[#allocation6 + $0x118] sm:$0xff] }
  0xb9   :  { %706 = vmatmul.f32.gmra.mxu1 %v296_v47  ;;  %v7938_v58 = vpop.f32.mrf.mxu2  ;;  %1663 = vmatpush.msrb.mxu0 %v1640_v46  ;;  %v340_v46 = vld [vmem:[#allocation2 + $0x3c7] sm:$0xff] }
  0xba   :  { %11962 = vst [vmem:[#allocation14_spill] sm:$0xff] %v7938_v58  ;;  %v7960_v27 = vpop.f32.mrf.mxu3  ;;  %956 = vmatpush.msrb.mxu2 %v931_v59 }
  0xbb   :  { %11964 = vst [vmem:[#allocation16_spill] sm:$0xff] %v7960_v27  ;;  %1664 = vmatpush.msrb.mxu0 %v1639_v8  ;;  %v216_v8 = vld [vmem:[#allocation3 + $0x1e0] sm:$0xff]  ;;  %v1576_v27 = vld [vmem:[#allocation2 + $0x70] sm:$0xff] }
  0xbc   :  { %280 = vst [vmem:[#allocation2 + $0x428] sm:$0xff] %v216_v8 }
  0xbd   :  { %v7944_v4 = vpop.f32.mrf.mxu0 }
  0xbe   :  { %611 = vmatmul.f32.gmra.mxu2 %v204_v56  ;;  %v304_v56 = vld [vmem:[#allocation2 + $0x147] sm:$0xff]  ;;  %v307_v35 = vld [vmem:[#allocation2 + $0x16f] sm:$0xff] }
  0xbf   :  { %805 = vmatmul.f32.gmra.mxu3 %v329_v54  ;;  %v336_v54 = vld [vmem:[#allocation2 + $0x387] sm:$0xff] }
  0xc0   :  { %515 = vmatmul.f32.gmra.mxu0 %v172_v3  ;;  %v337_v3 = vld [vmem:[#allocation2 + $0x38f] sm:$0xff] }
  0xc1   :  { %709 = vmatmul.f32.gmra.mxu1 %v297_v55  ;;  %v7942_v2 = vpop.f32.mrf.mxu2 }
  0xc5   :  { %v7950_v12 = vpop.f32.mrf.mxu0 }
  0xc6   :  { %614 = vmatmul.f32.gmra.mxu2 %v205_v63  ;;  %v178_v63 = vld [vmem:[#allocation3 + $0xb0] sm:$0xff] }
  0xc7   :  { %808 = vmatmul.f32.gmra.mxu3 %v330_v61  ;;  %v1285_v61 = vld [vmem:[#allocation6 + $0x198] sm:$0xff]  ;;  %242 = vst [vmem:[#allocation2 + $0x188] sm:$0xff] %v178_v63 }
  0xc8   :  { %518 = vmatmul.f32.gmra.mxu0 %v173_v10  ;;  %1310 = vmatpush.msrb.mxu3 %v1285_v61  ;;  %v179_v10 = vld [vmem:[#allocation3 + $0xb8] sm:$0xff]  ;;  %v182_v61 = vld [vmem:[#allocation3 + $0xd0] sm:$0xff] }
  0xc9   :  { %712 = vmatmul.f32.gmra.mxu1 %v298_v62  ;;  %v7946_v9 = vpop.f32.mrf.mxu2  ;;  %243 = vst [vmem:[#allocation2 + $0x190] sm:$0xff] %v179_v10 }
  0xca   :  { %246 = vst [vmem:[#allocation2 + $0x1c8] sm:$0xff] %v182_v61 }
  0xcd   :  { %v7956_v21 = vpop.f32.mrf.mxu0 }
  0xce   :  { %617 = vmatmul.f32.gmra.mxu2 %v206_v7  ;;  %v212_v7 = vld [vmem:[#allocation3 + $0x1c0] sm:$0xff] }
  0xcf   :  { %811 = vmatmul.f32.gmra.mxu3 %v331_v5  ;;  %276 = vst [vmem:[#allocation2 + $0x3e8] sm:$0xff] %v212_v7 }
  0xd0   :  { %521 = vmatmul.f32.gmra.mxu0 %v174_v20  ;;  %v213_v20 = vld [vmem:[#allocation3 + $0x1c8] sm:$0xff] }
  0xd1   :  { %715 = vmatmul.f32.gmra.mxu1 %v299_v6  ;;  %v7954_v19 = vpop.f32.mrf.mxu2  ;;  %v305_v6 = vld [vmem:[#allocation2 + $0x14f] sm:$0xff]  ;;  %277 = vst [vmem:[#allocation2 + $0x3f0] sm:$0xff] %v213_v20 }
  0xd5   :  { %v7964_v30 = vpop.f32.mrf.mxu0 }
  0xd6   :  { %620 = vmatmul.f32.gmra.mxu2 %v207_v16 }
  0xd7   :  { %814 = vmatmul.f32.gmra.mxu3 %v332_v13 }
  0xd8   :  { %524 = vmatmul.f32.gmra.mxu0 %v175_v29 }
  0xd9   :  { %718 = vmatmul.f32.gmra.mxu1 %v300_v15  ;;  %v7962_v28 = vpop.f32.mrf.mxu2 }
  0xdd   :  { %v7973_v41 = vpop.f32.mrf.mxu0 }
  0xde   :  { %623 = vmatmul.f32.gmra.mxu2 %v208_v25 }
  0xdf   :  { %817 = vmatmul.f32.gmra.mxu3 %v333_v22  ;;  %v930_v22 = vld [vmem:[#allocation6 + $0x110] sm:$0xff] }
  0xe0   :  { %527 = vmatmul.f32.gmra.mxu0 %v176_v38  ;;  %957 = vmatpush.msrb.mxu2 %v930_v22  ;;  %v1638_v38 = vld [vmem:[#allocation6 + $0x210] sm:$0xff] }
  0xe1   :  { %721 = vmatmul.f32.gmra.mxu1 %v301_v24  ;;  %v7968_v37 = vpop.f32.mrf.mxu2  ;;  %v1284_v24 = vld [vmem:[#allocation6 + $0x190] sm:$0xff]  ;;  %1665 = vmatpush.msrb.mxu0 %v1638_v38  ;;  %v2003_v38 = vld [vmem:[#allocation6 + $0x2e8] sm:$0xff] }
  0xe2   :  { %1311 = vmatpush.msrb.mxu3 %v1284_v24  ;;  %v2004_v24 = vld [vmem:[#allocation6 + $0x2f0] sm:$0xff] }
  0xe5   :  { %v7982_v53 = vpop.f32.mrf.mxu0 }
  0xe6   :  { %v7966_v32 = vpop.f32.mrf.mxu1  ;;  %626 = vmatmul.f32.gmra.mxu2 %v209_v34 }
  0xe7   :  { %820 = vmatmul.f32.gmra.mxu3 %v334_v31 }
  0xe8   :  { %530 = vmatmul.f32.gmra.mxu0 %v177_v48 }
  0xe9   :  { %724 = vmatmul.f32.gmra.mxu1 %v302_v33  ;;  %v7977_v47 = vpop.f32.mrf.mxu2  ;;  %v339_v33 = vld [vmem:[#allocation2 + $0x3af] sm:$0xff] }
  0xea   :  { %v773_v39 = vpop.f32.mrf.mxu3 }
  0xeb   :  { %v7971_v40 = vadd.f32 %v773_v39, %v7942_v2 }
  0xed   :  { %11965 = vst [vmem:[#allocation17_spill] sm:$0xff] %v7971_v40  ;;  %v7991_v2 = vpop.f32.mrf.mxu0 }
  0xee   :  { %v7975_v43 = vpop.f32.mrf.mxu1  ;;  %629 = vmatmul.f32.gmra.mxu2 %v210_v45 }
  0xef   :  { %823 = vmatmul.f32.gmra.mxu3 %v335_v42  ;;  %v181_v42 = vld [vmem:[#allocation3 + $0xc8] sm:$0xff] }
  0xf0   :  { %533 = vmatmul.f32.gmra.mxu0 %v178_v63  ;;  %245 = vst [vmem:[#allocation2 + $0x1b0] sm:$0xff] %v181_v42 }
  0xf1   :  { %727 = vmatmul.f32.gmra.mxu1 %v303_v44  ;;  %v7986_v62 = vpop.f32.mrf.mxu2 }
  0xf2   :  { %v776_v49 = vpop.f32.mrf.mxu3 }
  0xf3   :  { %v7980_v50 = vadd.f32 %v776_v49, %v7946_v9  ;;  %v308_v49 = vld [vmem:[#allocation2 + $0x187] sm:$0xff] }
  0xf5   :  { %11966 = vst [vmem:[#allocation18_spill] sm:$0xff] %v7980_v50  ;;  %v8000_v16 = vpop.f32.mrf.mxu0  ;;  %v1575_v50 = vld [vmem:[#allocation2 + $0x68] sm:$0xff] }
  0xf6   :  { %v7984_v55 = vpop.f32.mrf.mxu1  ;;  %632 = vmatmul.f32.gmra.mxu2 %v211_v57  ;;  %v1283_v57 = vld [vmem:[#allocation6 + $0x188] sm:$0xff] }
  0xf7   :  { %826 = vmatmul.f32.gmra.mxu3 %v336_v54  ;;  %v215_v54 = vld [vmem:[#allocation3 + $0x1d8] sm:$0xff] }
  0xf8   :  { %536 = vmatmul.f32.gmra.mxu0 %v179_v10  ;;  %279 = vst [vmem:[#allocation2 + $0x410] sm:$0xff] %v215_v54  ;;  %1312 = vmatpush.msrb.mxu3 %v1283_v57  ;;  %v1637_v10 = vld [vmem:[#allocation6 + $0x208] sm:$0xff] }
  0xf9   :  { %730 = vmatmul.f32.gmra.mxu1 %v304_v56  ;;  %v7995_v9 = vpop.f32.mrf.mxu2  ;;  %v929_v56 = vld [vmem:[#allocation6 + $0x108] sm:$0xff]  ;;  %1666 = vmatpush.msrb.mxu0 %v1637_v10  ;;  %v1636_v10 = vld [vmem:[#allocation6 + $0x200] sm:$0xff] }
  0xfa   :  { %v779_v0 = vpop.f32.mrf.mxu3  ;;  %958 = vmatpush.msrb.mxu2 %v929_v56  ;;  %v2001_v56 = vld [vmem:[#allocation6 + $0x2d8] sm:$0xff] }
  0xfb   :  { %v7989_v1 = vadd.f32 %v779_v0, %v7954_v19  ;;  %v306_v19 = vld [vmem:[#allocation2 + $0x167] sm:$0xff]  ;;  %1667 = vmatpush.msrb.mxu0 %v1636_v10 }
  0xfd   :  { %11967 = vst [vmem:[#allocation19_spill] sm:$0xff] %v7989_v1  ;;  %v8009_v31 = vpop.f32.mrf.mxu0  ;;  %v1928_v1 = vld [vmem:[#allocation2 + $0x51] sm:$0xff] }
  0xfe   :  { %v7993_v5 = vpop.f32.mrf.mxu1  ;;  %635 = vmatmul.f32.gmra.mxu2 %v212_v7  ;;  %v309_v7 = vld [vmem:[#allocation2 + $0x18f] sm:$0xff] }
  0xff   :  { %829 = vmatmul.f32.gmra.mxu3 %v337_v3  ;;  %v341_v3 = vld [vmem:[#allocation2 + $0x3cf] sm:$0xff] }
 0x100   :  { %539 = vmatmul.f32.gmra.mxu0 %v180_v26  ;;  %v342_v26 = vld [vmem:[#allocation2 + $0x3e7] sm:$0xff] }
 0x101   :  { %733 = vmatmul.f32.gmra.mxu1 %v305_v6  ;;  %v8004_v25 = vpop.f32.mrf.mxu2 }
 0x102   :  { %v782_v13 = vpop.f32.mrf.mxu3 }
 0x103   :  { %v7998_v15 = vadd.f32 %v782_v13, %v7962_v28 }
 0x105   :  { %11968 = vst [vmem:[#allocation20_spill] sm:$0xff] %v7998_v15  ;;  %v8018_v45 = vpop.f32.mrf.mxu0 }
 0x106   :  { %v8002_v18 = vpop.f32.mrf.mxu1  ;;  %638 = vmatmul.f32.gmra.mxu2 %v213_v20  ;;  %v2005_v20 = vld [vmem:[#allocation6 + $0x2f8] sm:$0xff] }
 0x107   :  { %832 = vmatmul.f32.gmra.mxu3 %v338_v17  ;;  %v183_v17 = vld [vmem:[#allocation3 + $0xd8] sm:$0xff]  ;;  %2006 = vmatpush.msrb.mxu1 %v2005_v20 }
 0x108   :  { %542 = vmatmul.f32.gmra.mxu0 %v181_v42  ;;  %247 = vst [vmem:[#allocation2 + $0x1d0] sm:$0xff] %v183_v17  ;;  %v1282_v42 = vld [vmem:[#allocation6 + $0x180] sm:$0xff] }
 0x109   :  { %736 = vmatmul.f32.gmra.mxu1 %v306_v19  ;;  %v8013_v39 = vpop.f32.mrf.mxu2  ;;  %1313 = vmatpush.msrb.mxu3 %v1282_v42  ;;  %v2360_v42 = vld [vmem:[#allocation6 + $0x378] sm:$0xff] }
 0x10a   :  { %v785_v28 = vpop.f32.mrf.mxu3  ;;  %2007 = vmatpush.msrb.mxu1 %v2004_v24 }
 0x10b   :  { %v8007_v29 = vadd.f32 %v785_v28, %v7968_v37 }
 0x10c   :  { %2008 = vmatpush.msrb.mxu1 %v2003_v38  ;;  %v344_v38 = vld [vmem:[#allocation2 + $0x407] sm:$0xff] }
 0x10d   :  { %11969 = vst [vmem:[#allocation21_spill] sm:$0xff] %v8007_v29  ;;  %v8027_v0 = vpop.f32.mrf.mxu0  ;;  %v2713_v29 = vld [vmem:[#allocation6 + $0x3f0] sm:$0xff] }
 0x10e   :  { %v8011_v34 = vpop.f32.mrf.mxu1  ;;  %641 = vmatmul.f32.gmra.mxu2 %v214_v36  ;;  %v928_v36 = vld [vmem:[#allocation6 + $0x100] sm:$0xff] }
 0x10f   :  { %835 = vmatmul.f32.gmra.mxu3 %v339_v33  ;;  %v310_v33 = vld [vmem:[#allocation2 + $0x1a7] sm:$0xff]  ;;  %959 = vmatpush.msrb.mxu2 %v928_v36 }
 0x110   :  { %545 = vmatmul.f32.gmra.mxu0 %v182_v61  ;;  %v2000_v61 = vld [vmem:[#allocation6 + $0x2d0] sm:$0xff] }
 0x111   :  { %739 = vmatmul.f32.gmra.mxu1 %v307_v35  ;;  %v8022_v59 = vpop.f32.mrf.mxu2  ;;  %v217_v35 = vld [vmem:[#allocation3 + $0x1e8] sm:$0xff]  ;;  %2361 = vmatpush.msra.mxu2 %v2360_v42 }
 0x112   :  { %v788_v37 = vpop.f32.mrf.mxu3  ;;  %281 = vst [vmem:[#allocation2 + $0x430] sm:$0xff] %v217_v35  ;;  %v863_v36 = vld [vmem:[#allocation2 + $0x9] sm:$0xff] }
 0x113   :  { %v8016_v44 = vadd.f32 %v788_v37, %v7977_v47  ;;  %v184_v37 = vld [vmem:[#allocation3 + $0xe0] sm:$0xff]  ;;  %v1571_v42 = vld [vmem:[#allocation2 + $0x28] sm:$0xff] }
 0x114   :  { %248 = vst [vmem:[#allocation2 + $0x1e8] sm:$0xff] %v184_v37 }
 0x115   :  { %11970 = vst [vmem:[#allocation22_spill] sm:$0xff] %v8016_v44  ;;  %v8036_v22 = vpop.f32.mrf.mxu0 }
 0x116   :  { %v8020_v48 = vpop.f32.mrf.mxu1  ;;  %644 = vmatmul.f32.gmra.mxu2 %v215_v54 }
 0x117   :  { %838 = vmatmul.f32.gmra.mxu3 %v340_v46  ;;  %v2002_v46 = vld [vmem:[#allocation6 + $0x2e0] sm:$0xff] }
 0x118   :  { %548 = vmatmul.f32.gmra.mxu0 %v183_v17  ;;  %2009 = vmatpush.msrb.mxu1 %v2002_v46 }
 0x119   :  { %742 = vmatmul.f32.gmra.mxu1 %v308_v49  ;;  %v8031_v13 = vpop.f32.mrf.mxu2 }
 0x11a   :  { %v791_v47 = vpop.f32.mrf.mxu3  ;;  %2010 = vmatpush.msrb.mxu1 %v2001_v56  ;;  %v2714_v56 = vld [vmem:[#allocation6 + $0x3f8] sm:$0xff] }
 0x11b   :  { %v8025_v63 = vadd.f32 %v791_v47, %v7986_v62  ;;  %v343_v47 = vld [vmem:[#allocation2 + $0x3ef] sm:$0xff]  ;;  %2715 = vmatpush.msra.mxu3 %v2714_v56 }
 0x11c   :  { %2011 = vmatpush.msrb.mxu1 %v2000_v61  ;;  %v1994_v61 = vld [vmem:[#allocation6 + $0x2a0] sm:$0xff] }
 0x11d   :  { %11971 = vst [vmem:[#allocation23_spill] sm:$0xff] %v8025_v63  ;;  %v8045_v57 = vpop.f32.mrf.mxu0  ;;  %v1927_v63 = vld [vmem:[#allocation2 + $0x49] sm:$0xff]  ;;  %2716 = vmatpush.msra.mxu3 %v2713_v29 }
 0x11e   :  { %v8029_v6 = vpop.f32.mrf.mxu1  ;;  %647 = vmatmul.f32.gmra.mxu2 %v216_v8  ;;  %v1999_v8 = vld [vmem:[#allocation6 + $0x2c8] sm:$0xff] }
 0x11f   :  { %841 = vmatmul.f32.gmra.mxu3 %v341_v3  ;;  %2012 = vmatpush.msrb.mxu1 %v1999_v8  ;;  %v1993_v8 = vld [vmem:[#allocation6 + $0x298] sm:$0xff] }
 0x120   :  { %551 = vmatmul.f32.gmra.mxu0 %v184_v37  ;;  %v1995_v37 = vld [vmem:[#allocation6 + $0x2a8] sm:$0xff] }
 0x121   :  { %745 = vmatmul.f32.gmra.mxu1 %v309_v7  ;;  %v311_v7 = vld [vmem:[#allocation2 + $0x1af] sm:$0xff] }
 0x122   :  { %v794_v62 = vpop.f32.mrf.mxu3 }
 0x123   :  { %v8034_v19 = vadd.f32 %v794_v62, %v7995_v9  ;;  %v8040_v9 = vpop.f32.mrf.mxu2  ;;  %v1998_v62 = vld [vmem:[#allocation6 + $0x2c0] sm:$0xff] }
 0x124   :  { %2013 = vmatpush.msrb.mxu1 %v1998_v62  ;;  %v1992_v62 = vld [vmem:[#allocation6 + $0x290] sm:$0xff] }
 0x125   :  { %11972 = vst [vmem:[#allocation24_spill] sm:$0xff] %v8034_v19 }
 0x126   :  { %v8038_v28 = vpop.f32.mrf.mxu1  ;;  %650 = vmatmul.f32.gmra.mxu2 %v217_v35  ;;  %v1996_v35 = vld [vmem:[#allocation6 + $0x2b0] sm:$0xff] }
 0x127   :  { %844 = vmatmul.f32.gmra.mxu3 %v342_v26  ;;  %v1997_v26 = vld [vmem:[#allocation6 + $0x2b8] sm:$0xff] }
 0x128   :  { %2014 = vmatpush.msrb.mxu1 %v1997_v26  ;;  %v345_v26 = vld [vmem:[#allocation2 + $0x40f] sm:$0xff] }
 0x129   :  { %748 = vmatmul.f32.gmra.mxu1 %v310_v33  ;;  %v8058_v33 = vpop.f32.mrf.mxu0 }
 0x12a   :  { %v797_v49 = vpop.f32.mrf.mxu3  ;;  %2015 = vmatpush.msrb.mxu1 %v1996_v35  ;;  %v1991_v35 = vld [vmem:[#allocation6 + $0x288] sm:$0xff] }
 0x12b   :  { %v8043_v54 = vadd.f32 %v797_v49, %v8004_v25  ;;  %v8049_v17 = vpop.f32.mrf.mxu2  ;;  %v8051_v25 = vld [vmem:[#allocation3 + $0xe8] sm:$0xff] }
 0x12c   :  { %249 = vst [vmem:[#allocation2 + $0x1f0] sm:$0xff] %v8051_v25  ;;  %554 = vmatmul.f32.gmra.mxu0 %v8051_v25  ;;  %v312_v49 = vld [vmem:[#allocation2 + $0x1c7] sm:$0xff]  ;;  %2016 = vmatpush.msrb.mxu1 %v1995_v37  ;;  %v3068_v37 = vld [vmem:[#allocation6 + $0x478] sm:$0xff] }
 0x12d   :  { %11973 = vst [vmem:[#allocation25_spill] sm:$0xff] %v8043_v54  ;;  %3069 = vmatpush.msra.mxu0 %v3068_v37 }
 0x12e   :  { %v8047_v3 = vpop.f32.mrf.mxu1  ;;  %960 = vmatmul.f32.vlgmr.msrb.gmra.mxu2 %v863_v36  ;;  %2017 = vmatpush.msrb.mxu1 %v1994_v61 }
 0x12f   :  { %847 = vmatmul.f32.gmra.mxu3 %v343_v47 }
 0x130   :  { %2018 = vmatpush.msrb.mxu1 %v1993_v8  ;;  %v346_v8 = vld [vmem:[#allocation2 + $0x427] sm:$0xff] }
 0x131   :  { %751 = vmatmul.f32.gmra.mxu1 %v311_v7  ;;  %v8067_v10 = vpop.f32.mrf.mxu0 }
 0x132   :  { %v800_v20 = vpop.f32.mrf.mxu3  ;;  %2019 = vmatpush.msrb.mxu1 %v1992_v62 }
 0x133   :  { %v8056_v24 = vadd.f32 %v800_v20, %v8013_v39  ;;  %v8062_v39 = vpop.f32.mrf.mxu2  ;;  %v864_v20 = vld [vmem:[#allocation2 + $0x11] sm:$0xff] }
 0x134   :  { %2020 = vmatpush.msrb.mxu1 %v1991_v35  ;;  %1668 = vmatmul.f32.vlgmr.msrb.gmra.mxu0 %v1571_v42  ;;  %v1572_v35 = vld [vmem:[#allocation2 + $0x30] sm:$0xff] }
 0x135   :  { %11974 = vst [vmem:[#allocation26_spill] sm:$0xff] %v8056_v24  ;;  %v8091_v24 = vld [vmem:[#allocation2 + $0x1ef] sm:$0xff] }
 0x136   :  { %v8060_v46 = vpop.f32.mrf.mxu1  ;;  %963 = vmatmul.f32.gmra.mxu2 %v864_v20  ;;  %v1925_v20 = vld [vmem:[#allocation2 + $0x29] sm:$0xff] }
 0x137   :  { %850 = vmatmul.f32.gmra.mxu3 %v344_v38  ;;  %v8071_v38 = vld [vmem:[#allocation2 + $0x1cf] sm:$0xff] }
 0x139   :  { %754 = vmatmul.f32.gmra.mxu1 %v312_v49  ;;  %v1990_v49 = vld [vmem:[#allocation6 + $0x280] sm:$0xff] }
 0x13a   :  { %v803_v47 = vpop.f32.mrf.mxu3  ;;  %2021 = vmatpush.msrb.mxu1 %v1990_v49 }
 0x13b   :  { %v8065_v7 = vadd.f32 %v803_v47, %v8022_v59  ;;  %v609_v59 = vpop.f32.mrf.mxu2  ;;  %v8077_v47 = vpop.f32.mrf.mxu0 }
 0x13c   :  { %1671 = vmatmul.f32.gmra.mxu0 %v1572_v35 }
 0x13d   :  { %11975 = vst [vmem:[#allocation27_spill] sm:$0xff] %v8065_v7 }
 0x13e   :  { %v8069_v36 = vpop.f32.mrf.mxu1  ;;  %966 = vmatmul.f32.gmra.mxu2 %v1925_v20 }
 0x13f   :  { %853 = vmatmul.f32.gmra.mxu3 %v345_v26  ;;  %v8081_v26 = vld [vmem:[#allocation2 + $0x1e7] sm:$0xff] }
 0x141   :  { %757 = vmatmul.f32.gmra.mxu1 %v8071_v38 }
 0x142   :  { %v806_v56 = vpop.f32.mrf.mxu3 }
 0x143   :  { %v8075_v61 = vadd.f32 %v806_v56, %v8031_v13  ;;  %v612_v42 = vpop.f32.mrf.mxu2  ;;  %v8087_v13 = vpop.f32.mrf.mxu0  ;;  %v347_v56 = vld [vmem:[#allocation2 + $0x42f] sm:$0xff] }
 0x145   :  { %11976 = vst [vmem:[#allocation28_spill] sm:$0xff] %v8075_v61  ;;  %v1926_v61 = vld [vmem:[#allocation2 + $0x31] sm:$0xff] }
 0x146   :  { %v8079_v62 = vpop.f32.mrf.mxu1  ;;  %969 = vmatmul.f32.gmra.mxu2 %v1926_v61 }
 0x147   :  { %856 = vmatmul.f32.gmra.mxu3 %v346_v8  ;;  %v1573_v8 = vld [vmem:[#allocation2 + $0x48] sm:$0xff] }
 0x148   :  { %1674 = vmatmul.f32.gmra.mxu0 %v1573_v8 }
 0x149   :  { %760 = vmatmul.f32.gmra.mxu1 %v8081_v26 }
 0x14a   :  { %v809_v37 = vpop.f32.mrf.mxu3 }
 0x14b   :  { %v8085_v49 = vadd.f32 %v809_v37, %v8040_v9  ;;  %v615_v35 = vpop.f32.mrf.mxu2  ;;  %v8097_v9 = vpop.f32.mrf.mxu0  ;;  %v2359_v37 = vld [vmem:[#allocation6 + $0x370] sm:$0xff] }
 0x14c   :  { %2362 = vmatpush.msra.mxu2 %v2359_v37 }
 0x14d   :  { %11977 = vst [vmem:[#allocation29_spill] sm:$0xff] %v8085_v49  ;;  %v1217_v49 = vld [vmem:[#allocation2 + $0x27] sm:$0xff] }
 0x14e   :  { %v8089_v7 = vpop.f32.mrf.mxu1  ;;  %972 = vmatmul.f32.gmra.mxu2 %v1927_v63 }
 0x14f   :  { %859 = vmatmul.f32.gmra.mxu3 %v347_v56  ;;  %v1574_v56 = vld [vmem:[#allocation2 + $0x50] sm:$0xff] }
 0x150   :  { %1677 = vmatmul.f32.gmra.mxu0 %v1574_v56 }
 0x151   :  { %763 = vmatmul.f32.gmra.mxu1 %v8091_v24 }
 0x152   :  { %v812_v54 = vpop.f32.mrf.mxu3 }
 0x153   :  { %v8095_v19 = vadd.f32 %v812_v54, %v8049_v17  ;;  %v618_v8 = vpop.f32.mrf.mxu2  ;;  %v8104_v17 = vpop.f32.mrf.mxu0 }
 0x154   :  { %11980 = vst [vmem:[#allocation32_spill] sm:$0xff] %v8104_v17 }
 0x155   :  { %11978 = vst [vmem:[#allocation30_spill] sm:$0xff] %v8095_v19  ;;  %v1218_v19 = vld [vmem:[#allocation2 + $0x2f] sm:$0xff] }
 0x156   :  { %v8099_v44 = vpop.f32.mrf.mxu1  ;;  %975 = vmatmul.f32.gmra.mxu2 %v1928_v1 }
 0x157   :  { %1314 = vmatmul.f32.vlgmr.msrb.gmra.mxu3 %v1217_v49  ;;  %v3067_v49 = vld [vmem:[#allocation6 + $0x470] sm:$0xff] }
 0x158   :  { %1680 = vmatmul.f32.gmra.mxu0 %v1575_v50 }
 0x159   :  { %2022 = vmatmul.f32.vlgmr.msrb.gmra.mxu1 %v1925_v20  ;;  %3070 = vmatpush.msra.mxu0 %v3067_v49  ;;  %v1220_v49 = vld [vmem:[#allocation2 + $0x4f] sm:$0xff] }
 0x15a   :  { %v815_v15 = vpop.f32.mrf.mxu3 }
 0x15b   :  { %v8102_v54 = vadd.f32 %v815_v15, %v8062_v39  ;;  %v621_v40 = vpop.f32.mrf.mxu2  ;;  %v8110_v56 = vpop.f32.mrf.mxu0  ;;  %v1219_v15 = vld [vmem:[#allocation2 + $0x47] sm:$0xff] }
 0x15c   :  { %11982 = vst [vmem:[#allocation34_spill] sm:$0xff] %v8110_v56  ;;  %v1929_v39 = vld [vmem:[#allocation2 + $0x69] sm:$0xff] }
 0x15d   :  { %11979 = vst [vmem:[#allocation31_spill] sm:$0xff] %v8102_v54  ;;  %v2712_v56 = vld [vmem:[#allocation6 + $0x3e8] sm:$0xff] }
 0x15e   :  { %v8106_v37 = vpop.f32.mrf.mxu1  ;;  %978 = vmatmul.f32.gmra.mxu2 %v1929_v39  ;;  %2717 = vmatpush.msra.mxu3 %v2712_v56 }
 0x15f   :  { %1317 = vmatmul.f32.gmra.mxu3 %v1218_v19 }
 0x160   :  { %1683 = vmatmul.f32.gmra.mxu0 %v1576_v27 }
 0x161   :  { %2025 = vmatmul.f32.gmra.mxu1 %v1926_v61 }
 0x162   :  { %v818_v29 = vpop.f32.mrf.mxu3 }
 0x163   :  { %v8108_v20 = vadd.f32 %v818_v29, %v609_v59  ;;  %v624_v19 = vpop.f32.mrf.mxu2  ;;  %v8116_v61 = vpop.f32.mrf.mxu0  ;;  %v1930_v59 = vld [vmem:[#allocation2 + $0x71] sm:$0xff] }
 0x164   :  { %11984 = vst [vmem:[#allocation36_spill] sm:$0xff] %v8116_v61  ;;  %v1578_v61 = vld [vmem:[#allocation2 + $0x90] sm:$0xff] }
 0x165   :  { %11981 = vst [vmem:[#allocation33_spill] sm:$0xff] %v8108_v20  ;;  %v1577_v20 = vld [vmem:[#allocation2 + $0x88] sm:$0xff] }
 0x166   :  { %v8112_v54 = vpop.f32.mrf.mxu1  ;;  %981 = vmatmul.f32.gmra.mxu2 %v1930_v59 }
 0x167   :  { %1320 = vmatmul.f32.gmra.mxu3 %v1219_v15 }
 0x168   :  { %1686 = vmatmul.f32.gmra.mxu0 %v1577_v20 }
 0x169   :  { %2028 = vmatmul.f32.gmra.mxu1 %v1927_v63  ;;  %v2358_v63 = vld [vmem:[#allocation6 + $0x368] sm:$0xff] }
 0x16a   :  { %v821_v58 = vpop.f32.mrf.mxu3  ;;  %2363 = vmatpush.msra.mxu2 %v2358_v63  ;;  %v1579_v63 = vld [vmem:[#allocation2 + $0xa8] sm:$0xff] }
 0x16b   :  { %v8114_v50 = vadd.f32 %v821_v58, %v612_v42  ;;  %v627_v14 = vpop.f32.mrf.mxu2  ;;  %v8122_v27 = vpop.f32.mrf.mxu0  ;;  %v1221_v58 = vld [vmem:[#allocation2 + $0x67] sm:$0xff] }
 0x16c   :  { %11986 = vst [vmem:[#allocation38_spill] sm:$0xff] %v8122_v27  ;;  %v1931_v42 = vld [vmem:[#allocation2 + $0x89] sm:$0xff] }
 0x16d   :  { %11983 = vst [vmem:[#allocation35_spill] sm:$0xff] %v8114_v50 }
 0x16e   :  { %v8118_v29 = vpop.f32.mrf.mxu1  ;;  %984 = vmatmul.f32.gmra.mxu2 %v1931_v42 }
 0x16f   :  { %1323 = vmatmul.f32.gmra.mxu3 %v1220_v49 }
 0x170   :  { %1689 = vmatmul.f32.gmra.mxu0 %v1578_v61 }
 0x171   :  { %2031 = vmatmul.f32.gmra.mxu1 %v1928_v1 }
 0x172   :  { %v824_v15 = vpop.f32.mrf.mxu3 }
 0x173   :  { %v8120_v52 = vadd.f32 %v824_v15, %v615_v35  ;;  %v630_v20 = vpop.f32.mrf.mxu2  ;;  %v8128_v35 = vpop.f32.mrf.mxu0  ;;  %v1222_v15 = vld [vmem:[#allocation2 + $0x6f] sm:$0xff] }
 0x174   :  { %11989 = vst [vmem:[#allocation41_spill] sm:$0xff] %v8128_v35  ;;  %v1580_v35 = vld [vmem:[#allocation2 + $0xb0] sm:$0xff] }
 0x175   :  { %11985 = vst [vmem:[#allocation37_spill] sm:$0xff] %v8120_v52  ;;  %v1932_v52 = vld [vmem:[#allocation2 + $0x91] sm:$0xff] }
 0x176   :  { %v8124_v50 = vpop.f32.mrf.mxu1  ;;  %987 = vmatmul.f32.gmra.mxu2 %v1932_v52 }
 0x177   :  { %11987 = vst [vmem:[#allocation39_spill] sm:$0xff] %v8124_v50  ;;  %1326 = vmatmul.f32.gmra.mxu3 %v1221_v58  ;;  %v3066_v50 = vld [vmem:[#allocation6 + $0x468] sm:$0xff] }
 0x178   :  { %1692 = vmatmul.f32.gmra.mxu0 %v1579_v63 }
 0x179   :  { %2034 = vmatmul.f32.gmra.mxu1 %v1929_v39  ;;  %3071 = vmatpush.msra.mxu0 %v3066_v50  ;;  %v1224_v50 = vld [vmem:[#allocation2 + $0x8f] sm:$0xff] }
 0x17a   :  { %v827_v1 = vpop.f32.mrf.mxu3 }
 0x17b   :  { %v8126_v49 = vadd.f32 %v827_v1, %v618_v8  ;;  %v633_v58 = vpop.f32.mrf.mxu2  ;;  %v8134_v39 = vpop.f32.mrf.mxu0  ;;  %v1223_v8 = vld [vmem:[#allocation2 + $0x87] sm:$0xff] }
 0x17c   :  { %11992 = vst [vmem:[#allocation44_spill] sm:$0xff] %v8134_v39  ;;  %v1933_v1 = vld [vmem:[#allocation2 + $0xa9] sm:$0xff] }
 0x17d   :  { %11988 = vst [vmem:[#allocation40_spill] sm:$0xff] %v8126_v49 }
 0x17e   :  { %v8130_v27 = vpop.f32.mrf.mxu1  ;;  %990 = vmatmul.f32.gmra.mxu2 %v1933_v1 }
 0x17f   :  { %11990 = vst [vmem:[#allocation42_spill] sm:$0xff] %v8130_v27  ;;  %1329 = vmatmul.f32.gmra.mxu3 %v1222_v15 }
 0x180   :  { %1695 = vmatmul.f32.gmra.mxu0 %v1580_v35 }
 0x181   :  { %2037 = vmatmul.f32.gmra.mxu1 %v1930_v59 }
 0x182   :  { %v830_v56 = vpop.f32.mrf.mxu3 }
 0x183   :  { %v8132_v61 = vadd.f32 %v830_v56, %v621_v40  ;;  %v636_v15 = vpop.f32.mrf.mxu2  ;;  %v8140_v59 = vpop.f32.mrf.mxu0  ;;  %v1934_v40 = vld [vmem:[#allocation2 + $0xb1] sm:$0xff] }
 0x184   :  { %11995 = vst [vmem:[#allocation47_spill] sm:$0xff] %v8140_v59  ;;  %v1582_v59 = vld [vmem:[#allocation2 + $0xd0] sm:$0xff] }
 0x185   :  { %11991 = vst [vmem:[#allocation43_spill] sm:$0xff] %v8132_v61  ;;  %v1581_v61 = vld [vmem:[#allocation2 + $0xc8] sm:$0xff] }
 0x186   :  { %v8136_v49 = vpop.f32.mrf.mxu1  ;;  %993 = vmatmul.f32.gmra.mxu2 %v1934_v40 }
 0x187   :  { %11993 = vst [vmem:[#allocation45_spill] sm:$0xff] %v8136_v49  ;;  %1332 = vmatmul.f32.gmra.mxu3 %v1223_v8 }
 0x188   :  { %1698 = vmatmul.f32.gmra.mxu0 %v1581_v61 }
 0x189   :  { %2040 = vmatmul.f32.gmra.mxu1 %v1931_v42  ;;  %v2357_v42 = vld [vmem:[#allocation6 + $0x360] sm:$0xff] }
 0x18a   :  { %v833_v27 = vpop.f32.mrf.mxu3  ;;  %2364 = vmatpush.msra.mxu2 %v2357_v42  ;;  %v1583_v42 = vld [vmem:[#allocation2 + $0xe8] sm:$0xff] }
 0x18b   :  { %v8138_v63 = vadd.f32 %v833_v27, %v624_v19  ;;  %v639_v39 = vpop.f32.mrf.mxu2  ;;  %v8146_v35 = vpop.f32.mrf.mxu0  ;;  %v1225_v19 = vld [vmem:[#allocation2 + $0xa7] sm:$0xff] }
 0x18c   :  { %11998 = vst [vmem:[#allocation50_spill] sm:$0xff] %v8146_v35  ;;  %v1935_v27 = vld [vmem:[#allocation2 + $0xc9] sm:$0xff] }
 0x18d   :  { %11994 = vst [vmem:[#allocation46_spill] sm:$0xff] %v8138_v63 }
 0x18e   :  { %v8142_v56 = vpop.f32.mrf.mxu1  ;;  %996 = vmatmul.f32.gmra.mxu2 %v1935_v27 }
 0x18f   :  { %11996 = vst [vmem:[#allocation48_spill] sm:$0xff] %v8142_v56  ;;  %1335 = vmatmul.f32.gmra.mxu3 %v1224_v50  ;;  %v2711_v56 = vld [vmem:[#allocation6 + $0x3e0] sm:$0xff] }
 0x190   :  { %1701 = vmatmul.f32.gmra.mxu0 %v1582_v59  ;;  %2718 = vmatpush.msra.mxu3 %v2711_v56 }
 0x191   :  { %2043 = vmatmul.f32.gmra.mxu1 %v1932_v52 }
 0x192   :  { %v836_v8 = vpop.f32.mrf.mxu3 }
 0x193   :  { %v8144_v49 = vadd.f32 %v836_v8, %v627_v14  ;;  %v642_v61 = vpop.f32.mrf.mxu2  ;;  %v8152_v14 = vpop.f32.mrf.mxu0  ;;  %v1226_v8 = vld [vmem:[#allocation2 + $0xaf] sm:$0xff] }
 0x194   :  { %12001 = vst [vmem:[#allocation53_spill] sm:$0xff] %v8152_v14  ;;  %v1584_v14 = vld [vmem:[#allocation2 + $0xf0] sm:$0xff] }
 0x195   :  { %11997 = vst [vmem:[#allocation49_spill] sm:$0xff] %v8144_v49  ;;  %v1936_v49 = vld [vmem:[#allocation2 + $0xd1] sm:$0xff] }
 0x196   :  { %v8148_v63 = vpop.f32.mrf.mxu1  ;;  %999 = vmatmul.f32.gmra.mxu2 %v1936_v49 }
 0x197   :  { %11999 = vst [vmem:[#allocation51_spill] sm:$0xff] %v8148_v63  ;;  %1338 = vmatmul.f32.gmra.mxu3 %v1225_v19  ;;  %v3065_v63 = vld [vmem:[#allocation6 + $0x460] sm:$0xff] }
 0x198   :  { %1704 = vmatmul.f32.gmra.mxu0 %v1583_v42 }
 0x199   :  { %2046 = vmatmul.f32.gmra.mxu1 %v1933_v1  ;;  %3072 = vmatpush.msra.mxu0 %v3065_v63  ;;  %v1228_v63 = vld [vmem:[#allocation2 + $0xcf] sm:$0xff] }
 0x19a   :  { %v839_v52 = vpop.f32.mrf.mxu3 }
 0x19b   :  { %v8150_v50 = vadd.f32 %v839_v52, %v630_v20  ;;  %v645_v19 = vpop.f32.mrf.mxu2  ;;  %v8158_v1 = vpop.f32.mrf.mxu0  ;;  %v1227_v20 = vld [vmem:[#allocation2 + $0xc7] sm:$0xff] }
 0x19c   :  { %12004 = vst [vmem:[#allocation56_spill] sm:$0xff] %v8158_v1  ;;  %v1937_v52 = vld [vmem:[#allocation2 + $0xe9] sm:$0xff] }
 0x19d   :  { %12000 = vst [vmem:[#allocation52_spill] sm:$0xff] %v8150_v50 }
 0x19e   :  { %v8154_v35 = vpop.f32.mrf.mxu1  ;;  %1002 = vmatmul.f32.gmra.mxu2 %v1937_v52 }
 0x19f   :  { %12002 = vst [vmem:[#allocation54_spill] sm:$0xff] %v8154_v35  ;;  %1341 = vmatmul.f32.gmra.mxu3 %v1226_v8 }
 0x1a0   :  { %1707 = vmatmul.f32.gmra.mxu0 %v1584_v14 }
 0x1a1   :  { %2049 = vmatmul.f32.gmra.mxu1 %v1934_v40 }
 0x1a2   :  { %v842_v59 = vpop.f32.mrf.mxu3 }
 0x1a3   :  { %v8156_v56 = vadd.f32 %v842_v59, %v633_v58  ;;  %v648_v8 = vpop.f32.mrf.mxu2  ;;  %v8164_v40 = vpop.f32.mrf.mxu0  ;;  %v1938_v58 = vld [vmem:[#allocation2 + $0xf1] sm:$0xff] }
 0x1a4   :  { %12007 = vst [vmem:[#allocation59_spill] sm:$0xff] %v8164_v40 }
 0x1a5   :  { %12003 = vst [vmem:[#allocation55_spill] sm:$0xff] %v8156_v56  ;;  %v1585_v56 = vld [vmem:[#allocation2 + $0x108] sm:$0xff] }
 0x1a6   :  { %v8160_v50 = vpop.f32.mrf.mxu1  ;;  %1005 = vmatmul.f32.gmra.mxu2 %v1938_v58 }
 0x1a7   :  { %12005 = vst [vmem:[#allocation57_spill] sm:$0xff] %v8160_v50  ;;  %1344 = vmatmul.f32.gmra.mxu3 %v1227_v20 }
 0x1a8   :  { %1710 = vmatmul.f32.gmra.mxu0 %v1585_v56 }
 0x1a9   :  { %2052 = vmatmul.f32.gmra.mxu1 %v1935_v27 }
 0x1aa   :  { %v845_v35 = vpop.f32.mrf.mxu3 }
 0x1ab   :  { %v8162_v42 = vadd.f32 %v845_v35, %v636_v15  ;;  %v8168_v1 = vpop.f32.mrf.mxu2  ;;  %v8172_v27 = vpop.f32.mrf.mxu0  ;;  %v2356_v15 = vld [vmem:[#allocation6 + $0x358] sm:$0xff]  ;;  %v1229_v35 = vld [vmem:[#allocation2 + $0xe7] sm:$0xff] }
 0x1ac   :  { %12010 = vst [vmem:[#allocation62_spill] sm:$0xff] %v8172_v27  ;;  %2365 = vmatpush.msra.mxu2 %v2356_v15  ;;  %v675_v15 = vadd.f32 %v7958_v23, %v7940_v60  ;;  %v678_v60 = vadd.f32 %v7966_v32, %v7944_v4  ;;  %v1588_v23 = vld [vmem:[#allocation2 + $0x130] sm:$0xff]  ;;  %v681_v4 = vadd.f32 %v7975_v43, %v7950_v12  ;;  %v1589_v32 = vld [vmem:[#allocation2 + $0x148] sm:$0xff] }
 0x1ad   :  { %12006 = vst [vmem:[#allocation58_spill] sm:$0xff] %v8162_v42  ;;  %v1939_v42 = vld [vmem:[#allocation2 + $0x109] sm:$0xff] }
 0x1ae   :  { %v8166_v59 = vpop.f32.mrf.mxu1  ;;  %1008 = vmatmul.f32.gmra.mxu2 %v1939_v42  ;;  %v2355_v12 = vld [vmem:[#allocation6 + $0x350] sm:$0xff] }
 0x1af   :  { %12008 = vst [vmem:[#allocation60_spill] sm:$0xff] %v8166_v59  ;;  %1347 = vmatmul.f32.gmra.mxu3 %v1228_v63  ;;  %v1586_v59 = vld [vmem:[#allocation2 + $0x110] sm:$0xff]  ;;  %v2710_v63 = vld [vmem:[#allocation6 + $0x3d8] sm:$0xff]  ;;  %2366 = vmatpush.msra.mxu2 %v2355_v12 }
 0x1b0   :  { %1713 = vmatmul.f32.gmra.mxu0 %v1586_v59  ;;  %2719 = vmatpush.msra.mxu3 %v2710_v63 }
 0x1b1   :  { %2055 = vmatmul.f32.gmra.mxu1 %v1936_v49 }
 0x1b2   :  { %v848_v20 = vpop.f32.mrf.mxu3 }
 0x1b3   :  { %v8170_v14 = vadd.f32 %v848_v20, %v639_v39  ;;  %v961_v56 = vpop.f32.mrf.mxu2  ;;  %v1230_v39 = vld [vmem:[#allocation2 + $0xef] sm:$0xff] }
 0x1b4   :  { %v1940_v20 = vld [vmem:[#allocation2 + $0x111] sm:$0xff] }
 0x1b5   :  { %12009 = vst [vmem:[#allocation61_spill] sm:$0xff] %v8170_v14  ;;  %v8178_v14 = vpop.f32.mrf.mxu0 }
 0x1b6   :  { %v8174_v40 = vpop.f32.mrf.mxu1  ;;  %1011 = vmatmul.f32.gmra.mxu2 %v1940_v20 }
 0x1b7   :  { %12011 = vst [vmem:[#allocation63_spill] sm:$0xff] %v8174_v40  ;;  %1350 = vmatmul.f32.gmra.mxu3 %v1229_v35  ;;  %v1587_v35 = vld [vmem:[#allocation2 + $0x128] sm:$0xff]  ;;  %v3064_v40 = vld [vmem:[#allocation6 + $0x458] sm:$0xff] }
 0x1b8   :  { %1716 = vmatmul.f32.gmra.mxu0 %v1587_v35  ;;  %v1942_v35 = vld [vmem:[#allocation2 + $0x131] sm:$0xff] }
 0x1b9   :  { %2058 = vmatmul.f32.gmra.mxu1 %v1937_v52  ;;  %3073 = vmatpush.msra.mxu0 %v3064_v40 }
 0x1ba   :  { %v851_v49 = vpop.f32.mrf.mxu3 }
 0x1bb   :  { %v8176_v50 = vadd.f32 %v851_v49, %v642_v61  ;;  %v964_v59 = vpop.f32.mrf.mxu2  ;;  %v1231_v49 = vld [vmem:[#allocation2 + $0x107] sm:$0xff] }
 0x1bc   :  { %v8184_v52 = vadd.f32 %v964_v59, %v675_v15  ;;  %v1232_v15 = vld [vmem:[#allocation2 + $0x10f] sm:$0xff] }
 0x1bd   :  { %12012 = vst [vmem:[#allocation64_spill] sm:$0xff] %v8176_v50  ;;  %v1941_v50 = vld [vmem:[#allocation2 + $0x129] sm:$0xff]  ;;  %v8188_v17 = vpop.f32.mrf.mxu0 }
 0x1be   :  { %v8180_v27 = vpop.f32.mrf.mxu1  ;;  %1014 = vmatmul.f32.gmra.mxu2 %v1941_v50 }
 0x1bf   :  { %12013 = vst [vmem:[#allocation65_spill] sm:$0xff] %v8180_v27  ;;  %1353 = vmatmul.f32.gmra.mxu3 %v1230_v39 }
 0x1c0   :  { %1719 = vmatmul.f32.gmra.mxu0 %v1588_v23  ;;  %v1233_v23 = vld [vmem:[#allocation2 + $0x127] sm:$0xff] }
 0x1c1   :  { %2061 = vmatmul.f32.gmra.mxu1 %v1938_v58 }
 0x1c2   :  { %v854_v61 = vpop.f32.mrf.mxu3 }
 0x1c3   :  { %v8186_v63 = vadd.f32 %v854_v61, %v645_v19  ;;  %v967_v58 = vpop.f32.mrf.mxu2 }
 0x1c4   :  { %v8194_v40 = vadd.f32 %v967_v58, %v678_v60  ;;  %v1943_v58 = vld [vmem:[#allocation2 + $0x149] sm:$0xff] }
 0x1c5   :  { %12014 = vst [vmem:[#allocation66_spill] sm:$0xff] %v8186_v63  ;;  %v8198_v59 = vpop.f32.mrf.mxu0 }
 0x1c6   :  { %v8190_v27 = vpop.f32.mrf.mxu1  ;;  %1017 = vmatmul.f32.gmra.mxu2 %v1942_v35 }
 0x1c7   :  { %1356 = vmatmul.f32.gmra.mxu3 %v1231_v49 }
 0x1c8   :  { %1722 = vmatmul.f32.gmra.mxu0 %v1589_v32  ;;  %v2709_v32 = vld [vmem:[#allocation6 + $0x3d0] sm:$0xff] }
 0x1c9   :  { %2064 = vmatmul.f32.gmra.mxu1 %v1939_v42  ;;  %2720 = vmatpush.msra.mxu3 %v2709_v32  ;;  %v1945_v32 = vld [vmem:[#allocation2 + $0x169] sm:$0xff] }
 0x1ca   :  { %v857_v39 = vpop.f32.mrf.mxu3 }
 0x1cb   :  { %v8196_v19 = vadd.f32 %v857_v39, %v648_v8  ;;  %v970_v49 = vpop.f32.mrf.mxu2  ;;  %v672_v39 = vadd.f32 %v7948_v11, %v7934_v51 }
 0x1cc   :  { %v8204_v42 = vadd.f32 %v970_v49, %v681_v4  ;;  %v1590_v4 = vld [vmem:[#allocation2 + $0x150] sm:$0xff] }
 0x1cd   :  { %12015 = vst [vmem:[#allocation67_spill] sm:$0xff] %v8196_v19  ;;  %v8211_v19 = vpop.f32.mrf.mxu0 }
 0x1ce   :  { %v8200_v61 = vpop.f32.mrf.mxu1  ;;  %1020 = vmatmul.f32.gmra.mxu2 %v1943_v58 }
 0x1cf   :  { %1359 = vmatmul.f32.gmra.mxu3 %v1232_v15  ;;  %v1153_v15 = vadd.f32 %v961_v56, %v672_v39 }
 0x1d0   :  { %1725 = vmatmul.f32.gmra.mxu0 %v1590_v4  ;;  %v1235_v4 = vld [vmem:[#allocation2 + $0x147] sm:$0xff] }
 0x1d1   :  { %2067 = vmatmul.f32.gmra.mxu1 %v1940_v20  ;;  %v684_v20 = vadd.f32 %v7984_v55, %v7956_v21  ;;  %v687_v55 = vadd.f32 %v7993_v5, %v7964_v30  ;;  %v690_v5 = vadd.f32 %v8002_v18, %v7973_v41  ;;  %v693_v18 = vadd.f32 %v8011_v34, %v7982_v53  ;;  %v2354_v53 = vld [vmem:[#allocation6 + $0x348] sm:$0xff] }
 0x1d2   :  { %v860_v60 = vpop.f32.mrf.mxu3  ;;  %2367 = vmatpush.msra.mxu2 %v2354_v53 }
 0x1d3   :  { %v8207_v8 = vadd.f32 %v860_v60, %v8168_v1  ;;  %v973_v1 = vpop.f32.mrf.mxu2  ;;  %v1234_v60 = vld [vmem:[#allocation2 + $0x12f] sm:$0xff] }
 0x1d4   :  { %v8215_v49 = vadd.f32 %v973_v1, %v684_v20 }
 0x1d5   :  { %12016 = vst [vmem:[#allocation68_spill] sm:$0xff] %v8207_v8  ;;  %v1944_v8 = vld [vmem:[#allocation2 + $0x151] sm:$0xff]  ;;  %v8218_v12 = vpop.f32.mrf.mxu0 }
 0x1d6   :  { %v2023_v43 = vpop.f32.mrf.mxu1  ;;  %1023 = vmatmul.f32.gmra.mxu2 %v1944_v8 }
 0x1d7   :  { %1362 = vmatmul.f32.gmra.mxu3 %v1233_v23  ;;  %v1591_v23 = vld [vmem:[#allocation2 + $0x168] sm:$0xff] }
 0x1d8   :  { %1728 = vmatmul.f32.gmra.mxu0 %v1591_v23 }
 0x1d9   :  { %2070 = vmatmul.f32.gmra.mxu1 %v1941_v50  ;;  %v3063_v50 = vld [vmem:[#allocation6 + $0x450] sm:$0xff] }
 0x1da   :  { %v1315_v51 = vpop.f32.mrf.mxu3  ;;  %3074 = vmatpush.msra.mxu0 %v3063_v50 }
 0x1db   :  { %v1507_v11 = vadd.f32 %v1315_v51, %v1153_v15  ;;  %v976_v39 = vpop.f32.mrf.mxu2 }
 0x1dc   :  { %v8224_v20 = vadd.f32 %v976_v39, %v687_v55  ;;  %v1946_v55 = vld [vmem:[#allocation2 + $0x171] sm:$0xff] }
 0x1dd   :  { %v1861_v63 = vadd.f32 %v8178_v14, %v1507_v11  ;;  %v8228_v51 = vpop.f32.mrf.mxu0 }
 0x1de   :  { %v2026_v21 = vpop.f32.mrf.mxu1  ;;  %1026 = vmatmul.f32.gmra.mxu2 %v1945_v32 }
 0x1df   :  { %v8222_v56 = vadd.f32 %v2023_v43, %v1861_v63  ;;  %1365 = vmatmul.f32.gmra.mxu3 %v1234_v60 }
 0x1e1   :  { %2073 = vmatmul.f32.gmra.mxu1 %v1942_v35  ;;  %v1592_v35 = vld [vmem:[#allocation2 + $0x170] sm:$0xff] }
 0x1e2   :  { %v1318_v15 = vpop.f32.mrf.mxu3  ;;  %1731 = vmatmul.f32.gmra.mxu0 %v1592_v35 }
 0x1e3   :  { %v1508_v14 = vadd.f32 %v1318_v15, %v8184_v52  ;;  %v979_v43 = vpop.f32.mrf.mxu2 }
 0x1e4   :  { %v8234_v11 = vadd.f32 %v979_v43, %v690_v5  ;;  %v2708_v43 = vld [vmem:[#allocation6 + $0x3c8] sm:$0xff] }
 0x1e5   :  { %v1862_v1 = vadd.f32 %v8188_v17, %v1508_v14  ;;  %v1236_v17 = vld [vmem:[#allocation2 + $0x14f] sm:$0xff]  ;;  %v8238_v50 = vpop.f32.mrf.mxu0  ;;  %2721 = vmatpush.msra.mxu3 %v2708_v43 }
 0x1e6   :  { %v2029_v30 = vpop.f32.mrf.mxu1  ;;  %1029 = vmatmul.f32.gmra.mxu2 %v1946_v55 }
 0x1e7   :  { %v8232_v63 = vadd.f32 %v2026_v21, %v1862_v1  ;;  %1368 = vmatmul.f32.gmra.mxu3 %v1235_v4  ;;  %v1947_v4 = vld [vmem:[#allocation2 + $0x189] sm:$0xff] }
 0x1e9   :  { %2076 = vmatmul.f32.gmra.mxu1 %v1943_v58  ;;  %v1593_v58 = vld [vmem:[#allocation2 + $0x188] sm:$0xff] }
 0x1ea   :  { %v1321_v52 = vpop.f32.mrf.mxu3  ;;  %1734 = vmatmul.f32.gmra.mxu0 %v1593_v58 }
 0x1eb   :  { %v1509_v60 = vadd.f32 %v1321_v52, %v8194_v40  ;;  %v982_v39 = vpop.f32.mrf.mxu2 }
 0x1ec   :  { %v8244_v15 = vadd.f32 %v982_v39, %v693_v18  ;;  %v3062_v39 = vld [vmem:[#allocation6 + $0x448] sm:$0xff] }
 0x1ed   :  { %v1863_v23 = vadd.f32 %v8198_v59, %v1509_v60  ;;  %v1237_v59 = vld [vmem:[#allocation2 + $0x167] sm:$0xff]  ;;  %v8248_v5 = vpop.f32.mrf.mxu0  ;;  %3075 = vmatpush.msra.mxu0 %v3062_v39 }
 0x1ee   :  { %v2032_v41 = vpop.f32.mrf.mxu1  ;;  %1032 = vmatmul.f32.gmra.mxu2 %v1947_v4  ;;  %v1951_v39 = vld [vmem:[#allocation2 + $0x1c9] sm:$0xff] }
 0x1ef   :  { %v8242_v21 = vadd.f32 %v2029_v30, %v1863_v23  ;;  %1371 = vmatmul.f32.gmra.mxu3 %v1236_v17  ;;  %v696_v30 = vadd.f32 %v8020_v48, %v7991_v2  ;;  %v1238_v17 = vld [vmem:[#allocation2 + $0x16f] sm:$0xff]  ;;  %v699_v48 = vadd.f32 %v8029_v6, %v8000_v16  ;;  %v702_v6 = vadd.f32 %v8038_v28, %v8009_v31 }
 0x1f0   :  { %v1948_v23 = vld [vmem:[#allocation2 + $0x191] sm:$0xff]  ;;  %v705_v28 = vadd.f32 %v8047_v3, %v8018_v45  ;;  %v2353_v45 = vld [vmem:[#allocation6 + $0x340] sm:$0xff] }
 0x1f1   :  { %2079 = vmatmul.f32.gmra.mxu1 %v1944_v8  ;;  %v1594_v8 = vld [vmem:[#allocation2 + $0x190] sm:$0xff]  ;;  %2368 = vmatpush.msra.mxu2 %v2353_v45  ;;  %v187_v45 = vld [vmem:[#allocation3 + $0xf8] sm:$0xff] }
 0x1f2   :  { %v1324_v40 = vpop.f32.mrf.mxu3  ;;  %1737 = vmatmul.f32.gmra.mxu0 %v1594_v8  ;;  %251 = vst [vmem:[#allocation2 + $0x210] sm:$0xff] %v187_v45 }
 0x1f3   :  { %v1510_v14 = vadd.f32 %v1324_v40, %v8204_v42  ;;  %v985_v42 = vpop.f32.mrf.mxu2 }
 0x1f4   :  { %v8254_v52 = vadd.f32 %v985_v42, %v696_v30 }
 0x1f5   :  { %v1864_v1 = vadd.f32 %v8211_v19, %v1510_v14  ;;  %v8258_v58 = vpop.f32.mrf.mxu0 }
 0x1f6   :  { %v2035_v34 = vpop.f32.mrf.mxu1  ;;  %1035 = vmatmul.f32.gmra.mxu2 %v1948_v23 }
 0x1f7   :  { %v8252_v35 = vadd.f32 %v2032_v41, %v1864_v1  ;;  %1374 = vmatmul.f32.gmra.mxu3 %v1237_v59  ;;  %v1239_v59 = vld [vmem:[#allocation2 + $0x187] sm:$0xff] }
 0x1f8   :  { %v1949_v1 = vld [vmem:[#allocation2 + $0x1a9] sm:$0xff] }
 0x1f9   :  { %2082 = vmatmul.f32.gmra.mxu1 %v1945_v32  ;;  %v1595_v32 = vld [vmem:[#allocation2 + $0x1a8] sm:$0xff] }
 0x1fa   :  { %v1327_v19 = vpop.f32.mrf.mxu3  ;;  %1740 = vmatmul.f32.gmra.mxu0 %v1595_v32 }
 0x1fb   :  { %v1511_v60 = vadd.f32 %v1327_v19, %v8215_v49  ;;  %v988_v40 = vpop.f32.mrf.mxu2  ;;  %v1950_v19 = vld [vmem:[#allocation2 + $0x1b1] sm:$0xff] }
 0x1fc   :  { %v8264_v49 = vadd.f32 %v988_v40, %v699_v48 }
 0x1fd   :  { %v1865_v18 = vadd.f32 %v8218_v12, %v1511_v60  ;;  %v8268_v30 = vpop.f32.mrf.mxu0 }
 0x1fe   :  { %v2038_v2 = vpop.f32.mrf.mxu1  ;;  %1038 = vmatmul.f32.gmra.mxu2 %v1949_v1 }
 0x1ff   :  { %v8262_v41 = vadd.f32 %v2035_v34, %v1865_v18  ;;  %1377 = vmatmul.f32.gmra.mxu3 %v1238_v17 }
 0x201   :  { %2085 = vmatmul.f32.gmra.mxu1 %v1946_v55  ;;  %v1596_v55 = vld [vmem:[#allocation2 + $0x1b0] sm:$0xff] }
 0x202   :  { %v1330_v14 = vpop.f32.mrf.mxu3  ;;  %1743 = vmatmul.f32.gmra.mxu0 %v1596_v55  ;;  %v1242_v55 = vld [vmem:[#allocation2 + $0x1af] sm:$0xff] }
 0x203   :  { %v1512_v12 = vadd.f32 %v1330_v14, %v8224_v20  ;;  %v991_v8 = vpop.f32.mrf.mxu2 }
 0x204   :  { %v8274_v43 = vadd.f32 %v991_v8, %v702_v6  ;;  %v1952_v8 = vld [vmem:[#allocation2 + $0x1d1] sm:$0xff] }
 0x205   :  { %v1866_v53 = vadd.f32 %v8228_v51, %v1512_v12  ;;  %v1240_v51 = vld [vmem:[#allocation2 + $0x18f] sm:$0xff]  ;;  %v8278_v17 = vpop.f32.mrf.mxu0  ;;  %v708_v12 = vadd.f32 %v8060_v46, %v8027_v0  ;;  %v711_v46 = vadd.f32 %v8069_v36, %v8036_v22 }
 0x206   :  { %v2041_v16 = vpop.f32.mrf.mxu1  ;;  %1041 = vmatmul.f32.gmra.mxu2 %v1950_v19 }
 0x207   :  { %v8272_v34 = vadd.f32 %v2038_v2, %v1866_v53  ;;  %1380 = vmatmul.f32.gmra.mxu3 %v1239_v59  ;;  %v2707_v53 = vld [vmem:[#allocation6 + $0x3c0] sm:$0xff] }
 0x208   :  { %2722 = vmatpush.msra.mxu3 %v2707_v53 }
 0x209   :  { %2088 = vmatmul.f32.gmra.mxu1 %v1947_v4  ;;  %v1597_v4 = vld [vmem:[#allocation2 + $0x1c8] sm:$0xff] }
 0x20a   :  { %v1333_v20 = vpop.f32.mrf.mxu3  ;;  %1746 = vmatmul.f32.gmra.mxu0 %v1597_v4 }
 0x20b   :  { %v1513_v42 = vadd.f32 %v1333_v20, %v8234_v11  ;;  %v994_v2 = vpop.f32.mrf.mxu2 }
 0x20c   :  { %v8284_v48 = vadd.f32 %v994_v2, %v705_v28  ;;  %v186_v28 = vld [vmem:[#allocation3 + $0xf0] sm:$0xff]  ;;  %v1243_v2 = vld [vmem:[#allocation2 + $0x1c7] sm:$0xff] }
 0x20d   :  { %v1867_v60 = vadd.f32 %v8238_v50, %v1513_v42  ;;  %v1241_v50 = vld [vmem:[#allocation2 + $0x1a7] sm:$0xff]  ;;  %v8288_v14 = vpop.f32.mrf.mxu0  ;;  %250 = vst [vmem:[#allocation2 + $0x208] sm:$0xff] %v186_v28 }
 0x20e   :  { %v2044_v31 = vpop.f32.mrf.mxu1  ;;  %1044 = vmatmul.f32.gmra.mxu2 %v1951_v39 }
 0x20f   :  { %v8282_v18 = vadd.f32 %v2041_v16, %v1867_v60  ;;  %1383 = vmatmul.f32.gmra.mxu3 %v1240_v51  ;;  %v3061_v60 = vld [vmem:[#allocation6 + $0x440] sm:$0xff] }
 0x210   :  { %3076 = vmatpush.msra.mxu0 %v3061_v60 }
 0x211   :  { %2091 = vmatmul.f32.gmra.mxu1 %v1948_v23  ;;  %v1598_v23 = vld [vmem:[#allocation2 + $0x1d0] sm:$0xff] }
 0x212   :  { %v1336_v11 = vpop.f32.mrf.mxu3  ;;  %1749 = vmatmul.f32.gmra.mxu0 %v1598_v23 }
 0x213   :  { %v1514_v32 = vadd.f32 %v1336_v11, %v8244_v15  ;;  %v997_v15 = vpop.f32.mrf.mxu2  ;;  %v1953_v11 = vld [vmem:[#allocation2 + $0x1e9] sm:$0xff] }
 0x214   :  { %v8294_v16 = vadd.f32 %v997_v15, %v708_v12  ;;  %v1954_v12 = vld [vmem:[#allocation2 + $0x1f1] sm:$0xff] }
 0x215   :  { %v1868_v40 = vadd.f32 %v8248_v5, %v1514_v32  ;;  %v8298_v42 = vpop.f32.mrf.mxu0 }
 0x216   :  { %v2047_v3 = vpop.f32.mrf.mxu1  ;;  %1047 = vmatmul.f32.gmra.mxu2 %v1952_v8 }
 0x217   :  { %v8292_v59 = vadd.f32 %v2044_v31, %v1868_v40  ;;  %1386 = vmatmul.f32.gmra.mxu3 %v1241_v50  ;;  %v714_v50 = vadd.f32 %v8079_v62, %v8045_v57  ;;  %v717_v62 = vadd.f32 %v8089_v7, %v8058_v33  ;;  %v720_v33 = vadd.f32 %v8099_v44, %v8067_v10  ;;  %v896_v44 = vld [vmem:[#allocation2 + $0x251] sm:$0xff] }
 0x219   :  { %2094 = vmatmul.f32.gmra.mxu1 %v1949_v1  ;;  %v1599_v1 = vld [vmem:[#allocation2 + $0x1e8] sm:$0xff] }
 0x21a   :  { %v1339_v5 = vpop.f32.mrf.mxu3  ;;  %1752 = vmatmul.f32.gmra.mxu0 %v1599_v1 }
 0x21b   :  { %v1515_v6 = vadd.f32 %v1339_v5, %v8254_v52  ;;  %v1000_v31 = vpop.f32.mrf.mxu2 }
 0x21c   :  { %v8304_v52 = vadd.f32 %v1000_v31, %v711_v46 }
 0x21d   :  { %v1869_v20 = vadd.f32 %v8258_v58, %v1515_v6  ;;  %v8308_v36 = vpop.f32.mrf.mxu0 }
 0x21e   :  { %v2050_v0 = vpop.f32.mrf.mxu1  ;;  %1050 = vmatmul.f32.gmra.mxu2 %v1953_v11 }
 0x21f   :  { %v8302_v51 = vadd.f32 %v2047_v3, %v1869_v20  ;;  %1389 = vmatmul.f32.gmra.mxu3 %v1242_v55  ;;  %v895_v55 = vld [vmem:[#allocation2 + $0x249] sm:$0xff]  ;;  %v2352_v20 = vld [vmem:[#allocation6 + $0x338] sm:$0xff] }
 0x220   :  { %2369 = vmatpush.msra.mxu2 %v2352_v20  ;;  %v1249_v20 = vld [vmem:[#allocation2 + $0x267] sm:$0xff] }
 0x221   :  { %2097 = vmatmul.f32.gmra.mxu1 %v1950_v19 }
 0x222   :  { %v1342_v58 = vpop.f32.mrf.mxu3  ;;  %1755 = vmatmul.f32.gmra.mxu0 %v8051_v25 }
 0x223   :  { %v1516_v4 = vadd.f32 %v1342_v58, %v8264_v49  ;;  %v1003_v19 = vpop.f32.mrf.mxu2  ;;  %v3060_v58 = vld [vmem:[#allocation6 + $0x438] sm:$0xff] }
 0x224   :  { %v8315_v49 = vadd.f32 %v1003_v19, %v714_v50  ;;  %3077 = vmatpush.msra.mxu0 %v3060_v58  ;;  %v1955_v50 = vld [vmem:[#allocation2 + $0x209] sm:$0xff] }
 0x225   :  { %v1870_v22 = vadd.f32 %v8268_v30, %v1516_v4  ;;  %v8319_v53 = vpop.f32.mrf.mxu0  ;;  %v1250_v58 = vld [vmem:[#allocation2 + $0x26f] sm:$0xff] }
 0x226   :  { %v2053_v32 = vpop.f32.mrf.mxu1  ;;  %1053 = vmatmul.f32.gmra.mxu2 %v1954_v12 }
 0x227   :  { %v8312_v40 = vadd.f32 %v2050_v0, %v1870_v22  ;;  %1392 = vmatmul.f32.gmra.mxu3 %v1243_v2 }
 0x229   :  { %2100 = vmatmul.f32.gmra.mxu1 %v1951_v39 }
 0x22a   :  { %v1345_v3 = vpop.f32.mrf.mxu3  ;;  %1758 = vmatmul.f32.gmra.mxu0 %v186_v28  ;;  %v1603_v28 = vld [vmem:[#allocation2 + $0x268] sm:$0xff] }
 0x22b   :  { %v1517_v30 = vadd.f32 %v1345_v3, %v8274_v43  ;;  %v1006_v39 = vpop.f32.mrf.mxu2 }
 0x22c   :  { %v8326_v15 = vadd.f32 %v1006_v39, %v717_v62 }
 0x22d   :  { %v1871_v23 = vadd.f32 %v8278_v17, %v1517_v30  ;;  %v8330_v6 = vpop.f32.mrf.mxu0 }
 0x22e   :  { %v2056_v57 = vpop.f32.mrf.mxu1  ;;  %1056 = vmatmul.f32.gmra.mxu2 %v895_v55 }
 0x22f   :  { %v8323_v25 = vadd.f32 %v2053_v32, %v1871_v23  ;;  %1395 = vmatmul.f32.gmra.mxu3 %v8071_v38  ;;  %v2706_v38 = vld [vmem:[#allocation6 + $0x3b8] sm:$0xff]  ;;  %v1957_v32 = vld [vmem:[#allocation2 + $0x269] sm:$0xff] }
 0x230   :  { %2723 = vmatpush.msra.mxu3 %v2706_v38 }
 0x231   :  { %2103 = vmatmul.f32.gmra.mxu1 %v1952_v8 }
 0x232   :  { %v1348_v43 = vpop.f32.mrf.mxu3  ;;  %1761 = vmatmul.f32.gmra.mxu0 %v187_v45  ;;  %v1604_v45 = vld [vmem:[#allocation2 + $0x270] sm:$0xff] }
 0x233   :  { %v1518_v5 = vadd.f32 %v1348_v43, %v8284_v48  ;;  %v1009_v48 = vpop.f32.mrf.mxu2 }
 0x235   :  { %v1872_v17 = vadd.f32 %v8288_v14, %v1518_v5  ;;  %v8337_v14 = vadd.f32 %v1009_v48, %v720_v33  ;;  %v8341_v60 = vpop.f32.mrf.mxu0  ;;  %v1605_v5 = vld [vmem:[#allocation2 + $0x288] sm:$0xff]  ;;  %v2351_v48 = vld [vmem:[#allocation6 + $0x330] sm:$0xff] }
 0x236   :  { %v2059_v0 = vpop.f32.mrf.mxu1  ;;  %1059 = vmatmul.f32.gmra.mxu2 %v896_v44  ;;  %v1959_v33 = vld [vmem:[#allocation2 + $0x289] sm:$0xff] }
 0x237   :  { %v8334_v7 = vadd.f32 %v2056_v57, %v1872_v17  ;;  %1398 = vmatmul.f32.gmra.mxu3 %v8081_v26  ;;  %v723_v26 = vadd.f32 %v8106_v37, %v8077_v47  ;;  %v1958_v57 = vld [vmem:[#allocation2 + $0x271] sm:$0xff]  ;;  %2370 = vmatpush.msra.mxu2 %v2351_v48 }
 0x238   :  { %v1606_v44 = vld [vmem:[#allocation2 + $0x290] sm:$0xff] }
 0x239   :  { %2106 = vmatmul.f32.gmra.mxu1 %v1953_v11  ;;  %v1247_v11 = vld [vmem:[#allocation2 + $0x207] sm:$0xff] }
 0x23a   :  { %v1351_v8 = vpop.f32.mrf.mxu3  ;;  %1764 = vmatmul.f32.gmra.mxu0 %v1603_v28 }
 0x23b   :  { %v1519_v46 = vadd.f32 %v1351_v8, %v8294_v16  ;;  %v1012_v4 = vpop.f32.mrf.mxu2  ;;  %v12018_v8 = vld [vmem:[#allocation39_spill] sm:$0xff] }
 0x23c   :  { %v8348_v16 = vadd.f32 %v1012_v4, %v723_v26 }
 0x23d   :  { %v1873_v1 = vadd.f32 %v8298_v42, %v1519_v46  ;;  %v8352_v47 = vpop.f32.mrf.mxu0 }
 0x23e   :  { %v2062_v10 = vpop.f32.mrf.mxu1  ;;  %1062 = vmatmul.f32.gmra.mxu2 %v1957_v32 }
 0x23f   :  { %v8345_v31 = vadd.f32 %v2059_v0, %v1873_v1  ;;  %1401 = vmatmul.f32.gmra.mxu3 %v8091_v24  ;;  %v726_v24 = vadd.f32 %v8112_v54, %v8087_v13  ;;  %v1956_v13 = vld [vmem:[#allocation2 + $0x211] sm:$0xff]  ;;  %v729_v54 = vadd.f32 %v8118_v29, %v8097_v9 }
 0x240   :  { %v12017_v29 = vld [vmem:[#allocation32_spill] sm:$0xff] }
 0x241   :  { %2109 = vmatmul.f32.gmra.mxu1 %v1954_v12  ;;  %v1248_v12 = vld [vmem:[#allocation2 + $0x20f] sm:$0xff]  ;;  %v732_v46 = vadd.f32 %v12018_v8, %v12017_v29 }
 0x242   :  { %v1354_v42 = vpop.f32.mrf.mxu3  ;;  %1767 = vmatmul.f32.gmra.mxu0 %v1604_v45  ;;  %v3059_v45 = vld [vmem:[#allocation6 + $0x430] sm:$0xff] }
 0x243   :  { %v1520_v2 = vadd.f32 %v1354_v42, %v8304_v52  ;;  %v1015_v3 = vpop.f32.mrf.mxu2  ;;  %v1960_v42 = vld [vmem:[#allocation2 + $0x291] sm:$0xff]  ;;  %3078 = vmatpush.msra.mxu0 %v3059_v45 }
 0x244   :  { %v8358_v52 = vadd.f32 %v1015_v3, %v726_v24  ;;  %v12026_v45 = vld [vmem:[#allocation51_spill] sm:$0xff] }
 0x245   :  { %v1874_v22 = vadd.f32 %v8308_v36, %v1520_v2  ;;  %v8362_v62 = vpop.f32.mrf.mxu0 }
 0x246   :  { %v2065_v37 = vpop.f32.mrf.mxu1  ;;  %1065 = vmatmul.f32.gmra.mxu2 %v1958_v57 }
 0x247   :  { %v8356_v19 = vadd.f32 %v2062_v10, %v1874_v22  ;;  %1404 = vmatmul.f32.gmra.mxu3 %v1247_v11  ;;  %v2705_v10 = vld [vmem:[#allocation6 + $0x3b0] sm:$0xff]  ;;  %v12019_v22 = vld [vmem:[#allocation34_spill] sm:$0xff] }
 0x248   :  { %2724 = vmatpush.msra.mxu3 %v2705_v10 }
 0x249   :  { %2112 = vmatmul.f32.gmra.mxu1 %v1955_v50 }
 0x24a   :  { %v1357_v30 = vpop.f32.mrf.mxu3  ;;  %1770 = vmatmul.f32.gmra.mxu0 %v1605_v5  ;;  %v12022_v5 = vld [vmem:[#allocation45_spill] sm:$0xff] }
 0x24b   :  { %v1521_v36 = vadd.f32 %v1357_v30, %v8315_v49  ;;  %v1018_v17 = vpop.f32.mrf.mxu2 }
 0x24c   :  { %v8368_v49 = vadd.f32 %v1018_v17, %v729_v54  ;;  %v12021_v54 = vld [vmem:[#allocation36_spill] sm:$0xff] }
 0x24d   :  { %v1875_v23 = vadd.f32 %v8319_v53, %v1521_v36  ;;  %v8372_v38 = vpop.f32.mrf.mxu0  ;;  %v1251_v36 = vld [vmem:[#allocation2 + $0x287] sm:$0xff]  ;;  %v738_v17 = vadd.f32 %v12022_v5, %v12021_v54  ;;  %v1964_v5 = vld [vmem:[#allocation2 + $0x2d1] sm:$0xff] }
 0x24e   :  { %v2068_v39 = vpop.f32.mrf.mxu1  ;;  %1068 = vmatmul.f32.gmra.mxu2 %v1959_v33 }
 0x24f   :  { %v8366_v43 = vadd.f32 %v2065_v37, %v1875_v23  ;;  %1407 = vmatmul.f32.gmra.mxu3 %v1248_v12  ;;  %v12020_v37 = vld [vmem:[#allocation42_spill] sm:$0xff] }
 0x250   :  { %v735_v50 = vadd.f32 %v12020_v37, %v12019_v22  ;;  %v1961_v23 = vld [vmem:[#allocation2 + $0x2a9] sm:$0xff] }
 0x251   :  { %2115 = vmatmul.f32.gmra.mxu1 %v1956_v13  ;;  %v2350_v37 = vld [vmem:[#allocation6 + $0x328] sm:$0xff] }
 0x252   :  { %v1360_v55 = vpop.f32.mrf.mxu3  ;;  %1773 = vmatmul.f32.gmra.mxu0 %v1606_v44  ;;  %v12024_v44 = vld [vmem:[#allocation48_spill] sm:$0xff]  ;;  %2371 = vmatpush.msra.mxu2 %v2350_v37 }
 0x253   :  { %v1522_v53 = vadd.f32 %v1360_v55, %v8326_v15  ;;  %v1021_v15 = vpop.f32.mrf.mxu2 }
 0x255   :  { %v1876_v0 = vadd.f32 %v8330_v6, %v1522_v53  ;;  %v8378_v6 = vadd.f32 %v1021_v15, %v732_v46  ;;  %v8382_v2 = vpop.f32.mrf.mxu0  ;;  %v12023_v46 = vld [vmem:[#allocation38_spill] sm:$0xff] }
 0x256   :  { %v2071_v9 = vpop.f32.mrf.mxu1  ;;  %1071 = vmatmul.f32.gmra.mxu2 %v1960_v42  ;;  %v741_v10 = vadd.f32 %v12024_v44, %v12023_v46  ;;  %v1255_v44 = vld [vmem:[#allocation2 + $0x2c7] sm:$0xff] }
 0x257   :  { %v8376_v1 = vadd.f32 %v2068_v39, %v1876_v0  ;;  %1410 = vmatmul.f32.gmra.mxu3 %v1249_v20  ;;  %v1252_v0 = vld [vmem:[#allocation2 + $0x28f] sm:$0xff] }
 0x259   :  { %2118 = vmatmul.f32.gmra.mxu1 %v1957_v32  ;;  %v1607_v32 = vld [vmem:[#allocation2 + $0x2a8] sm:$0xff] }
 0x25a   :  { %v1363_v26 = vpop.f32.mrf.mxu3  ;;  %1776 = vmatmul.f32.gmra.mxu0 %v1607_v32  ;;  %v12025_v32 = vld [vmem:[#allocation41_spill] sm:$0xff] }
 0x25b   :  { %v1523_v28 = vadd.f32 %v1363_v26, %v8337_v14  ;;  %v1024_v3 = vpop.f32.mrf.mxu2 }
 0x25c   :  { %v8388_v14 = vadd.f32 %v1024_v3, %v735_v50  ;;  %v744_v3 = vadd.f32 %v12026_v45, %v12025_v32  ;;  %v1256_v45 = vld [vmem:[#allocation2 + $0x2cf] sm:$0xff] }
 0x25d   :  { %v1877_v4 = vadd.f32 %v8341_v60, %v1523_v28 }
 0x25e   :  { %v2074_v11 = vpop.f32.mrf.mxu1  ;;  %1074 = vmatmul.f32.gmra.mxu2 %v1961_v23 }
 0x25f   :  { %v8386_v24 = vadd.f32 %v2071_v9, %v1877_v4  ;;  %1413 = vmatmul.f32.gmra.mxu3 %v1250_v58  ;;  %v8392_v39 = vpop.f32.mrf.mxu0  ;;  %v1962_v9 = vld [vmem:[#allocation2 + $0x2b1] sm:$0xff]  ;;  %v1253_v58 = vld [vmem:[#allocation2 + $0x2a7] sm:$0xff] }
 0x261   :  { %2121 = vmatmul.f32.gmra.mxu1 %v1958_v57  ;;  %v1608_v57 = vld [vmem:[#allocation2 + $0x2b0] sm:$0xff] }
 0x262   :  { %v1366_v60 = vpop.f32.mrf.mxu3  ;;  %1779 = vmatmul.f32.gmra.mxu0 %v1608_v57 }
 0x263   :  { %v1524_v30 = vadd.f32 %v1366_v60, %v8348_v16  ;;  %v1027_v53 = vpop.f32.mrf.mxu2 }
 0x264   :  { %v8398_v20 = vadd.f32 %v1027_v53, %v738_v17  ;;  %v12027_v53 = vld [vmem:[#allocation44_spill] sm:$0xff] }
 0x265   :  { %v1878_v12 = vadd.f32 %v8352_v47, %v1524_v30  ;;  %v2704_v30 = vld [vmem:[#allocation6 + $0x3a8] sm:$0xff] }
 0x266   :  { %v2077_v13 = vpop.f32.mrf.mxu1  ;;  %1077 = vmatmul.f32.gmra.mxu2 %v1962_v9  ;;  %2725 = vmatpush.msra.mxu3 %v2704_v30 }
 0x267   :  { %v8396_v55 = vadd.f32 %v2074_v11, %v1878_v12  ;;  %1416 = vmatmul.f32.gmra.mxu3 %v1251_v36  ;;  %v8402_v29 = vpop.f32.mrf.mxu0  ;;  %v1963_v11 = vld [vmem:[#allocation2 + $0x2c9] sm:$0xff] }
 0x269   :  { %2124 = vmatmul.f32.gmra.mxu1 %v1959_v33  ;;  %v1609_v33 = vld [vmem:[#allocation2 + $0x2c8] sm:$0xff] }
 0x26a   :  { %v1369_v16 = vpop.f32.mrf.mxu3  ;;  %1782 = vmatmul.f32.gmra.mxu0 %v1609_v33  ;;  %v1965_v33 = vld [vmem:[#allocation2 + $0x2e9] sm:$0xff] }
 0x26b   :  { %v1525_v47 = vadd.f32 %v1369_v16, %v8358_v52  ;;  %v1030_v26 = vpop.f32.mrf.mxu2  ;;  %v12028_v16 = vld [vmem:[#allocation54_spill] sm:$0xff] }
 0x26c   :  { %v8408_v28 = vadd.f32 %v1030_v26, %v741_v10 }
 0x26d   :  { %v1879_v48 = vadd.f32 %v8362_v62, %v1525_v47  ;;  %v747_v47 = vadd.f32 %v12028_v16, %v12027_v53  ;;  %v1257_v16 = vld [vmem:[#allocation2 + $0x2e7] sm:$0xff] }
 0x26e   :  { %v2080_v8 = vpop.f32.mrf.mxu1  ;;  %1080 = vmatmul.f32.gmra.mxu2 %v1963_v11 }
 0x26f   :  { %v8406_v15 = vadd.f32 %v2077_v13, %v1879_v48  ;;  %1419 = vmatmul.f32.gmra.mxu3 %v1252_v0  ;;  %v8412_v22 = vpop.f32.mrf.mxu0  ;;  %v1254_v13 = vld [vmem:[#allocation2 + $0x2af] sm:$0xff] }
 0x270   :  { %v3058_v48 = vld [vmem:[#allocation6 + $0x428] sm:$0xff] }
 0x271   :  { %2127 = vmatmul.f32.gmra.mxu1 %v1960_v42  ;;  %v1610_v42 = vld [vmem:[#allocation2 + $0x2d0] sm:$0xff]  ;;  %3079 = vmatpush.msra.mxu0 %v3058_v48 }
 0x272   :  { %v1372_v52 = vpop.f32.mrf.mxu3  ;;  %1785 = vmatmul.f32.gmra.mxu0 %v1610_v42  ;;  %v1966_v42 = vld [vmem:[#allocation2 + $0x2f1] sm:$0xff] }
 0x273   :  { %v1526_v62 = vadd.f32 %v1372_v52, %v8368_v49  ;;  %v1033_v49 = vpop.f32.mrf.mxu2 }
 0x275   :  { %v1880_v4 = vadd.f32 %v8372_v38, %v1526_v62  ;;  %v8418_v38 = vadd.f32 %v1033_v49, %v744_v3  ;;  %v12029_v62 = vld [vmem:[#allocation47_spill] sm:$0xff] }
 0x276   :  { %v2083_v50 = vpop.f32.mrf.mxu1  ;;  %1083 = vmatmul.f32.gmra.mxu2 %v1964_v5 }
 0x277   :  { %v8416_v60 = vadd.f32 %v2080_v8, %v1880_v4  ;;  %1422 = vmatmul.f32.gmra.mxu3 %v1253_v58  ;;  %v8422_v17 = vpop.f32.mrf.mxu0  ;;  %v12030_v58 = vld [vmem:[#allocation57_spill] sm:$0xff] }
 0x278   :  { %v750_v4 = vadd.f32 %v12030_v58, %v12029_v62  ;;  %v2703_v62 = vld [vmem:[#allocation6 + $0x3a0] sm:$0xff] }
 0x279   :  { %2130 = vmatmul.f32.gmra.mxu1 %v1961_v23  ;;  %v1611_v23 = vld [vmem:[#allocation2 + $0x2e8] sm:$0xff]  ;;  %2726 = vmatpush.msra.mxu3 %v2703_v62 }
 0x27a   :  { %v1375_v36 = vpop.f32.mrf.mxu3  ;;  %1788 = vmatmul.f32.gmra.mxu0 %v1611_v23  ;;  %v1967_v23 = vld [vmem:[#allocation2 + $0x309] sm:$0xff] }
 0x27b   :  { %v1527_v12 = vadd.f32 %v1375_v36, %v8378_v6  ;;  %v1036_v8 = vpop.f32.mrf.mxu2  ;;  %v12031_v36 = vld [vmem:[#allocation50_spill] sm:$0xff] }
 0x27c   :  { %v8428_v6 = vadd.f32 %v1036_v8, %v747_v47  ;;  %v2349_v8 = vld [vmem:[#allocation6 + $0x320] sm:$0xff]  ;;  %v1260_v62 = vld [vmem:[#allocation2 + $0x30f] sm:$0xff] }
 0x27d   :  { %v1881_v54 = vadd.f32 %v8382_v2, %v1527_v12  ;;  %v12032_v12 = vld [vmem:[#allocation60_spill] sm:$0xff]  ;;  %2372 = vmatpush.msra.mxu2 %v2349_v8 }
 0x27e   :  { %v2086_v57 = vpop.f32.mrf.mxu1  ;;  %1086 = vmatmul.f32.gmra.mxu2 %v1965_v33 }
 0x27f   :  { %v8426_v0 = vadd.f32 %v2083_v50, %v1881_v54  ;;  %1425 = vmatmul.f32.gmra.mxu3 %v1254_v13  ;;  %v8432_v26 = vpop.f32.mrf.mxu0  ;;  %v753_v13 = vadd.f32 %v12032_v12, %v12031_v36 }
 0x281   :  { %2133 = vmatmul.f32.gmra.mxu1 %v1962_v9  ;;  %v1612_v9 = vld [vmem:[#allocation2 + $0x2f0] sm:$0xff] }
 0x282   :  { %v1378_v2 = vpop.f32.mrf.mxu3  ;;  %1791 = vmatmul.f32.gmra.mxu0 %v1612_v9  ;;  %v1258_v9 = vld [vmem:[#allocation2 + $0x2ef] sm:$0xff] }
 0x283   :  { %v1528_v46 = vadd.f32 %v1378_v2, %v8388_v14  ;;  %v1039_v50 = vpop.f32.mrf.mxu2 }
 0x284   :  { %v8438_v32 = vadd.f32 %v1039_v50, %v750_v4 }
 0x285   :  { %v1882_v10 = vadd.f32 %v8392_v39, %v1528_v46  ;;  %v12033_v46 = vld [vmem:[#allocation53_spill] sm:$0xff] }
 0x286   :  { %v2089_v52 = vpop.f32.mrf.mxu1  ;;  %1089 = vmatmul.f32.gmra.mxu2 %v1966_v42 }
 0x287   :  { %v8436_v37 = vadd.f32 %v2086_v57, %v1882_v10  ;;  %1428 = vmatmul.f32.gmra.mxu3 %v1255_v44  ;;  %v8442_v30 = vpop.f32.mrf.mxu0  ;;  %v12034_v44 = vld [vmem:[#allocation63_spill] sm:$0xff] }
 0x288   :  { %v756_v10 = vadd.f32 %v12034_v44, %v12033_v46 }
 0x289   :  { %2136 = vmatmul.f32.gmra.mxu1 %v1963_v11  ;;  %v1613_v11 = vld [vmem:[#allocation2 + $0x308] sm:$0xff] }
 0x28a   :  { %v1381_v14 = vpop.f32.mrf.mxu3  ;;  %1794 = vmatmul.f32.gmra.mxu0 %v1613_v11 }
 0x28b   :  { %v1529_v39 = vadd.f32 %v1381_v14, %v8398_v20  ;;  %v1042_v57 = vpop.f32.mrf.mxu2  ;;  %v1968_v14 = vld [vmem:[#allocation2 + $0x311] sm:$0xff] }
 0x28c   :  { %v8448_v53 = vadd.f32 %v1042_v57, %v753_v13  ;;  %v3057_v13 = vld [vmem:[#allocation6 + $0x420] sm:$0xff] }
 0x28d   :  { %v1883_v3 = vadd.f32 %v8402_v29, %v1529_v39  ;;  %3080 = vmatpush.msra.mxu0 %v3057_v13  ;;  %v1971_v13 = vld [vmem:[#allocation2 + $0x349] sm:$0xff] }
 0x28e   :  { %v2092_v49 = vpop.f32.mrf.mxu1  ;;  %1092 = vmatmul.f32.gmra.mxu2 %v1967_v23 }
 0x28f   :  { %v8446_v54 = vadd.f32 %v2089_v52, %v1883_v3  ;;  %1431 = vmatmul.f32.gmra.mxu3 %v1256_v45  ;;  %v8452_v48 = vpop.f32.mrf.mxu0  ;;  %v12035_v3 = vld [vmem:[#allocation56_spill] sm:$0xff] }
 0x291   :  { %2139 = vmatmul.f32.gmra.mxu1 %v1964_v5  ;;  %v1614_v5 = vld [vmem:[#allocation2 + $0x310] sm:$0xff] }
 0x292   :  { %v1384_v20 = vpop.f32.mrf.mxu3  ;;  %1797 = vmatmul.f32.gmra.mxu0 %v1614_v5 }
 0x293   :  { %v1530_v29 = vadd.f32 %v1384_v20, %v8408_v28  ;;  %v1045_v28 = vpop.f32.mrf.mxu2  ;;  %v1259_v20 = vld [vmem:[#allocation2 + $0x307] sm:$0xff] }
 0x295   :  { %v1884_v47 = vadd.f32 %v8412_v22, %v1530_v29  ;;  %v8458_v22 = vadd.f32 %v1045_v28, %v756_v10 }
 0x296   :  { %v2095_v2 = vpop.f32.mrf.mxu1  ;;  %1095 = vmatmul.f32.gmra.mxu2 %v1968_v14 }
 0x297   :  { %v8456_v52 = vadd.f32 %v2092_v49, %v1884_v47  ;;  %1434 = vmatmul.f32.gmra.mxu3 %v1257_v16  ;;  %v8462_v39 = vpop.f32.mrf.mxu0  ;;  %v12036_v49 = vld [vmem:[#allocation65_spill] sm:$0xff]  ;;  %v1969_v16 = vld [vmem:[#allocation2 + $0x329] sm:$0xff] }
 0x298   :  { %v759_v36 = vadd.f32 %v12036_v49, %v12035_v3 }
 0x299   :  { %2142 = vmatmul.f32.gmra.mxu1 %v1965_v33  ;;  %v1615_v33 = vld [vmem:[#allocation2 + $0x328] sm:$0xff] }
 0x29a   :  { %v1387_v58 = vpop.f32.mrf.mxu3  ;;  %1800 = vmatmul.f32.gmra.mxu0 %v1615_v33 }
 0x29b   :  { %v1531_v4 = vadd.f32 %v1387_v58, %v8418_v38  ;;  %v1048_v11 = vpop.f32.mrf.mxu2  ;;  %v1970_v58 = vld [vmem:[#allocation2 + $0x331] sm:$0xff] }
 0x29c   :  { %v8468_v38 = vadd.f32 %v1048_v11, %v759_v36  ;;  %v1261_v36 = vld [vmem:[#allocation2 + $0x327] sm:$0xff] }
 0x29d   :  { %v1885_v50 = vadd.f32 %v8422_v17, %v1531_v4 }
 0x29e   :  { %v2098_v45 = vpop.f32.mrf.mxu1  ;;  %1098 = vmatmul.f32.gmra.mxu2 %v1969_v16 }
 0x29f   :  { %v8466_v12 = vadd.f32 %v2095_v2, %v1885_v50  ;;  %1437 = vmatmul.f32.gmra.mxu3 %v1258_v9  ;;  %v8472_v47 = vpop.f32.mrf.mxu0  ;;  %v12037_v2 = vld [vmem:[#allocation59_spill] sm:$0xff] }
 0x2a0   :  { %v762_v46 = vadd.f32 %v8190_v27, %v12037_v2  ;;  %v12038_v27 = vld [vmem:[#allocation62_spill] sm:$0xff] }
 0x2a1   :  { %2145 = vmatmul.f32.gmra.mxu1 %v1966_v42  ;;  %v1616_v42 = vld [vmem:[#allocation2 + $0x330] sm:$0xff]  ;;  %v765_v50 = vadd.f32 %v8200_v61, %v12038_v27  ;;  %v1619_v27 = vld [vmem:[#allocation2 + $0x368] sm:$0xff] }
 0x2a2   :  { %v1390_v17 = vpop.f32.mrf.mxu3  ;;  %1803 = vmatmul.f32.gmra.mxu0 %v1616_v42 }
 0x2a3   :  { %v1532_v57 = vadd.f32 %v1390_v17, %v8428_v6  ;;  %v1051_v10 = vpop.f32.mrf.mxu2  ;;  %v2348_v17 = vld [vmem:[#allocation6 + $0x318] sm:$0xff] }
 0x2a4   :  { %v8478_v5 = vadd.f32 %v1051_v10, %v762_v46  ;;  %2373 = vmatpush.msra.mxu2 %v2348_v17  ;;  %v1262_v10 = vld [vmem:[#allocation2 + $0x32f] sm:$0xff] }
 0x2a5   :  { %v1886_v29 = vadd.f32 %v8432_v26, %v1532_v57  ;;  %v1973_v17 = vld [vmem:[#allocation2 + $0x369] sm:$0xff] }
 0x2a6   :  { %v2101_v8 = vpop.f32.mrf.mxu1  ;;  %1101 = vmatmul.f32.gmra.mxu2 %v1970_v58 }
 0x2a7   :  { %v8476_v44 = vadd.f32 %v2098_v45, %v1886_v29  ;;  %1440 = vmatmul.f32.gmra.mxu3 %v1259_v20  ;;  %v8482_v4 = vpop.f32.mrf.mxu0  ;;  %v1618_v20 = vld [vmem:[#allocation2 + $0x350] sm:$0xff]  ;;  %v12039_v29 = vld [vmem:[#allocation13_spill] sm:$0xff] }
 0x2a9   :  { %2148 = vmatmul.f32.gmra.mxu1 %v1967_v23  ;;  %v1617_v23 = vld [vmem:[#allocation2 + $0x348] sm:$0xff] }
 0x2aa   :  { %v1393_v6 = vpop.f32.mrf.mxu3  ;;  %1806 = vmatmul.f32.gmra.mxu0 %v1617_v23  ;;  %v12042_v23 = vld [vmem:[#allocation16_spill] sm:$0xff] }
 0x2ab   :  { %v1533_v26 = vadd.f32 %v1393_v6, %v8438_v32  ;;  %v1054_v3 = vpop.f32.mrf.mxu2 }
 0x2ac   :  { %v8488_v49 = vadd.f32 %v1054_v3, %v765_v50  ;;  %v3056_v50 = vld [vmem:[#allocation6 + $0x418] sm:$0xff] }
 0x2ad   :  { %v1887_v28 = vadd.f32 %v8442_v30, %v1533_v26  ;;  %v1972_v26 = vld [vmem:[#allocation2 + $0x351] sm:$0xff]  ;;  %3081 = vmatpush.msra.mxu0 %v3056_v50 }
 0x2ae   :  { %v2104_v9 = vpop.f32.mrf.mxu1  ;;  %1104 = vmatmul.f32.gmra.mxu2 %v1971_v13 }
 0x2af   :  { %v8486_v45 = vadd.f32 %v2101_v8, %v1887_v28  ;;  %1443 = vmatmul.f32.gmra.mxu3 %v1260_v62  ;;  %v8492_v11 = vpop.f32.mrf.mxu0  ;;  %v12040_v8 = vld [vmem:[#allocation15_spill] sm:$0xff] }
 0x2b0   :  { %v768_v2 = vadd.f32 %v12040_v8, %v12039_v29  ;;  %v1620_v29 = vld [vmem:[#allocation2 + $0x370] sm:$0xff] }
 0x2b1   :  { %2151 = vmatmul.f32.gmra.mxu1 %v1968_v14  ;;  %v2702_v14 = vld [vmem:[#allocation6 + $0x398] sm:$0xff] }
 0x2b2   :  { %v1396_v32 = vpop.f32.mrf.mxu3  ;;  %1809 = vmatmul.f32.gmra.mxu0 %v1618_v20  ;;  %2727 = vmatpush.msra.mxu3 %v2702_v14 }
 0x2b3   :  { %v1534_v30 = vadd.f32 %v1396_v32, %v8448_v53  ;;  %v1057_v53 = vpop.f32.mrf.mxu2 }
 0x2b4   :  { %v8498_v46 = vadd.f32 %v1057_v53, %v768_v2  ;;  %v12043_v2 = vld [vmem:[#allocation17_spill] sm:$0xff] }
 0x2b5   :  { %v1888_v33 = vadd.f32 %v8452_v48, %v1534_v30 }
 0x2b6   :  { %v2107_v61 = vpop.f32.mrf.mxu1  ;;  %1107 = vmatmul.f32.gmra.mxu2 %v1972_v26 }
 0x2b7   :  { %v8494_v57 = vadd.f32 %v2104_v9, %v1888_v33  ;;  %1446 = vmatmul.f32.gmra.mxu3 %v1261_v36  ;;  %v8502_v62 = vpop.f32.mrf.mxu0  ;;  %v1263_v36 = vld [vmem:[#allocation2 + $0x347] sm:$0xff] }
 0x2b9   :  { %2154 = vmatmul.f32.gmra.mxu1 %v1969_v16  ;;  %v12041_v16 = vld [vmem:[#allocation14_spill] sm:$0xff] }
 0x2ba   :  { %v1399_v48 = vpop.f32.mrf.mxu3  ;;  %v771_v3 = vadd.f32 %v12042_v23, %v12041_v16  ;;  %1812 = vmatmul.f32.gmra.mxu0 %v1619_v27  ;;  %v1621_v27 = vld [vmem:[#allocation2 + $0x388] sm:$0xff] }
 0x2bb   :  { %v1535_v42 = vadd.f32 %v1399_v48, %v8458_v22  ;;  %v1060_v22 = vpop.f32.mrf.mxu2  ;;  %v1264_v48 = vld [vmem:[#allocation2 + $0x34f] sm:$0xff] }
 0x2bc   :  { %v8508_v30 = vadd.f32 %v1060_v22, %v771_v3  ;;  %v12044_v16 = vld [vmem:[#allocation18_spill] sm:$0xff] }
 0x2bd   :  { %v1889_v6 = vadd.f32 %v8462_v39, %v1535_v42  ;;  %v1974_v42 = vld [vmem:[#allocation2 + $0x371] sm:$0xff]  ;;  %v1265_v3 = vld [vmem:[#allocation2 + $0x367] sm:$0xff] }
 0x2be   :  { %v2110_v28 = vpop.f32.mrf.mxu1  ;;  %1110 = vmatmul.f32.gmra.mxu2 %v1973_v17  ;;  %v1975_v22 = vld [vmem:[#allocation2 + $0x389] sm:$0xff] }
 0x2bf   :  { %v8504_v9 = vadd.f32 %v2107_v61, %v1889_v6  ;;  %1449 = vmatmul.f32.gmra.mxu3 %v1262_v10  ;;  %v8512_v61 = vpop.f32.mrf.mxu0 }
 0x2c1   :  { %2157 = vmatmul.f32.gmra.mxu1 %v1970_v58 }
 0x2c2   :  { %v1402_v32 = vpop.f32.mrf.mxu3  ;;  %1815 = vmatmul.f32.gmra.mxu0 %v1620_v29 }
 0x2c3   :  { %v1536_v39 = vadd.f32 %v1402_v32, %v8468_v38  ;;  %v1063_v58 = vpop.f32.mrf.mxu2 }
 0x2c4   :  { %v8517_v53 = vadd.f32 %v1063_v58, %v12043_v2  ;;  %v12045_v58 = vld [vmem:[#allocation19_spill] sm:$0xff] }
 0x2c5   :  { %v1890_v33 = vadd.f32 %v8472_v47, %v1536_v39  ;;  %v2347_v39 = vld [vmem:[#allocation6 + $0x310] sm:$0xff] }
 0x2c6   :  { %v2113_v20 = vpop.f32.mrf.mxu1  ;;  %1113 = vmatmul.f32.gmra.mxu2 %v1974_v42  ;;  %v1266_v2 = vld [vmem:[#allocation2 + $0x36f] sm:$0xff] }
 0x2c7   :  { %v8514_v14 = vadd.f32 %v2110_v28, %v1890_v33  ;;  %1452 = vmatmul.f32.gmra.mxu3 %v1263_v36  ;;  %v8521_v10 = vpop.f32.mrf.mxu0  ;;  %2374 = vmatpush.msra.mxu2 %v2347_v39  ;;  %v1977_v39 = vld [vmem:[#allocation2 + $0x3a9] sm:$0xff] }
 0x2c9   :  { %2160 = vmatmul.f32.gmra.mxu1 %v1971_v13 }
 0x2ca   :  { %v1405_v8 = vpop.f32.mrf.mxu3  ;;  %1818 = vmatmul.f32.gmra.mxu0 %v1621_v27 }
 0x2cb   :  { %v1537_v38 = vadd.f32 %v1405_v8, %v8478_v5  ;;  %v1066_v13 = vpop.f32.mrf.mxu2 }
 0x2cc   :  { %v8526_v23 = vadd.f32 %v1066_v13, %v12044_v16  ;;  %v1623_v13 = vld [vmem:[#allocation2 + $0x3a8] sm:$0xff] }
 0x2cd   :  { %v1891_v47 = vadd.f32 %v8482_v4, %v1537_v38 }
 0x2ce   :  { %v2116_v6 = vpop.f32.mrf.mxu1  ;;  %1116 = vmatmul.f32.gmra.mxu2 %v1975_v22 }
 0x2cf   :  { %v8523_v28 = vadd.f32 %v2113_v20, %v1891_v47  ;;  %1455 = vmatmul.f32.gmra.mxu3 %v1264_v48  ;;  %v8530_v32 = vpop.f32.mrf.mxu0  ;;  %v2701_v20 = vld [vmem:[#allocation6 + $0x390] sm:$0xff] }
 0x2d0   :  { %2728 = vmatpush.msra.mxu3 %v2701_v20  ;;  %v1976_v48 = vld [vmem:[#allocation2 + $0x391] sm:$0xff] }
 0x2d1   :  { %2163 = vmatmul.f32.gmra.mxu1 %v1972_v26  ;;  %v1622_v26 = vld [vmem:[#allocation2 + $0x390] sm:$0xff] }
 0x2d2   :  { %v1408_v50 = vpop.f32.mrf.mxu3  ;;  %1821 = vmatmul.f32.gmra.mxu0 %v1622_v26 }
 0x2d3   :  { %v1538_v5 = vadd.f32 %v1408_v50, %v8488_v49  ;;  %v1069_v29 = vpop.f32.mrf.mxu2 }
 0x2d4   :  { %v8535_v8 = vadd.f32 %v1069_v29, %v12045_v58  ;;  %v12047_v58 = vld [vmem:[#allocation21_spill] sm:$0xff] }
 0x2d5   :  { %v1892_v4 = vadd.f32 %v8492_v11, %v1538_v5  ;;  %v12046_v5 = vld [vmem:[#allocation20_spill] sm:$0xff] }
 0x2d6   :  { %v2119_v36 = vpop.f32.mrf.mxu1  ;;  %1119 = vmatmul.f32.gmra.mxu2 %v1976_v48 }
 0x2d7   :  { %v8532_v33 = vadd.f32 %v2116_v6, %v1892_v4  ;;  %1458 = vmatmul.f32.gmra.mxu3 %v1265_v3  ;;  %v8539_v47 = vpop.f32.mrf.mxu0  ;;  %v1267_v3 = vld [vmem:[#allocation2 + $0x387] sm:$0xff] }
 0x2d9   :  { %2166 = vmatmul.f32.gmra.mxu1 %v1973_v17  ;;  %v3055_v17 = vld [vmem:[#allocation6 + $0x410] sm:$0xff] }
 0x2da   :  { %v1411_v49 = vpop.f32.mrf.mxu3  ;;  %1824 = vmatmul.f32.gmra.mxu0 %v1623_v13 }
 0x2db   :  { %v1539_v11 = vadd.f32 %v1411_v49, %v8498_v46  ;;  %3082 = vmatpush.msra.mxu0 %v3055_v17  ;;  %v1072_v50 = vpop.f32.mrf.mxu2 }
 0x2dc   :  { %v8544_v46 = vadd.f32 %v1072_v50, %v12046_v5  ;;  %v1625_v50 = vld [vmem:[#allocation2 + $0x3c8] sm:$0xff] }
 0x2dd   :  { %v1893_v38 = vadd.f32 %v8502_v62, %v1539_v11  ;;  %v12048_v5 = vld [vmem:[#allocation22_spill] sm:$0xff] }
 0x2de   :  { %v2122_v6 = vpop.f32.mrf.mxu1  ;;  %1122 = vmatmul.f32.gmra.mxu2 %v1977_v39 }
 0x2df   :  { %v8541_v27 = vadd.f32 %v2119_v36, %v1893_v38  ;;  %1461 = vmatmul.f32.gmra.mxu3 %v1266_v2  ;;  %v8548_v26 = vpop.f32.mrf.mxu0  ;;  %v1268_v2 = vld [vmem:[#allocation2 + $0x38f] sm:$0xff] }
 0x2e0   :  { %v1978_v38 = vld [vmem:[#allocation2 + $0x3b1] sm:$0xff] }
 0x2e1   :  { %2169 = vmatmul.f32.gmra.mxu1 %v1974_v42  ;;  %v1624_v42 = vld [vmem:[#allocation2 + $0x3b0] sm:$0xff] }
 0x2e2   :  { %v1414_v16 = vpop.f32.mrf.mxu3  ;;  %1827 = vmatmul.f32.gmra.mxu0 %v1624_v42 }
 0x2e3   :  { %v1540_v62 = vadd.f32 %v1414_v16, %v8508_v30  ;;  %v1075_v29 = vpop.f32.mrf.mxu2 }
 0x2e4   :  { %v8553_v11 = vadd.f32 %v1075_v29, %v12047_v58  ;;  %v2346_v29 = vld [vmem:[#allocation6 + $0x308] sm:$0xff] }
 0x2e5   :  { %v1894_v4 = vadd.f32 %v8512_v61, %v1540_v62  ;;  %2375 = vmatpush.msra.mxu2 %v2346_v29  ;;  %v2700_v58 = vld [vmem:[#allocation6 + $0x388] sm:$0xff] }
 0x2e6   :  { %v2125_v36 = vpop.f32.mrf.mxu1  ;;  %1125 = vmatmul.f32.gmra.mxu2 %v1978_v38  ;;  %2729 = vmatpush.msra.mxu3 %v2700_v58  ;;  %v1271_v58 = vld [vmem:[#allocation2 + $0x3c7] sm:$0xff] }
 0x2e7   :  { %v8550_v20 = vadd.f32 %v2122_v6, %v1894_v4  ;;  %1464 = vmatmul.f32.gmra.mxu3 %v1267_v3  ;;  %v8557_v13 = vpop.f32.mrf.mxu0  ;;  %v1269_v3 = vld [vmem:[#allocation2 + $0x3a7] sm:$0xff] }
 0x2e8   :  { %v1979_v4 = vld [vmem:[#allocation2 + $0x3c9] sm:$0xff] }
 0x2e9   :  { %2172 = vmatmul.f32.gmra.mxu1 %v1975_v22 }
 0x2ea   :  { %v1417_v49 = vpop.f32.mrf.mxu3  ;;  %1830 = vmatmul.f32.gmra.mxu0 %v1625_v50  ;;  %v1270_v50 = vld [vmem:[#allocation2 + $0x3af] sm:$0xff] }
 0x2eb   :  { %v1541_v30 = vadd.f32 %v1417_v49, %v8517_v53  ;;  %v1078_v22 = vpop.f32.mrf.mxu2 }
 0x2ec   :  { %v8562_v62 = vadd.f32 %v1078_v22, %v12048_v5 }
 0x2ed   :  { %v1895_v61 = vadd.f32 %v8521_v10, %v1541_v30 }
 0x2ee   :  { %v2128_v17 = vpop.f32.mrf.mxu1  ;;  %1128 = vmatmul.f32.gmra.mxu2 %v1979_v4 }
 0x2ef   :  { %v8559_v6 = vadd.f32 %v2125_v36, %v1895_v61  ;;  %1467 = vmatmul.f32.gmra.mxu3 %v1268_v2  ;;  %v8566_v42 = vpop.f32.mrf.mxu0  ;;  %v12049_v2 = vld [vmem:[#allocation23_spill] sm:$0xff] }
 0x2f1   :  { %2175 = vmatmul.f32.gmra.mxu1 %v1976_v48  ;;  %v1626_v48 = vld [vmem:[#allocation2 + $0x3d0] sm:$0xff] }
 0x2f2   :  { %v1420_v16 = vpop.f32.mrf.mxu3  ;;  %1833 = vmatmul.f32.gmra.mxu0 %v1626_v48  ;;  %v12050_v48 = vld [vmem:[#allocation24_spill] sm:$0xff] }
 0x2f3   :  { %v1542_v53 = vadd.f32 %v1420_v16, %v8526_v23  ;;  %v1081_v30 = vpop.f32.mrf.mxu2  ;;  %v1980_v16 = vld [vmem:[#allocation2 + $0x3d1] sm:$0xff] }
 0x2f4   :  { %v8571_v61 = vadd.f32 %v1081_v30, %v12049_v2 }
 0x2f5   :  { %v1896_v10 = vadd.f32 %v8530_v32, %v1542_v53  ;;  %v1627_v53 = vld [vmem:[#allocation2 + $0x3e8] sm:$0xff] }
 0x2f6   :  { %v2131_v36 = vpop.f32.mrf.mxu1  ;;  %1131 = vmatmul.f32.gmra.mxu2 %v1980_v16 }
 0x2f7   :  { %v8568_v49 = vadd.f32 %v2128_v17, %v1896_v10  ;;  %1470 = vmatmul.f32.gmra.mxu3 %v1269_v3  ;;  %v8575_v17 = vpop.f32.mrf.mxu0  ;;  %v3054_v3 = vld [vmem:[#allocation6 + $0x408] sm:$0xff] }
 0x2f8   :  { %3083 = vmatpush.msra.mxu0 %v3054_v3 }
 0x2f9   :  { %2178 = vmatmul.f32.gmra.mxu1 %v1977_v39 }
 0x2fa   :  { %v1423_v23 = vpop.f32.mrf.mxu3  ;;  %1836 = vmatmul.f32.gmra.mxu0 %v1627_v53  ;;  %v12052_v53 = vld [vmem:[#allocation25_spill] sm:$0xff] }
 0x2fb   :  { %v1543_v32 = vadd.f32 %v1423_v23, %v8535_v8  ;;  %v1084_v10 = vpop.f32.mrf.mxu2  ;;  %v1981_v23 = vld [vmem:[#allocation2 + $0x3e9] sm:$0xff] }
 0x2fc   :  { %v8580_v8 = vadd.f32 %v1084_v10, %v12050_v48  ;;  %v1272_v10 = vld [vmem:[#allocation2 + $0x3cf] sm:$0xff] }
 0x2fd   :  { %v1897_v22 = vadd.f32 %v8539_v47, %v1543_v32  ;;  %v1628_v32 = vld [vmem:[#allocation2 + $0x3f0] sm:$0xff] }
 0x2fe   :  { %v2134_v39 = vpop.f32.mrf.mxu1  ;;  %1134 = vmatmul.f32.gmra.mxu2 %v1981_v23 }
 0x2ff   :  { %v8577_v5 = vadd.f32 %v2131_v36, %v1897_v22  ;;  %1473 = vmatmul.f32.gmra.mxu3 %v1270_v50  ;;  %v8584_v36 = vpop.f32.mrf.mxu0 }
 0x301   :  { %2181 = vmatmul.f32.gmra.mxu1 %v1978_v38 }
 0x302   :  { %v1426_v29 = vpop.f32.mrf.mxu3  ;;  %1839 = vmatmul.f32.gmra.mxu0 %v1628_v32 }
 0x303   :  { %v1544_v47 = vadd.f32 %v1426_v29, %v8544_v46  ;;  %v1087_v38 = vpop.f32.mrf.mxu2  ;;  %v1982_v29 = vld [vmem:[#allocation2 + $0x3f1] sm:$0xff] }
 0x304   :  { %v8589_v3 = vadd.f32 %v1087_v38, %v12052_v53  ;;  %v1983_v53 = vld [vmem:[#allocation2 + $0x409] sm:$0xff] }
 0x305   :  { %v1898_v30 = vadd.f32 %v8548_v26, %v1544_v47  ;;  %v1629_v47 = vld [vmem:[#allocation2 + $0x408] sm:$0xff] }
 0x306   :  { %v2137_v22 = vpop.f32.mrf.mxu1  ;;  %1137 = vmatmul.f32.gmra.mxu2 %v1982_v29 }
 0x307   :  { %v8586_v2 = vadd.f32 %v2134_v39, %v1898_v30  ;;  %1476 = vmatmul.f32.gmra.mxu3 %v1271_v58  ;;  %v8593_v48 = vpop.f32.mrf.mxu0  ;;  %v12054_v30 = vld [vmem:[#allocation26_spill] sm:$0xff] }
 0x309   :  { %12051 = vst [vmem:[#allocation32_spill] sm:$0xff] %v8586_v2  ;;  %2184 = vmatmul.f32.gmra.mxu1 %v1979_v4  ;;  %v2345_v2 = vld [vmem:[#allocation6 + $0x300] sm:$0xff] }
 0x30a   :  { %v1429_v50 = vpop.f32.mrf.mxu3  ;;  %1842 = vmatmul.f32.gmra.mxu0 %v1629_v47  ;;  %2376 = vmatpush.msra.mxu2 %v2345_v2  ;;  %v1631_v2 = vld [vmem:[#allocation2 + $0x428] sm:$0xff] }
 0x30b   :  { %v1545_v46 = vadd.f32 %v1429_v50, %v8553_v11  ;;  %v1090_v4 = vpop.f32.mrf.mxu2  ;;  %v1273_v50 = vld [vmem:[#allocation2 + $0x3e7] sm:$0xff] }
 0x30c   :  { %v8598_v32 = vadd.f32 %v1090_v4, %v12054_v30 }
 0x30d   :  { %v1899_v26 = vadd.f32 %v8557_v13, %v1545_v46 }
 0x30e   :  { %v2140_v38 = vpop.f32.mrf.mxu1  ;;  %1140 = vmatmul.f32.gmra.mxu2 %v1983_v53 }
 0x30f   :  { %v8595_v39 = vadd.f32 %v2137_v22, %v1899_v26  ;;  %1479 = vmatmul.f32.gmra.mxu3 %v1272_v10  ;;  %v1798_v46 = vpop.f32.mrf.mxu0  ;;  %v2699_v10 = vld [vmem:[#allocation6 + $0x380] sm:$0xff] }
 0x310   :  { %2730 = vmatpush.msra.mxu3 %v2699_v10  ;;  %v12058_v10 = vld [vmem:[#allocation28_spill] sm:$0xff] }
 0x311   :  { %12053 = vst [vmem:[#allocation39_spill] sm:$0xff] %v8595_v39  ;;  %2187 = vmatmul.f32.gmra.mxu1 %v1980_v16  ;;  %v1630_v16 = vld [vmem:[#allocation2 + $0x410] sm:$0xff]  ;;  %v1277_v39 = vld [vmem:[#allocation2 + $0x427] sm:$0xff] }
 0x312   :  { %v1432_v58 = vpop.f32.mrf.mxu3  ;;  %1845 = vmatmul.f32.gmra.mxu0 %v1630_v16 }
 0x313   :  { %v1546_v11 = vadd.f32 %v1432_v58, %v8562_v62  ;;  %v1093_v26 = vpop.f32.mrf.mxu2  ;;  %v12056_v62 = vld [vmem:[#allocation27_spill] sm:$0xff] }
 0x314   :  { %v1197_v4 = vadd.f32 %v1093_v26, %v12056_v62  ;;  %v1985_v62 = vld [vmem:[#allocation2 + $0x429] sm:$0xff] }
 0x315   :  { %v1900_v13 = vadd.f32 %v8566_v42, %v1546_v11  ;;  %v1274_v42 = vld [vmem:[#allocation2 + $0x3ef] sm:$0xff] }
 0x316   :  { %v1984_v11 = vld [vmem:[#allocation2 + $0x411] sm:$0xff] }
 0x317   :  { %v8602_v22 = vadd.f32 %v2140_v38, %v1900_v13  ;;  %1482 = vmatmul.f32.gmra.mxu3 %v1273_v50  ;;  %v1801_v38 = vpop.f32.mrf.mxu0  ;;  %1143 = vmatmul.f32.gmra.mxu2 %v1984_v11  ;;  %v3053_v50 = vld [vmem:[#allocation6 + $0x400] sm:$0xff]  ;;  %v218_v13 = vld [vmem:[#allocation3 + $0x1f0] sm:$0xff] }
 0x318   :  { %3084 = vmatpush.msra.mxu0 %v3053_v50  ;;  %282 = vst [vmem:[#allocation2 + $0x448] sm:$0xff] %v218_v13 }
 0x319   :  { %12055 = vst [vmem:[#allocation34_spill] sm:$0xff] %v8602_v22  ;;  %2190 = vmatmul.f32.gmra.mxu1 %v1981_v23 }
 0x31a   :  { %v1435_v47 = vpop.f32.mrf.mxu3  ;;  %1848 = vmatmul.f32.gmra.mxu0 %v1631_v2  ;;  %v219_v2 = vld [vmem:[#allocation3 + $0x1f8] sm:$0xff] }
 0x31b   :  { %v1547_v58 = vadd.f32 %v1435_v47, %v8571_v61  ;;  %v1096_v23 = vpop.f32.mrf.mxu2  ;;  %v1275_v47 = vld [vmem:[#allocation2 + $0x407] sm:$0xff]  ;;  %283 = vst [vmem:[#allocation2 + $0x450] sm:$0xff] %v219_v2 }
 0x31c   :  { %v1198_v26 = vadd.f32 %v1096_v23, %v12058_v10 }
 0x31d   :  { %v8607_v30 = vadd.f32 %v8575_v17, %v1547_v58 }
 0x31f   :  { %12057 = vst [vmem:[#allocation42_spill] sm:$0xff] %v8607_v30  ;;  %1485 = vmatmul.f32.gmra.mxu3 %v1274_v42  ;;  %v1804_v58 = vpop.f32.mrf.mxu0  ;;  %1146 = vmatmul.f32.gmra.mxu2 %v1985_v62  ;;  %v1632_v42 = vld [vmem:[#allocation2 + $0x430] sm:$0xff]  ;;  %v12060_v30 = vld [vmem:[#allocation29_spill] sm:$0xff] }
 0x321   :  { %2193 = vmatmul.f32.gmra.mxu1 %v1982_v29 }
 0x322   :  { %v1438_v16 = vpop.f32.mrf.mxu3  ;;  %1851 = vmatmul.f32.gmra.mxu0 %v1632_v42 }
 0x323   :  { %v1548_v61 = vadd.f32 %v1438_v16, %v8580_v8  ;;  %v1099_v29 = vpop.f32.mrf.mxu2  ;;  %v1276_v8 = vld [vmem:[#allocation2 + $0x40f] sm:$0xff] }
 0x324   :  { %v1199_v22 = vadd.f32 %v1099_v29, %v12060_v30  ;;  %v2280_v29 = vld [vmem:[#allocation2 + $0x47] sm:$0xff] }
 0x325   :  { %v8612_v17 = vadd.f32 %v8584_v36, %v1548_v61  ;;  %v1986_v36 = vld [vmem:[#allocation2 + $0x431] sm:$0xff] }
 0x327   :  { %12059 = vst [vmem:[#allocation36_spill] sm:$0xff] %v8612_v17  ;;  %1488 = vmatmul.f32.gmra.mxu3 %v1275_v47  ;;  %v1807_v10 = vpop.f32.mrf.mxu0  ;;  %1149 = vmatmul.f32.gmra.mxu2 %v1986_v36 }
 0x329   :  { %2196 = vmatmul.f32.gmra.mxu1 %v1983_v53  ;;  %v12062_v53 = vld [vmem:[#allocation30_spill] sm:$0xff] }
 0x32a   :  { %v1441_v50 = vpop.f32.mrf.mxu3  ;;  %1854 = vmatmul.f32.gmra.mxu0 %v218_v13 }
 0x32b   :  { %v1549_v23 = vadd.f32 %v1441_v50, %v8589_v3  ;;  %v1102_v61 = vpop.f32.mrf.mxu2 }
 0x32c   :  { %v1200_v42 = vadd.f32 %v1102_v61, %v12062_v53  ;;  %v2281_v53 = vld [vmem:[#allocation2 + $0x4f] sm:$0xff] }
 0x32d   :  { %v8617_v16 = vadd.f32 %v8593_v48, %v1549_v23  ;;  %v12063_v23 = vld [vmem:[#allocation31_spill] sm:$0xff] }
 0x32f   :  { %12061 = vst [vmem:[#allocation45_spill] sm:$0xff] %v8617_v16  ;;  %1491 = vmatmul.f32.gmra.mxu3 %v1276_v8  ;;  %v1810_v3 = vpop.f32.mrf.mxu0  ;;  %2377 = vmatmul.f32.vlgmr.msra.gmra.mxu2 %v2280_v29  ;;  %v1278_v8 = vld [vmem:[#allocation2 + $0x42f] sm:$0xff] }
 0x331   :  { %2199 = vmatmul.f32.gmra.mxu1 %v1984_v11 }
 0x332   :  { %v1444_v47 = vpop.f32.mrf.mxu3  ;;  %1857 = vmatmul.f32.gmra.mxu0 %v219_v2 }
 0x333   :  { %v1550_v17 = vadd.f32 %v1444_v47, %v8598_v32  ;;  %v1105_v48 = vpop.f32.mrf.mxu2  ;;  %v2988_v32 = vld [vmem:[#allocation2 + $0x49] sm:$0xff] }
 0x334   :  { %v1201_v13 = vadd.f32 %v1105_v48, %v12063_v23  ;;  %v1279_v47 = vld [vmem:[#allocation2 + $0x447] sm:$0xff] }
 0x335   :  { %v8621_v30 = vadd.f32 %v1798_v46, %v1550_v17 }
 0x337   :  { %1494 = vmatmul.f32.gmra.mxu3 %v1277_v39  ;;  %v1813_v61 = vpop.f32.mrf.mxu0  ;;  %2380 = vmatmul.f32.gmra.mxu2 %v2281_v53  ;;  %v12065_v39 = vld [vmem:[#allocation33_spill] sm:$0xff] }
 0x339   :  { %2202 = vmatmul.f32.gmra.mxu1 %v1985_v62 }
 0x33a   :  { %v1447_v50 = vpop.f32.mrf.mxu3  ;;  %3085 = vmatmul.f32.vlgmr.msra.gmra.mxu0 %v2988_v32  ;;  %v1280_v32 = vld [vmem:[#allocation2 + $0x44f] sm:$0xff] }
 0x33b   :  { %v1551_v11 = vadd.f32 %v1447_v50, %v1197_v4  ;;  %v1108_v46 = vpop.f32.mrf.mxu2  ;;  %v2282_v4 = vld [vmem:[#allocation2 + $0x67] sm:$0xff] }
 0x33c   :  { %v1202_v2 = vadd.f32 %v1108_v46, %v12065_v39  ;;  %v1987_v50 = vld [vmem:[#allocation2 + $0x449] sm:$0xff] }
 0x33d   :  { %v8624_v16 = vadd.f32 %v1801_v38, %v1551_v11  ;;  %v2989_v38 = vld [vmem:[#allocation2 + $0x51] sm:$0xff] }
 0x33e   :  { %v2283_v46 = vld [vmem:[#allocation2 + $0x6f] sm:$0xff] }
 0x33f   :  { %12064 = vst [vmem:[#allocation38_spill] sm:$0xff] %v8624_v16  ;;  %1497 = vmatmul.f32.gmra.mxu3 %v1278_v8  ;;  %v1816_v48 = vpop.f32.mrf.mxu0  ;;  %2383 = vmatmul.f32.gmra.mxu2 %v2282_v4  ;;  %v12067_v8 = vld [vmem:[#allocation35_spill] sm:$0xff] }
 0x341   :  { %2205 = vmatmul.f32.gmra.mxu1 %v1986_v36 }
 0x342   :  { %v1450_v17 = vpop.f32.mrf.mxu3  ;;  %3088 = vmatmul.f32.gmra.mxu0 %v2989_v38  ;;  %v2634_v38 = vld [vmem:[#allocation2 + $0x48] sm:$0xff] }
 0x343   :  { %v1552_v62 = vadd.f32 %v1450_v17, %v1198_v26  ;;  %v1111_v23 = vpop.f32.mrf.mxu2  ;;  %v2990_v17 = vld [vmem:[#allocation2 + $0x69] sm:$0xff] }
 0x344   :  { %v1203_v36 = vadd.f32 %v1111_v23, %v12067_v8  ;;  %v2284_v23 = vld [vmem:[#allocation2 + $0x87] sm:$0xff] }
 0x345   :  { %v8627_v29 = vadd.f32 %v1804_v58, %v1552_v62  ;;  %v1988_v58 = vld [vmem:[#allocation2 + $0x451] sm:$0xff] }
 0x347   :  { %12066 = vst [vmem:[#allocation48_spill] sm:$0xff] %v8627_v29  ;;  %1500 = vmatmul.f32.gmra.mxu3 %v1279_v47  ;;  %v1819_v26 = vpop.f32.mrf.mxu0  ;;  %2386 = vmatmul.f32.gmra.mxu2 %v2283_v46  ;;  %v12069_v47 = vld [vmem:[#allocation37_spill] sm:$0xff] }
 0x349   :  { %2208 = vmatmul.f32.gmra.mxu1 %v1987_v50 }
 0x34a   :  { %v1453_v11 = vpop.f32.mrf.mxu3  ;;  %3091 = vmatmul.f32.gmra.mxu0 %v2990_v17 }
 0x34b   :  { %v1553_v53 = vadd.f32 %v1453_v11, %v1199_v22  ;;  %v1114_v39 = vpop.f32.mrf.mxu2 }
 0x34c   :  { %v1204_v4 = vadd.f32 %v1114_v39, %v12069_v47  ;;  %v2285_v39 = vld [vmem:[#allocation2 + $0x8f] sm:$0xff] }
 0x34d   :  { %v8630_v16 = vadd.f32 %v1807_v10, %v1553_v53  ;;  %v2991_v10 = vld [vmem:[#allocation2 + $0x71] sm:$0xff] }
 0x34e   :  { %v12071_v53 = vld [vmem:[#allocation40_spill] sm:$0xff]  ;;  %v12073_v47 = vld [vmem:[#allocation43_spill] sm:$0xff] }
 0x34f   :  { %12068 = vst [vmem:[#allocation41_spill] sm:$0xff] %v8630_v16  ;;  %1503 = vmatmul.f32.gmra.mxu3 %v1280_v32  ;;  %v1822_v22 = vpop.f32.mrf.mxu0  ;;  %2389 = vmatmul.f32.gmra.mxu2 %v2284_v23  ;;  %v2636_v23 = vld [vmem:[#allocation2 + $0x68] sm:$0xff] }
 0x351   :  { %2211 = vmatmul.f32.gmra.mxu1 %v1988_v58  ;;  %v2635_v58 = vld [vmem:[#allocation2 + $0x50] sm:$0xff] }
 0x352   :  { %v1456_v62 = vpop.f32.mrf.mxu3  ;;  %3094 = vmatmul.f32.gmra.mxu0 %v2991_v10 }
 0x353   :  { %v1554_v50 = vadd.f32 %v1456_v62, %v1200_v42  ;;  %v1117_v11 = vpop.f32.mrf.mxu2  ;;  %v2992_v42 = vld [vmem:[#allocation2 + $0x89] sm:$0xff] }
 0x354   :  { %v1205_v32 = vadd.f32 %v1117_v11, %v12071_v53  ;;  %v2286_v11 = vld [vmem:[#allocation2 + $0xa7] sm:$0xff] }
 0x355   :  { %v8633_v29 = vadd.f32 %v1810_v3, %v1554_v50  ;;  %v12075_v53 = vld [vmem:[#allocation46_spill] sm:$0xff] }
 0x357   :  { %12070 = vst [vmem:[#allocation51_spill] sm:$0xff] %v8633_v29  ;;  %2731 = vmatmul.f32.vlgmr.msra.gmra.mxu3 %v2634_v38  ;;  %v1825_v16 = vpop.f32.mrf.mxu0  ;;  %2392 = vmatmul.f32.gmra.mxu2 %v2285_v39  ;;  %v2637_v39 = vld [vmem:[#allocation2 + $0x70] sm:$0xff] }
 0x35a   :  { %v1459_v8 = vpop.f32.mrf.mxu3  ;;  %3097 = vmatmul.f32.gmra.mxu0 %v2992_v42 }
 0x35b   :  { %v1555_v46 = vadd.f32 %v1459_v8, %v1201_v13  ;;  %v1120_v3 = vpop.f32.mrf.mxu2  ;;  %v2993_v13 = vld [vmem:[#allocation2 + $0x91] sm:$0xff] }
 0x35c   :  { %v1206_v50 = vadd.f32 %v1120_v3, %v12073_v47  ;;  %v2287_v3 = vld [vmem:[#allocation2 + $0xaf] sm:$0xff]  ;;  %v12077_v47 = vld [vmem:[#allocation49_spill] sm:$0xff] }
 0x35d   :  { %v8636_v17 = vadd.f32 %v1813_v61, %v1555_v46 }
 0x35f   :  { %12072 = vst [vmem:[#allocation44_spill] sm:$0xff] %v8636_v17  ;;  %2734 = vmatmul.f32.gmra.mxu3 %v2635_v58  ;;  %v1828_v29 = vpop.f32.mrf.mxu0  ;;  %2395 = vmatmul.f32.gmra.mxu2 %v2286_v11  ;;  %v2638_v11 = vld [vmem:[#allocation2 + $0x88] sm:$0xff] }
 0x362   :  { %v1462_v62 = vpop.f32.mrf.mxu3  ;;  %3100 = vmatmul.f32.gmra.mxu0 %v2993_v13 }
 0x363   :  { %v1556_v38 = vadd.f32 %v1462_v62, %v1202_v2  ;;  %v1123_v61 = vpop.f32.mrf.mxu2  ;;  %v2994_v2 = vld [vmem:[#allocation2 + $0xa9] sm:$0xff] }
 0x364   :  { %v1207_v46 = vadd.f32 %v1123_v61, %v12075_v53  ;;  %v2288_v61 = vld [vmem:[#allocation2 + $0xc7] sm:$0xff]  ;;  %v12079_v53 = vld [vmem:[#allocation52_spill] sm:$0xff] }
 0x365   :  { %v8639_v10 = vadd.f32 %v1816_v48, %v1556_v38 }
 0x367   :  { %12074 = vst [vmem:[#allocation54_spill] sm:$0xff] %v8639_v10  ;;  %2737 = vmatmul.f32.gmra.mxu3 %v2636_v23  ;;  %v1831_v17 = vpop.f32.mrf.mxu0  ;;  %2398 = vmatmul.f32.gmra.mxu2 %v2287_v3  ;;  %v2639_v3 = vld [vmem:[#allocation2 + $0x90] sm:$0xff] }
 0x36a   :  { %v1465_v8 = vpop.f32.mrf.mxu3  ;;  %3103 = vmatmul.f32.gmra.mxu0 %v2994_v2 }
 0x36b   :  { %v1557_v58 = vadd.f32 %v1465_v8, %v1203_v36  ;;  %v1126_v48 = vpop.f32.mrf.mxu2  ;;  %v2995_v36 = vld [vmem:[#allocation2 + $0xb1] sm:$0xff] }
 0x36c   :  { %v1208_v38 = vadd.f32 %v1126_v48, %v12077_v47  ;;  %v2289_v48 = vld [vmem:[#allocation2 + $0xcf] sm:$0xff] }
 0x36d   :  { %v8642_v42 = vadd.f32 %v1819_v26, %v1557_v58  ;;  %v12081_v47 = vld [vmem:[#allocation55_spill] sm:$0xff] }
 0x36f   :  { %12076 = vst [vmem:[#allocation47_spill] sm:$0xff] %v8642_v42  ;;  %2740 = vmatmul.f32.gmra.mxu3 %v2637_v39  ;;  %v1834_v10 = vpop.f32.mrf.mxu0  ;;  %2401 = vmatmul.f32.gmra.mxu2 %v2288_v61  ;;  %v2640_v61 = vld [vmem:[#allocation2 + $0xa8] sm:$0xff] }
 0x372   :  { %v1468_v62 = vpop.f32.mrf.mxu3  ;;  %3106 = vmatmul.f32.gmra.mxu0 %v2995_v36 }
 0x373   :  { %v1558_v23 = vadd.f32 %v1468_v62, %v1204_v4  ;;  %v1129_v26 = vpop.f32.mrf.mxu2  ;;  %v2996_v4 = vld [vmem:[#allocation2 + $0xc9] sm:$0xff] }
 0x374   :  { %v1209_v58 = vadd.f32 %v1129_v26, %v12079_v53  ;;  %v2290_v26 = vld [vmem:[#allocation2 + $0xe7] sm:$0xff] }
 0x375   :  { %v8645_v13 = vadd.f32 %v1822_v22, %v1558_v23  ;;  %v12083_v53 = vld [vmem:[#allocation58_spill] sm:$0xff] }
 0x377   :  { %12078 = vst [vmem:[#allocation57_spill] sm:$0xff] %v8645_v13  ;;  %2743 = vmatmul.f32.gmra.mxu3 %v2638_v11  ;;  %v1837_v42 = vpop.f32.mrf.mxu0  ;;  %2404 = vmatmul.f32.gmra.mxu2 %v2289_v48  ;;  %v2641_v48 = vld [vmem:[#allocation2 + $0xb0] sm:$0xff] }
 0x37a   :  { %v1471_v8 = vpop.f32.mrf.mxu3  ;;  %3109 = vmatmul.f32.gmra.mxu0 %v2996_v4 }
 0x37b   :  { %v1559_v39 = vadd.f32 %v1471_v8, %v1205_v32  ;;  %v1132_v22 = vpop.f32.mrf.mxu2 }
 0x37c   :  { %v1210_v23 = vadd.f32 %v1132_v22, %v12081_v47  ;;  %v2291_v22 = vld [vmem:[#allocation2 + $0xef] sm:$0xff]  ;;  %v12085_v47 = vld [vmem:[#allocation61_spill] sm:$0xff] }
 0x37d   :  { %v8648_v2 = vadd.f32 %v1825_v16, %v1559_v39  ;;  %v2997_v16 = vld [vmem:[#allocation2 + $0xd1] sm:$0xff] }
 0x37f   :  { %12080 = vst [vmem:[#allocation50_spill] sm:$0xff] %v8648_v2  ;;  %2746 = vmatmul.f32.gmra.mxu3 %v2639_v3  ;;  %v1840_v13 = vpop.f32.mrf.mxu0  ;;  %2407 = vmatmul.f32.gmra.mxu2 %v2290_v26  ;;  %v2642_v26 = vld [vmem:[#allocation2 + $0xc8] sm:$0xff] }
 0x382   :  { %v1474_v62 = vpop.f32.mrf.mxu3  ;;  %3112 = vmatmul.f32.gmra.mxu0 %v2997_v16 }
 0x383   :  { %v1560_v11 = vadd.f32 %v1474_v62, %v1206_v50  ;;  %v1135_v32 = vpop.f32.mrf.mxu2 }
 0x384   :  { %v1211_v39 = vadd.f32 %v1135_v32, %v12083_v53  ;;  %v2292_v32 = vld [vmem:[#allocation2 + $0x107] sm:$0xff]  ;;  %v12087_v53 = vld [vmem:[#allocation64_spill] sm:$0xff] }
 0x385   :  { %v8651_v36 = vadd.f32 %v1828_v29, %v1560_v11  ;;  %v2998_v29 = vld [vmem:[#allocation2 + $0xe9] sm:$0xff] }
 0x387   :  { %12082 = vst [vmem:[#allocation60_spill] sm:$0xff] %v8651_v36  ;;  %2749 = vmatmul.f32.gmra.mxu3 %v2640_v61  ;;  %v1843_v2 = vpop.f32.mrf.mxu0  ;;  %2410 = vmatmul.f32.gmra.mxu2 %v2291_v22  ;;  %v2643_v22 = vld [vmem:[#allocation2 + $0xd0] sm:$0xff] }
 0x38a   :  { %v1477_v8 = vpop.f32.mrf.mxu3  ;;  %3115 = vmatmul.f32.gmra.mxu0 %v2998_v29 }
 0x38b   :  { %v1561_v3 = vadd.f32 %v1477_v8, %v1207_v46  ;;  %v1138_v50 = vpop.f32.mrf.mxu2 }
 0x38c   :  { %v1212_v11 = vadd.f32 %v1138_v50, %v12085_v47  ;;  %v2293_v50 = vld [vmem:[#allocation2 + $0x10f] sm:$0xff] }
 0x38d   :  { %v8654_v4 = vadd.f32 %v1831_v17, %v1561_v3  ;;  %v2999_v17 = vld [vmem:[#allocation2 + $0xf1] sm:$0xff]  ;;  %v12089_v47 = vld [vmem:[#allocation66_spill] sm:$0xff] }
 0x38f   :  { %12084 = vst [vmem:[#allocation53_spill] sm:$0xff] %v8654_v4  ;;  %2752 = vmatmul.f32.gmra.mxu3 %v2641_v48  ;;  %v1846_v36 = vpop.f32.mrf.mxu0  ;;  %2413 = vmatmul.f32.gmra.mxu2 %v2292_v32  ;;  %v2644_v32 = vld [vmem:[#allocation2 + $0xe8] sm:$0xff] }
 0x392   :  { %v1480_v62 = vpop.f32.mrf.mxu3  ;;  %3118 = vmatmul.f32.gmra.mxu0 %v2999_v17 }
 0x393   :  { %v1562_v61 = vadd.f32 %v1480_v62, %v1208_v38  ;;  %v1141_v46 = vpop.f32.mrf.mxu2 }
 0x394   :  { %v1213_v3 = vadd.f32 %v1141_v46, %v12087_v53  ;;  %v2294_v46 = vld [vmem:[#allocation2 + $0x127] sm:$0xff]  ;;  %v12091_v53 = vld [vmem:[#allocation67_spill] sm:$0xff] }
 0x395   :  { %v8657_v16 = vadd.f32 %v1834_v10, %v1562_v61  ;;  %v3000_v10 = vld [vmem:[#allocation2 + $0x109] sm:$0xff] }
 0x397   :  { %12086 = vst [vmem:[#allocation63_spill] sm:$0xff] %v8657_v16  ;;  %2755 = vmatmul.f32.gmra.mxu3 %v2642_v26  ;;  %v1849_v4 = vpop.f32.mrf.mxu0  ;;  %2416 = vmatmul.f32.gmra.mxu2 %v2293_v50  ;;  %v2645_v50 = vld [vmem:[#allocation2 + $0xf0] sm:$0xff] }
 0x39a   :  { %v1483_v8 = vpop.f32.mrf.mxu3  ;;  %3121 = vmatmul.f32.gmra.mxu0 %v3000_v10 }
 0x39b   :  { %v1563_v48 = vadd.f32 %v1483_v8, %v1209_v58  ;;  %v1144_v38 = vpop.f32.mrf.mxu2 }
 0x39c   :  { %v1214_v61 = vadd.f32 %v1144_v38, %v12089_v47  ;;  %v2295_v38 = vld [vmem:[#allocation2 + $0x12f] sm:$0xff]  ;;  %v12093_v47 = vld [vmem:[#allocation68_spill] sm:$0xff] }
 0x39d   :  { %v8660_v29 = vadd.f32 %v1837_v42, %v1563_v48  ;;  %v3001_v42 = vld [vmem:[#allocation2 + $0x111] sm:$0xff] }
 0x39f   :  { %12088 = vst [vmem:[#allocation56_spill] sm:$0xff] %v8660_v29  ;;  %2758 = vmatmul.f32.gmra.mxu3 %v2643_v22  ;;  %v1852_v16 = vpop.f32.mrf.mxu0  ;;  %2419 = vmatmul.f32.gmra.mxu2 %v2294_v46  ;;  %v2646_v46 = vld [vmem:[#allocation2 + $0x108] sm:$0xff] }
 0x3a2   :  { %v1486_v62 = vpop.f32.mrf.mxu3  ;;  %3124 = vmatmul.f32.gmra.mxu0 %v3001_v42 }
 0x3a3   :  { %v1564_v26 = vadd.f32 %v1486_v62, %v1210_v23  ;;  %v1147_v58 = vpop.f32.mrf.mxu2 }
 0x3a4   :  { %v1215_v48 = vadd.f32 %v1147_v58, %v12091_v53  ;;  %v2296_v58 = vld [vmem:[#allocation2 + $0x147] sm:$0xff] }
 0x3a5   :  { %v8663_v17 = vadd.f32 %v1840_v13, %v1564_v26  ;;  %v3002_v13 = vld [vmem:[#allocation2 + $0x129] sm:$0xff] }
 0x3a7   :  { %12090 = vst [vmem:[#allocation65_spill] sm:$0xff] %v8663_v17  ;;  %2761 = vmatmul.f32.gmra.mxu3 %v2644_v32  ;;  %v1855_v29 = vpop.f32.mrf.mxu0  ;;  %2422 = vmatmul.f32.gmra.mxu2 %v2295_v38 }
 0x3aa   :  { %v1489_v8 = vpop.f32.mrf.mxu3  ;;  %3127 = vmatmul.f32.gmra.mxu0 %v3002_v13 }
 0x3ab   :  { %v1565_v22 = vadd.f32 %v1489_v8, %v1211_v39  ;;  %v1150_v23 = vpop.f32.mrf.mxu2 }
 0x3ac   :  { %v1216_v26 = vadd.f32 %v1150_v23, %v12093_v47  ;;  %v2297_v23 = vld [vmem:[#allocation2 + $0x14f] sm:$0xff] }
 0x3ad   :  { %v8666_v10 = vadd.f32 %v1843_v2, %v1565_v22  ;;  %v3003_v2 = vld [vmem:[#allocation2 + $0x131] sm:$0xff] }
 0x3af   :  { %12092 = vst [vmem:[#allocation59_spill] sm:$0xff] %v8666_v10  ;;  %2764 = vmatmul.f32.gmra.mxu3 %v2645_v50  ;;  %v1858_v17 = vpop.f32.mrf.mxu0  ;;  %2425 = vmatmul.f32.gmra.mxu2 %v2296_v58  ;;  %v2647_v50 = vld [vmem:[#allocation2 + $0x110] sm:$0xff] }
 0x3b0   :  { %v2689_v10 = vld [vmem:[#allocation2 + $0x3f0] sm:$0xff] }
 0x3b2   :  { %v1492_v62 = vpop.f32.mrf.mxu3  ;;  %3130 = vmatmul.f32.gmra.mxu0 %v3003_v2 }
 0x3b3   :  { %v1566_v32 = vadd.f32 %v1492_v62, %v1212_v11  ;;  %v2378_v39 = vpop.f32.mrf.mxu2 }
 0x3b4   :  { %v2570_v53 = vadd.f32 %v2378_v39, %v8222_v56  ;;  %v2298_v56 = vld [vmem:[#allocation2 + $0x167] sm:$0xff] }
 0x3b5   :  { %v8669_v42 = vadd.f32 %v1846_v36, %v1566_v32  ;;  %v3004_v36 = vld [vmem:[#allocation2 + $0x149] sm:$0xff] }
 0x3b7   :  { %12094 = vst [vmem:[#allocation62_spill] sm:$0xff] %v8669_v42  ;;  %2767 = vmatmul.f32.gmra.mxu3 %v2646_v46  ;;  %v3086_v13 = vpop.f32.mrf.mxu0  ;;  %2428 = vmatmul.f32.gmra.mxu2 %v2297_v23  ;;  %v2648_v46 = vld [vmem:[#allocation2 + $0x128] sm:$0xff] }
 0x3ba   :  { %v1495_v8 = vpop.f32.mrf.mxu3  ;;  %3133 = vmatmul.f32.gmra.mxu0 %v3004_v36 }
 0x3bb   :  { %v1567_v22 = vadd.f32 %v1495_v8, %v1213_v3  ;;  %v2381_v11 = vpop.f32.mrf.mxu2 }
 0x3bc   :  { %v2571_v47 = vadd.f32 %v2381_v11, %v8232_v63  ;;  %v2299_v63 = vld [vmem:[#allocation2 + $0x16f] sm:$0xff] }
 0x3bd   :  { %v8672_v38 = vadd.f32 %v1849_v4, %v1567_v22  ;;  %v3005_v4 = vld [vmem:[#allocation2 + $0x151] sm:$0xff] }
 0x3bf   :  { %12095 = vst [vmem:[#allocation13_spill] sm:$0xff] %v8672_v38  ;;  %2770 = vmatmul.f32.gmra.mxu3 %v2647_v50  ;;  %v3089_v2 = vpop.f32.mrf.mxu0  ;;  %2431 = vmatmul.f32.gmra.mxu2 %v2298_v56  ;;  %v2649_v50 = vld [vmem:[#allocation2 + $0x130] sm:$0xff]  ;;  %v2336_v38 = vld [vmem:[#allocation2 + $0x407] sm:$0xff] }
 0x3c2   :  { %v1498_v62 = vpop.f32.mrf.mxu3  ;;  %3136 = vmatmul.f32.gmra.mxu0 %v3005_v4 }
 0x3c3   :  { %v1568_v32 = vadd.f32 %v1498_v62, %v1214_v61  ;;  %v2384_v3 = vpop.f32.mrf.mxu2 }
 0x3c4   :  { %v2572_v8 = vadd.f32 %v2384_v3, %v8242_v21  ;;  %v2300_v21 = vld [vmem:[#allocation2 + $0x187] sm:$0xff] }
 0x3c5   :  { %v8675_v58 = vadd.f32 %v1852_v16, %v1568_v32  ;;  %v3006_v16 = vld [vmem:[#allocation2 + $0x169] sm:$0xff] }
 0x3c7   :  { %12096 = vst [vmem:[#allocation15_spill] sm:$0xff] %v8675_v58  ;;  %2773 = vmatmul.f32.gmra.mxu3 %v2648_v46  ;;  %v3092_v36 = vpop.f32.mrf.mxu0  ;;  %2434 = vmatmul.f32.gmra.mxu2 %v2299_v63  ;;  %v2650_v46 = vld [vmem:[#allocation2 + $0x148] sm:$0xff] }
 0x3ca   :  { %v1501_v39 = vpop.f32.mrf.mxu3  ;;  %3139 = vmatmul.f32.gmra.mxu0 %v3006_v16 }
 0x3cb   :  { %v1569_v22 = vadd.f32 %v1501_v39, %v1215_v48  ;;  %v2387_v61 = vpop.f32.mrf.mxu2 }
 0x3cc   :  { %v2573_v62 = vadd.f32 %v2387_v61, %v8252_v35  ;;  %v2301_v35 = vld [vmem:[#allocation2 + $0x18f] sm:$0xff] }
 0x3cd   :  { %v8678_v23 = vadd.f32 %v1855_v29, %v1569_v22  ;;  %v3007_v29 = vld [vmem:[#allocation2 + $0x171] sm:$0xff] }
 0x3cf   :  { %12097 = vst [vmem:[#allocation14_spill] sm:$0xff] %v8678_v23  ;;  %2776 = vmatmul.f32.gmra.mxu3 %v2649_v50  ;;  %v3095_v4 = vpop.f32.mrf.mxu0  ;;  %2437 = vmatmul.f32.gmra.mxu2 %v2300_v21  ;;  %v2651_v50 = vld [vmem:[#allocation2 + $0x150] sm:$0xff] }
 0x3d0   :  { %v2685_v23 = vld [vmem:[#allocation2 + $0x3b0] sm:$0xff] }
 0x3d2   :  { %v1504_v11 = vpop.f32.mrf.mxu3  ;;  %3142 = vmatmul.f32.gmra.mxu0 %v3007_v29 }
 0x3d3   :  { %v1570_v32 = vadd.f32 %v1504_v11, %v1216_v26  ;;  %v2390_v48 = vpop.f32.mrf.mxu2 }
 0x3d4   :  { %v2574_v39 = vadd.f32 %v2390_v48, %v8262_v41  ;;  %v2302_v41 = vld [vmem:[#allocation2 + $0x1a7] sm:$0xff] }
 0x3d5   :  { %v8681_v56 = vadd.f32 %v1858_v17, %v1570_v32  ;;  %v3008_v17 = vld [vmem:[#allocation2 + $0x189] sm:$0xff] }
 0x3d7   :  { %12098 = vst [vmem:[#allocation16_spill] sm:$0xff] %v8681_v56  ;;  %2779 = vmatmul.f32.gmra.mxu3 %v2650_v46  ;;  %v3098_v16 = vpop.f32.mrf.mxu0  ;;  %2440 = vmatmul.f32.gmra.mxu2 %v2301_v35  ;;  %v2652_v46 = vld [vmem:[#allocation2 + $0x168] sm:$0xff] }
 0x3d8   :  { %v2684_v56 = vld [vmem:[#allocation2 + $0x3a8] sm:$0xff] }
 0x3da   :  { %v2732_v3 = vpop.f32.mrf.mxu3  ;;  %3145 = vmatmul.f32.gmra.mxu0 %v3008_v17 }
 0x3db   :  { %v2924_v22 = vadd.f32 %v2732_v3, %v2570_v53  ;;  %v2393_v26 = vpop.f32.mrf.mxu2  ;;  %v3009_v53 = vld [vmem:[#allocation2 + $0x191] sm:$0xff] }
 0x3dc   :  { %v2575_v11 = vadd.f32 %v2393_v26, %v8272_v34  ;;  %v2303_v34 = vld [vmem:[#allocation2 + $0x1af] sm:$0xff] }
 0x3dd   :  { %v8684_v63 = vadd.f32 %v3086_v13, %v2924_v22 }
 0x3df   :  { %12099 = vst [vmem:[#allocation17_spill] sm:$0xff] %v8684_v63  ;;  %2782 = vmatmul.f32.gmra.mxu3 %v2651_v50  ;;  %v3101_v29 = vpop.f32.mrf.mxu0  ;;  %2443 = vmatmul.f32.gmra.mxu2 %v2302_v41  ;;  %v2653_v50 = vld [vmem:[#allocation2 + $0x170] sm:$0xff] }
 0x3e2   :  { %v2735_v61 = vpop.f32.mrf.mxu3  ;;  %3148 = vmatmul.f32.gmra.mxu0 %v3009_v53 }
 0x3e3   :  { %v2925_v32 = vadd.f32 %v2735_v61, %v2571_v47  ;;  %v2396_v13 = vpop.f32.mrf.mxu2  ;;  %v3010_v47 = vld [vmem:[#allocation2 + $0x1a9] sm:$0xff] }
 0x3e4   :  { %v2576_v3 = vadd.f32 %v2396_v13, %v8282_v18  ;;  %v2304_v18 = vld [vmem:[#allocation2 + $0x1c7] sm:$0xff] }
 0x3e5   :  { %v8687_v21 = vadd.f32 %v3089_v2, %v2925_v32 }
 0x3e7   :  { %12100 = vst [vmem:[#allocation18_spill] sm:$0xff] %v8687_v21  ;;  %2785 = vmatmul.f32.gmra.mxu3 %v2652_v46  ;;  %v3104_v17 = vpop.f32.mrf.mxu0  ;;  %2446 = vmatmul.f32.gmra.mxu2 %v2303_v34  ;;  %v2654_v46 = vld [vmem:[#allocation2 + $0x188] sm:$0xff] }
 0x3ea   :  { %v2738_v48 = vpop.f32.mrf.mxu3  ;;  %3151 = vmatmul.f32.gmra.mxu0 %v3010_v47 }
 0x3eb   :  { %v2926_v22 = vadd.f32 %v2738_v48, %v2572_v8  ;;  %v2399_v2 = vpop.f32.mrf.mxu2  ;;  %v3011_v8 = vld [vmem:[#allocation2 + $0x1b1] sm:$0xff] }
 0x3ec   :  { %v2577_v61 = vadd.f32 %v2399_v2, %v8292_v59  ;;  %v2305_v59 = vld [vmem:[#allocation2 + $0x1cf] sm:$0xff] }
 0x3ed   :  { %v8690_v35 = vadd.f32 %v3092_v36, %v2926_v22 }
 0x3ef   :  { %2788 = vmatmul.f32.gmra.mxu3 %v2653_v50  ;;  %v3107_v53 = vpop.f32.mrf.mxu0  ;;  %2449 = vmatmul.f32.gmra.mxu2 %v2304_v18  ;;  %v2655_v50 = vld [vmem:[#allocation2 + $0x190] sm:$0xff] }
 0x3f2   :  { %v2741_v26 = vpop.f32.mrf.mxu3  ;;  %3154 = vmatmul.f32.gmra.mxu0 %v3011_v8 }
 0x3f3   :  { %v2927_v32 = vadd.f32 %v2741_v26, %v2573_v62  ;;  %v2402_v36 = vpop.f32.mrf.mxu2  ;;  %v3012_v62 = vld [vmem:[#allocation2 + $0x1c9] sm:$0xff] }
 0x3f4   :  { %v2578_v48 = vadd.f32 %v2402_v36, %v8302_v51  ;;  %v2306_v51 = vld [vmem:[#allocation2 + $0x1e7] sm:$0xff] }
 0x3f5   :  { %v8693_v41 = vadd.f32 %v3095_v4, %v2927_v32 }
 0x3f7   :  { %12101 = vst [vmem:[#allocation19_spill] sm:$0xff] %v8693_v41  ;;  %2791 = vmatmul.f32.gmra.mxu3 %v2654_v46  ;;  %v3110_v47 = vpop.f32.mrf.mxu0  ;;  %2452 = vmatmul.f32.gmra.mxu2 %v2305_v59  ;;  %v2656_v46 = vld [vmem:[#allocation2 + $0x1a8] sm:$0xff] }
 0x3fa   :  { %v2744_v13 = vpop.f32.mrf.mxu3  ;;  %3157 = vmatmul.f32.gmra.mxu0 %v3012_v62 }
 0x3fb   :  { %v2928_v22 = vadd.f32 %v2744_v13, %v2574_v39  ;;  %v2405_v4 = vpop.f32.mrf.mxu2  ;;  %v3013_v39 = vld [vmem:[#allocation2 + $0x1d1] sm:$0xff] }
 0x3fc   :  { %v2579_v26 = vadd.f32 %v2405_v4, %v8312_v40  ;;  %v2307_v40 = vld [vmem:[#allocation2 + $0x1ef] sm:$0xff] }
 0x3fd   :  { %v8696_v34 = vadd.f32 %v3098_v16, %v2928_v22 }
 0x3ff   :  { %12102 = vst [vmem:[#allocation20_spill] sm:$0xff] %v8696_v34  ;;  %2794 = vmatmul.f32.gmra.mxu3 %v2655_v50  ;;  %v3113_v8 = vpop.f32.mrf.mxu0  ;;  %2455 = vmatmul.f32.gmra.mxu2 %v2306_v51  ;;  %v2657_v50 = vld [vmem:[#allocation2 + $0x1b0] sm:$0xff] }
 0x402   :  { %v2747_v2 = vpop.f32.mrf.mxu3  ;;  %3160 = vmatmul.f32.gmra.mxu0 %v3013_v39 }
 0x403   :  { %v2929_v32 = vadd.f32 %v2747_v2, %v2575_v11  ;;  %v2408_v16 = vpop.f32.mrf.mxu2  ;;  %v3014_v11 = vld [vmem:[#allocation2 + $0x1e9] sm:$0xff] }
 0x404   :  { %v2580_v13 = vadd.f32 %v2408_v16, %v8323_v25  ;;  %v2308_v25 = vld [vmem:[#allocation2 + $0x207] sm:$0xff] }
 0x405   :  { %v8699_v18 = vadd.f32 %v3101_v29, %v2929_v32 }
 0x407   :  { %12103 = vst [vmem:[#allocation21_spill] sm:$0xff] %v8699_v18  ;;  %2797 = vmatmul.f32.gmra.mxu3 %v2656_v46  ;;  %v3116_v62 = vpop.f32.mrf.mxu0  ;;  %2458 = vmatmul.f32.gmra.mxu2 %v2307_v40  ;;  %v2658_v46 = vld [vmem:[#allocation2 + $0x1c8] sm:$0xff] }
 0x40a   :  { %v2750_v36 = vpop.f32.mrf.mxu3  ;;  %3163 = vmatmul.f32.gmra.mxu0 %v3014_v11 }
 0x40b   :  { %v2930_v22 = vadd.f32 %v2750_v36, %v2576_v3  ;;  %v2411_v29 = vpop.f32.mrf.mxu2  ;;  %v3015_v3 = vld [vmem:[#allocation2 + $0x1f1] sm:$0xff] }
 0x40c   :  { %v2581_v2 = vadd.f32 %v2411_v29, %v8334_v7  ;;  %v2309_v7 = vld [vmem:[#allocation2 + $0x20f] sm:$0xff] }
 0x40d   :  { %v8702_v59 = vadd.f32 %v3104_v17, %v2930_v22 }
 0x40f   :  { %2800 = vmatmul.f32.gmra.mxu3 %v2657_v50  ;;  %v3119_v39 = vpop.f32.mrf.mxu0  ;;  %2461 = vmatmul.f32.gmra.mxu2 %v2308_v25  ;;  %v2659_v50 = vld [vmem:[#allocation2 + $0x1d0] sm:$0xff] }
 0x412   :  { %v2753_v4 = vpop.f32.mrf.mxu3  ;;  %3166 = vmatmul.f32.gmra.mxu0 %v3015_v3 }
 0x413   :  { %v2931_v32 = vadd.f32 %v2753_v4, %v2577_v61  ;;  %v2414_v17 = vpop.f32.mrf.mxu2  ;;  %v3016_v61 = vld [vmem:[#allocation2 + $0x209] sm:$0xff] }
 0x414   :  { %v2582_v36 = vadd.f32 %v2414_v17, %v8345_v31  ;;  %v2310_v31 = vld [vmem:[#allocation2 + $0x227] sm:$0xff] }
 0x415   :  { %v8705_v51 = vadd.f32 %v3107_v53, %v2931_v32 }
 0x417   :  { %12104 = vst [vmem:[#allocation22_spill] sm:$0xff] %v8705_v51  ;;  %2803 = vmatmul.f32.gmra.mxu3 %v2658_v46  ;;  %v3122_v11 = vpop.f32.mrf.mxu0  ;;  %2464 = vmatmul.f32.gmra.mxu2 %v2309_v7  ;;  %v2660_v46 = vld [vmem:[#allocation2 + $0x1e8] sm:$0xff] }
 0x41a   :  { %v2756_v16 = vpop.f32.mrf.mxu3  ;;  %3169 = vmatmul.f32.gmra.mxu0 %v3016_v61 }
 0x41b   :  { %v2932_v22 = vadd.f32 %v2756_v16, %v2578_v48  ;;  %v2417_v53 = vpop.f32.mrf.mxu2  ;;  %v3017_v48 = vld [vmem:[#allocation2 + $0x211] sm:$0xff] }
 0x41c   :  { %v2583_v4 = vadd.f32 %v2417_v53, %v8356_v19  ;;  %v2311_v19 = vld [vmem:[#allocation2 + $0x22f] sm:$0xff] }
 0x41d   :  { %v8708_v40 = vadd.f32 %v3110_v47, %v2932_v22 }
 0x41f   :  { %12105 = vst [vmem:[#allocation23_spill] sm:$0xff] %v8708_v40  ;;  %2806 = vmatmul.f32.gmra.mxu3 %v2659_v50  ;;  %v3125_v3 = vpop.f32.mrf.mxu0  ;;  %2467 = vmatmul.f32.gmra.mxu2 %v2310_v31  ;;  %v2661_v50 = vld [vmem:[#allocation2 + $0x1f0] sm:$0xff] }
 0x422   :  { %v2759_v29 = vpop.f32.mrf.mxu3  ;;  %3172 = vmatmul.f32.gmra.mxu0 %v3017_v48 }
 0x423   :  { %v2933_v32 = vadd.f32 %v2759_v29, %v2579_v26  ;;  %v2420_v47 = vpop.f32.mrf.mxu2  ;;  %v3018_v26 = vld [vmem:[#allocation2 + $0x229] sm:$0xff] }
 0x424   :  { %v2584_v16 = vadd.f32 %v2420_v47, %v8366_v43  ;;  %v2312_v43 = vld [vmem:[#allocation2 + $0x287] sm:$0xff] }
 0x425   :  { %v8711_v25 = vadd.f32 %v3113_v8, %v2933_v32 }
 0x427   :  { %12106 = vst [vmem:[#allocation24_spill] sm:$0xff] %v8711_v25  ;;  %2809 = vmatmul.f32.gmra.mxu3 %v2660_v46  ;;  %v3128_v61 = vpop.f32.mrf.mxu0  ;;  %2470 = vmatmul.f32.gmra.mxu2 %v2311_v19  ;;  %v2662_v46 = vld [vmem:[#allocation2 + $0x208] sm:$0xff] }
 0x42a   :  { %v2762_v17 = vpop.f32.mrf.mxu3  ;;  %3175 = vmatmul.f32.gmra.mxu0 %v3018_v26 }
 0x42b   :  { %v2934_v22 = vadd.f32 %v2762_v17, %v2580_v13  ;;  %v2423_v8 = vpop.f32.mrf.mxu2  ;;  %v3019_v13 = vld [vmem:[#allocation2 + $0x231] sm:$0xff] }
 0x42c   :  { %v2585_v29 = vadd.f32 %v2423_v8, %v8376_v1  ;;  %v2313_v1 = vld [vmem:[#allocation2 + $0x28f] sm:$0xff] }
 0x42d   :  { %v8714_v7 = vadd.f32 %v3116_v62, %v2934_v22 }
 0x42f   :  { %12107 = vst [vmem:[#allocation25_spill] sm:$0xff] %v8714_v7  ;;  %2812 = vmatmul.f32.gmra.mxu3 %v2661_v50  ;;  %v3131_v48 = vpop.f32.mrf.mxu0  ;;  %2473 = vmatmul.f32.gmra.mxu2 %v2312_v43  ;;  %v2663_v50 = vld [vmem:[#allocation2 + $0x210] sm:$0xff] }
 0x432   :  { %v2765_v53 = vpop.f32.mrf.mxu3  ;;  %3178 = vmatmul.f32.gmra.mxu0 %v3019_v13  ;;  %v2314_v13 = vld [vmem:[#allocation2 + $0x2a7] sm:$0xff] }
 0x433   :  { %v2935_v32 = vadd.f32 %v2765_v53, %v2581_v2  ;;  %v2426_v62 = vpop.f32.mrf.mxu2  ;;  %v3020_v2 = vld [vmem:[#allocation2 + $0x289] sm:$0xff] }
 0x434   :  { %v2586_v17 = vadd.f32 %v2426_v62, %v8386_v24  ;;  %v8725_v24 = vld [vmem:[#allocation2 + $0x248] sm:$0xff] }
 0x435   :  { %v8717_v31 = vadd.f32 %v3119_v39, %v2935_v32 }
 0x437   :  { %12108 = vst [vmem:[#allocation26_spill] sm:$0xff] %v8717_v31  ;;  %2815 = vmatmul.f32.gmra.mxu3 %v2662_v46  ;;  %v3134_v26 = vpop.f32.mrf.mxu0  ;;  %2476 = vmatmul.f32.gmra.mxu2 %v2313_v1 }
 0x43a   :  { %v2768_v47 = vpop.f32.mrf.mxu3  ;;  %3181 = vmatmul.f32.gmra.mxu0 %v3020_v2 }
 0x43b   :  { %v2936_v22 = vadd.f32 %v2768_v47, %v2582_v36  ;;  %v2429_v39 = vpop.f32.mrf.mxu2  ;;  %v3021_v36 = vld [vmem:[#allocation2 + $0x291] sm:$0xff] }
 0x43c   :  { %v2587_v53 = vadd.f32 %v2429_v39, %v8396_v55 }
 0x43d   :  { %v8720_v19 = vadd.f32 %v3122_v11, %v2936_v22 }
 0x43f   :  { %2818 = vmatmul.f32.gmra.mxu3 %v2663_v50  ;;  %v3137_v43 = vpop.f32.mrf.mxu0  ;;  %2479 = vmatmul.f32.gmra.mxu2 %v2314_v13 }
 0x442   :  { %v2771_v8 = vpop.f32.mrf.mxu3  ;;  %3184 = vmatmul.f32.gmra.mxu0 %v3021_v36  ;;  %v2316_v36 = vld [vmem:[#allocation2 + $0x2c7] sm:$0xff] }
 0x443   :  { %v2937_v32 = vadd.f32 %v2771_v8, %v2583_v4  ;;  %v2432_v62 = vpop.f32.mrf.mxu2  ;;  %v2315_v4 = vld [vmem:[#allocation2 + $0x2af] sm:$0xff] }
 0x444   :  { %v2588_v22 = vadd.f32 %v2432_v62, %v8406_v15  ;;  %v3023_v15 = vld [vmem:[#allocation2 + $0x2b1] sm:$0xff] }
 0x445   :  { %v8723_v46 = vadd.f32 %v3125_v3, %v2937_v32  ;;  %v3022_v3 = vld [vmem:[#allocation2 + $0x2a9] sm:$0xff] }
 0x446   :  { %v2666_v32 = vld [vmem:[#allocation2 + $0x288] sm:$0xff] }
 0x447   :  { %12109 = vst [vmem:[#allocation27_spill] sm:$0xff] %v8723_v46  ;;  %2821 = vmatmul.f32.gmra.mxu3 %v8725_v24  ;;  %v3140_v55 = vpop.f32.mrf.mxu0  ;;  %2482 = vmatmul.f32.gmra.mxu2 %v2315_v4  ;;  %v2667_v4 = vld [vmem:[#allocation2 + $0x290] sm:$0xff] }
 0x44a   :  { %v2774_v11 = vpop.f32.mrf.mxu3  ;;  %3187 = vmatmul.f32.gmra.mxu0 %v3022_v3 }
 0x44b   :  { %v2938_v47 = vadd.f32 %v2774_v11, %v2584_v16  ;;  %v2435_v2 = vpop.f32.mrf.mxu2 }
 0x44c   :  { %v2589_v8 = vadd.f32 %v2435_v2, %v8416_v60  ;;  %v3024_v60 = vld [vmem:[#allocation2 + $0x2c9] sm:$0xff] }
 0x44d   :  { %v8729_v50 = vadd.f32 %v3128_v61, %v2938_v47 }
 0x44f   :  { %12110 = vst [vmem:[#allocation28_spill] sm:$0xff] %v8729_v50  ;;  %2824 = vmatmul.f32.gmra.mxu3 %v8725_v24  ;;  %v3143_v16 = vpop.f32.mrf.mxu0  ;;  %2485 = vmatmul.f32.gmra.mxu2 %v2316_v36  ;;  %v2668_v36 = vld [vmem:[#allocation2 + $0x2a8] sm:$0xff] }
 0x452   :  { %v2777_v1 = vpop.f32.mrf.mxu3  ;;  %3190 = vmatmul.f32.gmra.mxu0 %v3023_v15 }
 0x453   :  { %v2939_v39 = vadd.f32 %v2777_v1, %v2585_v29  ;;  %v2438_v11 = vpop.f32.mrf.mxu2  ;;  %v2317_v1 = vld [vmem:[#allocation2 + $0x2cf] sm:$0xff] }
 0x454   :  { %v2590_v47 = vadd.f32 %v2438_v11, %v8426_v0  ;;  %v3025_v0 = vld [vmem:[#allocation2 + $0x2d1] sm:$0xff] }
 0x455   :  { %v8733_v13 = vadd.f32 %v3131_v48, %v2939_v39 }
 0x457   :  { %12111 = vst [vmem:[#allocation29_spill] sm:$0xff] %v8733_v13  ;;  %2827 = vmatmul.f32.gmra.mxu3 %v2666_v32  ;;  %v3146_v29 = vpop.f32.mrf.mxu0  ;;  %2488 = vmatmul.f32.gmra.mxu2 %v2317_v1  ;;  %v2669_v1 = vld [vmem:[#allocation2 + $0x2b0] sm:$0xff] }
 0x45a   :  { %v2780_v61 = vpop.f32.mrf.mxu3  ;;  %3193 = vmatmul.f32.gmra.mxu0 %v3024_v60 }
 0x45b   :  { %v2940_v62 = vadd.f32 %v2780_v61, %v2586_v17  ;;  %v2441_v2 = vpop.f32.mrf.mxu2  ;;  %v2318_v61 = vld [vmem:[#allocation2 + $0x2e7] sm:$0xff] }
 0x45c   :  { %v2591_v32 = vadd.f32 %v2441_v2, %v8436_v37  ;;  %v4046_v37 = vld [vmem:[#allocation8 + $0xf8] sm:$0xff] }
 0x45d   :  { %v8736_v3 = vadd.f32 %v3134_v26, %v2940_v62  ;;  %4047 = vmatpush.msra.mxu1 %v4046_v37  ;;  %v2671_v37 = vld [vmem:[#allocation2 + $0x2d0] sm:$0xff] }
 0x45f   :  { %12112 = vst [vmem:[#allocation30_spill] sm:$0xff] %v8736_v3  ;;  %2830 = vmatmul.f32.gmra.mxu3 %v2667_v4  ;;  %v3149_v17 = vpop.f32.mrf.mxu0  ;;  %2491 = vmatmul.f32.gmra.mxu2 %v2318_v61 }
 0x462   :  { %v2783_v48 = vpop.f32.mrf.mxu3  ;;  %3196 = vmatmul.f32.gmra.mxu0 %v3025_v0  ;;  %v2670_v0 = vld [vmem:[#allocation2 + $0x2c8] sm:$0xff] }
 0x463   :  { %v2941_v39 = vadd.f32 %v2783_v48, %v2587_v53  ;;  %v2444_v11 = vpop.f32.mrf.mxu2  ;;  %v2319_v48 = vld [vmem:[#allocation2 + $0x2ef] sm:$0xff] }
 0x464   :  { %v2592_v4 = vadd.f32 %v2444_v11, %v8446_v54 }
 0x465   :  { %v8739_v15 = vadd.f32 %v3137_v43, %v2941_v39  ;;  %v3026_v43 = vld [vmem:[#allocation2 + $0x2e9] sm:$0xff] }
 0x467   :  { %2833 = vmatmul.f32.gmra.mxu3 %v2668_v36  ;;  %v3152_v53 = vpop.f32.mrf.mxu0  ;;  %2494 = vmatmul.f32.gmra.mxu2 %v2319_v48 }
 0x46a   :  { %v2786_v26 = vpop.f32.mrf.mxu3  ;;  %3199 = vmatmul.f32.gmra.mxu0 %v3026_v43 }
 0x46b   :  { %v2942_v62 = vadd.f32 %v2786_v26, %v2588_v22  ;;  %v2447_v39 = vpop.f32.mrf.mxu2  ;;  %v2320_v26 = vld [vmem:[#allocation2 + $0x307] sm:$0xff] }
 0x46c   :  { %v2593_v61 = vadd.f32 %v2447_v39, %v8456_v52  ;;  %v3028_v52 = vld [vmem:[#allocation2 + $0x309] sm:$0xff] }
 0x46d   :  { %v8742_v60 = vadd.f32 %v3140_v55, %v2942_v62  ;;  %v3027_v55 = vld [vmem:[#allocation2 + $0x2f1] sm:$0xff] }
 0x46f   :  { %12113 = vst [vmem:[#allocation31_spill] sm:$0xff] %v8742_v60  ;;  %2836 = vmatmul.f32.gmra.mxu3 %v2669_v1  ;;  %v3155_v54 = vpop.f32.mrf.mxu0  ;;  %2497 = vmatmul.f32.gmra.mxu2 %v2320_v26  ;;  %v2672_v26 = vld [vmem:[#allocation2 + $0x2e8] sm:$0xff] }
 0x472   :  { %v2789_v2 = vpop.f32.mrf.mxu3  ;;  %3202 = vmatmul.f32.gmra.mxu0 %v3027_v55 }
 0x473   :  { %v2943_v36 = vadd.f32 %v2789_v2, %v2589_v8  ;;  %v2450_v62 = vpop.f32.mrf.mxu2  ;;  %v2321_v2 = vld [vmem:[#allocation2 + $0x30f] sm:$0xff] }
 0x474   :  { %v2594_v48 = vadd.f32 %v2450_v62, %v8466_v12  ;;  %v3029_v12 = vld [vmem:[#allocation2 + $0x311] sm:$0xff] }
 0x475   :  { %v8745_v22 = vadd.f32 %v3143_v16, %v2943_v36 }
 0x477   :  { %12114 = vst [vmem:[#allocation33_spill] sm:$0xff] %v8745_v22  ;;  %2839 = vmatmul.f32.gmra.mxu3 %v2670_v0  ;;  %v3158_v8 = vpop.f32.mrf.mxu0  ;;  %2500 = vmatmul.f32.gmra.mxu2 %v2321_v2  ;;  %v2673_v2 = vld [vmem:[#allocation2 + $0x2f0] sm:$0xff] }
 0x47a   :  { %v2792_v11 = vpop.f32.mrf.mxu3  ;;  %3205 = vmatmul.f32.gmra.mxu0 %v3028_v52 }
 0x47b   :  { %v2944_v1 = vadd.f32 %v2792_v11, %v2590_v47  ;;  %v2453_v39 = vpop.f32.mrf.mxu2  ;;  %v2322_v11 = vld [vmem:[#allocation2 + $0x327] sm:$0xff] }
 0x47c   :  { %v2595_v0 = vadd.f32 %v2453_v39, %v8476_v44  ;;  %v4045_v44 = vld [vmem:[#allocation8 + $0xf0] sm:$0xff] }
 0x47d   :  { %v8748_v43 = vadd.f32 %v3146_v29, %v2944_v1  ;;  %4048 = vmatpush.msra.mxu1 %v4045_v44  ;;  %v2675_v44 = vld [vmem:[#allocation2 + $0x310] sm:$0xff] }
 0x47f   :  { %12115 = vst [vmem:[#allocation35_spill] sm:$0xff] %v8748_v43  ;;  %2842 = vmatmul.f32.gmra.mxu3 %v2671_v37  ;;  %v3161_v47 = vpop.f32.mrf.mxu0  ;;  %2503 = vmatmul.f32.gmra.mxu2 %v2322_v11 }
 0x482   :  { %v2795_v16 = vpop.f32.mrf.mxu3  ;;  %3208 = vmatmul.f32.gmra.mxu0 %v3029_v12  ;;  %v2674_v12 = vld [vmem:[#allocation2 + $0x308] sm:$0xff] }
 0x483   :  { %v2945_v36 = vadd.f32 %v2795_v16, %v2591_v32  ;;  %v2456_v62 = vpop.f32.mrf.mxu2  ;;  %v2323_v16 = vld [vmem:[#allocation2 + $0x32f] sm:$0xff] }
 0x484   :  { %v2596_v37 = vadd.f32 %v2456_v62, %v8486_v45 }
 0x485   :  { %v8751_v55 = vadd.f32 %v3149_v17, %v2945_v36  ;;  %v3030_v17 = vld [vmem:[#allocation2 + $0x329] sm:$0xff] }
 0x487   :  { %12116 = vst [vmem:[#allocation37_spill] sm:$0xff] %v8751_v55  ;;  %2845 = vmatmul.f32.gmra.mxu3 %v2672_v26  ;;  %v3164_v32 = vpop.f32.mrf.mxu0  ;;  %2506 = vmatmul.f32.gmra.mxu2 %v2323_v16 }
 0x48a   :  { %v2798_v29 = vpop.f32.mrf.mxu3  ;;  %3211 = vmatmul.f32.gmra.mxu0 %v3030_v17 }
 0x48b   :  { %v2946_v1 = vadd.f32 %v2798_v29, %v2592_v4  ;;  %v2459_v36 = vpop.f32.mrf.mxu2  ;;  %v2324_v29 = vld [vmem:[#allocation2 + $0x347] sm:$0xff] }
 0x48c   :  { %v2597_v11 = vadd.f32 %v2459_v36, %v8494_v57  ;;  %v3032_v57 = vld [vmem:[#allocation2 + $0x349] sm:$0xff] }
 0x48d   :  { %v8754_v52 = vadd.f32 %v3152_v53, %v2946_v1  ;;  %v3031_v53 = vld [vmem:[#allocation2 + $0x331] sm:$0xff] }
 0x48f   :  { %12117 = vst [vmem:[#allocation40_spill] sm:$0xff] %v8754_v52  ;;  %2848 = vmatmul.f32.gmra.mxu3 %v2673_v2  ;;  %v3167_v45 = vpop.f32.mrf.mxu0  ;;  %2509 = vmatmul.f32.gmra.mxu2 %v2324_v29  ;;  %v2676_v29 = vld [vmem:[#allocation2 + $0x328] sm:$0xff] }
 0x492   :  { %v2801_v39 = vpop.f32.mrf.mxu3  ;;  %3214 = vmatmul.f32.gmra.mxu0 %v3031_v53 }
 0x493   :  { %v2947_v26 = vadd.f32 %v2801_v39, %v2593_v61  ;;  %v2462_v1 = vpop.f32.mrf.mxu2  ;;  %v2325_v39 = vld [vmem:[#allocation2 + $0x34f] sm:$0xff] }
 0x494   :  { %v2598_v16 = vadd.f32 %v2462_v1, %v8504_v9  ;;  %v3033_v9 = vld [vmem:[#allocation2 + $0x351] sm:$0xff] }
 0x495   :  { %v8757_v4 = vadd.f32 %v3155_v54, %v2947_v26 }
 0x497   :  { %12118 = vst [vmem:[#allocation43_spill] sm:$0xff] %v8757_v4  ;;  %2851 = vmatmul.f32.gmra.mxu3 %v2674_v12  ;;  %v3170_v61 = vpop.f32.mrf.mxu0  ;;  %2512 = vmatmul.f32.gmra.mxu2 %v2325_v39  ;;  %v2677_v39 = vld [vmem:[#allocation2 + $0x330] sm:$0xff] }
 0x49a   :  { %v2804_v62 = vpop.f32.mrf.mxu3  ;;  %3217 = vmatmul.f32.gmra.mxu0 %v3032_v57 }
 0x49b   :  { %v2948_v2 = vadd.f32 %v2804_v62, %v2594_v48  ;;  %v2465_v36 = vpop.f32.mrf.mxu2  ;;  %v2326_v62 = vld [vmem:[#allocation2 + $0x367] sm:$0xff] }
 0x49c   :  { %v2599_v12 = vadd.f32 %v2465_v36, %v8514_v14  ;;  %v4044_v14 = vld [vmem:[#allocation8 + $0xe8] sm:$0xff] }
 0x49d   :  { %v8760_v17 = vadd.f32 %v3158_v8, %v2948_v2  ;;  %4049 = vmatpush.msra.mxu1 %v4044_v14  ;;  %v2679_v14 = vld [vmem:[#allocation2 + $0x350] sm:$0xff] }
 0x49f   :  { %12119 = vst [vmem:[#allocation46_spill] sm:$0xff] %v8760_v17  ;;  %2854 = vmatmul.f32.gmra.mxu3 %v2675_v44  ;;  %v3173_v48 = vpop.f32.mrf.mxu0  ;;  %2515 = vmatmul.f32.gmra.mxu2 %v2326_v62 }
 0x4a2   :  { %v2807_v54 = vpop.f32.mrf.mxu3  ;;  %3220 = vmatmul.f32.gmra.mxu0 %v3033_v9  ;;  %v2678_v9 = vld [vmem:[#allocation2 + $0x348] sm:$0xff] }
 0x4a3   :  { %v2949_v26 = vadd.f32 %v2807_v54, %v2595_v0  ;;  %v2468_v1 = vpop.f32.mrf.mxu2  ;;  %v2327_v54 = vld [vmem:[#allocation2 + $0x36f] sm:$0xff] }
 0x4a4   :  { %v2600_v44 = vadd.f32 %v2468_v1, %v8523_v28 }
 0x4a5   :  { %v8763_v53 = vadd.f32 %v3161_v47, %v2949_v26  ;;  %v3034_v47 = vld [vmem:[#allocation2 + $0x369] sm:$0xff] }
 0x4a7   :  { %12120 = vst [vmem:[#allocation49_spill] sm:$0xff] %v8763_v53  ;;  %2857 = vmatmul.f32.gmra.mxu3 %v2676_v29  ;;  %v3176_v0 = vpop.f32.mrf.mxu0  ;;  %2518 = vmatmul.f32.gmra.mxu2 %v2327_v54 }
 0x4aa   :  { %v2810_v8 = vpop.f32.mrf.mxu3  ;;  %3223 = vmatmul.f32.gmra.mxu0 %v3034_v47 }
 0x4ab   :  { %v2950_v2 = vadd.f32 %v2810_v8, %v2596_v37  ;;  %v2471_v26 = vpop.f32.mrf.mxu2  ;;  %v2328_v8 = vld [vmem:[#allocation2 + $0x387] sm:$0xff] }
 0x4ac   :  { %v2601_v62 = vadd.f32 %v2471_v26, %v8532_v33  ;;  %v3036_v33 = vld [vmem:[#allocation2 + $0x389] sm:$0xff] }
 0x4ad   :  { %v8766_v57 = vadd.f32 %v3164_v32, %v2950_v2  ;;  %v3035_v32 = vld [vmem:[#allocation2 + $0x371] sm:$0xff] }
 0x4af   :  { %12121 = vst [vmem:[#allocation52_spill] sm:$0xff] %v8766_v57  ;;  %2860 = vmatmul.f32.gmra.mxu3 %v2677_v39  ;;  %v3179_v28 = vpop.f32.mrf.mxu0  ;;  %2521 = vmatmul.f32.gmra.mxu2 %v2328_v8  ;;  %v2680_v8 = vld [vmem:[#allocation2 + $0x368] sm:$0xff] }
 0x4b2   :  { %v2813_v36 = vpop.f32.mrf.mxu3  ;;  %3226 = vmatmul.f32.gmra.mxu0 %v3035_v32 }
 0x4b3   :  { %v2951_v29 = vadd.f32 %v2813_v36, %v2597_v11  ;;  %v2474_v2 = vpop.f32.mrf.mxu2  ;;  %v2329_v36 = vld [vmem:[#allocation2 + $0x38f] sm:$0xff] }
 0x4b4   :  { %v2602_v54 = vadd.f32 %v2474_v2, %v8541_v27  ;;  %v3037_v27 = vld [vmem:[#allocation2 + $0x391] sm:$0xff] }
 0x4b5   :  { %v8769_v37 = vadd.f32 %v3167_v45, %v2951_v29 }
 0x4b7   :  { %12122 = vst [vmem:[#allocation55_spill] sm:$0xff] %v8769_v37  ;;  %2863 = vmatmul.f32.gmra.mxu3 %v2678_v9  ;;  %v3182_v11 = vpop.f32.mrf.mxu0  ;;  %2524 = vmatmul.f32.gmra.mxu2 %v2329_v36  ;;  %v2681_v36 = vld [vmem:[#allocation2 + $0x370] sm:$0xff] }
 0x4ba   :  { %v2816_v1 = vpop.f32.mrf.mxu3  ;;  %3229 = vmatmul.f32.gmra.mxu0 %v3036_v33 }
 0x4bb   :  { %v2952_v39 = vadd.f32 %v2816_v1, %v2598_v16  ;;  %v2477_v26 = vpop.f32.mrf.mxu2  ;;  %v2330_v1 = vld [vmem:[#allocation2 + $0x3a7] sm:$0xff] }
 0x4bc   :  { %v2603_v9 = vadd.f32 %v2477_v26, %v8550_v20  ;;  %v4043_v20 = vld [vmem:[#allocation8 + $0xe0] sm:$0xff] }
 0x4bd   :  { %v8772_v47 = vadd.f32 %v3170_v61, %v2952_v39  ;;  %4050 = vmatpush.msra.mxu1 %v4043_v20  ;;  %v2683_v20 = vld [vmem:[#allocation2 + $0x390] sm:$0xff] }
 0x4bf   :  { %12123 = vst [vmem:[#allocation58_spill] sm:$0xff] %v8772_v47  ;;  %2866 = vmatmul.f32.gmra.mxu3 %v2679_v14  ;;  %v3185_v16 = vpop.f32.mrf.mxu0  ;;  %2527 = vmatmul.f32.gmra.mxu2 %v2330_v1 }
 0x4c2   :  { %v2819_v45 = vpop.f32.mrf.mxu3  ;;  %3232 = vmatmul.f32.gmra.mxu0 %v3037_v27  ;;  %v2682_v27 = vld [vmem:[#allocation2 + $0x388] sm:$0xff] }
 0x4c3   :  { %v2953_v29 = vadd.f32 %v2819_v45, %v2599_v12  ;;  %v2480_v2 = vpop.f32.mrf.mxu2  ;;  %v2331_v45 = vld [vmem:[#allocation2 + $0x3af] sm:$0xff] }
 0x4c4   :  { %v2604_v14 = vadd.f32 %v2480_v2, %v8559_v6 }
 0x4c5   :  { %v8775_v32 = vadd.f32 %v3173_v48, %v2953_v29  ;;  %v3038_v48 = vld [vmem:[#allocation2 + $0x3a9] sm:$0xff] }
 0x4c7   :  { %12124 = vst [vmem:[#allocation61_spill] sm:$0xff] %v8775_v32  ;;  %2869 = vmatmul.f32.gmra.mxu3 %v2680_v8  ;;  %v3188_v12 = vpop.f32.mrf.mxu0  ;;  %2530 = vmatmul.f32.gmra.mxu2 %v2331_v45 }
 0x4ca   :  { %v2822_v61 = vpop.f32.mrf.mxu3  ;;  %3235 = vmatmul.f32.gmra.mxu0 %v3038_v48 }
 0x4cb   :  { %v2954_v39 = vadd.f32 %v2822_v61, %v2600_v44  ;;  %v2483_v29 = vpop.f32.mrf.mxu2  ;;  %v2332_v61 = vld [vmem:[#allocation2 + $0x3c7] sm:$0xff] }
 0x4cc   :  { %v2605_v1 = vadd.f32 %v2483_v29, %v8568_v49  ;;  %v3040_v49 = vld [vmem:[#allocation2 + $0x3c9] sm:$0xff] }
 0x4cd   :  { %v8778_v33 = vadd.f32 %v3176_v0, %v2954_v39  ;;  %v3039_v0 = vld [vmem:[#allocation2 + $0x3b1] sm:$0xff] }
 0x4cf   :  { %12125 = vst [vmem:[#allocation64_spill] sm:$0xff] %v8778_v33  ;;  %2872 = vmatmul.f32.gmra.mxu3 %v2681_v36  ;;  %v3191_v6 = vpop.f32.mrf.mxu0  ;;  %2533 = vmatmul.f32.gmra.mxu2 %v2332_v61  ;;  %v12127_v61 = vld [vmem:[#allocation32_spill] sm:$0xff] }
 0x4d2   :  { %v2825_v26 = vpop.f32.mrf.mxu3  ;;  %3238 = vmatmul.f32.gmra.mxu0 %v3039_v0 }
 0x4d3   :  { %v2955_v8 = vadd.f32 %v2825_v26, %v2601_v62  ;;  %v2486_v39 = vpop.f32.mrf.mxu2  ;;  %v2333_v26 = vld [vmem:[#allocation2 + $0x3cf] sm:$0xff] }
 0x4d4   :  { %v2606_v45 = vadd.f32 %v2486_v39, %v8577_v5 }
 0x4d5   :  { %v8781_v44 = vadd.f32 %v3179_v28, %v2955_v8  ;;  %v8786_v8 = vpop.f32.mrf.mxu1 }
 0x4d7   :  { %12126 = vst [vmem:[#allocation66_spill] sm:$0xff] %v8781_v44  ;;  %2875 = vmatmul.f32.gmra.mxu3 %v2682_v27  ;;  %v3194_v62 = vpop.f32.mrf.mxu0  ;;  %2536 = vmatmul.f32.gmra.mxu2 %v2333_v26  ;;  %v12129_v26 = vld [vmem:[#allocation39_spill] sm:$0xff] }
 0x4da   :  { %v2828_v2 = vpop.f32.mrf.mxu3  ;;  %3241 = vmatmul.f32.gmra.mxu0 %v3040_v49 }
 0x4db   :  { %v2956_v36 = vadd.f32 %v2828_v2, %v2602_v54  ;;  %v2489_v29 = vpop.f32.mrf.mxu2  ;;  %v2334_v2 = vld [vmem:[#allocation2 + $0x3e7] sm:$0xff] }
 0x4dc   :  { %v2607_v0 = vadd.f32 %v2489_v29, %v12127_v61  ;;  %v2335_v29 = vld [vmem:[#allocation2 + $0x3ef] sm:$0xff] }
 0x4dd   :  { %v8784_v48 = vadd.f32 %v3182_v11, %v2956_v36  ;;  %v3041_v11 = vld [vmem:[#allocation2 + $0x3d1] sm:$0xff]  ;;  %v8792_v58 = vpop.f32.mrf.mxu1 }
 0x4df   :  { %2878 = vmatmul.f32.gmra.mxu3 %v2683_v20  ;;  %v3197_v5 = vpop.f32.mrf.mxu0  ;;  %2539 = vmatmul.f32.gmra.mxu2 %v2334_v2 }
 0x4e2   :  { %v2831_v28 = vpop.f32.mrf.mxu3  ;;  %3244 = vmatmul.f32.gmra.mxu0 %v3041_v11  ;;  %v12131_v11 = vld [vmem:[#allocation34_spill] sm:$0xff] }
 0x4e3   :  { %v2957_v27 = vadd.f32 %v2831_v28, %v2603_v9  ;;  %v2492_v36 = vpop.f32.mrf.mxu2 }
 0x4e4   :  { %v2608_v49 = vadd.f32 %v2492_v36, %v12129_v26 }
 0x4e5   :  { %v8789_v54 = vadd.f32 %v3185_v16, %v2957_v27  ;;  %v4042_v16 = vld [vmem:[#allocation8 + $0xd8] sm:$0xff]  ;;  %v3042_v27 = vld [vmem:[#allocation2 + $0x3e9] sm:$0xff] }
 0x4e6   :  { %4051 = vmatpush.msra.mxu1 %v4042_v16 }
 0x4e7   :  { %12128 = vst [vmem:[#allocation67_spill] sm:$0xff] %v8789_v54  ;;  %2881 = vmatmul.f32.gmra.mxu3 %v2684_v56  ;;  %v3200_v28 = vpop.f32.mrf.mxu0  ;;  %2542 = vmatmul.f32.gmra.mxu2 %v2335_v29 }
 0x4ea   :  { %v2834_v39 = vpop.f32.mrf.mxu3  ;;  %3247 = vmatmul.f32.gmra.mxu0 %v3042_v27  ;;  %v2687_v27 = vld [vmem:[#allocation2 + $0x3d0] sm:$0xff] }
 0x4eb   :  { %v2958_v20 = vadd.f32 %v2834_v39, %v2604_v14  ;;  %v2495_v61 = vpop.f32.mrf.mxu2  ;;  %v2686_v39 = vld [vmem:[#allocation2 + $0x3c8] sm:$0xff] }
 0x4ec   :  { %v2609_v14 = vadd.f32 %v2495_v61, %v12131_v11 }
 0x4ed   :  { %v8794_v9 = vadd.f32 %v3188_v12, %v2958_v20  ;;  %v8799_v12 = vpop.f32.mrf.mxu1 }
 0x4ef   :  { %12130 = vst [vmem:[#allocation68_spill] sm:$0xff] %v8794_v9  ;;  %2884 = vmatmul.f32.gmra.mxu3 %v2685_v23  ;;  %v3203_v26 = vpop.f32.mrf.mxu0  ;;  %2545 = vmatmul.f32.gmra.mxu2 %v2336_v38  ;;  %v3043_v23 = vld [vmem:[#allocation2 + $0x3f1] sm:$0xff] }
 0x4f2   :  { %v2837_v56 = vpop.f32.mrf.mxu3  ;;  %3250 = vmatmul.f32.gmra.mxu0 %v3043_v23 }
 0x4f3   :  { %v2959_v2 = vadd.f32 %v2837_v56, %v2605_v1  ;;  %v8801_v29 = vpop.f32.mrf.mxu2  ;;  %v2337_v56 = vld [vmem:[#allocation2 + $0x40f] sm:$0xff] }
 0x4f5   :  { %v8797_v36 = vadd.f32 %v3191_v6, %v2959_v2  ;;  %v3044_v6 = vld [vmem:[#allocation2 + $0x409] sm:$0xff]  ;;  %v8807_v61 = vpop.f32.mrf.mxu1 }
 0x4f7   :  { %12132 = vst [vmem:[#allocation32_spill] sm:$0xff] %v8797_v36  ;;  %2887 = vmatmul.f32.gmra.mxu3 %v2686_v39  ;;  %v8805_v1 = vpop.f32.mrf.mxu0  ;;  %2548 = vmatmul.f32.gmra.mxu2 %v2337_v56  ;;  %v2688_v39 = vld [vmem:[#allocation2 + $0x3e8] sm:$0xff] }
 0x4f8   :  { %12134 = vst [vmem:[#allocation34_spill] sm:$0xff] %v8805_v1 }
 0x4fa   :  { %v2840_v20 = vpop.f32.mrf.mxu3  ;;  %3253 = vmatmul.f32.gmra.mxu0 %v3044_v6 }
 0x4fb   :  { %v2960_v16 = vadd.f32 %v2840_v20, %v2606_v45  ;;  %v8809_v38 = vpop.f32.mrf.mxu2  ;;  %v3045_v20 = vld [vmem:[#allocation2 + $0x411] sm:$0xff] }
 0x4fd   :  { %v8803_v42 = vadd.f32 %v3194_v62, %v2960_v16  ;;  %v2338_v62 = vld [vmem:[#allocation2 + $0x427] sm:$0xff]  ;;  %v8817_v56 = vpop.f32.mrf.mxu1 }
 0x4ff   :  { %12133 = vst [vmem:[#allocation39_spill] sm:$0xff] %v8803_v42  ;;  %2890 = vmatmul.f32.gmra.mxu3 %v2687_v27  ;;  %v8813_v45 = vpop.f32.mrf.mxu0  ;;  %2551 = vmatmul.f32.gmra.mxu2 %v2338_v62 }
 0x500   :  { %12136 = vst [vmem:[#allocation70_spill] sm:$0xff] %v8813_v45  ;;  %v2690_v45 = vld [vmem:[#allocation2 + $0x408] sm:$0xff] }
 0x502   :  { %v2843_v2 = vpop.f32.mrf.mxu3  ;;  %3256 = vmatmul.f32.gmra.mxu0 %v3045_v20 }
 0x503   :  { %v2961_v11 = vadd.f32 %v2843_v2, %v2607_v0  ;;  %v8815_v27 = vpop.f32.mrf.mxu2  ;;  %v4041_v2 = vld [vmem:[#allocation8 + $0xd0] sm:$0xff] }
 0x504   :  { %4052 = vmatpush.msra.mxu1 %v4041_v2  ;;  %v2691_v2 = vld [vmem:[#allocation2 + $0x410] sm:$0xff] }
 0x505   :  { %v8811_v23 = vadd.f32 %v3197_v5, %v2961_v11  ;;  %v2339_v5 = vld [vmem:[#allocation2 + $0x42f] sm:$0xff] }
 0x506   :  { %v3046_v11 = vld [vmem:[#allocation2 + $0x429] sm:$0xff] }
 0x507   :  { %12135 = vst [vmem:[#allocation69_spill] sm:$0xff] %v8811_v23  ;;  %2893 = vmatmul.f32.gmra.mxu3 %v2688_v39  ;;  %v8821_v0 = vpop.f32.mrf.mxu0  ;;  %2554 = vmatmul.f32.gmra.mxu2 %v2339_v5  ;;  %v8825_v23 = vpop.f32.mrf.mxu1 }
 0x508   :  { %12138 = vst [vmem:[#allocation72_spill] sm:$0xff] %v8821_v0  ;;  %v3049_v0 = vld [vmem:[#allocation2 + $0x451] sm:$0xff] }
 0x50a   :  { %v2846_v16 = vpop.f32.mrf.mxu3  ;;  %3259 = vmatmul.f32.gmra.mxu0 %v3046_v11 }
 0x50b   :  { %v2962_v6 = vadd.f32 %v2846_v16, %v2608_v49  ;;  %v8823_v62 = vpop.f32.mrf.mxu2  ;;  %v2340_v16 = vld [vmem:[#allocation2 + $0x447] sm:$0xff] }
 0x50d   :  { %v8819_v1 = vadd.f32 %v3200_v28, %v2962_v6 }
 0x50f   :  { %12137 = vst [vmem:[#allocation71_spill] sm:$0xff] %v8819_v1  ;;  %2896 = vmatmul.f32.gmra.mxu3 %v2689_v10  ;;  %v8829_v28 = vpop.f32.mrf.mxu0  ;;  %2557 = vmatmul.f32.gmra.mxu2 %v2340_v16  ;;  %v3047_v10 = vld [vmem:[#allocation2 + $0x431] sm:$0xff]  ;;  %v2692_v16 = vld [vmem:[#allocation2 + $0x428] sm:$0xff] }
 0x510   :  { %12140 = vst [vmem:[#allocation74_spill] sm:$0xff] %v8829_v28  ;;  %v2342_v28 = vld [vmem:[#allocation2 + $0x467] sm:$0xff] }
 0x512   :  { %v2849_v39 = vpop.f32.mrf.mxu3  ;;  %3262 = vmatmul.f32.gmra.mxu0 %v3047_v10 }
 0x513   :  { %v2963_v20 = vadd.f32 %v2849_v39, %v2609_v14  ;;  %v8833_v5 = vpop.f32.mrf.mxu2  ;;  %v2341_v14 = vld [vmem:[#allocation2 + $0x44f] sm:$0xff]  ;;  %v8837_v39 = vpop.f32.mrf.mxu1 }
 0x514   :  { %12141 = vst [vmem:[#allocation75_spill] sm:$0xff] %v8833_v5  ;;  %v3050_v5 = vld [vmem:[#allocation2 + $0x469] sm:$0xff] }
 0x515   :  { %v8827_v49 = vadd.f32 %v3203_v26, %v2963_v20  ;;  %12143 = vst [vmem:[#allocation77_spill] sm:$0xff] %v8837_v39  ;;  %v3048_v26 = vld [vmem:[#allocation2 + $0x449] sm:$0xff] }
 0x516   :  { %v2343_v39 = vld [vmem:[#allocation2 + $0x46f] sm:$0xff] }
 0x517   :  { %12139 = vst [vmem:[#allocation73_spill] sm:$0xff] %v8827_v49  ;;  %2899 = vmatmul.f32.gmra.mxu3 %v2690_v45  ;;  %v8835_v11 = vpop.f32.mrf.mxu0  ;;  %2560 = vmatmul.f32.gmra.mxu2 %v2341_v14  ;;  %v2693_v14 = vld [vmem:[#allocation2 + $0x430] sm:$0xff] }
 0x518   :  { %12142 = vst [vmem:[#allocation76_spill] sm:$0xff] %v8835_v11 }
 0x51a   :  { %v8831_v6 = vpop.f32.mrf.mxu3  ;;  %3265 = vmatmul.f32.gmra.mxu0 %v3048_v26 }
 0x51b   :  { %v8841_v45 = vpop.f32.mrf.mxu2  ;;  %v8845_v11 = vpop.f32.mrf.mxu1 }
 0x51c   :  { %12144 = vst [vmem:[#allocation78_spill] sm:$0xff] %v8841_v45  ;;  %v4040_v45 = vld [vmem:[#allocation8 + $0xc8] sm:$0xff] }
 0x51d   :  { %12146 = vst [vmem:[#allocation80_spill] sm:$0xff] %v8845_v11  ;;  %4053 = vmatpush.msra.mxu1 %v4040_v45 }
 0x51f   :  { %2902 = vmatmul.f32.gmra.mxu3 %v2691_v2  ;;  %v8843_v10 = vpop.f32.mrf.mxu0  ;;  %2563 = vmatmul.f32.gmra.mxu2 %v2342_v28 }
 0x520   :  { %12145 = vst [vmem:[#allocation79_spill] sm:$0xff] %v8843_v10  ;;  %v2694_v10 = vld [vmem:[#allocation2 + $0x448] sm:$0xff] }
 0x522   :  { %v8839_v20 = vpop.f32.mrf.mxu3  ;;  %3268 = vmatmul.f32.gmra.mxu0 %v3049_v0 }
 0x523   :  { %v8849_v2 = vpop.f32.mrf.mxu2  ;;  %v8857_v0 = vpop.f32.mrf.mxu1 }
 0x524   :  { %12148 = vst [vmem:[#allocation82_spill] sm:$0xff] %v8849_v2  ;;  %v3051_v2 = vld [vmem:[#allocation2 + $0x471] sm:$0xff] }
 0x525   :  { %12151 = vst [vmem:[#allocation85_spill] sm:$0xff] %v8857_v0 }
 0x527   :  { %2905 = vmatmul.f32.gmra.mxu3 %v2692_v16  ;;  %v8851_v26 = vpop.f32.mrf.mxu0  ;;  %2566 = vmatmul.f32.gmra.mxu2 %v2343_v39  ;;  %v2695_v39 = vld [vmem:[#allocation2 + $0x450] sm:$0xff] }
 0x528   :  { %12149 = vst [vmem:[#allocation83_spill] sm:$0xff] %v8851_v26 }
 0x52a   :  { %v8847_v49 = vpop.f32.mrf.mxu3  ;;  %3271 = vmatmul.f32.gmra.mxu0 %v3050_v5 }
 0x52b   :  { %12147 = vst [vmem:[#allocation81_spill] sm:$0xff] %v8847_v49  ;;  %v8855_v28 = vpop.f32.mrf.mxu2  ;;  %v8867_v5 = vpop.f32.mrf.mxu1 }
 0x52c   :  { %12150 = vst [vmem:[#allocation84_spill] sm:$0xff] %v8855_v28 }
 0x52d   :  { %12155 = vst [vmem:[#allocation89_spill] sm:$0xff] %v8867_v5 }
 0x52f   :  { %2908 = vmatmul.f32.gmra.mxu3 %v2693_v14  ;;  %v8859_v11 = vpop.f32.mrf.mxu0 }
 0x530   :  { %12152 = vst [vmem:[#allocation86_spill] sm:$0xff] %v8859_v11 }
 0x532   :  { %v8853_v16 = vpop.f32.mrf.mxu3  ;;  %3274 = vmatmul.f32.gmra.mxu0 %v3051_v2  ;;  %v3342_v2 = vadd.f32 %v8687_v21, %v8684_v63 }
 0x533   :  { %v8863_v14 = vpop.f32.mrf.mxu2 }
 0x534   :  { %12153 = vst [vmem:[#allocation87_spill] sm:$0xff] %v8863_v14 }
 0x537   :  { %2911 = vmatmul.f32.gmra.mxu3 %v2694_v10  ;;  %v8865_v49 = vpop.f32.mrf.mxu0  ;;  %v8876_v10 = vpop.f32.mrf.mxu1 }
 0x538   :  { %12154 = vst [vmem:[#allocation88_spill] sm:$0xff] %v8865_v49  ;;  %v3343_v49 = vadd.f32 %v3342_v2, %v8690_v35 }
 0x539   :  { %12159 = vst [vmem:[#allocation93_spill] sm:$0xff] %v8876_v10 }
 0x53a   :  { %v8861_v26 = vpop.f32.mrf.mxu3 }
 0x53b   :  { %v8871_v28 = vpop.f32.mrf.mxu2 }
 0x53c   :  { %12157 = vst [vmem:[#allocation91_spill] sm:$0xff] %v8871_v28 }
 0x53f   :  { %2914 = vmatmul.f32.gmra.mxu3 %v2695_v39  ;;  %v8873_v0 = vpop.f32.mrf.mxu0  ;;  %v3344_v39 = vadd.f32 %v3343_v49, %v8693_v41 }
 0x540   :  { %12158 = vst [vmem:[#allocation92_spill] sm:$0xff] %v8873_v0  ;;  %v4039_v0 = vld [vmem:[#allocation8 + $0xc0] sm:$0xff] }
 0x541   :  { %v3345_v5 = vadd.f32 %v3344_v39, %v8696_v34  ;;  %4054 = vmatpush.msra.mxu1 %v4039_v0 }
 0x542   :  { %v8869_v45 = vpop.f32.mrf.mxu3 }
 0x543   :  { %12156 = vst [vmem:[#allocation90_spill] sm:$0xff] %v8869_v45  ;;  %v8882_v14 = vpop.f32.mrf.mxu2  ;;  %v3346_v10 = vadd.f32 %v3345_v5, %v8699_v18  ;;  %v8891_v45 = vpop.f32.mrf.mxu1 }
 0x544   :  { %12160 = vst [vmem:[#allocation94_spill] sm:$0xff] %v8882_v14 }
 0x545   :  { %v3347_v63 = vadd.f32 %v3346_v10, %v8702_v59 }
 0x547   :  { %2917 = vmatmul.f32.gmra.mxu3 %v8725_v24  ;;  %v8888_v28 = vpop.f32.mrf.mxu0  ;;  %v3348_v49 = vadd.f32 %v3347_v63, %v8705_v51 }
 0x549   :  { %v3349_v2 = vadd.f32 %v3348_v49, %v8708_v40 }
 0x54a   :  { %v8880_v11 = vpop.f32.mrf.mxu3 }
 0x54b   :  { %v8896_v14 = vpop.f32.mrf.mxu2  ;;  %v8906_v5 = vpop.f32.mrf.mxu1 }
 0x54f   :  { %2920 = vmatmul.f32.gmra.mxu3 %v8725_v24  ;;  %v3350_v24 = vadd.f32 %v3349_v2, %v8711_v25  ;;  %v8903_v34 = vpop.f32.mrf.mxu0 }
 0x551   :  { %v3351_v0 = vadd.f32 %v3350_v24, %v8714_v7 }
 0x552   :  { %v8893_v21 = vpop.f32.mrf.mxu3 }
 0x553   :  { %v3352_v18 = vadd.f32 %v3351_v0, %v8717_v31  ;;  %v8909_v41 = vpop.f32.mrf.mxu2  ;;  %v8919_v40 = vpop.f32.mrf.mxu1 }
 0x555   :  { %v3353_v10 = vadd.f32 %v3352_v18, %v8720_v19 }
 0x557   :  { %v3354_v63 = vadd.f32 %v3353_v10, %v8723_v46  ;;  %v8916_v2 = vpop.f32.mrf.mxu0 }
 0x559   :  { %v3355_v49 = vadd.f32 %v3354_v63, %v8729_v50  ;;  %v4038_v50 = vld [vmem:[#allocation8 + $0xb8] sm:$0xff] }
 0x55a   :  { %v8901_v39 = vpop.f32.mrf.mxu3  ;;  %4055 = vmatpush.msra.mxu1 %v4038_v50 }
 0x55b   :  { %v3356_v25 = vadd.f32 %v3355_v49, %v8733_v13  ;;  %v8922_v7 = vpop.f32.mrf.mxu2  ;;  %v8932_v49 = vpop.f32.mrf.mxu1 }
 0x55d   :  { %v3357_v24 = vadd.f32 %v3356_v25, %v8736_v3 }
 0x55f   :  { %v3358_v0 = vadd.f32 %v3357_v24, %v8739_v15  ;;  %v8929_v46 = vpop.f32.mrf.mxu0 }
 0x561   :  { %v3359_v18 = vadd.f32 %v3358_v0, %v8742_v60 }
 0x562   :  { %v8913_v51 = vpop.f32.mrf.mxu3 }
 0x563   :  { %v3360_v10 = vadd.f32 %v3359_v18, %v8745_v22  ;;  %v8937_v13 = vpop.f32.mrf.mxu2 }
 0x565   :  { %v3361_v63 = vadd.f32 %v3360_v10, %v8748_v43  ;;  %v8945_v43 = vpop.f32.mrf.mxu1 }
 0x567   :  { %v3362_v25 = vadd.f32 %v3361_v63, %v8751_v55  ;;  %v8942_v22 = vpop.f32.mrf.mxu0 }
 0x569   :  { %v3363_v24 = vadd.f32 %v3362_v25, %v8754_v52 }
 0x56a   :  { %v8925_v31 = vpop.f32.mrf.mxu3 }
 0x56b   :  { %v3364_v0 = vadd.f32 %v3363_v24, %v8757_v4  ;;  %v8950_v63 = vpop.f32.mrf.mxu2 }
 0x56d   :  { %v3365_v18 = vadd.f32 %v3364_v0, %v8760_v17 }
 0x56f   :  { %v3366_v10 = vadd.f32 %v3365_v18, %v8763_v53  ;;  %v8957_v0 = vpop.f32.mrf.mxu0  ;;  %v8960_v53 = vpop.f32.mrf.mxu1 }
 0x571   :  { %v3367_v50 = vadd.f32 %v3366_v10, %v8766_v57  ;;  %v12161_v57 = vld [vmem:[#allocation42_spill] sm:$0xff] }
 0x572   :  { %v8935_v3 = vpop.f32.mrf.mxu3 }
 0x573   :  { %v3368_v55 = vadd.f32 %v3367_v50, %v8769_v37  ;;  %v8963_v52 = vpop.f32.mrf.mxu2  ;;  %v2255_v50 = vadd.f32 %v8786_v8, %v12161_v57 }
 0x575   :  { %v3369_v25 = vadd.f32 %v3368_v55, %v8772_v47 }
 0x577   :  { %v3370_v24 = vadd.f32 %v3369_v25, %v8775_v32  ;;  %v12162_v32 = vld [vmem:[#allocation36_spill] sm:$0xff]  ;;  %v8975_v37 = vpop.f32.mrf.mxu0  ;;  %v8981_v8 = vpop.f32.mrf.mxu1 }
 0x578   :  { %v2256_v47 = vadd.f32 %v8792_v58, %v12162_v32 }
 0x579   :  { %v3371_v18 = vadd.f32 %v3370_v24, %v8778_v33  ;;  %v2610_v33 = vadd.f32 %v8801_v29, %v2255_v50  ;;  %v4037_v50 = vld [vmem:[#allocation8 + $0xb0] sm:$0xff] }
 0x57a   :  { %v8947_v60 = vpop.f32.mrf.mxu3  ;;  %v2611_v57 = vadd.f32 %v8809_v38, %v2256_v47  ;;  %4056 = vmatpush.msra.mxu1 %v4037_v50 }
 0x57b   :  { %v3372_v17 = vadd.f32 %v3371_v18, %v8781_v44  ;;  %v12163_v18 = vld [vmem:[#allocation45_spill] sm:$0xff]  ;;  %v2964_v32 = vadd.f32 %v8831_v6, %v2610_v33 }
 0x57c   :  { %v2257_v44 = vadd.f32 %v8799_v12, %v12163_v18  ;;  %v12164_v12 = vld [vmem:[#allocation38_spill] sm:$0xff]  ;;  %v12165_v18 = vld [vmem:[#allocation69_spill] sm:$0xff]  ;;  %v2965_v38 = vadd.f32 %v8839_v20, %v2611_v57 }
 0x57d   :  { %v3373_v10 = vadd.f32 %v3372_v17, %v8784_v48  ;;  %v12169_v6 = vld [vmem:[#allocation81_spill] sm:$0xff] }
 0x57e   :  { %v2612_v29 = vadd.f32 %v8815_v27, %v2257_v44  ;;  %v12167_v44 = vld [vmem:[#allocation34_spill] sm:$0xff]  ;;  %v12173_v20 = vld [vmem:[#allocation73_spill] sm:$0xff] }
 0x57f   :  { %v3374_v55 = vadd.f32 %v3373_v10, %v8789_v54  ;;  %v2258_v10 = vadd.f32 %v8807_v61, %v8621_v30  ;;  %v12166_v30 = vld [vmem:[#allocation48_spill] sm:$0xff]  ;;  %v9001_v27 = vadd.f32 %v12167_v44, %v2964_v32  ;;  %v9015_v44 = vpop.f32.mrf.mxu0 }
 0x580   :  { %v2260_v61 = vadd.f32 %v8825_v23, %v12166_v30  ;;  %v2966_v50 = vadd.f32 %v12169_v6, %v2612_v29  ;;  %v12176_v30 = vld [vmem:[#allocation78_spill] sm:$0xff] }
 0x581   :  { %v3375_v24 = vadd.f32 %v3374_v55, %v8794_v9  ;;  %v8988_v55 = vpop.f32.mrf.mxu2  ;;  %12168 = vst [vmem:[#allocation42_spill] sm:$0xff] %v9001_v27 }
 0x582   :  { %v8955_v4 = vpop.f32.mrf.mxu3  ;;  %v2615_v9 = vadd.f32 %v12176_v30, %v2260_v61  ;;  %v12183_v61 = vld [vmem:[#allocation74_spill] sm:$0xff] }
 0x583   :  { %v3376_v17 = vadd.f32 %v3375_v24, %v8797_v36  ;;  %v2259_v24 = vadd.f32 %v8817_v56, %v12164_v12  ;;  %v2613_v36 = vadd.f32 %v8823_v62, %v2258_v10  ;;  %v12171_v12 = vld [vmem:[#allocation41_spill] sm:$0xff]  ;;  %v12174_v62 = vld [vmem:[#allocation70_spill] sm:$0xff] }
 0x584   :  { %v9009_v10 = vadd.f32 %v12174_v62, %v2965_v38  ;;  %v12181_v38 = vld [vmem:[#allocation44_spill] sm:$0xff] }
 0x585   :  { %v3377_v58 = vadd.f32 %v3376_v17, %v8803_v42  ;;  %v12170_v42 = vld [vmem:[#allocation75_spill] sm:$0xff]  ;;  %v2967_v23 = vadd.f32 %v8853_v16, %v2613_v36  ;;  %v2197_v36 = vpop.f32.mrf.mxu1 }
 0x586   :  { %v2614_v56 = vadd.f32 %v12170_v42, %v2259_v24  ;;  %12175 = vst [vmem:[#allocation36_spill] sm:$0xff] %v9009_v10  ;;  %v12179_v42 = vld [vmem:[#allocation72_spill] sm:$0xff] }
 0x587   :  { %v3378_v47 = vadd.f32 %v3377_v58, %v12165_v18  ;;  %v12172_v58 = vld [vmem:[#allocation77_spill] sm:$0xff]  ;;  %v9019_v24 = vadd.f32 %v12179_v42, %v2966_v50  ;;  %v9027_v30 = vadd.f32 %v12183_v61, %v2967_v23  ;;  %v12190_v23 = vld [vmem:[#allocation47_spill] sm:$0xff] }
 0x588   :  { %v2261_v18 = vadd.f32 %v12172_v58, %v12171_v12  ;;  %v2968_v6 = vadd.f32 %v8861_v26, %v2614_v56  ;;  %v12182_v58 = vld [vmem:[#allocation85_spill] sm:$0xff]  ;;  %v12188_v56 = vld [vmem:[#allocation76_spill] sm:$0xff] }
 0x589   :  { %v3379_v33 = vadd.f32 %v3378_v47, %v8819_v1  ;;  %v12177_v47 = vld [vmem:[#allocation51_spill] sm:$0xff]  ;;  %v12178_v1 = vld [vmem:[#allocation80_spill] sm:$0xff]  ;;  %v2263_v62 = vadd.f32 %v12182_v58, %v12181_v38  ;;  %v12187_v50 = vld [vmem:[#allocation89_spill] sm:$0xff]  ;;  %v2552_v26 = vpop.f32.mrf.mxu2 }
 0x58a   :  { %v8969_v25 = vpop.f32.mrf.mxu3  ;;  %v2262_v32 = vadd.f32 %v12178_v1, %v12177_v47  ;;  %v12184_v1 = vld [vmem:[#allocation90_spill] sm:$0xff]  ;;  %v12191_v61 = vld [vmem:[#allocation93_spill] sm:$0xff] }
 0x58b   :  { %v3380_v57 = vadd.f32 %v3379_v33, %v12173_v20  ;;  %v12180_v33 = vld [vmem:[#allocation82_spill] sm:$0xff]  ;;  %v2969_v47 = vadd.f32 %v12184_v1, %v2615_v9  ;;  %v12185_v20 = vld [vmem:[#allocation84_spill] sm:$0xff]  ;;  %v12193_v1 = vld [vmem:[#allocation91_spill] sm:$0xff] }
 0x58c   :  { %v2616_v12 = vadd.f32 %v12180_v33, %v2261_v18  ;;  %v9035_v33 = vadd.f32 %v12188_v56, %v2968_v6 }
 0x58d   :  { %v3381_v29 = vadd.f32 %v3380_v57, %v9001_v27  ;;  %v2617_v57 = vadd.f32 %v12185_v20, %v2262_v32  ;;  %v12186_v27 = vld [vmem:[#allocation54_spill] sm:$0xff]  ;;  %v12192_v20 = vld [vmem:[#allocation79_spill] sm:$0xff] }
 0x58e   :  { %v2264_v42 = vadd.f32 %v12187_v50, %v12186_v27  ;;  %v2970_v38 = vadd.f32 %v8880_v11, %v2616_v12  ;;  %v9043_v32 = vadd.f32 %v12192_v20, %v2969_v47  ;;  %v12195_v11 = vld [vmem:[#allocation83_spill] sm:$0xff] }
 0x58f   :  { %v3382_v16 = vadd.f32 %v3381_v29, %v9009_v10  ;;  %v12189_v29 = vld [vmem:[#allocation87_spill] sm:$0xff]  ;;  %v2265_v10 = vadd.f32 %v12191_v61, %v12190_v23  ;;  %v2971_v27 = vadd.f32 %v8893_v21, %v2617_v57  ;;  %v9057_v61 = vpop.f32.mrf.mxu0  ;;  %v12198_v57 = vld [vmem:[#allocation86_spill] sm:$0xff] }
 0x590   :  { %v2618_v58 = vadd.f32 %v12189_v29, %v2263_v62  ;;  %v2619_v50 = vadd.f32 %v12193_v1, %v2264_v42  ;;  %v9051_v12 = vadd.f32 %v12195_v11, %v2970_v38  ;;  %v12196_v29 = vld [vmem:[#allocation94_spill] sm:$0xff]  ;;  %v12199_v38 = vld [vmem:[#allocation60_spill] sm:$0xff] }
 0x591   :  { %v3383_v18 = vadd.f32 %v3382_v16, %v9019_v24  ;;  %v12194_v16 = vld [vmem:[#allocation57_spill] sm:$0xff]  ;;  %v2620_v23 = vadd.f32 %v12196_v29, %v2265_v10  ;;  %v9061_v42 = vadd.f32 %v12198_v57, %v2971_v27  ;;  %v2268_v20 = vadd.f32 %v8919_v40, %v12199_v38  ;;  %v12200_v1 = vld [vmem:[#allocation88_spill] sm:$0xff] }
 0x592   :  { %v8997_v17 = vpop.f32.mrf.mxu3  ;;  %v2266_v6 = vadd.f32 %v8891_v45, %v12194_v16  ;;  %v2972_v62 = vadd.f32 %v8901_v39, %v2618_v58  ;;  %v2973_v45 = vadd.f32 %v8913_v51, %v2619_v50  ;;  %v2200_v39 = vpop.f32.mrf.mxu1  ;;  %v12201_v27 = vld [vmem:[#allocation53_spill] sm:$0xff]  ;;  %v12202_v50 = vld [vmem:[#allocation92_spill] sm:$0xff] }
 0x593   :  { %v3384_v9 = vadd.f32 %v3383_v18, %v9027_v30  ;;  %v12197_v18 = vld [vmem:[#allocation50_spill] sm:$0xff]  ;;  %v2974_v16 = vadd.f32 %v8925_v31, %v2620_v23  ;;  %v2269_v11 = vadd.f32 %v8932_v49, %v12201_v27  ;;  %v2555_v51 = vpop.f32.mrf.mxu2  ;;  %v2623_v29 = vadd.f32 %v8922_v7, %v2268_v20 }
 0x594   :  { %v2267_v47 = vadd.f32 %v8906_v5, %v12197_v18  ;;  %v9069_v5 = vadd.f32 %v12200_v1, %v2972_v62  ;;  %v12203_v18 = vld [vmem:[#allocation63_spill] sm:$0xff] }
 0x595   :  { %v3385_v56 = vadd.f32 %v3384_v9, %v9035_v33  ;;  %v2621_v9 = vadd.f32 %v8896_v14, %v2266_v6  ;;  %v9077_v6 = vadd.f32 %v12202_v50, %v2973_v45  ;;  %v2270_v62 = vadd.f32 %v8945_v43, %v12203_v18  ;;  %v12205_v45 = vld [vmem:[#allocation65_spill] sm:$0xff] }
 0x596   :  { %v2624_v23 = vadd.f32 %v8937_v13, %v2269_v11  ;;  %v2977_v7 = vadd.f32 %v8955_v4, %v2623_v29 }
 0x597   :  { %v3386_v21 = vadd.f32 %v3385_v56, %v9043_v32  ;;  %v2622_v56 = vadd.f32 %v8909_v41, %v2267_v47  ;;  %v2975_v40 = vadd.f32 %v8935_v3, %v2621_v9  ;;  %v9085_v41 = vadd.f32 %v8888_v28, %v2974_v16  ;;  %v12204_v47 = vld [vmem:[#allocation56_spill] sm:$0xff]  ;;  %v3263_v38 = vpop.f32.mrf.mxu0 }
 0x598   :  { %v2625_v43 = vadd.f32 %v8950_v63, %v2270_v62  ;;  %v2272_v28 = vadd.f32 %v8981_v8, %v12205_v45  ;;  %v9108_v63 = vadd.f32 %v8929_v46, %v2977_v7  ;;  %v12208_v62 = vld [vmem:[#allocation13_spill] sm:$0xff]  ;;  %v12209_v45 = vld [vmem:[#allocation15_spill] sm:$0xff] }
 0x599   :  { %v3387_v10 = vadd.f32 %v3386_v21, %v9051_v12  ;;  %v2976_v49 = vadd.f32 %v8947_v60, %v2622_v56  ;;  %v2271_v21 = vadd.f32 %v8960_v53, %v12204_v47  ;;  %v9093_v3 = vadd.f32 %v8903_v34, %v2975_v40  ;;  %v12206_v34 = vld [vmem:[#allocation59_spill] sm:$0xff]  ;;  %v12207_v56 = vld [vmem:[#allocation62_spill] sm:$0xff] }
 0x59a   :  { %v2900_v54 = vpop.f32.mrf.mxu3  ;;  %v2978_v53 = vadd.f32 %v8969_v25, %v2624_v23  ;;  %v2203_v1 = vpop.f32.mrf.mxu1  ;;  %v2979_v8 = vadd.f32 %v8997_v17, %v2625_v43  ;;  %v2627_v16 = vadd.f32 %v8988_v55, %v2272_v28  ;;  %v2274_v27 = vadd.f32 %v2200_v39, %v12207_v56 }
 0x59b   :  { %v3388_v14 = vadd.f32 %v3387_v10, %v9061_v42  ;;  %v9101_v13 = vadd.f32 %v8916_v2, %v2976_v49  ;;  %v2626_v20 = vadd.f32 %v8963_v52, %v2271_v21  ;;  %v2273_v10 = vadd.f32 %v2197_v36, %v12206_v34  ;;  %v2558_v2 = vpop.f32.mrf.mxu2 }
 0x59c   :  { %v9115_v25 = vadd.f32 %v8942_v22, %v2978_v53  ;;  %v9119_v46 = vadd.f32 %v8957_v0, %v2979_v8  ;;  %v2629_v40 = vadd.f32 %v2555_v51, %v2274_v27 }
 0x59d   :  { %v3389_v31 = vadd.f32 %v3388_v14, %v9069_v5  ;;  %v2980_v52 = vadd.f32 %v2900_v54, %v2626_v20  ;;  %v2628_v36 = vadd.f32 %v2552_v26, %v2273_v10  ;;  %v4036_v14 = vld [vmem:[#allocation8 + $0xa8] sm:$0xff]  ;;  %v2275_v54 = vadd.f32 %v2203_v1, %v12208_v62 }
 0x59e   :  { %4057 = vmatpush.msra.mxu1 %v4036_v14  ;;  %v12211_v14 = vld [vmem:[#allocation16_spill] sm:$0xff] }
 0x59f   :  { %v3390_v57 = vadd.f32 %v3389_v31, %v9077_v6  ;;  %v9123_v29 = vadd.f32 %v8975_v37, %v2980_v52  ;;  %v3266_v22 = vpop.f32.mrf.mxu0  ;;  %v2630_v23 = vadd.f32 %v2558_v2, %v2275_v54 }
 0x5a1   :  { %v3391_v60 = vadd.f32 %v3390_v57, %v9085_v41 }
 0x5a2   :  { %v2903_v58 = vpop.f32.mrf.mxu3  ;;  %v2206_v0 = vpop.f32.mrf.mxu1 }
 0x5a3   :  { %v3392_v4 = vadd.f32 %v3391_v60, %v9093_v3  ;;  %v2981_v17 = vadd.f32 %v2903_v58, %v2627_v16  ;;  %v2561_v47 = vpop.f32.mrf.mxu2  ;;  %v2276_v28 = vadd.f32 %v2206_v0, %v12209_v45 }
 0x5a5   :  { %v3393_v11 = vadd.f32 %v3392_v4, %v9101_v13  ;;  %v9128_v31 = vadd.f32 %v9015_v44, %v2981_v17  ;;  %v2631_v20 = vadd.f32 %v2561_v47, %v2276_v28  ;;  %v12210_v4 = vld [vmem:[#allocation14_spill] sm:$0xff] }
 0x5a7   :  { %v3394_v50 = vadd.f32 %v3393_v11, %v9108_v63  ;;  %v3269_v60 = vpop.f32.mrf.mxu0 }
 0x5a9   :  { %v3395_v39 = vadd.f32 %v3394_v50, %v9115_v25 }
 0x5aa   :  { %v2906_v9 = vpop.f32.mrf.mxu3  ;;  %v2209_v34 = vpop.f32.mrf.mxu1 }
 0x5ab   :  { %v2982_v18 = vadd.f32 %v2906_v9, %v2628_v36  ;;  %v3396_v26 = vadd.f32 %v3395_v39, %v9119_v46  ;;  %v2277_v8 = vadd.f32 %v2209_v34, %v12210_v4 }
 0x5ad   :  { %v3397_v58 = vadd.f32 %v3396_v26, %v9123_v29  ;;  %v9132_v51 = vadd.f32 %v9057_v61, %v2982_v18  ;;  %v2564_v61 = vpop.f32.mrf.mxu2 }
 0x5af   :  { %v3398_v37 = vadd.f32 %v3397_v58, %v9128_v31  ;;  %v3272_v27 = vpop.f32.mrf.mxu0 }
 0x5b1   :  { %v3399_v7 = vadd.f32 %v3398_v37, %v9132_v51 }
 0x5b2   :  { %v2909_v55 = vpop.f32.mrf.mxu3  ;;  %v2212_v2 = vpop.f32.mrf.mxu1 }
 0x5b3   :  { %v2983_v49 = vadd.f32 %v2909_v55, %v2629_v40  ;;  %v2278_v50 = vadd.f32 %v2212_v2, %v12211_v14 }
 0x5b5   :  { %v3337_v21 = vadd.f32 %v3263_v38, %v2983_v49  ;;  %v2632_v38 = vadd.f32 %v2564_v61, %v2277_v8  ;;  %v2567_v36 = vpop.f32.mrf.mxu2 }
 0x5b6   :  { %v2633_v55 = vadd.f32 %v2567_v36, %v2278_v50  ;;  %v12217_v36 = vld [vmem:[#allocation22_spill] sm:$0xff] }
 0x5b7   :  { %v3400_v44 = vadd.f32 %v3399_v7, %v3337_v21  ;;  %v3275_v18 = vpop.f32.mrf.mxu0 }
 0x5ba   :  { %v2912_v57 = vpop.f32.mrf.mxu3 }
 0x5bb   :  { %v2984_v43 = vadd.f32 %v2912_v57, %v2630_v23 }
 0x5bd   :  { %v3338_v9 = vadd.f32 %v3266_v22, %v2984_v43 }
 0x5bf   :  { %v3401_v53 = vadd.f32 %v3400_v44, %v3338_v9  ;;  %v12212_v44 = vld [vmem:[#allocation17_spill] sm:$0xff] }
 0x5c2   :  { %v2915_v10 = vpop.f32.mrf.mxu3 }
 0x5c3   :  { %v2985_v1 = vadd.f32 %v2915_v10, %v2631_v20  ;;  %v12214_v10 = vld [vmem:[#allocation19_spill] sm:$0xff] }
 0x5c5   :  { %v3339_v16 = vadd.f32 %v3269_v60, %v2985_v1  ;;  %v12215_v1 = vld [vmem:[#allocation20_spill] sm:$0xff] }
 0x5c7   :  { %v3402_v56 = vadd.f32 %v3401_v53, %v3339_v16  ;;  %v12213_v53 = vld [vmem:[#allocation18_spill] sm:$0xff] }
 0x5ca   :  { %v2918_v11 = vpop.f32.mrf.mxu3 }
 0x5cb   :  { %v2986_v52 = vadd.f32 %v2918_v11, %v2632_v38 }
 0x5cd   :  { %v3340_v17 = vadd.f32 %v3272_v27, %v2986_v52 }
 0x5cf   :  { %v3403_v40 = vadd.f32 %v3402_v56, %v3340_v17 }
 0x5d2   :  { %v2921_v39 = vpop.f32.mrf.mxu3 }
 0x5d3   :  { %v2987_v22 = vadd.f32 %v2921_v39, %v2633_v55 }
 0x5d5   :  { %v3341_v62 = vadd.f32 %v3275_v18, %v2987_v22  ;;  %v12219_v18 = vld [vmem:[#allocation24_spill] sm:$0xff] }
 0x5d7   :  { %v3404_v54 = vadd.f32 %v3403_v40, %v3341_v62  ;;  %v12218_v40 = vld [vmem:[#allocation23_spill] sm:$0xff] }
 0x5d9   :  { %v3405_v26 = vrot.slane %v3404_v54, 4 }
 0x5db   :  { %v3406_v49 = vadd.f32 %v3405_v26, %v3404_v54  ;;  %v12220_v26 = vld [vmem:[#allocation25_spill] sm:$0xff] }
 0x5dd   :  { %v3407_v0 = vrot.slane %v3406_v49, 2 }
 0x5df   :  { %v3408_v58 = vadd.f32 %v3407_v0, %v3406_v49 }
 0x5e1   :  { %v3409_v23 = vrot.slane %v3408_v58, 1 }
 0x5e3   :  { %v3410_v47 = vadd.f32 %v3409_v23, %v3408_v58  ;;  %v12221_v23 = vld [vmem:[#allocation26_spill] sm:$0xff] }
 0x5e5   :  { %v9139_v37 = vmul.f32 0.001953125, %v3410_v47 }
 0x5e7   :  { %v9142_v57 = vsub.f32 %v3337_v21, %v9139_v37  ;;  %v9145_v7 = vsub.f32 %v3338_v9, %v9139_v37  ;;  %v9148_v43 = vsub.f32 %v3339_v16, %v9139_v37  ;;  %v9151_v45 = vsub.f32 %v3340_v17, %v9139_v37 }
 0x5e8   :  { %v9154_v28 = vsub.f32 %v3341_v62, %v9139_v37  ;;  %v9158_v60 = vsub.f32 %v12212_v44, %v9139_v37  ;;  %v9162_v21 = vsub.f32 %v12213_v53, %v9139_v37  ;;  %v9166_v9 = vsub.f32 %v8690_v35, %v9139_v37  ;;  %v12216_v35 = vld [vmem:[#allocation21_spill] sm:$0xff] }
 0x5e9   :  { %v9174_v61 = vsub.f32 %v12214_v10, %v9139_v37  ;;  %v9178_v4 = vsub.f32 %v12215_v1, %v9139_v37  ;;  %v9184_v56 = vsub.f32 %v12216_v35, %v9139_v37  ;;  %v9190_v2 = vsub.f32 %v8702_v59, %v9139_v37  ;;  %v12222_v1 = vld [vmem:[#allocation27_spill] sm:$0xff] }
 0x5ea   :  { %v3476_v20 = vmul.f32 %v9158_v60, %v9158_v60  ;;  %v3477_v34 = vmul.f32 %v9162_v21, %v9162_v21  ;;  %v3478_v8 = vmul.f32 %v9166_v9, %v9166_v9  ;;  %v9196_v14 = vsub.f32 %v12217_v36, %v9139_v37 }
 0x5eb   :  { %v3479_v38 = vmul.f32 %v9174_v61, %v9174_v61  ;;  %v3480_v11 = vmul.f32 %v9178_v4, %v9178_v4  ;;  %v3481_v50 = vmul.f32 %v9184_v56, %v9184_v56  ;;  %v9202_v55 = vsub.f32 %v12218_v40, %v9139_v37  ;;  %v12226_v40 = vld [vmem:[#allocation30_spill] sm:$0xff] }
 0x5ec   :  { %v3540_v16 = vadd.f32 %v3477_v34, %v3476_v20  ;;  %v3482_v59 = vmul.f32 %v9190_v2, %v9190_v2  ;;  %v9208_v22 = vsub.f32 %v12219_v18, %v9139_v37  ;;  %v3483_v62 = vmul.f32 %v9196_v14, %v9196_v14 }
 0x5ed   :  { %v9214_v49 = vsub.f32 %v12220_v26, %v9139_v37  ;;  %v3484_v0 = vmul.f32 %v9202_v55, %v9202_v55  ;;  %v9220_v47 = vsub.f32 %v12221_v23, %v9139_v37  ;;  %v9226_v20 = vsub.f32 %v8720_v19, %v9139_v37 }
 0x5ee   :  { %v3541_v27 = vadd.f32 %v3540_v16, %v3478_v8  ;;  %v3485_v44 = vmul.f32 %v9208_v22, %v9208_v22  ;;  %v9232_v8 = vsub.f32 %v12222_v1, %v9139_v37  ;;  %v12233_v1 = vld [vmem:[#allocation35_spill] sm:$0xff] }
 0x5ef   :  { %v3486_v34 = vmul.f32 %v9214_v49, %v9214_v49  ;;  %v3487_v16 = vmul.f32 %v9220_v47, %v9220_v47  ;;  %v3488_v19 = vmul.f32 %v9226_v20, %v9226_v20 }
 0x5f0   :  { %v3542_v52 = vadd.f32 %v3541_v27, %v3479_v38  ;;  %v12223_v38 = vld [vmem:[#allocation28_spill] sm:$0xff] }
 0x5f1   :  { %v9238_v27 = vsub.f32 %v12223_v38, %v9139_v37 }
 0x5f2   :  { %v3543_v17 = vadd.f32 %v3542_v52, %v3480_v11  ;;  %v12224_v52 = vld [vmem:[#allocation29_spill] sm:$0xff] }
 0x5f3   :  { %v9244_v36 = vsub.f32 %v12224_v52, %v9139_v37 }
 0x5f4   :  { %v3544_v39 = vadd.f32 %v3543_v17, %v3481_v50  ;;  %v3489_v50 = vmul.f32 %v9232_v8, %v9232_v8 }
 0x5f5   :  { %12225 = vst [vmem:[#allocation45_spill] sm:$0xff] %v9244_v36 }
 0x5f6   :  { %v3545_v54 = vadd.f32 %v3544_v39, %v3482_v59  ;;  %v9250_v59 = vsub.f32 %v12226_v40, %v9139_v37  ;;  %v3490_v39 = vmul.f32 %v9238_v27, %v9238_v27 }
 0x5f8   :  { %v3546_v58 = vadd.f32 %v3545_v54, %v3483_v62  ;;  %12227 = vst [vmem:[#allocation38_spill] sm:$0xff] %v9250_v59  ;;  %v9256_v62 = vsub.f32 %v8739_v15, %v9139_v37  ;;  %v3491_v54 = vmul.f32 %v9244_v36, %v9244_v36  ;;  %v3492_v23 = vmul.f32 %v9250_v59, %v9250_v59 }
 0x5fa   :  { %v3547_v53 = vadd.f32 %v3546_v58, %v3484_v0  ;;  %12228 = vst [vmem:[#allocation48_spill] sm:$0xff] %v9256_v62  ;;  %v12229_v0 = vld [vmem:[#allocation31_spill] sm:$0xff]  ;;  %v3493_v15 = vmul.f32 %v9256_v62, %v9256_v62 }
 0x5fb   :  { %v9262_v58 = vsub.f32 %v12229_v0, %v9139_v37 }
 0x5fc   :  { %v3548_v10 = vadd.f32 %v3547_v53, %v3485_v44  ;;  %v12231_v53 = vld [vmem:[#allocation33_spill] sm:$0xff] }
 0x5fd   :  { %12230 = vst [vmem:[#allocation34_spill] sm:$0xff] %v9262_v58 }
 0x5fe   :  { %v3549_v35 = vadd.f32 %v3548_v10, %v3486_v34  ;;  %v9268_v34 = vsub.f32 %v12231_v53, %v9139_v37 }
 0x600   :  { %v3550_v11 = vadd.f32 %v3549_v35, %v3487_v16  ;;  %12232 = vst [vmem:[#allocation81_spill] sm:$0xff] %v9268_v34  ;;  %v9274_v16 = vsub.f32 %v12233_v1, %v9139_v37  ;;  %v3494_v35 = vmul.f32 %v9262_v58, %v9262_v58  ;;  %v3495_v52 = vmul.f32 %v9268_v34, %v9268_v34  ;;  %v12243_v1 = vld [vmem:[#allocation49_spill] sm:$0xff] }
 0x602   :  { %v3551_v17 = vadd.f32 %v3550_v11, %v3488_v19  ;;  %12234 = vst [vmem:[#allocation75_spill] sm:$0xff] %v9274_v16  ;;  %v12235_v19 = vld [vmem:[#allocation37_spill] sm:$0xff] }
 0x603   :  { %v9280_v11 = vsub.f32 %v12235_v19, %v9139_v37 }
 0x604   :  { %v3552_v18 = vadd.f32 %v3551_v17, %v3489_v50  ;;  %v12237_v17 = vld [vmem:[#allocation40_spill] sm:$0xff] }
 0x605   :  { %12236 = vst [vmem:[#allocation41_spill] sm:$0xff] %v9280_v11  ;;  %v9286_v40 = vsub.f32 %v12237_v17, %v9139_v37  ;;  %v3497_v0 = vmul.f32 %v9280_v11, %v9280_v11 }
 0x606   :  { %v3553_v26 = vadd.f32 %v3552_v18, %v3490_v39  ;;  %v3496_v39 = vmul.f32 %v9274_v16, %v9274_v16 }
 0x607   :  { %12238 = vst [vmem:[#allocation77_spill] sm:$0xff] %v9286_v40 }
 0x608   :  { %v3554_v44 = vadd.f32 %v3553_v26, %v3491_v54  ;;  %v12239_v54 = vld [vmem:[#allocation43_spill] sm:$0xff] }
 0x609   :  { %v9292_v26 = vsub.f32 %v12239_v54, %v9139_v37 }
 0x60a   :  { %v3555_v10 = vadd.f32 %v3554_v44, %v3492_v23  ;;  %v12241_v44 = vld [vmem:[#allocation46_spill] sm:$0xff] }
 0x60b   :  { %12240 = vst [vmem:[#allocation70_spill] sm:$0xff] %v9292_v26  ;;  %v9298_v53 = vsub.f32 %v12241_v44, %v9139_v37  ;;  %v12249_v44 = vld [vmem:[#allocation58_spill] sm:$0xff] }
 0x60c   :  { %v3556_v38 = vadd.f32 %v3555_v10, %v3493_v15  ;;  %v3498_v15 = vmul.f32 %v9286_v40, %v9286_v40  ;;  %v3535_v40 = vmul.f32 %v9142_v57, %v9142_v57 }
 0x60d   :  { %12242 = vst [vmem:[#allocation78_spill] sm:$0xff] %v9298_v53  ;;  %v3500_v17 = vmul.f32 %v9298_v53, %v9298_v53 }
 0x60e   :  { %v3557_v50 = vadd.f32 %v3556_v38, %v3494_v35  ;;  %v9304_v35 = vsub.f32 %v12243_v1, %v9139_v37  ;;  %v3499_v38 = vmul.f32 %v9292_v26, %v9292_v26  ;;  %v9322_v1 = vsub.f32 %v12249_v44, %v9139_v37  ;;  %v12255_v44 = vld [vmem:[#allocation66_spill] sm:$0xff] }
 0x610   :  { %v3558_v18 = vadd.f32 %v3557_v50, %v3495_v52  ;;  %12244 = vst [vmem:[#allocation51_spill] sm:$0xff] %v9304_v35  ;;  %v12245_v52 = vld [vmem:[#allocation52_spill] sm:$0xff] }
 0x611   :  { %v9310_v50 = vsub.f32 %v12245_v52, %v9139_v37  ;;  %12250 = vst [vmem:[#allocation82_spill] sm:$0xff] %v9322_v1  ;;  %v12251_v52 = vld [vmem:[#allocation61_spill] sm:$0xff] }
 0x612   :  { %v3559_v23 = vadd.f32 %v3558_v18, %v3496_v39  ;;  %v12247_v18 = vld [vmem:[#allocation55_spill] sm:$0xff]  ;;  %v9328_v53 = vsub.f32 %v12251_v52, %v9139_v37  ;;  %v9346_v52 = vsub.f32 %v8784_v48, %v9139_v37 }
 0x613   :  { %12246 = vst [vmem:[#allocation80_spill] sm:$0xff] %v9310_v50  ;;  %v9316_v54 = vsub.f32 %v12247_v18, %v9139_v37  ;;  %v12253_v18 = vld [vmem:[#allocation64_spill] sm:$0xff] }
 0x614   :  { %v3560_v10 = vadd.f32 %v3559_v23, %v3497_v0  ;;  %v3501_v0 = vmul.f32 %v9304_v35, %v9304_v35  ;;  %12252 = vst [vmem:[#allocation44_spill] sm:$0xff] %v9328_v53  ;;  %v9334_v35 = vsub.f32 %v12253_v18, %v9139_v37  ;;  %v12258_v18 = vld [vmem:[#allocation67_spill] sm:$0xff]  ;;  %v3508_v48 = vmul.f32 %v9346_v52, %v9346_v52 }
 0x615   :  { %12248 = vst [vmem:[#allocation72_spill] sm:$0xff] %v9316_v54 }
 0x616   :  { %v3561_v19 = vadd.f32 %v3560_v10, %v3498_v15  ;;  %v3502_v15 = vmul.f32 %v9310_v50, %v9310_v50  ;;  %12254 = vst [vmem:[#allocation85_spill] sm:$0xff] %v9334_v35  ;;  %v9340_v50 = vsub.f32 %v12255_v44, %v9139_v37  ;;  %v12260_v44 = vld [vmem:[#allocation68_spill] sm:$0xff] }
 0x617   :  { %12257 = vst [vmem:[#allocation90_spill] sm:$0xff] %v9346_v52 }
 0x618   :  { %v3562_v39 = vadd.f32 %v3561_v19, %v3499_v38  ;;  %v3503_v38 = vmul.f32 %v9316_v54, %v9316_v54  ;;  %12256 = vst [vmem:[#allocation74_spill] sm:$0xff] %v9340_v50 }
 0x61a   :  { %v3563_v23 = vadd.f32 %v3562_v39, %v3500_v17  ;;  %v3504_v17 = vmul.f32 %v9322_v1, %v9322_v1  ;;  %v9352_v1 = vsub.f32 %v12258_v18, %v9139_v37  ;;  %v12263_v18 = vld [vmem:[#allocation39_spill] sm:$0xff] }
 0x61c   :  { %v3564_v10 = vadd.f32 %v3563_v23, %v3501_v0  ;;  %v3505_v0 = vmul.f32 %v9328_v53, %v9328_v53  ;;  %12259 = vst [vmem:[#allocation84_spill] sm:$0xff] %v9352_v1  ;;  %v9358_v53 = vsub.f32 %v12260_v44, %v9139_v37  ;;  %v12264_v44 = vld [vmem:[#allocation69_spill] sm:$0xff] }
 0x61d   :  { %v9376_v52 = vsub.f32 %v12264_v44, %v9139_v37  ;;  %v12267_v44 = vld [vmem:[#allocation42_spill] sm:$0xff] }
 0x61e   :  { %v3565_v19 = vadd.f32 %v3564_v10, %v3502_v15  ;;  %v3506_v15 = vmul.f32 %v9334_v35, %v9334_v35  ;;  %12261 = vst [vmem:[#allocation54_spill] sm:$0xff] %v9358_v53  ;;  %v9394_v54 = vsub.f32 %v12267_v44, %v9139_v37  ;;  %v9412_v44 = vsub.f32 %v9027_v30, %v9139_v37 }
 0x620   :  { %v3566_v39 = vadd.f32 %v3565_v19, %v3503_v38  ;;  %v3507_v38 = vmul.f32 %v9340_v50, %v9340_v50  ;;  %v9370_v50 = vsub.f32 %v12263_v18, %v9139_v37  ;;  %v12266_v18 = vld [vmem:[#allocation73_spill] sm:$0xff]  ;;  %v3519_v30 = vmul.f32 %v9412_v44, %v9412_v44 }
 0x622   :  { %v3567_v23 = vadd.f32 %v3566_v39, %v3504_v17  ;;  %v12262_v39 = vld [vmem:[#allocation32_spill] sm:$0xff] }
 0x623   :  { %v9364_v35 = vsub.f32 %v12262_v39, %v9139_v37  ;;  %v12265_v39 = vld [vmem:[#allocation71_spill] sm:$0xff] }
 0x624   :  { %v3568_v10 = vadd.f32 %v3567_v23, %v3505_v0  ;;  %v3509_v0 = vmul.f32 %v9352_v1, %v9352_v1  ;;  %v9382_v1 = vsub.f32 %v12265_v39, %v9139_v37  ;;  %v12268_v39 = vld [vmem:[#allocation36_spill] sm:$0xff] }
 0x625   :  { %v9400_v26 = vsub.f32 %v12268_v39, %v9139_v37  ;;  %v9418_v39 = vsub.f32 %v9035_v33, %v9139_v37 }
 0x626   :  { %v3569_v19 = vadd.f32 %v3568_v10, %v3506_v15  ;;  %v3510_v15 = vmul.f32 %v9358_v53, %v9358_v53  ;;  %v9388_v53 = vsub.f32 %v12266_v18, %v9139_v37  ;;  %v9406_v18 = vsub.f32 %v9019_v24, %v9139_v37 }
 0x627   :  { %v3520_v33 = vmul.f32 %v9418_v39, %v9418_v39 }
 0x628   :  { %v3570_v17 = vadd.f32 %v3569_v19, %v3507_v38  ;;  %v3511_v38 = vmul.f32 %v9364_v35, %v9364_v35  ;;  %v3518_v24 = vmul.f32 %v9406_v18, %v9406_v18 }
 0x62a   :  { %v3571_v23 = vadd.f32 %v3570_v17, %v3508_v48  ;;  %v3512_v48 = vmul.f32 %v9370_v50, %v9370_v50 }
 0x62c   :  { %v3572_v10 = vadd.f32 %v3571_v23, %v3509_v0  ;;  %v3513_v0 = vmul.f32 %v9376_v52, %v9376_v52 }
 0x62e   :  { %v3573_v19 = vadd.f32 %v3572_v10, %v3510_v15  ;;  %v3514_v15 = vmul.f32 %v9382_v1, %v9382_v1 }
 0x630   :  { %v3574_v17 = vadd.f32 %v3573_v19, %v3511_v38  ;;  %v3515_v38 = vmul.f32 %v9388_v53, %v9388_v53 }
 0x632   :  { %v3575_v23 = vadd.f32 %v3574_v17, %v3512_v48  ;;  %v3516_v48 = vmul.f32 %v9394_v54, %v9394_v54 }
 0x634   :  { %v3576_v10 = vadd.f32 %v3575_v23, %v3513_v0  ;;  %v3517_v0 = vmul.f32 %v9400_v26, %v9400_v26 }
 0x636   :  { %v3577_v19 = vadd.f32 %v3576_v10, %v3514_v15  ;;  %v9424_v10 = vsub.f32 %v9043_v32, %v9139_v37 }
 0x638   :  { %v3578_v17 = vadd.f32 %v3577_v19, %v3515_v38  ;;  %v9430_v19 = vsub.f32 %v9051_v12, %v9139_v37  ;;  %v3521_v32 = vmul.f32 %v9424_v10, %v9424_v10 }
 0x63a   :  { %v3579_v23 = vadd.f32 %v3578_v17, %v3516_v48  ;;  %v9436_v17 = vsub.f32 %v9061_v42, %v9139_v37  ;;  %v3522_v12 = vmul.f32 %v9430_v19, %v9430_v19 }
 0x63c   :  { %v3580_v15 = vadd.f32 %v3579_v23, %v3517_v0  ;;  %v9442_v23 = vsub.f32 %v9069_v5, %v9139_v37  ;;  %v3523_v42 = vmul.f32 %v9436_v17, %v9436_v17 }
 0x63e   :  { %v3581_v38 = vadd.f32 %v3580_v15, %v3518_v24  ;;  %v9448_v15 = vsub.f32 %v9077_v6, %v9139_v37  ;;  %v3524_v5 = vmul.f32 %v9442_v23, %v9442_v23 }
 0x640   :  { %v3582_v48 = vadd.f32 %v3581_v38, %v3519_v30  ;;  %v9454_v38 = vsub.f32 %v9085_v41, %v9139_v37  ;;  %v3525_v6 = vmul.f32 %v9448_v15, %v9448_v15 }
 0x642   :  { %v3583_v0 = vadd.f32 %v3582_v48, %v3520_v33  ;;  %v9460_v48 = vsub.f32 %v9093_v3, %v9139_v37  ;;  %v3526_v41 = vmul.f32 %v9454_v38, %v9454_v38 }
 0x644   :  { %v3584_v24 = vadd.f32 %v3583_v0, %v3521_v32  ;;  %v9466_v0 = vsub.f32 %v9101_v13, %v9139_v37  ;;  %v3527_v3 = vmul.f32 %v9460_v48, %v9460_v48 }
 0x646   :  { %v3585_v30 = vadd.f32 %v3584_v24, %v3522_v12  ;;  %v9472_v24 = vsub.f32 %v9108_v63, %v9139_v37  ;;  %v3528_v13 = vmul.f32 %v9466_v0, %v9466_v0 }
 0x648   :  { %v3586_v33 = vadd.f32 %v3585_v30, %v3523_v42  ;;  %v9478_v30 = vsub.f32 %v9115_v25, %v9139_v37  ;;  %v3529_v63 = vmul.f32 %v9472_v24, %v9472_v24 }
 0x64a   :  { %v3587_v32 = vadd.f32 %v3586_v33, %v3524_v5  ;;  %v9484_v33 = vsub.f32 %v9119_v46, %v9139_v37  ;;  %v3530_v25 = vmul.f32 %v9478_v30, %v9478_v30 }
 0x64c   :  { %v3588_v12 = vadd.f32 %v3587_v32, %v3525_v6  ;;  %v9490_v32 = vsub.f32 %v9123_v29, %v9139_v37  ;;  %v3531_v46 = vmul.f32 %v9484_v33, %v9484_v33 }
 0x64e   :  { %v3589_v42 = vadd.f32 %v3588_v12, %v3526_v41  ;;  %v9496_v12 = vsub.f32 %v9128_v31, %v9139_v37  ;;  %v3532_v29 = vmul.f32 %v9490_v32, %v9490_v32 }
 0x650   :  { %v3590_v5 = vadd.f32 %v3589_v42, %v3527_v3  ;;  %v9502_v42 = vsub.f32 %v9132_v51, %v9139_v37  ;;  %v3536_v51 = vmul.f32 %v9145_v7, %v9145_v7 }
 0x652   :  { %v3591_v6 = vadd.f32 %v3590_v5, %v3528_v13  ;;  %v3533_v5 = vmul.f32 %v9496_v12, %v9496_v12  ;;  %v3534_v31 = vmul.f32 %v9502_v42, %v9502_v42 }
 0x654   :  { %v3592_v41 = vadd.f32 %v3591_v6, %v3529_v63 }
 0x656   :  { %v3593_v3 = vadd.f32 %v3592_v41, %v3530_v25  ;;  %v3537_v41 = vmul.f32 %v9148_v43, %v9148_v43 }
 0x658   :  { %v3594_v13 = vadd.f32 %v3593_v3, %v3531_v46  ;;  %v3538_v3 = vmul.f32 %v9151_v45, %v9151_v45 }
 0x65a   :  { %v3595_v63 = vadd.f32 %v3594_v13, %v3532_v29  ;;  %v3539_v13 = vmul.f32 %v9154_v28, %v9154_v28 }
 0x65c   :  { %v3596_v6 = vadd.f32 %v3595_v63, %v3533_v5 }
 0x65e   :  { %v3597_v25 = vadd.f32 %v3596_v6, %v3534_v31 }
 0x660   :  { %v3598_v37 = vadd.f32 %v3597_v25, %v3535_v40 }
 0x662   :  { %v3599_v46 = vadd.f32 %v3598_v37, %v3536_v51 }
 0x664   :  { %v3600_v29 = vadd.f32 %v3599_v46, %v3537_v41  ;;  %v4035_v41 = vld [vmem:[#allocation8 + $0xa0] sm:$0xff] }
 0x665   :  { %4058 = vmatpush.msra.mxu1 %v4035_v41  ;;  %v3610_v46 = vld [vmem:[%s11819_s2] sm:$0x1]  ;;  %v4543_v41 = vld [vmem:[#allocation8 + $0x168] sm:$0xff] }
 0x666   :  { %v3601_v5 = vadd.f32 %v3600_v29, %v3538_v3 }
 0x668   :  { %v3602_v63 = vadd.f32 %v3601_v5, %v3539_v13  ;;  %v3965_v5 = vld [vmem:[#allocation8 + $0x78] sm:$0xff] }
 0x669   :  { %4256 = vmatpush.msrb.mxu2 %v3965_v5 }
 0x66a   :  { %v3603_v11 = vrot.slane %v3602_v63, 4 }
 0x66c   :  { %v3604_v16 = vadd.f32 %v3603_v11, %v3602_v63  ;;  %v4545_v63 = vld [vmem:[#allocation8 + $0x178] sm:$0xff] }
 0x66d   :  { %4546 = vmatpush.msrb.mxu3 %v4545_v63 }
 0x66e   :  { %v3605_v31 = vrot.slane %v3604_v16, 2 }
 0x670   :  { %v3606_v6 = vadd.f32 %v3605_v31, %v3604_v16 }
 0x672   :  { %v3607_v34 = vrot.slane %v3606_v6, 1 }
 0x674   :  { %v3608_v58 = vadd.f32 %v3607_v34, %v3606_v6 }
 0x676   :  { %v3609_v40 = vmul.f32 0.001953125, %v3608_v58  ;;  %v9526_v58 = vld [vmem:[%s11820_s3] ss:$0 sm:$0xff] }
 0x678   :  { %v3611_v25 = vadd.f32 1e-05, %v3609_v40 }
 0x67a   :  { %7676 = vrsqrt.f32 %v3611_v25  ;;  %vm3618_vm1 = vweird.f32 %v3611_v25 }
 0x680   :  { %v7677_v62 = vpop.eup %7676 }
 0x681   :  { %v3613_v51 = vmul.f32 %v7677_v62, %v3611_v25  ;;  %vm3619_vm0 = vweird.f32 %v7677_v62  ;;  %v3963_v25 = vld [vmem:[#allocation8 + $0x68] sm:$0xff] }
 0x682   :  { %vm3620_vm2 = vmor %vm3618_vm1, %vm3619_vm0 }
 0x683   :  { %v3614_v37 = vmul.f32 %v7677_v62, %v3613_v51  ;;  %v4544_v51 = vld [vmem:[#allocation8 + $0x170] sm:$0xff] }
 0x684   :  { %4547 = vmatpush.msrb.mxu3 %v4544_v51 }
 0x685   :  { %v3615_v59 = vmul.f32 0.5, %v3614_v37 }
 0x686   :  { %4548 = vmatpush.msrb.mxu3 %v4543_v41 }
 0x687   :  { %v3616_v36 = vsub.f32 1.5, %v3615_v59 }
 0x689   :  { %v3617_v11 = vmul.f32 %v7677_v62, %v3616_v36  ;;  %v3964_v36 = vld [vmem:[#allocation8 + $0x70] sm:$0xff] }
 0x68a   :  { %4257 = vmatpush.msrb.mxu2 %v3964_v36  ;;  %v4539_v36 = vld [vmem:[#allocation8 + $0x148] sm:$0xff] }
 0x68b   :  { %v3621_v16 = vsel %vm3620_vm2, %v7677_v62, %v3617_v11 }
 0x68c   :  { %v3622_v34 = vmul.f32 %v3621_v16, %v3610_v46  ;;  %4258 = vmatpush.msrb.mxu2 %v3963_v25  ;;  %v4542_v16 = vld [vmem:[#allocation8 + $0x160] sm:$0xff] }
 0x68d   :  { %4549 = vmatpush.msrb.mxu3 %v4542_v16 }
 0x68e   :  { %v9528_v3 = vperm.slane %v3622_v34, 0 }
 0x690   :  { %v3689_v59 = vmul.f32 %v9528_v3, %v9154_v28  ;;  %v3626_v62 = vmul.f32 %v9528_v3, %v9158_v60  ;;  %v3627_v31 = vmul.f32 %v9528_v3, %v9162_v21  ;;  %v3628_v6 = vmul.f32 %v9528_v3, %v9166_v9 }
 0x691   :  { %v3629_v28 = vmul.f32 %v9528_v3, %v9174_v61  ;;  %v3630_v40 = vmul.f32 %v9528_v3, %v9178_v4  ;;  %v3631_v37 = vmul.f32 %v9528_v3, %v9184_v56  ;;  %v3632_v60 = vmul.f32 %v9528_v3, %v9190_v2 }
 0x692   :  { %v3757_v29 = vadd.f32 %v9526_v58, %v3689_v59  ;;  %v9549_v21 = vmul.f32 %v9528_v3, %v9196_v14  ;;  %v9553_v9 = vmul.f32 %v9528_v3, %v9202_v55  ;;  %v9557_v61 = vmul.f32 %v9528_v3, %v9208_v22  ;;  %v3962_v14 = vld [vmem:[#allocation8 + $0x60] sm:$0xff]  ;;  %v4541_v59 = vld [vmem:[#allocation8 + $0x158] sm:$0xff] }
 0x693   :  { %v9561_v4 = vmul.f32 %v9528_v3, %v9214_v49  ;;  %v3661_v56 = vmul.f32 %v9528_v3, %v9364_v35  ;;  %v3662_v2 = vmul.f32 %v9528_v3, %v9370_v50  ;;  %v3663_v55 = vmul.f32 %v9528_v3, %v9376_v52  ;;  %4259 = vmatpush.msrb.mxu2 %v3962_v14 }
 0x694   :  { %v3821_v13 = vmax.f32 %v3757_v29, 0.0  ;;  %v3664_v22 = vmul.f32 %v9528_v3, %v9382_v1  ;;  %v3665_v46 = vmul.f32 %v9528_v3, %v9388_v53  ;;  %v3666_v49 = vmul.f32 %v9528_v3, %v9394_v54  ;;  %v3961_v1 = vld [vmem:[#allocation8 + $0x58] sm:$0xff]  ;;  %4550 = vmatpush.msrb.mxu3 %v4541_v59 }
 0x695   :  { %v3667_v35 = vmul.f32 %v9528_v3, %v9400_v26  ;;  %v3668_v50 = vmul.f32 %v9528_v3, %v9406_v18  ;;  %v3669_v11 = vmul.f32 %v9528_v3, %v9412_v44  ;;  %v3670_v52 = vmul.f32 %v9528_v3, %v9418_v39  ;;  %4260 = vmatpush.msrb.mxu2 %v3961_v1 }
 0x696   :  { %3885 = vst [vmem:[#allocation2 + $0x450] sm:$0xff] %v3821_v13  ;;  %v3671_v53 = vmul.f32 %v9528_v3, %v9424_v10  ;;  %v3672_v54 = vmul.f32 %v9528_v3, %v9430_v19  ;;  %v3673_v26 = vmul.f32 %v9528_v3, %v9436_v17  ;;  %v3674_v18 = vmul.f32 %v9528_v3, %v9442_v23  ;;  %v3960_v19 = vld [vmem:[#allocation8 + $0x50] sm:$0xff] }
 0x697   :  { %v3675_v44 = vmul.f32 %v9528_v3, %v9448_v15  ;;  %v3676_v39 = vmul.f32 %v9528_v3, %v9454_v38  ;;  %v3677_v34 = vmul.f32 %v9528_v3, %v9460_v48  ;;  %v3678_v10 = vmul.f32 %v9528_v3, %v9466_v0  ;;  %4261 = vmatpush.msrb.mxu2 %v3960_v19  ;;  %v4540_v13 = vld [vmem:[#allocation8 + $0x150] sm:$0xff] }
 0x698   :  { %v3679_v17 = vmul.f32 %v9528_v3, %v9472_v24  ;;  %v3680_v23 = vmul.f32 %v9528_v3, %v9478_v30  ;;  %v3681_v15 = vmul.f32 %v9528_v3, %v9484_v33  ;;  %v3682_v38 = vmul.f32 %v9528_v3, %v9490_v32  ;;  %v3959_v30 = vld [vmem:[#allocation8 + $0x48] sm:$0xff]  ;;  %4551 = vmatpush.msrb.mxu3 %v4540_v13 }
 0x699   :  { %v3683_v48 = vmul.f32 %v9528_v3, %v9496_v12  ;;  %v3684_v0 = vmul.f32 %v9528_v3, %v9502_v42  ;;  %v3685_v29 = vmul.f32 %v9528_v3, %v9142_v57  ;;  %v3686_v24 = vmul.f32 %v9528_v3, %v9145_v7  ;;  %4262 = vmatpush.msrb.mxu2 %v3959_v30 }
 0x69a   :  { %v3687_v33 = vmul.f32 %v9528_v3, %v9148_v43  ;;  %v3688_v32 = vmul.f32 %v9528_v3, %v9151_v45  ;;  %v9620_v12 = vadd.f32 %v9526_v58, %v3626_v62  ;;  %v9623_v42 = vadd.f32 %v9526_v58, %v3627_v31  ;;  %v3958_v45 = vld [vmem:[#allocation8 + $0x40] sm:$0xff]  ;;  %4552 = vmatpush.msrb.mxu3 %v4539_v36 }
 0x69b   :  { %v9626_v57 = vadd.f32 %v9526_v58, %v3628_v6  ;;  %v9629_v7 = vadd.f32 %v9526_v58, %v3629_v28  ;;  %v9632_v5 = vadd.f32 %v9526_v58, %v3630_v40  ;;  %v9635_v43 = vadd.f32 %v9526_v58, %v3631_v37  ;;  %4263 = vmatpush.msrb.mxu2 %v3958_v45  ;;  %v3957_v37 = vld [vmem:[#allocation8 + $0x38] sm:$0xff] }
 0x69c   :  { %v9638_v63 = vadd.f32 %v9526_v58, %v3632_v60  ;;  %v9641_v62 = vadd.f32 %v9526_v58, %v3661_v56  ;;  %v9644_v31 = vadd.f32 %v9526_v58, %v3662_v2  ;;  %v9647_v6 = vadd.f32 %v9526_v58, %v3663_v55  ;;  %v4538_v60 = vld [vmem:[#allocation8 + $0x140] sm:$0xff] }
 0x69d   :  { %v9650_v28 = vadd.f32 %v9526_v58, %v3664_v22  ;;  %v9653_v40 = vadd.f32 %v9526_v58, %v3665_v46  ;;  %v9656_v25 = vadd.f32 %v9526_v58, %v3666_v49  ;;  %v9659_v51 = vadd.f32 %v9526_v58, %v3667_v35  ;;  %4264 = vmatpush.msrb.mxu2 %v3957_v37  ;;  %v3956_v35 = vld [vmem:[#allocation8 + $0x30] sm:$0xff] }
 0x69e   :  { %v9662_v56 = vadd.f32 %v9526_v58, %v3668_v50  ;;  %v9665_v2 = vadd.f32 %v9526_v58, %v3669_v11  ;;  %v9668_v14 = vadd.f32 %v9526_v58, %v3670_v52  ;;  %v9671_v41 = vadd.f32 %v9526_v58, %v3671_v53  ;;  %4553 = vmatpush.msrb.mxu3 %v4538_v60  ;;  %v4537_v50 = vld [vmem:[#allocation8 + $0x138] sm:$0xff]  ;;  %v12273_v60 = vld [vmem:[#allocation45_spill] sm:$0xff] }
 0x69f   :  { %v9674_v55 = vadd.f32 %v9526_v58, %v3672_v54  ;;  %v9677_v22 = vadd.f32 %v9526_v58, %v3673_v26  ;;  %v9680_v46 = vadd.f32 %v9526_v58, %v3674_v18  ;;  %v9683_v49 = vadd.f32 %v9526_v58, %v3675_v44  ;;  %4265 = vmatpush.msrb.mxu2 %v3956_v35  ;;  %v3955_v44 = vld [vmem:[#allocation8 + $0x28] sm:$0xff] }
 0x6a0   :  { %v9686_v11 = vadd.f32 %v9526_v58, %v3676_v39  ;;  %v9689_v52 = vadd.f32 %v9526_v58, %v3677_v34  ;;  %v9692_v1 = vadd.f32 %v9526_v58, %v3678_v10  ;;  %v9695_v16 = vadd.f32 %v9526_v58, %v3679_v17  ;;  %4554 = vmatpush.msrb.mxu3 %v4537_v50  ;;  %v4536_v39 = vld [vmem:[#allocation8 + $0x130] sm:$0xff] }
 0x6a1   :  { %v9698_v53 = vadd.f32 %v9526_v58, %v3680_v23  ;;  %v9701_v54 = vadd.f32 %v9526_v58, %v3681_v15  ;;  %v9704_v26 = vadd.f32 %v9526_v58, %v3682_v38  ;;  %v9707_v18 = vadd.f32 %v9526_v58, %v3683_v48  ;;  %4266 = vmatpush.msrb.mxu2 %v3955_v44  ;;  %v3954_v48 = vld [vmem:[#allocation8 + $0x20] sm:$0xff] }
 0x6a2   :  { %v9710_v34 = vadd.f32 %v9526_v58, %v3684_v0  ;;  %v9713_v10 = vadd.f32 %v9526_v58, %v3685_v29  ;;  %v9716_v19 = vadd.f32 %v9526_v58, %v3686_v24  ;;  %v9719_v59 = vadd.f32 %v9526_v58, %v3687_v33  ;;  %4555 = vmatpush.msrb.mxu3 %v4536_v39  ;;  %v4535_v0 = vld [vmem:[#allocation8 + $0x128] sm:$0xff] }
 0x6a3   :  { %v9722_v17 = vadd.f32 %v9526_v58, %v3688_v32  ;;  %v11888_v23 = vmax.f32 %v9620_v12, 0.0  ;;  %v11886_v15 = vmax.f32 %v9623_v42, 0.0  ;;  %v11884_v38 = vmax.f32 %v9626_v57, 0.0  ;;  %4267 = vmatpush.msrb.mxu2 %v3954_v48 }
 0x6a4   :  { %v3637_v29 = vmul.f32 %v9528_v3, %v9220_v47  ;;  %v9731_v24 = vadd.f32 %v9526_v58, %v9549_v21  ;;  %v11882_v30 = vmax.f32 %v9629_v7, 0.0  ;;  %v3638_v13 = vmul.f32 %v9528_v3, %v9226_v20  ;;  %4556 = vmatpush.msrb.mxu3 %v4535_v0  ;;  %v3953_v47 = vld [vmem:[#allocation8 + $0x18] sm:$0xff] }
 0x6a5   :  { %v9738_v33 = vadd.f32 %v9526_v58, %v9553_v9  ;;  %v11883_v32 = vmax.f32 %v9632_v5, 0.0  ;;  %3822 = vst [vmem:[#allocation2 + $0x28] sm:$0xff] %v11888_v23  ;;  %v3639_v21 = vmul.f32 %v9528_v3, %v9232_v8  ;;  %v9747_v45 = vadd.f32 %v9526_v58, %v9557_v61  ;;  %4268 = vmatpush.msrb.mxu2 %v3953_v47  ;;  %v4534_v9 = vld [vmem:[#allocation8 + $0x120] sm:$0xff]  ;;  %v3952_v61 = vld [vmem:[#allocation8 + $0x10] sm:$0xff]  ;;  %v12277_v47 = vld [vmem:[#allocation48_spill] sm:$0xff] }
 0x6a6   :  { %12269 = vst [vmem:[#allocation89_spill] sm:$0xff] %v9731_v24  ;;  %v11885_v20 = vmax.f32 %v9635_v43, 0.0  ;;  %v3640_v36 = vmul.f32 %v9528_v3, %v9238_v27  ;;  %v9756_v37 = vadd.f32 %v9526_v58, %v9561_v4  ;;  %v11887_v8 = vmax.f32 %v9638_v63, 0.0  ;;  %4557 = vmatpush.msrb.mxu3 %v4534_v9  ;;  %v4533_v27 = vld [vmem:[#allocation8 + $0x118] sm:$0xff]  ;;  %v12275_v4 = vld [vmem:[#allocation38_spill] sm:$0xff] }
 0x6a7   :  { %12270 = vst [vmem:[#allocation76_spill] sm:$0xff] %v9738_v33  ;;  %v3641_v35 = vmul.f32 %v9528_v3, %v12273_v60  ;;  %v9764_v50 = vadd.f32 %v9526_v58, %v3637_v29  ;;  %v11889_v44 = vmax.f32 %v9731_v24, 0.0  ;;  %4269 = vmatpush.msrb.mxu2 %v3952_v61  ;;  %v3642_v39 = vmul.f32 %v9528_v3, %v12275_v4  ;;  %v3951_v29 = vld [vmem:[#allocation8 + $0x8] sm:$0xff] }
 0x6a8   :  { %12271 = vst [vmem:[#allocation87_spill] sm:$0xff] %v9747_v45  ;;  %v9772_v48 = vadd.f32 %v9526_v58, %v3638_v13  ;;  %v11890_v0 = vmax.f32 %v9738_v33, 0.0  ;;  %4558 = vmatpush.msrb.mxu3 %v4533_v27  ;;  %v3643_v9 = vmul.f32 %v9528_v3, %v12277_v47  ;;  %v9780_v60 = vadd.f32 %v9526_v58, %v3639_v21  ;;  %v4532_v13 = vld [vmem:[#allocation8 + $0x110] sm:$0xff]  ;;  %v12279_v4 = vld [vmem:[#allocation34_spill] sm:$0xff]  ;;  %v4034_v21 = vld [vmem:[#allocation8 + $0x98] sm:$0xff] }
 0x6a9   :  { %3823 = vst [vmem:[#allocation2 + $0x30] sm:$0xff] %v11886_v15  ;;  %v11891_v61 = vmax.f32 %v9747_v45, 0.0  ;;  %4270 = vmatpush.msrb.mxu2 %v3951_v29  ;;  %v11892_v27 = vmax.f32 %v9756_v37, 0.0  ;;  %v12281_v47 = vld [vmem:[#allocation81_spill] sm:$0xff]  ;;  %v11894_v29 = vmax.f32 %v9764_v50, 0.0  ;;  %4059 = vmatpush.msra.mxu1 %v4034_v21  ;;  %v9857_v45 = vld [vmem:[#allocation2 + $0x248] sm:$0xff] }
 0x6aa   :  { %12272 = vst [vmem:[#allocation47_spill] sm:$0xff] %v9756_v37  ;;  %4559 = vmatpush.msrb.mxu3 %v4532_v13  ;;  %v12292_v37 = vld [vmem:[#allocation51_spill] sm:$0xff] }
 0x6ab   :  { %3824 = vst [vmem:[#allocation2 + $0x48] sm:$0xff] %v11884_v38  ;;  %v3645_v38 = vmul.f32 %v9528_v3, %v12281_v47  ;;  %v12284_v47 = vld [vmem:[#allocation41_spill] sm:$0xff] }
 0x6ac   :  { %12274 = vst [vmem:[#allocation93_spill] sm:$0xff] %v9764_v50  ;;  %v3647_v23 = vmul.f32 %v9528_v3, %v12284_v47  ;;  %v12287_v47 = vld [vmem:[#allocation70_spill] sm:$0xff]  ;;  %v12295_v50 = vld [vmem:[#allocation80_spill] sm:$0xff] }
 0x6ad   :  { %3825 = vst [vmem:[#allocation2 + $0x50] sm:$0xff] %v11882_v30  ;;  %v3644_v30 = vmul.f32 %v9528_v3, %v12279_v4  ;;  %v12283_v4 = vld [vmem:[#allocation75_spill] sm:$0xff]  ;;  %v3649_v21 = vmul.f32 %v9528_v3, %v12287_v47  ;;  %v12291_v47 = vmax.f32 %v9772_v48, 0.0 }
 0x6ae   :  { %12276 = vst [vmem:[#allocation79_spill] sm:$0xff] %v9772_v48  ;;  %v3646_v15 = vmul.f32 %v9528_v3, %v12283_v4  ;;  %v12285_v4 = vld [vmem:[#allocation77_spill] sm:$0xff]  ;;  %v4531_v48 = vld [vmem:[#allocation8 + $0x108] sm:$0xff] }
 0x6af   :  { %3826 = vst [vmem:[#allocation2 + $0x68] sm:$0xff] %v11883_v32  ;;  %v9788_v32 = vadd.f32 %v9526_v58, %v3640_v36  ;;  %v4899_v36 = vld [vmem:[#allocation8 + $0x1f8] sm:$0xff]  ;;  %v3648_v13 = vmul.f32 %v9528_v3, %v12285_v4  ;;  %v12289_v4 = vld [vmem:[#allocation78_spill] sm:$0xff]  ;;  %4560 = vmatpush.msrb.mxu3 %v4531_v48 }
 0x6b0   :  { %12278 = vst [vmem:[#allocation91_spill] sm:$0xff] %v9780_v60  ;;  %4900 = vmatpush.msrb.mxu0 %v4899_v36  ;;  %v3650_v36 = vmul.f32 %v9528_v3, %v12289_v4  ;;  %v12294_v4 = vmax.f32 %v9780_v60, 0.0  ;;  %v12299_v60 = vld [vmem:[#allocation82_spill] sm:$0xff] }
 0x6b1   :  { %3827 = vst [vmem:[#allocation2 + $0x70] sm:$0xff] %v11885_v20  ;;  %v9796_v20 = vadd.f32 %v9526_v58, %v3641_v35  ;;  %v4033_v35 = vld [vmem:[#allocation8 + $0x90] sm:$0xff]  ;;  %v3654_v33 = vmul.f32 %v9528_v3, %v12299_v60 }
 0x6b2   :  { %12280 = vst [vmem:[#allocation57_spill] sm:$0xff] %v9788_v32  ;;  %4060 = vmatpush.msra.mxu1 %v4033_v35  ;;  %v3651_v35 = vmul.f32 %v9528_v3, %v12292_v37  ;;  %v12296_v37 = vmax.f32 %v9788_v32, 0.0  ;;  %v4465_v32 = vld [vmem:[#allocation2 + $0x9] sm:$0xff]  ;;  %v9871_v24 = vadd.f32 %v9526_v58, %v3650_v36  ;;  %v12303_v36 = vld [vmem:[#allocation85_spill] sm:$0xff] }
 0x6b3   :  { %3828 = vst [vmem:[#allocation2 + $0x88] sm:$0xff] %v11887_v8  ;;  %v9804_v8 = vadd.f32 %v9526_v58, %v3642_v39  ;;  %v4898_v39 = vld [vmem:[#allocation8 + $0x1f0] sm:$0xff] }
 0x6b4   :  { %12282 = vst [vmem:[#allocation83_spill] sm:$0xff] %v9796_v20  ;;  %4901 = vmatpush.msrb.mxu0 %v4898_v39  ;;  %v3652_v39 = vmul.f32 %v9528_v3, %v12295_v50  ;;  %v9863_v50 = vadd.f32 %v9526_v58, %v3649_v21 }
 0x6b5   :  { %3829 = vst [vmem:[#allocation2 + $0x90] sm:$0xff] %v11889_v44  ;;  %v9812_v44 = vadd.f32 %v9526_v58, %v3643_v9  ;;  %v4032_v9 = vld [vmem:[#allocation8 + $0x88] sm:$0xff]  ;;  %v12300_v21 = vmax.f32 %v9804_v8, 0.0 }
 0x6b6   :  { %3830 = vst [vmem:[#allocation2 + $0xa8] sm:$0xff] %v11890_v0  ;;  %v9820_v0 = vadd.f32 %v9526_v58, %v3644_v30  ;;  %4061 = vmatpush.msra.mxu1 %v4032_v9  ;;  %v4897_v30 = vld [vmem:[#allocation8 + $0x1e8] sm:$0xff]  ;;  %v4895_v9 = vld [vmem:[#allocation8 + $0x1d8] sm:$0xff] }
 0x6b7   :  { %3831 = vst [vmem:[#allocation2 + $0xb0] sm:$0xff] %v11891_v61  ;;  %v9828_v61 = vadd.f32 %v9526_v58, %v3645_v38  ;;  %v4031_v38 = vld [vmem:[#allocation8 + $0x80] sm:$0xff]  ;;  %4902 = vmatpush.msrb.mxu0 %v4897_v30  ;;  %v12298_v30 = vmax.f32 %v9796_v20, 0.0  ;;  %v12302_v60 = vmax.f32 %v9812_v44, 0.0 }
 0x6b8   :  { %12286 = vst [vmem:[#allocation94_spill] sm:$0xff] %v9820_v0  ;;  %4062 = vmatpush.msra.mxu1 %v4031_v38  ;;  %v12297_v38 = vld [vmem:[#allocation72_spill] sm:$0xff] }
 0x6b9   :  { %3832 = vst [vmem:[#allocation2 + $0xc8] sm:$0xff] %v11892_v27  ;;  %v9836_v27 = vadd.f32 %v9526_v58, %v3646_v15  ;;  %v4896_v15 = vld [vmem:[#allocation8 + $0x1e0] sm:$0xff]  ;;  %4063 = vmatmul.f32.vlgmr.msra.gmra.mxu1 %v9857_v45 }
 0x6ba   :  { %12288 = vst [vmem:[#allocation50_spill] sm:$0xff] %v9828_v61  ;;  %4903 = vmatpush.msrb.mxu0 %v4896_v15  ;;  %v3886_v15 = vld [vmem:[#allocation2 + $0x7] sm:$0xff] }
 0x6bb   :  { %3833 = vst [vmem:[#allocation2 + $0xd0] sm:$0xff] %v11894_v29  ;;  %v9844_v29 = vadd.f32 %v9526_v58, %v3647_v23  ;;  %v3950_v23 = vld [vmem:[#allocation8] sm:$0xff] }
 0x6bc   :  { %12290 = vst [vmem:[#allocation86_spill] sm:$0xff] %v9836_v27  ;;  %4271 = vmatpush.msrb.mxu2 %v3950_v23  ;;  %4904 = vmatpush.msrb.mxu0 %v4895_v9  ;;  %v9879_v23 = vadd.f32 %v9526_v58, %v3651_v35  ;;  %v4893_v35 = vld [vmem:[#allocation8 + $0x1c8] sm:$0xff] }
 0x6bd   :  { %3834 = vst [vmem:[#allocation2 + $0xe8] sm:$0xff] %v12291_v47  ;;  %v9852_v47 = vadd.f32 %v9526_v58, %v3648_v13  ;;  %4272 = vmatmul.f32.vlgmr.msrb.gmra.mxu2 %v3886_v15  ;;  %v4894_v13 = vld [vmem:[#allocation8 + $0x1d0] sm:$0xff]  ;;  %v12304_v15 = vmax.f32 %v9820_v0, 0.0  ;;  %v9903_v0 = vadd.f32 %v9526_v58, %v3654_v33 }
 0x6be   :  { %12293 = vst [vmem:[#allocation60_spill] sm:$0xff] %v9844_v29  ;;  %4905 = vmatpush.msrb.mxu0 %v4894_v13  ;;  %v12308_v13 = vmax.f32 %v9836_v27, 0.0  ;;  %v3887_v33 = vld [vmem:[#allocation2 + $0xf] sm:$0xff] }
 0x6bf   :  { %3835 = vst [vmem:[#allocation2 + $0xf0] sm:$0xff] %v12294_v4  ;;  %v3653_v4 = vmul.f32 %v9528_v3, %v12297_v38  ;;  %v3656_v38 = vmul.f32 %v9528_v3, %v12303_v36  ;;  %v12306_v36 = vmax.f32 %v9828_v61, 0.0  ;;  %v12311_v61 = vld [vmem:[#allocation54_spill] sm:$0xff] }
 0x6c0   :  { %3836 = vst [vmem:[#allocation2 + $0x108] sm:$0xff] %v12296_v37  ;;  %v4530_v37 = vld [vmem:[#allocation8 + $0x100] sm:$0xff]  ;;  %4906 = vmatpush.msrb.mxu0 %v4893_v35 }
 0x6c1   :  { %3837 = vst [vmem:[#allocation2 + $0x110] sm:$0xff] %v12298_v30  ;;  %v12301_v30 = vld [vmem:[#allocation44_spill] sm:$0xff]  ;;  %4561 = vmatpush.msrb.mxu3 %v4530_v37  ;;  %v3724_v27 = vadd.f32 %v9526_v58, %v3656_v38  ;;  %4066 = vmatmul.f32.gmra.mxu1 %v9857_v45  ;;  %v12314_v38 = vmax.f32 %v9871_v24, 0.0 }
 0x6c2   :  { %3838 = vst [vmem:[#allocation2 + $0x128] sm:$0xff] %v12300_v21  ;;  %v3655_v48 = vmul.f32 %v9528_v3, %v12301_v30  ;;  %v9887_v21 = vadd.f32 %v9526_v58, %v3652_v39  ;;  %4562 = vmatmul.f32.vlgmr.msrb.gmra.mxu3 %v4465_v32  ;;  %v12305_v30 = vld [vmem:[#allocation74_spill] sm:$0xff]  ;;  %v3660_v32 = vmul.f32 %v9528_v3, %v12311_v61 }
 0x6c3   :  { %3839 = vst [vmem:[#allocation2 + $0x130] sm:$0xff] %v12302_v60  ;;  %v3657_v20 = vmul.f32 %v9528_v3, %v12305_v30  ;;  %v9895_v60 = vadd.f32 %v9526_v58, %v3653_v4  ;;  %v12307_v39 = vld [vmem:[#allocation90_spill] sm:$0xff]  ;;  %v12309_v4 = vld [vmem:[#allocation84_spill] sm:$0xff]  ;;  %v3788_v35 = vmax.f32 %v3724_v27, 0.0 }
 0x6c4   :  { %3840 = vst [vmem:[#allocation2 + $0x148] sm:$0xff] %v12304_v15  ;;  %v3658_v9 = vmul.f32 %v9528_v3, %v12307_v39  ;;  %v4892_v15 = vld [vmem:[#allocation8 + $0x1c0] sm:$0xff]  ;;  %v3659_v30 = vmul.f32 %v9528_v3, %v12309_v4  ;;  %v9911_v37 = vadd.f32 %v9526_v58, %v3655_v48  ;;  %v12310_v39 = vmax.f32 %v9844_v29, 0.0  ;;  %v4891_v4 = vld [vmem:[#allocation8 + $0x1b8] sm:$0xff]  ;;  %v4889_v61 = vld [vmem:[#allocation8 + $0x1a8] sm:$0xff] }
 0x6c5   :  { %3841 = vst [vmem:[#allocation2 + $0x150] sm:$0xff] %v12306_v36  ;;  %4907 = vmatpush.msrb.mxu0 %v4892_v15  ;;  %v3725_v48 = vadd.f32 %v9526_v58, %v3657_v20  ;;  %v4466_v29 = vld [vmem:[#allocation2 + $0x11] sm:$0xff]  ;;  %4275 = vmatmul.f32.gmra.mxu2 %v3887_v33  ;;  %v12315_v36 = vmax.f32 %v9879_v23, 0.0  ;;  %v12317_v33 = vmax.f32 %v9895_v60, 0.0  ;;  %v4888_v20 = vld [vmem:[#allocation8 + $0x1a0] sm:$0xff] }
 0x6c6   :  { %3842 = vst [vmem:[#allocation2 + $0x168] sm:$0xff] %v12308_v13  ;;  %v12312_v13 = vmax.f32 %v9852_v47, 0.0  ;;  %v3726_v3 = vadd.f32 %v9526_v58, %v3658_v9  ;;  %v4890_v15 = vld [vmem:[#allocation8 + $0x1b0] sm:$0xff]  ;;  %v12316_v9 = vmax.f32 %v9887_v21, 0.0 }
 0x6c7   :  { %3843 = vst [vmem:[#allocation2 + $0x170] sm:$0xff] %v12310_v39  ;;  %v12313_v39 = vmax.f32 %v9863_v50, 0.0  ;;  %4908 = vmatpush.msrb.mxu0 %v4891_v4 }
 0x6c8   :  { %3844 = vst [vmem:[#allocation2 + $0x188] sm:$0xff] %v12312_v13  ;;  %v3727_v13 = vadd.f32 %v9526_v58, %v3659_v30  ;;  %v3790_v4 = vmax.f32 %v3726_v3, 0.0  ;;  %v12318_v30 = vmax.f32 %v9903_v0, 0.0  ;;  %v4886_v3 = vld [vmem:[#allocation8 + $0x190] sm:$0xff] }
 0x6c9   :  { %3845 = vst [vmem:[#allocation2 + $0x190] sm:$0xff] %v12313_v39  ;;  %v3728_v39 = vadd.f32 %v9526_v58, %v3660_v32  ;;  %4909 = vmatpush.msrb.mxu0 %v4890_v15  ;;  %v12319_v58 = vmax.f32 %v9911_v37, 0.0  ;;  %v5253_v32 = vld [vmem:[#allocation8 + $0x278] sm:$0xff]  ;;  %v3793_v15 = vmax.f32 %v9641_v62, 0.0  ;;  %v3797_v62 = vmax.f32 %v9653_v40, 0.0  ;;  %v3889_v40 = vld [vmem:[#allocation2 + $0x2f] sm:$0xff] }
 0x6ca   :  { %3846 = vst [vmem:[#allocation2 + $0x1a8] sm:$0xff] %v12314_v38  ;;  %4565 = vmatmul.f32.gmra.mxu3 %v4466_v29  ;;  %v3789_v38 = vmax.f32 %v3725_v48, 0.0  ;;  %v4887_v29 = vld [vmem:[#allocation8 + $0x198] sm:$0xff]  ;;  %v12320_v48 = vmax.f32 %v9620_v12, 0.0  ;;  %5254 = vmatpush.msrb.mxu1 %v5253_v32  ;;  %v3796_v12 = vmax.f32 %v9650_v28, 0.0  ;;  %v12321_v28 = vmax.f32 %v9623_v42, 0.0 }
 0x6cb   :  { %3847 = vst [vmem:[#allocation2 + $0x1b0] sm:$0xff] %v12315_v36  ;;  %4910 = vmatpush.msrb.mxu0 %v4889_v61  ;;  %v3791_v36 = vmax.f32 %v3727_v13, 0.0  ;;  %v3792_v27 = vmax.f32 %v3728_v39, 0.0  ;;  %v3794_v61 = vmax.f32 %v9644_v31, 0.0  ;;  %v4467_v13 = vld [vmem:[#allocation2 + $0x29] sm:$0xff]  ;;  %v3798_v31 = vmax.f32 %v9656_v25, 0.0 }
 0x6cc   :  { %3848 = vst [vmem:[#allocation2 + $0x1c8] sm:$0xff] %v12316_v9  ;;  %4069 = vmatmul.f32.gmra.mxu1 %v12320_v48  ;;  %v3888_v9 = vld [vmem:[#allocation2 + $0x27] sm:$0xff]  ;;  %v5252_v39 = vld [vmem:[#allocation8 + $0x270] sm:$0xff]  ;;  %v3803_v25 = vmax.f32 %v9671_v41, 0.0  ;;  %v3805_v42 = vmax.f32 %v9677_v22, 0.0  ;;  %v12322_v41 = vmax.f32 %v9626_v57, 0.0 }
 0x6cd   :  { %3849 = vst [vmem:[#allocation2 + $0x1d0] sm:$0xff] %v12317_v33  ;;  %4911 = vmatpush.msrb.mxu0 %v4888_v20  ;;  %4278 = vmatmul.f32.gmra.mxu2 %v3888_v9  ;;  %v4885_v20 = vld [vmem:[#allocation8 + $0x188] sm:$0xff]  ;;  %v3799_v33 = vmax.f32 %v9659_v51, 0.0  ;;  %v4468_v51 = vld [vmem:[#allocation2 + $0x31] sm:$0xff]  ;;  %v3810_v22 = vmax.f32 %v9692_v1, 0.0  ;;  %v3813_v57 = vmax.f32 %v9701_v54, 0.0 }
 0x6ce   :  { %3850 = vst [vmem:[#allocation2 + $0x1e8] sm:$0xff] %v12318_v30  ;;  %5255 = vmatpush.msrb.mxu1 %v5252_v39  ;;  %v3802_v30 = vmax.f32 %v9668_v14, 0.0  ;;  %v3808_v14 = vmax.f32 %v9686_v11, 0.0  ;;  %v3814_v11 = vmax.f32 %v9704_v26, 0.0  ;;  %v3816_v1 = vmax.f32 %v9710_v34, 0.0  ;;  %v3893_v48 = vld [vmem:[#allocation2 + $0x6f] sm:$0xff] }
 0x6cf   :  { %3851 = vst [vmem:[#allocation2 + $0x1f0] sm:$0xff] %v12319_v58  ;;  %4912 = vmatpush.msrb.mxu0 %v4887_v29  ;;  %v3809_v58 = vmax.f32 %v9689_v52, 0.0  ;;  %v3815_v52 = vmax.f32 %v9707_v18, 0.0  ;;  %v3817_v32 = vmax.f32 %v9713_v10, 0.0  ;;  %v5251_v29 = vld [vmem:[#allocation8 + $0x268] sm:$0xff]  ;;  %v3818_v54 = vmax.f32 %v9716_v19, 0.0 }
 0x6d0   :  { %3852 = vst [vmem:[#allocation2 + $0x208] sm:$0xff] %v3788_v35  ;;  %v3795_v35 = vmax.f32 %v9647_v6, 0.0  ;;  %v3800_v6 = vmax.f32 %v9662_v56, 0.0  ;;  %v3804_v56 = vmax.f32 %v9674_v55, 0.0  ;;  %v3890_v55 = vld [vmem:[#allocation2 + $0x47] sm:$0xff]  ;;  %5256 = vmatpush.msrb.mxu1 %v5251_v29  ;;  %v3819_v26 = vmax.f32 %v9719_v59, 0.0 }
 0x6d1   :  { %3853 = vst [vmem:[#allocation2 + $0x210] sm:$0xff] %v3789_v38  ;;  %4913 = vmatpush.msrb.mxu0 %v4886_v3  ;;  %v4884_v38 = vld [vmem:[#allocation8 + $0x180] sm:$0xff]  ;;  %v4470_v18 = vld [vmem:[#allocation2 + $0x51] sm:$0xff]  ;;  %v3820_v34 = vmax.f32 %v9722_v17, 0.0  ;;  %v4471_v19 = vld [vmem:[#allocation2 + $0x69] sm:$0xff]  ;;  %v12325_v59 = vmax.f32 %v9635_v43, 0.0 }
 0x6d2   :  { %3854 = vst [vmem:[#allocation2 + $0x268] sm:$0xff] %v3790_v4  ;;  %4568 = vmatmul.f32.gmra.mxu3 %v4467_v13  ;;  %v3801_v4 = vmax.f32 %v9665_v2, 0.0  ;;  %v3806_v2 = vmax.f32 %v9680_v46, 0.0  ;;  %v3811_v46 = vmax.f32 %v9695_v16, 0.0  ;;  %v12323_v16 = vmax.f32 %v9629_v7, 0.0  ;;  %v3892_v10 = vld [vmem:[#allocation2 + $0x67] sm:$0xff] }
 0x6d3   :  { %3855 = vst [vmem:[#allocation2 + $0x270] sm:$0xff] %v3791_v36  ;;  %4914 = vmatpush.msrb.mxu0 %v4885_v20  ;;  %v3807_v36 = vmax.f32 %v9683_v49, 0.0  ;;  %v4469_v49 = vld [vmem:[#allocation2 + $0x49] sm:$0xff]  ;;  %v12324_v7 = vmax.f32 %v9632_v5, 0.0  ;;  %v4472_v17 = vld [vmem:[#allocation2 + $0x71] sm:$0xff]  ;;  %v5250_v43 = vld [vmem:[#allocation8 + $0x260] sm:$0xff] }
 0x6d4   :  { %3856 = vst [vmem:[#allocation2 + $0x288] sm:$0xff] %v3792_v27  ;;  %4072 = vmatmul.f32.gmra.mxu1 %v12321_v28  ;;  %v3812_v27 = vmax.f32 %v9698_v53, 0.0  ;;  %v3891_v53 = vld [vmem:[#allocation2 + $0x4f] sm:$0xff]  ;;  %v3894_v3 = vld [vmem:[#allocation2 + $0x87] sm:$0xff]  ;;  %v12329_v20 = vld [vmem:[#allocation76_spill] sm:$0xff] }
 0x6d5   :  { %3857 = vst [vmem:[#allocation2 + $0x290] sm:$0xff] %v3793_v15  ;;  %4915 = vmatpush.msrb.mxu0 %v4884_v38  ;;  %4281 = vmatmul.f32.gmra.mxu2 %v3889_v40  ;;  %v12326_v15 = vmax.f32 %v9638_v63, 0.0  ;;  %v4473_v5 = vld [vmem:[#allocation2 + $0x89] sm:$0xff]  ;;  %v12330_v39 = vmax.f32 %v12329_v20, 0.0 }
 0x6d6   :  { %3858 = vst [vmem:[#allocation2 + $0x2a8] sm:$0xff] %v3794_v61  ;;  %4916 = vmatmul.f32.vlgmr.msrb.gmra.mxu0 %v3888_v9  ;;  %v12327_v9 = vld [vmem:[#allocation89_spill] sm:$0xff]  ;;  %v3895_v13 = vld [vmem:[#allocation2 + $0x8f] sm:$0xff]  ;;  %5257 = vmatpush.msrb.mxu1 %v5250_v43 }
 0x6d7   :  { %3859 = vst [vmem:[#allocation2 + $0x2b0] sm:$0xff] %v3795_v35  ;;  %v12328_v61 = vmax.f32 %v12327_v9, 0.0  ;;  %v4474_v35 = vld [vmem:[#allocation2 + $0x91] sm:$0xff]  ;;  %v3896_v63 = vld [vmem:[#allocation2 + $0xa7] sm:$0xff] }
 0x6d8   :  { %3860 = vst [vmem:[#allocation2 + $0x2c8] sm:$0xff] %v3796_v12  ;;  %v4475_v12 = vld [vmem:[#allocation2 + $0xa9] sm:$0xff] }
 0x6d9   :  { %3861 = vst [vmem:[#allocation2 + $0x2d0] sm:$0xff] %v3797_v62  ;;  %v12331_v62 = vld [vmem:[#allocation87_spill] sm:$0xff] }
 0x6da   :  { %3862 = vst [vmem:[#allocation2 + $0x2e8] sm:$0xff] %v3798_v31  ;;  %4571 = vmatmul.f32.gmra.mxu3 %v4468_v51  ;;  %v12332_v38 = vmax.f32 %v12331_v62, 0.0  ;;  %v3897_v31 = vld [vmem:[#allocation2 + $0xaf] sm:$0xff] }
 0x6db   :  { %3863 = vst [vmem:[#allocation2 + $0x2f0] sm:$0xff] %v3799_v33  ;;  %v4476_v33 = vld [vmem:[#allocation2 + $0xb1] sm:$0xff] }
 0x6dc   :  { %3864 = vst [vmem:[#allocation2 + $0x308] sm:$0xff] %v3800_v6  ;;  %4075 = vmatmul.f32.gmra.mxu1 %v12322_v41  ;;  %v12333_v6 = vld [vmem:[#allocation47_spill] sm:$0xff] }
 0x6dd   :  { %3865 = vst [vmem:[#allocation2 + $0x310] sm:$0xff] %v3801_v4  ;;  %4284 = vmatmul.f32.gmra.mxu2 %v3890_v55  ;;  %v12334_v28 = vmax.f32 %v12333_v6, 0.0  ;;  %v3898_v4 = vld [vmem:[#allocation2 + $0xc7] sm:$0xff]  ;;  %v3899_v51 = vld [vmem:[#allocation2 + $0xcf] sm:$0xff] }
 0x6de   :  { %3866 = vst [vmem:[#allocation2 + $0x328] sm:$0xff] %v3802_v30  ;;  %4919 = vmatmul.f32.gmra.mxu0 %v3889_v40  ;;  %v4477_v40 = vld [vmem:[#allocation2 + $0xc9] sm:$0xff]  ;;  %v12335_v30 = vld [vmem:[#allocation93_spill] sm:$0xff] }
 0x6df   :  { %3867 = vst [vmem:[#allocation2 + $0x330] sm:$0xff] %v3803_v25  ;;  %v12336_v25 = vmax.f32 %v12335_v30, 0.0  ;;  %v4479_v41 = vld [vmem:[#allocation2 + $0xe9] sm:$0xff] }
 0x6e0   :  { %3868 = vst [vmem:[#allocation2 + $0x348] sm:$0xff] %v3804_v56  ;;  %v5249_v56 = vld [vmem:[#allocation8 + $0x258] sm:$0xff] }
 0x6e1   :  { %3869 = vst [vmem:[#allocation2 + $0x350] sm:$0xff] %v3805_v42  ;;  %5258 = vmatpush.msrb.mxu1 %v5249_v56  ;;  %v4478_v42 = vld [vmem:[#allocation2 + $0xd1] sm:$0xff] }
 0x6e2   :  { %3870 = vst [vmem:[#allocation2 + $0x368] sm:$0xff] %v3806_v2  ;;  %4574 = vmatmul.f32.gmra.mxu3 %v4469_v49  ;;  %v12337_v2 = vld [vmem:[#allocation79_spill] sm:$0xff] }
 0x6e3   :  { %3871 = vst [vmem:[#allocation2 + $0x370] sm:$0xff] %v3807_v36  ;;  %v12338_v36 = vmax.f32 %v12337_v2, 0.0 }
 0x6e4   :  { %3872 = vst [vmem:[#allocation2 + $0x388] sm:$0xff] %v3808_v14  ;;  %4078 = vmatmul.f32.gmra.mxu1 %v12323_v16  ;;  %v3900_v14 = vld [vmem:[#allocation2 + $0xe7] sm:$0xff] }
 0x6e5   :  { %3873 = vst [vmem:[#allocation2 + $0x390] sm:$0xff] %v3809_v58  ;;  %4287 = vmatmul.f32.gmra.mxu2 %v3891_v53  ;;  %v12339_v58 = vld [vmem:[#allocation91_spill] sm:$0xff] }
 0x6e6   :  { %3874 = vst [vmem:[#allocation2 + $0x3a8] sm:$0xff] %v3810_v22  ;;  %4922 = vmatmul.f32.gmra.mxu0 %v3890_v55  ;;  %v12340_v55 = vmax.f32 %v12339_v58, 0.0  ;;  %v3901_v22 = vld [vmem:[#allocation2 + $0xef] sm:$0xff] }
 0x6e7   :  { %3875 = vst [vmem:[#allocation2 + $0x3b0] sm:$0xff] %v3811_v46  ;;  %v4480_v46 = vld [vmem:[#allocation2 + $0xf1] sm:$0xff]  ;;  %v5247_v58 = vld [vmem:[#allocation8 + $0x248] sm:$0xff] }
 0x6e8   :  { %3876 = vst [vmem:[#allocation2 + $0x3c8] sm:$0xff] %v3812_v27  ;;  %v12341_v27 = vld [vmem:[#allocation57_spill] sm:$0xff] }
 0x6e9   :  { %3877 = vst [vmem:[#allocation2 + $0x3d0] sm:$0xff] %v3813_v57  ;;  %v12342_v57 = vmax.f32 %v12341_v27, 0.0 }
 0x6ea   :  { %3878 = vst [vmem:[#allocation2 + $0x3e8] sm:$0xff] %v3814_v11  ;;  %4577 = vmatmul.f32.gmra.mxu3 %v4470_v18  ;;  %v3902_v11 = vld [vmem:[#allocation2 + $0x107] sm:$0xff]  ;;  %v3903_v18 = vld [vmem:[#allocation2 + $0x10f] sm:$0xff] }
 0x6eb   :  { %3879 = vst [vmem:[#allocation2 + $0x3f0] sm:$0xff] %v3815_v52  ;;  %v4481_v52 = vld [vmem:[#allocation2 + $0x109] sm:$0xff] }
 0x6ec   :  { %3880 = vst [vmem:[#allocation2 + $0x408] sm:$0xff] %v3816_v1  ;;  %4081 = vmatmul.f32.gmra.mxu1 %v12324_v7  ;;  %v4482_v7 = vld [vmem:[#allocation2 + $0x111] sm:$0xff] }
 0x6ed   :  { %3881 = vst [vmem:[#allocation2 + $0x410] sm:$0xff] %v3817_v32  ;;  %4290 = vmatmul.f32.gmra.mxu2 %v3892_v10 }
 0x6ee   :  { %3882 = vst [vmem:[#allocation2 + $0x428] sm:$0xff] %v3818_v54  ;;  %4925 = vmatmul.f32.gmra.mxu0 %v3891_v53  ;;  %v12343_v54 = vld [vmem:[#allocation83_spill] sm:$0xff] }
 0x6ef   :  { %3883 = vst [vmem:[#allocation2 + $0x430] sm:$0xff] %v3819_v26  ;;  %v12344_v26 = vmax.f32 %v12343_v54, 0.0 }
 0x6f0   :  { %3884 = vst [vmem:[#allocation2 + $0x448] sm:$0xff] %v3820_v34  ;;  %v5248_v34 = vld [vmem:[#allocation8 + $0x250] sm:$0xff] }
 0x6f1   :  { %5259 = vmatpush.msrb.mxu1 %v5248_v34 }
 0x6f2   :  { %4580 = vmatmul.f32.gmra.mxu3 %v4471_v19 }
 0x6f3   :  { %5260 = vmatpush.msrb.mxu1 %v5247_v58  ;;  %v4491_v58 = vld [vmem:[#allocation2 + $0x1a9] sm:$0xff] }
 0x6f4   :  { %4084 = vmatmul.f32.gmra.mxu1 %v12325_v59 }
 0x6f5   :  { %4293 = vmatmul.f32.gmra.mxu2 %v3893_v48 }
 0x6f6   :  { %4928 = vmatmul.f32.gmra.mxu0 %v3892_v10 }
 0x6fa   :  { %4583 = vmatmul.f32.gmra.mxu3 %v4472_v17 }
 0x6fc   :  { %4087 = vmatmul.f32.gmra.mxu1 %v12326_v15  ;;  %v12345_v15 = vmax.f32 %v9804_v8, 0.0  ;;  %v4484_v8 = vld [vmem:[#allocation2 + $0x131] sm:$0xff] }
 0x6fd   :  { %4296 = vmatmul.f32.gmra.mxu2 %v3894_v3 }
 0x6fe   :  { %4931 = vmatmul.f32.gmra.mxu0 %v3893_v48 }
 0x702   :  { %4586 = vmatmul.f32.gmra.mxu3 %v4473_v5  ;;  %v4483_v5 = vld [vmem:[#allocation2 + $0x129] sm:$0xff] }
 0x704   :  { %4090 = vmatmul.f32.gmra.mxu1 %v12328_v61 }
 0x705   :  { %4299 = vmatmul.f32.gmra.mxu2 %v3895_v13 }
 0x706   :  { %4934 = vmatmul.f32.gmra.mxu0 %v3894_v3  ;;  %v3904_v3 = vld [vmem:[#allocation2 + $0x127] sm:$0xff] }
 0x70a   :  { %4589 = vmatmul.f32.gmra.mxu3 %v4474_v35 }
 0x70c   :  { %4093 = vmatmul.f32.gmra.mxu1 %v12330_v39  ;;  %v12346_v39 = vmax.f32 %v9812_v44, 0.0  ;;  %v4485_v44 = vld [vmem:[#allocation2 + $0x149] sm:$0xff] }
 0x70d   :  { %4302 = vmatmul.f32.gmra.mxu2 %v3896_v63 }
 0x70e   :  { %4937 = vmatmul.f32.gmra.mxu0 %v3895_v13 }
 0x712   :  { %4592 = vmatmul.f32.gmra.mxu3 %v4475_v12 }
 0x714   :  { %4096 = vmatmul.f32.gmra.mxu1 %v12332_v38 }
 0x715   :  { %4305 = vmatmul.f32.gmra.mxu2 %v3897_v31 }
 0x716   :  { %4940 = vmatmul.f32.gmra.mxu0 %v3896_v63  ;;  %v3905_v63 = vld [vmem:[#allocation2 + $0x12f] sm:$0xff] }
 0x71a   :  { %4595 = vmatmul.f32.gmra.mxu3 %v4476_v33 }
 0x71c   :  { %4099 = vmatmul.f32.gmra.mxu1 %v12334_v28  ;;  %v12347_v28 = vld [vmem:[#allocation94_spill] sm:$0xff] }
 0x71d   :  { %4308 = vmatmul.f32.gmra.mxu2 %v3898_v4 }
 0x71e   :  { %4943 = vmatmul.f32.gmra.mxu0 %v3897_v31 }
 0x722   :  { %4598 = vmatmul.f32.gmra.mxu3 %v4477_v40  ;;  %v3906_v40 = vld [vmem:[#allocation2 + $0x147] sm:$0xff] }
 0x724   :  { %4102 = vmatmul.f32.gmra.mxu1 %v12336_v25 }
 0x725   :  { %4311 = vmatmul.f32.gmra.mxu2 %v3899_v51 }
 0x726   :  { %4946 = vmatmul.f32.gmra.mxu0 %v3898_v4  ;;  %v12348_v4 = vmax.f32 %v12347_v28, 0.0 }
 0x72a   :  { %4601 = vmatmul.f32.gmra.mxu3 %v4478_v42 }
 0x72c   :  { %4105 = vmatmul.f32.gmra.mxu1 %v12338_v36  ;;  %v12349_v36 = vld [vmem:[#allocation50_spill] sm:$0xff] }
 0x72d   :  { %4314 = vmatmul.f32.gmra.mxu2 %v3900_v14 }
 0x72e   :  { %4949 = vmatmul.f32.gmra.mxu0 %v3899_v51 }
 0x732   :  { %4604 = vmatmul.f32.gmra.mxu3 %v4479_v41  ;;  %v3907_v41 = vld [vmem:[#allocation2 + $0x14f] sm:$0xff] }
 0x734   :  { %4108 = vmatmul.f32.gmra.mxu1 %v12340_v55  ;;  %v4486_v55 = vld [vmem:[#allocation2 + $0x151] sm:$0xff] }
 0x735   :  { %4317 = vmatmul.f32.gmra.mxu2 %v3901_v22 }
 0x736   :  { %4952 = vmatmul.f32.gmra.mxu0 %v3900_v14  ;;  %v4064_v49 = vpop.f32.mrf.mxu1  ;;  %v12350_v14 = vmax.f32 %v12349_v36, 0.0 }
 0x73a   :  { %4607 = vmatmul.f32.gmra.mxu3 %v4480_v46 }
 0x73c   :  { %4111 = vmatmul.f32.gmra.mxu1 %v12342_v57 }
 0x73d   :  { %4320 = vmatmul.f32.gmra.mxu2 %v3902_v11 }
 0x73e   :  { %4955 = vmatmul.f32.gmra.mxu0 %v3901_v22  ;;  %v4067_v16 = vpop.f32.mrf.mxu1 }
 0x740   :  { %v4273_v1 = vpop.f32.mrf.mxu2 }
 0x741   :  { %v4274_v32 = vadd.f32 %v4273_v1, %v4064_v49 }
 0x742   :  { %4610 = vmatmul.f32.gmra.mxu3 %v4481_v52  ;;  %v12351_v52 = vld [vmem:[#allocation86_spill] sm:$0xff] }
 0x743   :  { %v12352_v1 = vmax.f32 %v12351_v52, 0.0 }
 0x744   :  { %4114 = vmatmul.f32.gmra.mxu1 %v12344_v26 }
 0x745   :  { %v4563_v53 = vpop.f32.mrf.mxu3  ;;  %4323 = vmatmul.f32.gmra.mxu2 %v3903_v18 }
 0x746   :  { %v10002_v29 = vadd.f32 %v4563_v53, %v4274_v32  ;;  %4958 = vmatmul.f32.gmra.mxu0 %v3902_v11  ;;  %v4487_v32 = vld [vmem:[#allocation2 + $0x169] sm:$0xff] }
 0x748   :  { %v4276_v10 = vpop.f32.mrf.mxu2 }
 0x749   :  { %v4070_v19 = vpop.f32.mrf.mxu1  ;;  %v4277_v59 = vadd.f32 %v4276_v10, %v4067_v16  ;;  %v3908_v16 = vld [vmem:[#allocation2 + $0x167] sm:$0xff]  ;;  %v12353_v10 = vld [vmem:[#allocation60_spill] sm:$0xff] }
 0x74a   :  { %4613 = vmatmul.f32.gmra.mxu3 %v4482_v7 }
 0x74c   :  { %4117 = vmatmul.f32.gmra.mxu1 %v12345_v15 }
 0x74d   :  { %v4566_v48 = vpop.f32.mrf.mxu3  ;;  %4326 = vmatmul.f32.gmra.mxu2 %v3904_v3 }
 0x74e   :  { %v10006_v17 = vadd.f32 %v4566_v48, %v4277_v59  ;;  %4961 = vmatmul.f32.gmra.mxu0 %v3903_v18  ;;  %v3909_v59 = vld [vmem:[#allocation2 + $0x16f] sm:$0xff] }
 0x74f   :  { %v4488_v48 = vld [vmem:[#allocation2 + $0x171] sm:$0xff] }
 0x750   :  { %v4279_v9 = vpop.f32.mrf.mxu2 }
 0x751   :  { %v4073_v61 = vpop.f32.mrf.mxu1  ;;  %v4280_v43 = vadd.f32 %v4279_v9, %v4070_v19  ;;  %v12354_v19 = vmax.f32 %v12353_v10, 0.0 }
 0x752   :  { %4616 = vmatmul.f32.gmra.mxu3 %v4483_v5 }
 0x753   :  { %v10010_v13 = vpop.f32.mrf.mxu0 }
 0x754   :  { %4120 = vmatmul.f32.gmra.mxu1 %v12346_v39  ;;  %v3910_v39 = vld [vmem:[#allocation2 + $0x187] sm:$0xff] }
 0x755   :  { %v4569_v35 = vpop.f32.mrf.mxu3  ;;  %4329 = vmatmul.f32.gmra.mxu2 %v3905_v63 }
 0x756   :  { %v10012_v20 = vadd.f32 %v4569_v35, %v4280_v43  ;;  %4964 = vmatmul.f32.gmra.mxu0 %v3904_v3  ;;  %v12355_v35 = vmax.f32 %v9852_v47, 0.0  ;;  %v5246_v47 = vld [vmem:[#allocation8 + $0x240] sm:$0xff] }
 0x757   :  { %5261 = vmatpush.msrb.mxu1 %v5246_v47 }
 0x758   :  { %v4282_v12 = vpop.f32.mrf.mxu2 }
 0x759   :  { %v4076_v62 = vpop.f32.mrf.mxu1  ;;  %v4283_v31 = vadd.f32 %v4282_v12, %v4073_v61 }
 0x75a   :  { %4619 = vmatmul.f32.gmra.mxu3 %v4484_v8 }
 0x75b   :  { %v10016_v38 = vpop.f32.mrf.mxu0 }
 0x75c   :  { %4123 = vmatmul.f32.gmra.mxu1 %v12348_v4  ;;  %v12356_v4 = vmax.f32 %v9863_v50, 0.0  ;;  %v3912_v50 = vld [vmem:[#allocation2 + $0x1a7] sm:$0xff] }
 0x75d   :  { %v4572_v33 = vpop.f32.mrf.mxu3  ;;  %4332 = vmatmul.f32.gmra.mxu2 %v3906_v40 }
 0x75e   :  { %v10018_v6 = vadd.f32 %v4572_v33, %v4283_v31  ;;  %4967 = vmatmul.f32.gmra.mxu0 %v3905_v63  ;;  %v4489_v63 = vld [vmem:[#allocation2 + $0x189] sm:$0xff] }
 0x760   :  { %v4285_v30 = vpop.f32.mrf.mxu2 }
 0x761   :  { %v4079_v25 = vpop.f32.mrf.mxu1  ;;  %v4286_v56 = vadd.f32 %v4285_v30, %v4076_v62 }
 0x762   :  { %4622 = vmatmul.f32.gmra.mxu3 %v4485_v44  ;;  %v4490_v44 = vld [vmem:[#allocation2 + $0x191] sm:$0xff] }
 0x763   :  { %v10022_v51 = vpop.f32.mrf.mxu0 }
 0x764   :  { %4126 = vmatmul.f32.gmra.mxu1 %v12350_v14 }
 0x765   :  { %v4575_v42 = vpop.f32.mrf.mxu3  ;;  %4335 = vmatmul.f32.gmra.mxu2 %v3907_v41 }
 0x766   :  { %v10024_v2 = vadd.f32 %v4575_v42, %v4286_v56  ;;  %4970 = vmatmul.f32.gmra.mxu0 %v3906_v40  ;;  %v3911_v40 = vld [vmem:[#allocation2 + $0x18f] sm:$0xff] }
 0x768   :  { %v4288_v22 = vpop.f32.mrf.mxu2 }
 0x769   :  { %v4082_v46 = vpop.f32.mrf.mxu1  ;;  %v4289_v27 = vadd.f32 %v4288_v22, %v4079_v25 }
 0x76a   :  { %4625 = vmatmul.f32.gmra.mxu3 %v4486_v55 }
 0x76b   :  { %v10028_v49 = vpop.f32.mrf.mxu0 }
 0x76c   :  { %4129 = vmatmul.f32.gmra.mxu1 %v12352_v1  ;;  %v12358_v1 = vmax.f32 %v9879_v23, 0.0  ;;  %v4493_v23 = vld [vmem:[#allocation2 + $0x1c9] sm:$0xff] }
 0x76d   :  { %v4578_v57 = vpop.f32.mrf.mxu3  ;;  %4338 = vmatmul.f32.gmra.mxu2 %v3908_v16 }
 0x76e   :  { %v10030_v11 = vadd.f32 %v4578_v57, %v4289_v27  ;;  %4973 = vmatmul.f32.gmra.mxu0 %v3907_v41  ;;  %v12357_v41 = vmax.f32 %v9871_v24, 0.0  ;;  %v4492_v24 = vld [vmem:[#allocation2 + $0x1b1] sm:$0xff] }
 0x770   :  { %v4291_v53 = vpop.f32.mrf.mxu2 }
 0x771   :  { %v4085_v54 = vpop.f32.mrf.mxu1  ;;  %v4292_v18 = vadd.f32 %v4291_v53, %v4082_v46 }
 0x772   :  { %4628 = vmatmul.f32.gmra.mxu3 %v4487_v32 }
 0x773   :  { %v10034_v26 = vpop.f32.mrf.mxu0 }
 0x774   :  { %4132 = vmatmul.f32.gmra.mxu1 %v12354_v19  ;;  %v12359_v19 = vmax.f32 %v9887_v21, 0.0  ;;  %v5245_v21 = vld [vmem:[#allocation8 + $0x238] sm:$0xff] }
 0x775   :  { %v4581_v34 = vpop.f32.mrf.mxu3  ;;  %4341 = vmatmul.f32.gmra.mxu2 %v3909_v59  ;;  %5262 = vmatpush.msrb.mxu1 %v5245_v21 }
 0x776   :  { %v10036_v7 = vadd.f32 %v4581_v34, %v4292_v18  ;;  %4976 = vmatmul.f32.gmra.mxu0 %v3908_v16  ;;  %v3913_v16 = vld [vmem:[#allocation2 + $0x1af] sm:$0xff] }
 0x778   :  { %v4294_v15 = vpop.f32.mrf.mxu2 }
 0x779   :  { %v4088_v3 = vpop.f32.mrf.mxu1  ;;  %v4295_v9 = vadd.f32 %v4294_v15, %v4085_v54 }
 0x77a   :  { %4631 = vmatmul.f32.gmra.mxu3 %v4488_v48 }
 0x77b   :  { %v10040_v5 = vpop.f32.mrf.mxu0 }
 0x77c   :  { %4135 = vmatmul.f32.gmra.mxu1 %v12355_v35 }
 0x77d   :  { %v4584_v61 = vpop.f32.mrf.mxu3  ;;  %4344 = vmatmul.f32.gmra.mxu2 %v3910_v39 }
 0x77e   :  { %v10042_v43 = vadd.f32 %v4584_v61, %v4295_v9  ;;  %4979 = vmatmul.f32.gmra.mxu0 %v3909_v59  ;;  %v3914_v59 = vld [vmem:[#allocation2 + $0x1c7] sm:$0xff] }
 0x780   :  { %v4297_v8 = vpop.f32.mrf.mxu2 }
 0x781   :  { %v4091_v12 = vpop.f32.mrf.mxu1  ;;  %v4298_v31 = vadd.f32 %v4297_v8, %v4088_v3  ;;  %v4494_v8 = vld [vmem:[#allocation2 + $0x1d1] sm:$0xff] }
 0x782   :  { %4634 = vmatmul.f32.gmra.mxu3 %v4489_v63  ;;  %v3915_v63 = vld [vmem:[#allocation2 + $0x1cf] sm:$0xff] }
 0x783   :  { %v10046_v62 = vpop.f32.mrf.mxu0 }
 0x784   :  { %4138 = vmatmul.f32.gmra.mxu1 %v12356_v4 }
 0x785   :  { %v4587_v33 = vpop.f32.mrf.mxu3  ;;  %4347 = vmatmul.f32.gmra.mxu2 %v3911_v40 }
 0x786   :  { %v10048_v28 = vadd.f32 %v4587_v33, %v4298_v31  ;;  %4982 = vmatmul.f32.gmra.mxu0 %v3910_v39  ;;  %v12360_v39 = vmax.f32 %v9895_v60, 0.0  ;;  %v3916_v60 = vld [vmem:[#allocation2 + $0x1e7] sm:$0xff] }
 0x788   :  { %v4300_v30 = vpop.f32.mrf.mxu2 }
 0x789   :  { %v4094_v25 = vpop.f32.mrf.mxu1  ;;  %v4301_v42 = vadd.f32 %v4300_v30, %v4091_v12  ;;  %v4495_v30 = vld [vmem:[#allocation2 + $0x1e9] sm:$0xff] }
 0x78a   :  { %4637 = vmatmul.f32.gmra.mxu3 %v4490_v44  ;;  %v12361_v44 = vmax.f32 %v9903_v0, 0.0  ;;  %v4496_v0 = vld [vmem:[#allocation2 + $0x1f1] sm:$0xff] }
 0x78b   :  { %v10052_v56 = vpop.f32.mrf.mxu0 }
 0x78c   :  { %4141 = vmatmul.f32.gmra.mxu1 %v12357_v41 }
 0x78d   :  { %v4590_v36 = vpop.f32.mrf.mxu3  ;;  %4350 = vmatmul.f32.gmra.mxu2 %v3912_v50 }
 0x78e   :  { %v10054_v14 = vadd.f32 %v4590_v36, %v4301_v42  ;;  %4985 = vmatmul.f32.gmra.mxu0 %v3911_v40 }
 0x790   :  { %v4303_v55 = vpop.f32.mrf.mxu2 }
 0x791   :  { %v4097_v22 = vpop.f32.mrf.mxu1  ;;  %v4304_v27 = vadd.f32 %v4303_v55, %v4094_v25  ;;  %v12362_v55 = vmax.f32 %v9911_v37, 0.0 }
 0x792   :  { %4640 = vmatmul.f32.gmra.mxu3 %v4491_v58 }
 0x793   :  { %v10058_v46 = vpop.f32.mrf.mxu0 }
 0x794   :  { %4144 = vmatmul.f32.gmra.mxu1 %v12358_v1 }
 0x795   :  { %v4593_v57 = vpop.f32.mrf.mxu3  ;;  %4353 = vmatmul.f32.gmra.mxu2 %v3913_v16 }
 0x796   :  { %v10060_v52 = vadd.f32 %v4593_v57, %v4304_v27  ;;  %4988 = vmatmul.f32.gmra.mxu0 %v3912_v50 }
 0x798   :  { %v4306_v32 = vpop.f32.mrf.mxu2 }
 0x799   :  { %v4100_v53 = vpop.f32.mrf.mxu1  ;;  %v4307_v18 = vadd.f32 %v4306_v32, %v4097_v22  ;;  %v3917_v22 = vld [vmem:[#allocation2 + $0x1ef] sm:$0xff]  ;;  %v3918_v32 = vld [vmem:[#allocation2 + $0x247] sm:$0xff] }
 0x79a   :  { %4643 = vmatmul.f32.gmra.mxu3 %v4492_v24 }
 0x79b   :  { %v10064_v54 = vpop.f32.mrf.mxu0 }
 0x79c   :  { %4147 = vmatmul.f32.gmra.mxu1 %v12359_v19 }
 0x79d   :  { %v4596_v34 = vpop.f32.mrf.mxu3  ;;  %4356 = vmatmul.f32.gmra.mxu2 %v3914_v59 }
 0x79e   :  { %v10066_v10 = vadd.f32 %v4596_v34, %v4307_v18  ;;  %4991 = vmatmul.f32.gmra.mxu0 %v3913_v16  ;;  %v4497_v18 = vld [vmem:[#allocation2 + $0x249] sm:$0xff] }
 0x7a0   :  { %v4309_v48 = vpop.f32.mrf.mxu2 }
 0x7a1   :  { %v4103_v15 = vpop.f32.mrf.mxu1  ;;  %v4310_v9 = vadd.f32 %v4309_v48, %v4100_v53  ;;  %v3919_v48 = vld [vmem:[#allocation2 + $0x24f] sm:$0xff] }
 0x7a2   :  { %4646 = vmatmul.f32.gmra.mxu3 %v4493_v23 }
 0x7a3   :  { %v10070_v3 = vpop.f32.mrf.mxu0 }
 0x7a4   :  { %4150 = vmatmul.f32.gmra.mxu1 %v12360_v39  ;;  %v5244_v39 = vld [vmem:[#allocation8 + $0x230] sm:$0xff] }
 0x7a5   :  { %v4599_v61 = vpop.f32.mrf.mxu3  ;;  %4359 = vmatmul.f32.gmra.mxu2 %v3915_v63  ;;  %5263 = vmatpush.msrb.mxu1 %v5244_v39 }
 0x7a6   :  { %v10072_v35 = vadd.f32 %v4599_v61, %v4310_v9  ;;  %4994 = vmatmul.f32.gmra.mxu0 %v3914_v59  ;;  %v4498_v61 = vld [vmem:[#allocation2 + $0x251] sm:$0xff] }
 0x7a8   :  { %v4312_v12 = vpop.f32.mrf.mxu2 }
 0x7a9   :  { %v4106_v31 = vpop.f32.mrf.mxu1  ;;  %v4313_v4 = vadd.f32 %v4312_v12, %v4103_v15  ;;  %v4849_v15 = vld [vmem:[#allocation2 + $0x207] sm:$0xff] }
 0x7aa   :  { %4649 = vmatmul.f32.gmra.mxu3 %v4494_v8 }
 0x7ab   :  { %v10076_v33 = vpop.f32.mrf.mxu0 }
 0x7ac   :  { %4153 = vmatmul.f32.gmra.mxu1 %v12361_v44 }
 0x7ad   :  { %v4602_v40 = vpop.f32.mrf.mxu3  ;;  %4362 = vmatmul.f32.gmra.mxu2 %v3916_v60 }
 0x7ae   :  { %v10078_v47 = vadd.f32 %v4602_v40, %v4313_v4  ;;  %4997 = vmatmul.f32.gmra.mxu0 %v3915_v63  ;;  %v4000_v4 = vld [vmem:[#allocation2 + $0x268] sm:$0xff] }
 0x7af   :  { %v4850_v40 = vld [vmem:[#allocation2 + $0x20f] sm:$0xff] }
 0x7b0   :  { %v4315_v25 = vpop.f32.mrf.mxu2 }
 0x7b1   :  { %v4109_v42 = vpop.f32.mrf.mxu1  ;;  %v4316_v41 = vadd.f32 %v4315_v25, %v4106_v31 }
 0x7b2   :  { %4652 = vmatmul.f32.gmra.mxu3 %v4495_v30 }
 0x7b3   :  { %v10082_v36 = vpop.f32.mrf.mxu0 }
 0x7b4   :  { %4156 = vmatmul.f32.gmra.mxu1 %v12362_v55  ;;  %v4001_v55 = vld [vmem:[#allocation2 + $0x270] sm:$0xff] }
 0x7b5   :  { %v4605_v50 = vpop.f32.mrf.mxu3  ;;  %4365 = vmatmul.f32.gmra.mxu2 %v3917_v22 }
 0x7b6   :  { %v10084_v58 = vadd.f32 %v4605_v50, %v4316_v41  ;;  %5000 = vmatmul.f32.gmra.mxu0 %v3916_v60  ;;  %v3920_v60 = vld [vmem:[#allocation2 + $0x267] sm:$0xff] }
 0x7b8   :  { %v4318_v27 = vpop.f32.mrf.mxu2 }
 0x7b9   :  { %v4112_v57 = vpop.f32.mrf.mxu1  ;;  %v4319_v16 = vadd.f32 %v4318_v27, %v4109_v42  ;;  %v4500_v27 = vld [vmem:[#allocation2 + $0x271] sm:$0xff] }
 0x7ba   :  { %4655 = vmatmul.f32.gmra.mxu3 %v4496_v0  ;;  %v3921_v0 = vld [vmem:[#allocation2 + $0x26f] sm:$0xff] }
 0x7bb   :  { %v10088_v1 = vpop.f32.mrf.mxu0 }
 0x7bc   :  { %4159 = vmatmul.f32.gmra.mxu1 %v9857_v45 }
 0x7bd   :  { %v4608_v24 = vpop.f32.mrf.mxu3  ;;  %4368 = vmatmul.f32.gmra.mxu2 %v3918_v32 }
 0x7be   :  { %v10090_v53 = vadd.f32 %v4608_v24, %v4319_v16  ;;  %5003 = vmatmul.f32.gmra.mxu0 %v3917_v22 }
 0x7c0   :  { %v4321_v37 = vpop.f32.mrf.mxu2 }
 0x7c1   :  { %v4115_v34 = vpop.f32.mrf.mxu1  ;;  %v4322_v59 = vadd.f32 %v4321_v37, %v4112_v57  ;;  %v4002_v37 = vld [vmem:[#allocation2 + $0x288] sm:$0xff] }
 0x7c2   :  { %4658 = vmatmul.f32.gmra.mxu3 %v4497_v18 }
 0x7c3   :  { %v10093_v19 = vpop.f32.mrf.mxu0 }
 0x7c4   :  { %4162 = vmatmul.f32.gmra.mxu1 %v9857_v45  ;;  %v4499_v45 = vld [vmem:[#allocation2 + $0x269] sm:$0xff] }
 0x7c5   :  { %v4611_v23 = vpop.f32.mrf.mxu3  ;;  %4371 = vmatmul.f32.gmra.mxu2 %v3919_v48 }
 0x7c6   :  { %v10095_v9 = vadd.f32 %v4611_v23, %v4322_v59  ;;  %5006 = vmatmul.f32.gmra.mxu0 %v4849_v15  ;;  %v3922_v59 = vld [vmem:[#allocation2 + $0x287] sm:$0xff] }
 0x7c7   :  { %v4501_v23 = vld [vmem:[#allocation2 + $0x289] sm:$0xff] }
 0x7c8   :  { %v4324_v63 = vpop.f32.mrf.mxu2 }
 0x7c9   :  { %v4118_v21 = vpop.f32.mrf.mxu1  ;;  %v4325_v12 = vadd.f32 %v4324_v63, %v4115_v34 }
 0x7ca   :  { %4661 = vmatmul.f32.gmra.mxu3 %v4498_v61 }
 0x7cb   :  { %v10098_v8 = vpop.f32.mrf.mxu0 }
 0x7cc   :  { %4165 = vmatmul.f32.gmra.mxu1 %v4000_v4  ;;  %v5243_v4 = vld [vmem:[#allocation8 + $0x228] sm:$0xff] }
 0x7cd   :  { %v4614_v31 = vpop.f32.mrf.mxu3  ;;  %4374 = vmatmul.f32.gmra.mxu2 %v3920_v60  ;;  %5264 = vmatpush.msrb.mxu1 %v5243_v4 }
 0x7ce   :  { %v10100_v44 = vadd.f32 %v4614_v31, %v4325_v12  ;;  %5009 = vmatmul.f32.gmra.mxu0 %v4850_v40  ;;  %v3923_v31 = vld [vmem:[#allocation2 + $0x28f] sm:$0xff] }
 0x7cf   :  { %v4502_v40 = vld [vmem:[#allocation2 + $0x291] sm:$0xff] }
 0x7d0   :  { %v4327_v30 = vpop.f32.mrf.mxu2 }
 0x7d1   :  { %v4121_v25 = vpop.f32.mrf.mxu1  ;;  %v4328_v41 = vadd.f32 %v4327_v30, %v4118_v21  ;;  %v4003_v21 = vld [vmem:[#allocation2 + $0x290] sm:$0xff] }
 0x7d2   :  { %4664 = vmatmul.f32.gmra.mxu3 %v4499_v45 }
 0x7d3   :  { %v10102_v42 = vpop.f32.mrf.mxu0 }
 0x7d4   :  { %4168 = vmatmul.f32.gmra.mxu1 %v4001_v55 }
 0x7d5   :  { %v4617_v50 = vpop.f32.mrf.mxu3  ;;  %4377 = vmatmul.f32.gmra.mxu2 %v3921_v0 }
 0x7d6   :  { %v10104_v22 = vadd.f32 %v4617_v50, %v4328_v41  ;;  %5012 = vmatmul.f32.gmra.mxu0 %v3920_v60  ;;  %v4004_v50 = vld [vmem:[#allocation2 + $0x2a8] sm:$0xff] }
 0x7d8   :  { %v4330_v57 = vpop.f32.mrf.mxu2 }
 0x7d9   :  { %v4124_v16 = vpop.f32.mrf.mxu1  ;;  %v4331_v32 = vadd.f32 %v4330_v57, %v4121_v25 }
 0x7da   :  { %4667 = vmatmul.f32.gmra.mxu3 %v4500_v27  ;;  %v4503_v27 = vld [vmem:[#allocation2 + $0x2a9] sm:$0xff] }
 0x7db   :  { %v10106_v24 = vpop.f32.mrf.mxu0 }
 0x7dc   :  { %4171 = vmatmul.f32.gmra.mxu1 %v4002_v37 }
 0x7dd   :  { %v4620_v18 = vpop.f32.mrf.mxu3  ;;  %4380 = vmatmul.f32.gmra.mxu2 %v3922_v59 }
 0x7de   :  { %v10108_v34 = vadd.f32 %v4620_v18, %v4331_v32  ;;  %5015 = vmatmul.f32.gmra.mxu0 %v3921_v0  ;;  %v3924_v0 = vld [vmem:[#allocation2 + $0x2a7] sm:$0xff] }
 0x7e0   :  { %v4333_v48 = vpop.f32.mrf.mxu2 }
 0x7e1   :  { %v4127_v15 = vpop.f32.mrf.mxu1  ;;  %v4334_v39 = vadd.f32 %v4333_v48, %v4124_v16  ;;  %v3925_v48 = vld [vmem:[#allocation2 + $0x2af] sm:$0xff] }
 0x7e2   :  { %4670 = vmatmul.f32.gmra.mxu3 %v4501_v23 }
 0x7e3   :  { %v10110_v61 = vpop.f32.mrf.mxu0 }
 0x7e4   :  { %4174 = vmatmul.f32.gmra.mxu1 %v4003_v21 }
 0x7e5   :  { %v4623_v63 = vpop.f32.mrf.mxu3  ;;  %4383 = vmatmul.f32.gmra.mxu2 %v3923_v31 }
 0x7e6   :  { %v10112_v12 = vadd.f32 %v4623_v63, %v4334_v39  ;;  %5018 = vmatmul.f32.gmra.mxu0 %v3922_v59  ;;  %v4005_v59 = vld [vmem:[#allocation2 + $0x2b0] sm:$0xff] }
 0x7e8   :  { %v4336_v60 = vpop.f32.mrf.mxu2 }
 0x7e9   :  { %v4130_v45 = vpop.f32.mrf.mxu1  ;;  %v4337_v25 = vadd.f32 %v4336_v60, %v4127_v15  ;;  %v4504_v15 = vld [vmem:[#allocation2 + $0x2b1] sm:$0xff] }
 0x7ea   :  { %4673 = vmatmul.f32.gmra.mxu3 %v4502_v40  ;;  %v4006_v40 = vld [vmem:[#allocation2 + $0x2c8] sm:$0xff] }
 0x7eb   :  { %v10114_v30 = vpop.f32.mrf.mxu0 }
 0x7ec   :  { %4177 = vmatmul.f32.gmra.mxu1 %v4004_v50 }
 0x7ed   :  { %v4626_v41 = vpop.f32.mrf.mxu3  ;;  %4386 = vmatmul.f32.gmra.mxu2 %v3924_v0 }
 0x7ee   :  { %v10116_v55 = vadd.f32 %v4626_v41, %v4337_v25  ;;  %5021 = vmatmul.f32.gmra.mxu0 %v3923_v31  ;;  %v4505_v25 = vld [vmem:[#allocation2 + $0x2c9] sm:$0xff] }
 0x7f0   :  { %v4339_v57 = vpop.f32.mrf.mxu2 }
 0x7f1   :  { %v4133_v16 = vpop.f32.mrf.mxu1  ;;  %v4340_v18 = vadd.f32 %v4339_v57, %v4130_v45  ;;  %v3926_v45 = vld [vmem:[#allocation2 + $0x2c7] sm:$0xff] }
 0x7f2   :  { %4676 = vmatmul.f32.gmra.mxu3 %v4503_v27 }
 0x7f3   :  { %v10118_v32 = vpop.f32.mrf.mxu0 }
 0x7f4   :  { %4180 = vmatmul.f32.gmra.mxu1 %v4005_v59  ;;  %v5242_v59 = vld [vmem:[#allocation8 + $0x220] sm:$0xff] }
 0x7f5   :  { %v4629_v37 = vpop.f32.mrf.mxu3  ;;  %4389 = vmatmul.f32.gmra.mxu2 %v3925_v48  ;;  %5265 = vmatpush.msrb.mxu1 %v5242_v59 }
 0x7f6   :  { %v10120_v23 = vadd.f32 %v4629_v37, %v4340_v18  ;;  %5024 = vmatmul.f32.gmra.mxu0 %v3924_v0  ;;  %v4007_v18 = vld [vmem:[#allocation2 + $0x2d0] sm:$0xff] }
 0x7f8   :  { %v4342_v39 = vpop.f32.mrf.mxu2 }
 0x7f9   :  { %v4136_v63 = vpop.f32.mrf.mxu1  ;;  %v4343_v31 = vadd.f32 %v4342_v39, %v4133_v16  ;;  %v3927_v16 = vld [vmem:[#allocation2 + $0x2cf] sm:$0xff] }
 0x7fa   :  { %4679 = vmatmul.f32.gmra.mxu3 %v4504_v15 }
 0x7fb   :  { %v10122_v21 = vpop.f32.mrf.mxu0 }
 0x7fc   :  { %4183 = vmatmul.f32.gmra.mxu1 %v4006_v40 }
 0x7fd   :  { %v4632_v4 = vpop.f32.mrf.mxu3  ;;  %4392 = vmatmul.f32.gmra.mxu2 %v3926_v45 }
 0x7fe   :  { %v10124_v60 = vadd.f32 %v4632_v4, %v4343_v31  ;;  %5027 = vmatmul.f32.gmra.mxu0 %v3925_v48  ;;  %v4506_v48 = vld [vmem:[#allocation2 + $0x2d1] sm:$0xff] }
 0x800   :  { %12363 = vst [vmem:[#allocation88_spill] sm:$0xff] %v10124_v60  ;;  %v4345_v41 = vpop.f32.mrf.mxu2 }
 0x801   :  { %v4139_v50 = vpop.f32.mrf.mxu1  ;;  %v4346_v27 = vadd.f32 %v4345_v41, %v4136_v63  ;;  %v3928_v41 = vld [vmem:[#allocation2 + $0x2e7] sm:$0xff] }
 0x802   :  { %4682 = vmatmul.f32.gmra.mxu3 %v4505_v25  ;;  %v4008_v25 = vld [vmem:[#allocation2 + $0x2e8] sm:$0xff] }
 0x803   :  { %v10126_v0 = vpop.f32.mrf.mxu0 }
 0x804   :  { %12364 = vst [vmem:[#allocation53_spill] sm:$0xff] %v10126_v0  ;;  %4186 = vmatmul.f32.gmra.mxu1 %v4007_v18  ;;  %v6312_v0 = vld [vmem:[#allocation8 + $0x3e0] sm:$0xff] }
 0x805   :  { %v4635_v57 = vpop.f32.mrf.mxu3  ;;  %4395 = vmatmul.f32.gmra.mxu2 %v3927_v16 }
 0x806   :  { %v10128_v37 = vadd.f32 %v4635_v57, %v4346_v27  ;;  %5030 = vmatmul.f32.gmra.mxu0 %v3926_v45  ;;  %v4507_v45 = vld [vmem:[#allocation2 + $0x2e9] sm:$0xff] }
 0x808   :  { %12365 = vst [vmem:[#allocation92_spill] sm:$0xff] %v10128_v37  ;;  %v4348_v15 = vpop.f32.mrf.mxu2  ;;  %v4009_v37 = vld [vmem:[#allocation2 + $0x2f0] sm:$0xff] }
 0x809   :  { %v4142_v39 = vpop.f32.mrf.mxu1  ;;  %v4349_v4 = vadd.f32 %v4348_v15, %v4139_v50  ;;  %v3929_v50 = vld [vmem:[#allocation2 + $0x2ef] sm:$0xff] }
 0x80a   :  { %4685 = vmatmul.f32.gmra.mxu3 %v4506_v48  ;;  %v4508_v15 = vld [vmem:[#allocation2 + $0x2f1] sm:$0xff] }
 0x80b   :  { %v10130_v31 = vpop.f32.mrf.mxu0 }
 0x80c   :  { %12366 = vst [vmem:[#allocation63_spill] sm:$0xff] %v10130_v31  ;;  %4189 = vmatmul.f32.gmra.mxu1 %v4008_v25 }
 0x80d   :  { %v4638_v40 = vpop.f32.mrf.mxu3  ;;  %4398 = vmatmul.f32.gmra.mxu2 %v3928_v41 }
 0x80e   :  { %v10132_v63 = vadd.f32 %v4638_v40, %v4349_v4  ;;  %5033 = vmatmul.f32.gmra.mxu0 %v3927_v16 }
 0x810   :  { %12367 = vst [vmem:[#allocation56_spill] sm:$0xff] %v10132_v63  ;;  %v4351_v27 = vpop.f32.mrf.mxu2  ;;  %v4010_v63 = vld [vmem:[#allocation2 + $0x308] sm:$0xff] }
 0x811   :  { %v4145_v57 = vpop.f32.mrf.mxu1  ;;  %v4352_v59 = vadd.f32 %v4351_v27, %v4142_v39  ;;  %v3930_v39 = vld [vmem:[#allocation2 + $0x307] sm:$0xff] }
 0x812   :  { %4688 = vmatmul.f32.gmra.mxu3 %v4507_v45  ;;  %v4509_v27 = vld [vmem:[#allocation2 + $0x309] sm:$0xff] }
 0x813   :  { %v10134_v18 = vpop.f32.mrf.mxu0 }
 0x814   :  { %12368 = vst [vmem:[#allocation65_spill] sm:$0xff] %v10134_v18  ;;  %4192 = vmatmul.f32.gmra.mxu1 %v4009_v37 }
 0x815   :  { %v4641_v48 = vpop.f32.mrf.mxu3  ;;  %4401 = vmatmul.f32.gmra.mxu2 %v3929_v50 }
 0x816   :  { %v10136_v60 = vadd.f32 %v4641_v48, %v4352_v59  ;;  %5036 = vmatmul.f32.gmra.mxu0 %v3928_v41 }
 0x818   :  { %12369 = vst [vmem:[#allocation59_spill] sm:$0xff] %v10136_v60  ;;  %v4354_v16 = vpop.f32.mrf.mxu2  ;;  %v4011_v60 = vld [vmem:[#allocation2 + $0x310] sm:$0xff] }
 0x819   :  { %v4148_v4 = vpop.f32.mrf.mxu1  ;;  %v4355_v25 = vadd.f32 %v4354_v16, %v4145_v57  ;;  %v3931_v57 = vld [vmem:[#allocation2 + $0x30f] sm:$0xff]  ;;  %v5241_v16 = vld [vmem:[#allocation8 + $0x218] sm:$0xff] }
 0x81a   :  { %4691 = vmatmul.f32.gmra.mxu3 %v4508_v15  ;;  %5266 = vmatpush.msrb.mxu1 %v5241_v16 }
 0x81b   :  { %v10138_v40 = vpop.f32.mrf.mxu0 }
 0x81c   :  { %12370 = vst [vmem:[#allocation62_spill] sm:$0xff] %v10138_v40  ;;  %4195 = vmatmul.f32.gmra.mxu1 %v4010_v63  ;;  %v4510_v63 = vld [vmem:[#allocation2 + $0x311] sm:$0xff] }
 0x81d   :  { %v4644_v45 = vpop.f32.mrf.mxu3  ;;  %4404 = vmatmul.f32.gmra.mxu2 %v3930_v39 }
 0x81e   :  { %v10140_v31 = vadd.f32 %v4644_v45, %v4355_v25  ;;  %5039 = vmatmul.f32.gmra.mxu0 %v3929_v50 }
 0x820   :  { %12371 = vst [vmem:[#allocation13_spill] sm:$0xff] %v10140_v31  ;;  %v4357_v37 = vpop.f32.mrf.mxu2 }
 0x821   :  { %v4151_v41 = vpop.f32.mrf.mxu1  ;;  %v4358_v48 = vadd.f32 %v4357_v37, %v4148_v4  ;;  %v3932_v37 = vld [vmem:[#allocation2 + $0x327] sm:$0xff] }
 0x822   :  { %4694 = vmatmul.f32.gmra.mxu3 %v4509_v27 }
 0x823   :  { %v10142_v59 = vpop.f32.mrf.mxu0 }
 0x824   :  { %12372 = vst [vmem:[#allocation15_spill] sm:$0xff] %v10142_v59  ;;  %4198 = vmatmul.f32.gmra.mxu1 %v4011_v60  ;;  %v4012_v59 = vld [vmem:[#allocation2 + $0x328] sm:$0xff] }
 0x825   :  { %v4647_v15 = vpop.f32.mrf.mxu3  ;;  %4407 = vmatmul.f32.gmra.mxu2 %v3931_v57  ;;  %v4511_v60 = vld [vmem:[#allocation2 + $0x329] sm:$0xff] }
 0x826   :  { %v10144_v18 = vadd.f32 %v4647_v15, %v4358_v48  ;;  %5042 = vmatmul.f32.gmra.mxu0 %v3930_v39 }
 0x828   :  { %12373 = vst [vmem:[#allocation14_spill] sm:$0xff] %v10144_v18  ;;  %v4360_v50 = vpop.f32.mrf.mxu2  ;;  %v4013_v18 = vld [vmem:[#allocation2 + $0x330] sm:$0xff] }
 0x829   :  { %v4154_v25 = vpop.f32.mrf.mxu1  ;;  %v4361_v27 = vadd.f32 %v4360_v50, %v4151_v41  ;;  %v3933_v41 = vld [vmem:[#allocation2 + $0x32f] sm:$0xff] }
 0x82a   :  { %4697 = vmatmul.f32.gmra.mxu3 %v4510_v63 }
 0x82b   :  { %v10146_v45 = vpop.f32.mrf.mxu0 }
 0x82c   :  { %12374 = vst [vmem:[#allocation16_spill] sm:$0xff] %v10146_v45  ;;  %4201 = vmatmul.f32.gmra.mxu1 %v4012_v59 }
 0x82d   :  { %v4650_v31 = vpop.f32.mrf.mxu3  ;;  %4410 = vmatmul.f32.gmra.mxu2 %v3932_v37 }
 0x82e   :  { %v10148_v4 = vadd.f32 %v4650_v31, %v4361_v27  ;;  %5045 = vmatmul.f32.gmra.mxu0 %v3931_v57  ;;  %v4512_v31 = vld [vmem:[#allocation2 + $0x331] sm:$0xff] }
 0x830   :  { %12375 = vst [vmem:[#allocation17_spill] sm:$0xff] %v10148_v4  ;;  %v4363_v39 = vpop.f32.mrf.mxu2  ;;  %v4014_v4 = vld [vmem:[#allocation2 + $0x348] sm:$0xff] }
 0x831   :  { %v4157_v48 = vpop.f32.mrf.mxu1  ;;  %v4364_v16 = vadd.f32 %v4363_v39, %v4154_v25  ;;  %v3934_v25 = vld [vmem:[#allocation2 + $0x347] sm:$0xff] }
 0x832   :  { %4700 = vmatmul.f32.gmra.mxu3 %v4511_v60  ;;  %v4513_v39 = vld [vmem:[#allocation2 + $0x349] sm:$0xff] }
 0x833   :  { %v10150_v15 = vpop.f32.mrf.mxu0 }
 0x834   :  { %12376 = vst [vmem:[#allocation18_spill] sm:$0xff] %v10150_v15  ;;  %4204 = vmatmul.f32.gmra.mxu1 %v4013_v18 }
 0x835   :  { %v4653_v63 = vpop.f32.mrf.mxu3  ;;  %4413 = vmatmul.f32.gmra.mxu2 %v3933_v41 }
 0x836   :  { %v10152_v40 = vadd.f32 %v4653_v63, %v4364_v16  ;;  %5048 = vmatmul.f32.gmra.mxu0 %v3932_v37 }
 0x838   :  { %12377 = vst [vmem:[#allocation19_spill] sm:$0xff] %v10152_v40  ;;  %v4366_v59 = vpop.f32.mrf.mxu2  ;;  %v4015_v40 = vld [vmem:[#allocation2 + $0x350] sm:$0xff] }
 0x839   :  { %v4160_v57 = vpop.f32.mrf.mxu1  ;;  %v4367_v27 = vadd.f32 %v4366_v59, %v4157_v48  ;;  %v3935_v48 = vld [vmem:[#allocation2 + $0x34f] sm:$0xff] }
 0x83a   :  { %4703 = vmatmul.f32.gmra.mxu3 %v4512_v31  ;;  %v5240_v59 = vld [vmem:[#allocation8 + $0x210] sm:$0xff] }
 0x83b   :  { %v10154_v50 = vpop.f32.mrf.mxu0  ;;  %5267 = vmatpush.msrb.mxu1 %v5240_v59 }
 0x83c   :  { %12378 = vst [vmem:[#allocation20_spill] sm:$0xff] %v10154_v50  ;;  %4207 = vmatmul.f32.gmra.mxu1 %v4014_v4  ;;  %v4514_v4 = vld [vmem:[#allocation2 + $0x351] sm:$0xff] }
 0x83d   :  { %v4656_v60 = vpop.f32.mrf.mxu3  ;;  %4416 = vmatmul.f32.gmra.mxu2 %v3934_v25 }
 0x83e   :  { %v10156_v45 = vadd.f32 %v4656_v60, %v4367_v27  ;;  %5051 = vmatmul.f32.gmra.mxu0 %v3933_v41 }
 0x840   :  { %12379 = vst [vmem:[#allocation21_spill] sm:$0xff] %v10156_v45  ;;  %v4369_v18 = vpop.f32.mrf.mxu2 }
 0x841   :  { %v4163_v37 = vpop.f32.mrf.mxu1  ;;  %v4370_v63 = vadd.f32 %v4369_v18, %v4160_v57  ;;  %v3936_v18 = vld [vmem:[#allocation2 + $0x367] sm:$0xff] }
 0x842   :  { %4706 = vmatmul.f32.gmra.mxu3 %v4513_v39 }
 0x843   :  { %v10158_v16 = vpop.f32.mrf.mxu0 }
 0x844   :  { %12380 = vst [vmem:[#allocation22_spill] sm:$0xff] %v10158_v16  ;;  %4210 = vmatmul.f32.gmra.mxu1 %v4015_v40  ;;  %v4016_v16 = vld [vmem:[#allocation2 + $0x368] sm:$0xff] }
 0x845   :  { %v4659_v31 = vpop.f32.mrf.mxu3  ;;  %4419 = vmatmul.f32.gmra.mxu2 %v3935_v48  ;;  %v4515_v40 = vld [vmem:[#allocation2 + $0x369] sm:$0xff] }
 0x846   :  { %v10160_v15 = vadd.f32 %v4659_v31, %v4370_v63  ;;  %5054 = vmatmul.f32.gmra.mxu0 %v3934_v25 }
 0x848   :  { %12381 = vst [vmem:[#allocation23_spill] sm:$0xff] %v10160_v15  ;;  %v4372_v41 = vpop.f32.mrf.mxu2  ;;  %v4017_v15 = vld [vmem:[#allocation2 + $0x370] sm:$0xff] }
 0x849   :  { %v4166_v27 = vpop.f32.mrf.mxu1  ;;  %v4373_v39 = vadd.f32 %v4372_v41, %v4163_v37  ;;  %v3937_v37 = vld [vmem:[#allocation2 + $0x36f] sm:$0xff] }
 0x84a   :  { %4709 = vmatmul.f32.gmra.mxu3 %v4514_v4 }
 0x84b   :  { %v10162_v60 = vpop.f32.mrf.mxu0 }
 0x84c   :  { %12382 = vst [vmem:[#allocation24_spill] sm:$0xff] %v10162_v60  ;;  %4213 = vmatmul.f32.gmra.mxu1 %v4016_v16 }
 0x84d   :  { %v4662_v45 = vpop.f32.mrf.mxu3  ;;  %4422 = vmatmul.f32.gmra.mxu2 %v3936_v18 }
 0x84e   :  { %v10164_v57 = vadd.f32 %v4662_v45, %v4373_v39  ;;  %5057 = vmatmul.f32.gmra.mxu0 %v3935_v48  ;;  %v4516_v45 = vld [vmem:[#allocation2 + $0x371] sm:$0xff] }
 0x850   :  { %12383 = vst [vmem:[#allocation25_spill] sm:$0xff] %v10164_v57  ;;  %v4375_v25 = vpop.f32.mrf.mxu2  ;;  %v4018_v57 = vld [vmem:[#allocation2 + $0x388] sm:$0xff] }
 0x851   :  { %v4169_v63 = vpop.f32.mrf.mxu1  ;;  %v4376_v59 = vadd.f32 %v4375_v25, %v4166_v27  ;;  %v3938_v27 = vld [vmem:[#allocation2 + $0x387] sm:$0xff] }
 0x852   :  { %4712 = vmatmul.f32.gmra.mxu3 %v4515_v40  ;;  %v4517_v25 = vld [vmem:[#allocation2 + $0x389] sm:$0xff] }
 0x853   :  { %v10166_v31 = vpop.f32.mrf.mxu0 }
 0x854   :  { %12384 = vst [vmem:[#allocation26_spill] sm:$0xff] %v10166_v31  ;;  %4216 = vmatmul.f32.gmra.mxu1 %v4017_v15 }
 0x855   :  { %v4665_v4 = vpop.f32.mrf.mxu3  ;;  %4425 = vmatmul.f32.gmra.mxu2 %v3937_v37 }
 0x856   :  { %v10168_v50 = vadd.f32 %v4665_v4, %v4376_v59  ;;  %5060 = vmatmul.f32.gmra.mxu0 %v3936_v18 }
 0x858   :  { %12385 = vst [vmem:[#allocation27_spill] sm:$0xff] %v10168_v50  ;;  %v4378_v16 = vpop.f32.mrf.mxu2  ;;  %v4019_v50 = vld [vmem:[#allocation2 + $0x390] sm:$0xff] }
 0x859   :  { %v4172_v48 = vpop.f32.mrf.mxu1  ;;  %v4379_v39 = vadd.f32 %v4378_v16, %v4169_v63  ;;  %v3939_v63 = vld [vmem:[#allocation2 + $0x38f] sm:$0xff] }
 0x85a   :  { %4715 = vmatmul.f32.gmra.mxu3 %v4516_v45  ;;  %v5239_v16 = vld [vmem:[#allocation8 + $0x208] sm:$0xff] }
 0x85b   :  { %v10170_v41 = vpop.f32.mrf.mxu0  ;;  %5268 = vmatpush.msrb.mxu1 %v5239_v16 }
 0x85c   :  { %12386 = vst [vmem:[#allocation28_spill] sm:$0xff] %v10170_v41  ;;  %4219 = vmatmul.f32.gmra.mxu1 %v4018_v57  ;;  %v4518_v57 = vld [vmem:[#allocation2 + $0x391] sm:$0xff] }
 0x85d   :  { %v4668_v40 = vpop.f32.mrf.mxu3  ;;  %4428 = vmatmul.f32.gmra.mxu2 %v3938_v27 }
 0x85e   :  { %v10172_v60 = vadd.f32 %v4668_v40, %v4379_v39  ;;  %5063 = vmatmul.f32.gmra.mxu0 %v3937_v37 }
 0x860   :  { %12387 = vst [vmem:[#allocation29_spill] sm:$0xff] %v10172_v60  ;;  %v4381_v15 = vpop.f32.mrf.mxu2 }
 0x861   :  { %v4175_v18 = vpop.f32.mrf.mxu1  ;;  %v4382_v4 = vadd.f32 %v4381_v15, %v4172_v48  ;;  %v3940_v15 = vld [vmem:[#allocation2 + $0x3a7] sm:$0xff] }
 0x862   :  { %4718 = vmatmul.f32.gmra.mxu3 %v4517_v25 }
 0x863   :  { %v10174_v59 = vpop.f32.mrf.mxu0 }
 0x864   :  { %12388 = vst [vmem:[#allocation30_spill] sm:$0xff] %v10174_v59  ;;  %4222 = vmatmul.f32.gmra.mxu1 %v4019_v50  ;;  %v4020_v59 = vld [vmem:[#allocation2 + $0x3a8] sm:$0xff] }
 0x865   :  { %v4671_v45 = vpop.f32.mrf.mxu3  ;;  %4431 = vmatmul.f32.gmra.mxu2 %v3939_v63  ;;  %v4519_v50 = vld [vmem:[#allocation2 + $0x3a9] sm:$0xff] }
 0x866   :  { %v10176_v31 = vadd.f32 %v4671_v45, %v4382_v4  ;;  %5066 = vmatmul.f32.gmra.mxu0 %v3938_v27 }
 0x868   :  { %12389 = vst [vmem:[#allocation31_spill] sm:$0xff] %v10176_v31  ;;  %v4384_v37 = vpop.f32.mrf.mxu2  ;;  %v4021_v31 = vld [vmem:[#allocation2 + $0x3b0] sm:$0xff] }
 0x869   :  { %v4178_v39 = vpop.f32.mrf.mxu1  ;;  %v4385_v25 = vadd.f32 %v4384_v37, %v4175_v18  ;;  %v3941_v18 = vld [vmem:[#allocation2 + $0x3af] sm:$0xff] }
 0x86a   :  { %4721 = vmatmul.f32.gmra.mxu3 %v4518_v57 }
 0x86b   :  { %v10178_v40 = vpop.f32.mrf.mxu0 }
 0x86c   :  { %12390 = vst [vmem:[#allocation33_spill] sm:$0xff] %v10178_v40  ;;  %4225 = vmatmul.f32.gmra.mxu1 %v4020_v59 }
 0x86d   :  { %v4674_v60 = vpop.f32.mrf.mxu3  ;;  %4434 = vmatmul.f32.gmra.mxu2 %v3940_v15 }
 0x86e   :  { %v10180_v48 = vadd.f32 %v4674_v60, %v4385_v25  ;;  %5069 = vmatmul.f32.gmra.mxu0 %v3939_v63  ;;  %v4520_v60 = vld [vmem:[#allocation2 + $0x3b1] sm:$0xff] }
 0x870   :  { %12391 = vst [vmem:[#allocation35_spill] sm:$0xff] %v10180_v48  ;;  %v4387_v27 = vpop.f32.mrf.mxu2  ;;  %v4022_v48 = vld [vmem:[#allocation2 + $0x3c8] sm:$0xff] }
 0x871   :  { %v4181_v4 = vpop.f32.mrf.mxu1  ;;  %v4388_v16 = vadd.f32 %v4387_v27, %v4178_v39  ;;  %v3942_v39 = vld [vmem:[#allocation2 + $0x3c7] sm:$0xff] }
 0x872   :  { %4724 = vmatmul.f32.gmra.mxu3 %v4519_v50  ;;  %v4521_v27 = vld [vmem:[#allocation2 + $0x3c9] sm:$0xff] }
 0x873   :  { %v10182_v45 = vpop.f32.mrf.mxu0 }
 0x874   :  { %12392 = vst [vmem:[#allocation37_spill] sm:$0xff] %v10182_v45  ;;  %4228 = vmatmul.f32.gmra.mxu1 %v4021_v31 }
 0x875   :  { %v4677_v57 = vpop.f32.mrf.mxu3  ;;  %4437 = vmatmul.f32.gmra.mxu2 %v3941_v18 }
 0x876   :  { %v10184_v41 = vadd.f32 %v4677_v57, %v4388_v16  ;;  %5072 = vmatmul.f32.gmra.mxu0 %v3940_v15 }
 0x878   :  { %12393 = vst [vmem:[#allocation40_spill] sm:$0xff] %v10184_v41  ;;  %v4390_v59 = vpop.f32.mrf.mxu2  ;;  %v4023_v41 = vld [vmem:[#allocation2 + $0x3d0] sm:$0xff] }
 0x879   :  { %v4184_v63 = vpop.f32.mrf.mxu1  ;;  %v4391_v25 = vadd.f32 %v4390_v59, %v4181_v4  ;;  %v3943_v4 = vld [vmem:[#allocation2 + $0x3cf] sm:$0xff]  ;;  %v5238_v59 = vld [vmem:[#allocation8 + $0x200] sm:$0xff] }
 0x87a   :  { %4727 = vmatmul.f32.gmra.mxu3 %v4520_v60  ;;  %5269 = vmatpush.msrb.mxu1 %v5238_v59  ;;  %v5604_v59 = vld [vmem:[#allocation8 + $0x2e0] sm:$0xff] }
 0x87b   :  { %v10186_v37 = vpop.f32.mrf.mxu0 }
 0x87c   :  { %12394 = vst [vmem:[#allocation43_spill] sm:$0xff] %v10186_v37  ;;  %4231 = vmatmul.f32.gmra.mxu1 %v4022_v48  ;;  %v5961_v48 = vld [vmem:[#allocation8 + $0x378] sm:$0xff]  ;;  %v5958_v37 = vld [vmem:[#allocation8 + $0x360] sm:$0xff] }
 0x87d   :  { %v4680_v50 = vpop.f32.mrf.mxu3  ;;  %4440 = vmatmul.f32.gmra.mxu2 %v3942_v39  ;;  %5962 = vmatpush.msra.mxu3 %v5961_v48  ;;  %v5603_v48 = vld [vmem:[#allocation8 + $0x2d8] sm:$0xff] }
 0x87e   :  { %v10188_v40 = vadd.f32 %v4680_v50, %v4391_v25  ;;  %5075 = vmatmul.f32.gmra.mxu0 %v3941_v18  ;;  %v5607_v25 = vld [vmem:[#allocation8 + $0x2f8] sm:$0xff]  ;;  %v5606_v18 = vld [vmem:[#allocation8 + $0x2f0] sm:$0xff] }
 0x87f   :  { %v5960_v50 = vld [vmem:[#allocation8 + $0x370] sm:$0xff]  ;;  %5608 = vmatpush.msra.mxu2 %v5607_v25  ;;  %v3944_v25 = vld [vmem:[#allocation2 + $0x3e7] sm:$0xff] }
 0x880   :  { %12395 = vst [vmem:[#allocation46_spill] sm:$0xff] %v10188_v40  ;;  %v4393_v31 = vpop.f32.mrf.mxu2  ;;  %5963 = vmatpush.msra.mxu3 %v5960_v50  ;;  %v4523_v50 = vld [vmem:[#allocation2 + $0x3e9] sm:$0xff] }
 0x881   :  { %v4187_v15 = vpop.f32.mrf.mxu1  ;;  %v4394_v57 = vadd.f32 %v4393_v31, %v4184_v63  ;;  %5609 = vmatpush.msra.mxu2 %v5606_v18  ;;  %v5957_v18 = vld [vmem:[#allocation8 + $0x358] sm:$0xff] }
 0x882   :  { %4730 = vmatmul.f32.gmra.mxu3 %v4521_v27  ;;  %v4522_v27 = vld [vmem:[#allocation2 + $0x3d1] sm:$0xff] }
 0x883   :  { %v10190_v16 = vpop.f32.mrf.mxu0 }
 0x884   :  { %12396 = vst [vmem:[#allocation49_spill] sm:$0xff] %v10190_v16  ;;  %4234 = vmatmul.f32.gmra.mxu1 %v4023_v41 }
 0x885   :  { %v4683_v60 = vpop.f32.mrf.mxu3  ;;  %4443 = vmatmul.f32.gmra.mxu2 %v3943_v4 }
 0x886   :  { %v10192_v45 = vadd.f32 %v4683_v60, %v4394_v57  ;;  %5078 = vmatmul.f32.gmra.mxu0 %v3942_v39  ;;  %v4024_v39 = vld [vmem:[#allocation2 + $0x3e8] sm:$0xff] }
 0x887   :  { %v5605_v60 = vld [vmem:[#allocation8 + $0x2e8] sm:$0xff] }
 0x888   :  { %12397 = vst [vmem:[#allocation52_spill] sm:$0xff] %v10192_v45  ;;  %v4396_v40 = vpop.f32.mrf.mxu2  ;;  %v5959_v45 = vld [vmem:[#allocation8 + $0x368] sm:$0xff]  ;;  %5610 = vmatpush.msra.mxu2 %v5605_v60 }
 0x889   :  { %v4190_v63 = vpop.f32.mrf.mxu1  ;;  %v4397_v41 = vadd.f32 %v4396_v40, %v4187_v15  ;;  %5964 = vmatpush.msra.mxu3 %v5959_v45  ;;  %v5602_v40 = vld [vmem:[#allocation8 + $0x2d0] sm:$0xff]  ;;  %v5601_v45 = vld [vmem:[#allocation8 + $0x2c8] sm:$0xff] }
 0x88a   :  { %4733 = vmatmul.f32.gmra.mxu3 %v4522_v27  ;;  %5611 = vmatpush.msra.mxu2 %v5604_v59  ;;  %v5956_v15 = vld [vmem:[#allocation8 + $0x350] sm:$0xff]  ;;  %v5955_v60 = vld [vmem:[#allocation8 + $0x348] sm:$0xff] }
 0x88b   :  { %v10194_v31 = vpop.f32.mrf.mxu0  ;;  %5965 = vmatpush.msra.mxu3 %v5958_v37  ;;  %v5600_v37 = vld [vmem:[#allocation8 + $0x2c0] sm:$0xff]  ;;  %v3945_v59 = vld [vmem:[#allocation2 + $0x3ef] sm:$0xff] }
 0x88c   :  { %12398 = vst [vmem:[#allocation55_spill] sm:$0xff] %v10194_v31  ;;  %4237 = vmatmul.f32.gmra.mxu1 %v4024_v39  ;;  %5612 = vmatpush.msra.mxu2 %v5603_v48  ;;  %v5954_v48 = vld [vmem:[#allocation8 + $0x340] sm:$0xff] }
 0x88d   :  { %v4686_v57 = vpop.f32.mrf.mxu3  ;;  %4446 = vmatmul.f32.gmra.mxu2 %v3944_v25  ;;  %5966 = vmatpush.msra.mxu3 %v5957_v18  ;;  %v5599_v18 = vld [vmem:[#allocation8 + $0x2b8] sm:$0xff] }
 0x88e   :  { %v10196_v16 = vadd.f32 %v4686_v57, %v4397_v41  ;;  %5081 = vmatmul.f32.gmra.mxu0 %v3943_v4  ;;  %v4025_v4 = vld [vmem:[#allocation2 + $0x3f0] sm:$0xff]  ;;  %5613 = vmatpush.msra.mxu2 %v5602_v40  ;;  %v5953_v40 = vld [vmem:[#allocation8 + $0x338] sm:$0xff] }
 0x88f   :  { %5967 = vmatpush.msra.mxu3 %v5956_v15  ;;  %v5598_v15 = vld [vmem:[#allocation8 + $0x2b0] sm:$0xff] }
 0x890   :  { %12399 = vst [vmem:[#allocation58_spill] sm:$0xff] %v10196_v16  ;;  %v4399_v27 = vpop.f32.mrf.mxu2  ;;  %5614 = vmatpush.msra.mxu2 %v5601_v45 }
 0x891   :  { %v4193_v31 = vpop.f32.mrf.mxu1  ;;  %v4400_v57 = vadd.f32 %v4399_v27, %v4190_v63  ;;  %5968 = vmatpush.msra.mxu3 %v5955_v60  ;;  %v6314_v63 = vld [vmem:[#allocation8 + $0x3f0] sm:$0xff]  ;;  %v4026_v60 = vld [vmem:[#allocation2 + $0x408] sm:$0xff] }
 0x892   :  { %4736 = vmatmul.f32.gmra.mxu3 %v4523_v50  ;;  %v6315_v50 = vld [vmem:[#allocation8 + $0x3f8] sm:$0xff]  ;;  %5615 = vmatpush.msra.mxu2 %v5600_v37 }
 0x893   :  { %v10198_v41 = vpop.f32.mrf.mxu0  ;;  %6316 = vmatpush.msra.mxu0 %v6315_v50  ;;  %5969 = vmatpush.msra.mxu3 %v5954_v48  ;;  %v5951_v50 = vld [vmem:[#allocation8 + $0x328] sm:$0xff] }
 0x894   :  { %12400 = vst [vmem:[#allocation61_spill] sm:$0xff] %v10198_v41  ;;  %4240 = vmatmul.f32.gmra.mxu1 %v4025_v4  ;;  %v4524_v41 = vld [vmem:[#allocation2 + $0x3f1] sm:$0xff]  ;;  %5616 = vmatpush.msra.mxu2 %v5599_v18  ;;  %v3946_v48 = vld [vmem:[#allocation2 + $0x407] sm:$0xff] }
 0x895   :  { %v4689_v39 = vpop.f32.mrf.mxu3  ;;  %4449 = vmatmul.f32.gmra.mxu2 %v3945_v59  ;;  %v5952_v4 = vld [vmem:[#allocation8 + $0x330] sm:$0xff]  ;;  %6317 = vmatpush.msra.mxu0 %v6314_v63  ;;  %v6311_v18 = vld [vmem:[#allocation8 + $0x3d8] sm:$0xff] }
 0x896   :  { %v10200_v16 = vadd.f32 %v4689_v39, %v4400_v57  ;;  %5084 = vmatmul.f32.gmra.mxu0 %v3944_v25  ;;  %5970 = vmatpush.msra.mxu3 %v5953_v40  ;;  %v4525_v63 = vld [vmem:[#allocation2 + $0x409] sm:$0xff] }
 0x897   :  { %5617 = vmatpush.msra.mxu2 %v5598_v15  ;;  %v6310_v40 = vld [vmem:[#allocation8 + $0x3d0] sm:$0xff]  ;;  %v5595_v15 = vld [vmem:[#allocation8 + $0x298] sm:$0xff] }
 0x898   :  { %12401 = vst [vmem:[#allocation64_spill] sm:$0xff] %v10200_v16  ;;  %v4402_v27 = vpop.f32.mrf.mxu2  ;;  %v6313_v16 = vld [vmem:[#allocation8 + $0x3e8] sm:$0xff]  ;;  %5971 = vmatpush.msra.mxu3 %v5952_v4  ;;  %v5594_v4 = vld [vmem:[#allocation8 + $0x290] sm:$0xff] }
 0x899   :  { %v4196_v57 = vpop.f32.mrf.mxu1  ;;  %v4403_v25 = vadd.f32 %v4402_v27, %v4193_v31  ;;  %6318 = vmatpush.msra.mxu0 %v6313_v16  ;;  %v5596_v31 = vld [vmem:[#allocation8 + $0x2a0] sm:$0xff] }
 0x89a   :  { %4739 = vmatmul.f32.gmra.mxu3 %v4524_v41  ;;  %v5597_v41 = vld [vmem:[#allocation8 + $0x2a8] sm:$0xff]  ;;  %v5950_v27 = vld [vmem:[#allocation8 + $0x320] sm:$0xff] }
 0x89b   :  { %v10202_v39 = vpop.f32.mrf.mxu0  ;;  %6319 = vmatpush.msra.mxu0 %v6312_v0  ;;  %5618 = vmatpush.msra.mxu2 %v5597_v41  ;;  %v5948_v0 = vld [vmem:[#allocation8 + $0x310] sm:$0xff]  ;;  %v6309_v41 = vld [vmem:[#allocation8 + $0x3c8] sm:$0xff] }
 0x89c   :  { %12402 = vst [vmem:[#allocation66_spill] sm:$0xff] %v10202_v39  ;;  %4243 = vmatmul.f32.gmra.mxu1 %v4026_v60  ;;  %5972 = vmatpush.msra.mxu3 %v5951_v50  ;;  %v4027_v39 = vld [vmem:[#allocation2 + $0x410] sm:$0xff] }
 0x89d   :  { %v4692_v45 = vpop.f32.mrf.mxu3  ;;  %4452 = vmatmul.f32.gmra.mxu2 %v3946_v48  ;;  %6320 = vmatpush.msra.mxu0 %v6311_v18  ;;  %v6308_v18 = vld [vmem:[#allocation8 + $0x3c0] sm:$0xff] }
 0x89e   :  { %v10204_v37 = vadd.f32 %v4692_v45, %v4403_v25  ;;  %5087 = vmatmul.f32.gmra.mxu0 %v3945_v59  ;;  %v5949_v25 = vld [vmem:[#allocation8 + $0x318] sm:$0xff]  ;;  %5619 = vmatpush.msra.mxu2 %v5596_v31  ;;  %v3947_v31 = vld [vmem:[#allocation2 + $0x40f] sm:$0xff] }
 0x89f   :  { %5973 = vmatpush.msra.mxu3 %v5950_v27  ;;  %6321 = vmatpush.msra.mxu0 %v6310_v40  ;;  %v6669_v27 = vld [vmem:[#allocation8 + $0x478] sm:$0xff]  ;;  %v5592_v40 = vld [vmem:[#allocation8 + $0x280] sm:$0xff] }
 0x8a0   :  { %12403 = vst [vmem:[#allocation67_spill] sm:$0xff] %v10204_v37  ;;  %v4405_v45 = vpop.f32.mrf.mxu2  ;;  %5620 = vmatpush.msra.mxu2 %v5595_v15  ;;  %v6307_v15 = vld [vmem:[#allocation8 + $0x3b8] sm:$0xff]  ;;  %6670 = vmatpush.msra.mxu1 %v6669_v27  ;;  %v4527_v27 = vld [vmem:[#allocation2 + $0x429] sm:$0xff] }
 0x8a1   :  { %v4199_v60 = vpop.f32.mrf.mxu1  ;;  %v4406_v59 = vadd.f32 %v4405_v45, %v4196_v57  ;;  %5974 = vmatpush.msra.mxu3 %v5949_v25  ;;  %6322 = vmatpush.msra.mxu0 %v6309_v41  ;;  %v5947_v57 = vld [vmem:[#allocation8 + $0x308] sm:$0xff]  ;;  %v4526_v45 = vld [vmem:[#allocation2 + $0x411] sm:$0xff]  ;;  %v5946_v25 = vld [vmem:[#allocation8 + $0x300] sm:$0xff] }
 0x8a2   :  { %4742 = vmatmul.f32.gmra.mxu3 %v4525_v63  ;;  %v5593_v63 = vld [vmem:[#allocation8 + $0x288] sm:$0xff]  ;;  %5621 = vmatpush.msra.mxu2 %v5594_v4 }
 0x8a3   :  { %v10206_v16 = vpop.f32.mrf.mxu0  ;;  %5975 = vmatpush.msra.mxu3 %v5948_v0  ;;  %6323 = vmatpush.msra.mxu0 %v6308_v18  ;;  %v4028_v0 = vld [vmem:[#allocation2 + $0x428] sm:$0xff]  ;;  %v6304_v18 = vld [vmem:[#allocation8 + $0x3a0] sm:$0xff] }
 0x8a4   :  { %12404 = vst [vmem:[#allocation68_spill] sm:$0xff] %v10206_v16  ;;  %4246 = vmatmul.f32.gmra.mxu1 %v4027_v39  ;;  %5622 = vmatpush.msra.mxu2 %v5593_v63  ;;  %v3948_v63 = vld [vmem:[#allocation2 + $0x427] sm:$0xff] }
 0x8a5   :  { %v4695_v37 = vpop.f32.mrf.mxu3  ;;  %4455 = vmatmul.f32.gmra.mxu2 %v3947_v31  ;;  %5976 = vmatpush.msra.mxu3 %v5947_v57  ;;  %v6303_v57 = vld [vmem:[#allocation8 + $0x398] sm:$0xff] }
 0x8a6   :  { %v10208_v50 = vadd.f32 %v4695_v37, %v4406_v59  ;;  %5090 = vmatmul.f32.gmra.mxu0 %v3946_v48  ;;  %5623 = vmatpush.msra.mxu2 %v5592_v40  ;;  %v6306_v59 = vld [vmem:[#allocation8 + $0x3b0] sm:$0xff] }
 0x8a7   :  { %6324 = vmatpush.msra.mxu0 %v6307_v15  ;;  %5977 = vmatpush.msra.mxu3 %v5946_v25 }
 0x8a8   :  { %12405 = vst [vmem:[#allocation32_spill] sm:$0xff] %v10208_v50  ;;  %v4408_v37 = vpop.f32.mrf.mxu2  ;;  %v6305_v50 = vld [vmem:[#allocation8 + $0x3a8] sm:$0xff] }
 0x8a9   :  { %v4202_v39 = vpop.f32.mrf.mxu1  ;;  %v4409_v4 = vadd.f32 %v4408_v37, %v4199_v60  ;;  %6325 = vmatpush.msra.mxu0 %v6306_v59 }
 0x8aa   :  { %4745 = vmatmul.f32.gmra.mxu3 %v4526_v45  ;;  %v6302_v45 = vld [vmem:[#allocation8 + $0x390] sm:$0xff] }
 0x8ab   :  { %v10210_v48 = vpop.f32.mrf.mxu0  ;;  %6326 = vmatpush.msra.mxu0 %v6305_v50  ;;  %v3949_v50 = vld [vmem:[#allocation2 + $0x42f] sm:$0xff] }
 0x8ac   :  { %4249 = vmatmul.f32.gmra.mxu1 %v4028_v0  ;;  %v4528_v0 = vld [vmem:[#allocation2 + $0x431] sm:$0xff] }
 0x8ad   :  { %v4698_v41 = vpop.f32.mrf.mxu3  ;;  %4458 = vmatmul.f32.gmra.mxu2 %v3948_v63  ;;  %6327 = vmatpush.msra.mxu0 %v6304_v18 }
 0x8ae   :  { %v10212_v16 = vadd.f32 %v4698_v41, %v4409_v4  ;;  %5093 = vmatmul.f32.gmra.mxu0 %v3947_v31  ;;  %v4029_v4 = vld [vmem:[#allocation2 + $0x430] sm:$0xff]  ;;  %v6301_v41 = vld [vmem:[#allocation8 + $0x388] sm:$0xff]  ;;  %v6300_v31 = vld [vmem:[#allocation8 + $0x380] sm:$0xff] }
 0x8af   :  { %6328 = vmatpush.msra.mxu0 %v6303_v57 }
 0x8b0   :  { %12406 = vst [vmem:[#allocation39_spill] sm:$0xff] %v10212_v16  ;;  %v4411_v40 = vpop.f32.mrf.mxu2 }
 0x8b1   :  { %v4205_v60 = vpop.f32.mrf.mxu1  ;;  %v4412_v25 = vadd.f32 %v4411_v40, %v4202_v39  ;;  %6329 = vmatpush.msra.mxu0 %v6302_v45  ;;  %v5173_v40 = vld [vmem:[#allocation2 + $0x28] sm:$0xff] }
 0x8b2   :  { %4748 = vmatmul.f32.gmra.mxu3 %v4527_v27  ;;  %v5527_v45 = vld [vmem:[#allocation2 + $0x29] sm:$0xff] }
 0x8b3   :  { %v10214_v15 = vpop.f32.mrf.mxu0  ;;  %6330 = vmatpush.msra.mxu0 %v6301_v41 }
 0x8b4   :  { %12407 = vst [vmem:[#allocation69_spill] sm:$0xff] %v10214_v15  ;;  %4252 = vmatmul.f32.gmra.mxu1 %v4029_v4 }
 0x8b5   :  { %v4701_v37 = vpop.f32.mrf.mxu3  ;;  %4461 = vmatmul.f32.gmra.mxu2 %v3949_v50  ;;  %6331 = vmatpush.msra.mxu0 %v6300_v31 }
 0x8b6   :  { %v10216_v59 = vadd.f32 %v4701_v37, %v4412_v25  ;;  %5096 = vmatmul.f32.gmra.mxu0 %v3948_v63  ;;  %v5881_v63 = vld [vmem:[#allocation2 + $0x47] sm:$0xff] }
 0x8b8   :  { %12408 = vst [vmem:[#allocation71_spill] sm:$0xff] %v10216_v59  ;;  %v4414_v18 = vpop.f32.mrf.mxu2  ;;  %v4881_v59 = vld [vmem:[#allocation2 + $0x447] sm:$0xff] }
 0x8b9   :  { %v4208_v27 = vpop.f32.mrf.mxu1  ;;  %v4415_v39 = vadd.f32 %v4414_v18, %v4205_v60  ;;  %v5528_v60 = vld [vmem:[#allocation2 + $0x31] sm:$0xff] }
 0x8ba   :  { %4751 = vmatmul.f32.gmra.mxu3 %v4528_v0  ;;  %v5174_v0 = vld [vmem:[#allocation2 + $0x30] sm:$0xff] }
 0x8bb   :  { %v10218_v16 = vpop.f32.mrf.mxu0  ;;  %v6668_v18 = vld [vmem:[#allocation8 + $0x470] sm:$0xff] }
 0x8bc   :  { %12409 = vst [vmem:[#allocation73_spill] sm:$0xff] %v10218_v16  ;;  %5270 = vmatmul.f32.vlgmr.msrb.gmra.mxu1 %v5173_v40 }
 0x8bd   :  { %v4704_v57 = vpop.f32.mrf.mxu3  ;;  %5624 = vmatmul.f32.vlgmr.msra.gmra.mxu2 %v5527_v45  ;;  %6671 = vmatpush.msra.mxu1 %v6668_v18 }
 0x8be   :  { %v10220_v15 = vadd.f32 %v4704_v57, %v4415_v39  ;;  %5099 = vmatmul.f32.gmra.mxu0 %v3949_v50  ;;  %v5882_v50 = vld [vmem:[#allocation2 + $0x4f] sm:$0xff] }
 0x8c0   :  { %12410 = vst [vmem:[#allocation42_spill] sm:$0xff] %v10220_v15  ;;  %v4417_v25 = vpop.f32.mrf.mxu2 }
 0x8c1   :  { %v4211_v37 = vpop.f32.mrf.mxu1  ;;  %v4418_v41 = vadd.f32 %v4417_v25, %v4208_v27  ;;  %v5175_v27 = vld [vmem:[#allocation2 + $0x48] sm:$0xff] }
 0x8c2   :  { %5978 = vmatmul.f32.vlgmr.msra.gmra.mxu3 %v5881_v63  ;;  %v4882_v25 = vld [vmem:[#allocation2 + $0x44f] sm:$0xff] }
 0x8c3   :  { %v10222_v4 = vpop.f32.mrf.mxu0 }
 0x8c4   :  { %12411 = vst [vmem:[#allocation36_spill] sm:$0xff] %v10222_v4  ;;  %5273 = vmatmul.f32.gmra.mxu1 %v5174_v0 }
 0x8c5   :  { %v4707_v31 = vpop.f32.mrf.mxu3  ;;  %5627 = vmatmul.f32.gmra.mxu2 %v5528_v60 }
 0x8c6   :  { %v10224_v16 = vadd.f32 %v4707_v31, %v4418_v41  ;;  %5102 = vmatmul.f32.gmra.mxu0 %v4881_v59  ;;  %v5529_v41 = vld [vmem:[#allocation2 + $0x49] sm:$0xff] }
 0x8c7   :  { %v5883_v59 = vld [vmem:[#allocation2 + $0x67] sm:$0xff] }
 0x8c8   :  { %12412 = vst [vmem:[#allocation45_spill] sm:$0xff] %v10224_v16  ;;  %v4420_v39 = vpop.f32.mrf.mxu2  ;;  %v5176_v16 = vld [vmem:[#allocation2 + $0x50] sm:$0xff] }
 0x8c9   :  { %v4214_v57 = vpop.f32.mrf.mxu1  ;;  %v4421_v45 = vadd.f32 %v4420_v39, %v4211_v37  ;;  %v5530_v37 = vld [vmem:[#allocation2 + $0x51] sm:$0xff] }
 0x8ca   :  { %5981 = vmatmul.f32.gmra.mxu3 %v5882_v50  ;;  %v5884_v39 = vld [vmem:[#allocation2 + $0x6f] sm:$0xff] }
 0x8cb   :  { %v10226_v40 = vpop.f32.mrf.mxu0 }
 0x8cc   :  { %12413 = vst [vmem:[#allocation38_spill] sm:$0xff] %v10226_v40  ;;  %5276 = vmatmul.f32.gmra.mxu1 %v5175_v27 }
 0x8cd   :  { %v4710_v63 = vpop.f32.mrf.mxu3  ;;  %5630 = vmatmul.f32.gmra.mxu2 %v5529_v41 }
 0x8ce   :  { %v10228_v15 = vadd.f32 %v4710_v63, %v4421_v45  ;;  %5105 = vmatmul.f32.gmra.mxu0 %v4882_v25 }
 0x8d0   :  { %12414 = vst [vmem:[#allocation48_spill] sm:$0xff] %v10228_v15  ;;  %v4423_v31 = vpop.f32.mrf.mxu2  ;;  %v5177_v15 = vld [vmem:[#allocation2 + $0x68] sm:$0xff] }
 0x8d1   :  { %v4217_v0 = vpop.f32.mrf.mxu1  ;;  %v4424_v18 = vadd.f32 %v4423_v31, %v4214_v57  ;;  %v5531_v57 = vld [vmem:[#allocation2 + $0x69] sm:$0xff] }
 0x8d2   :  { %5984 = vmatmul.f32.gmra.mxu3 %v5883_v59  ;;  %v5885_v31 = vld [vmem:[#allocation2 + $0x87] sm:$0xff] }
 0x8d3   :  { %v10230_v60 = vpop.f32.mrf.mxu0 }
 0x8d4   :  { %12415 = vst [vmem:[#allocation34_spill] sm:$0xff] %v10230_v60  ;;  %5279 = vmatmul.f32.gmra.mxu1 %v5176_v16 }
 0x8d5   :  { %v4713_v50 = vpop.f32.mrf.mxu3  ;;  %5633 = vmatmul.f32.gmra.mxu2 %v5530_v37 }
 0x8d6   :  { %v10232_v40 = vadd.f32 %v4713_v50, %v4424_v18  ;;  %6332 = vmatmul.f32.vlgmr.msra.gmra.mxu0 %v5175_v27 }
 0x8d8   :  { %12416 = vst [vmem:[#allocation81_spill] sm:$0xff] %v10232_v40  ;;  %v4426_v45 = vpop.f32.mrf.mxu2  ;;  %v5178_v40 = vld [vmem:[#allocation2 + $0x70] sm:$0xff] }
 0x8d9   :  { %v4220_v63 = vpop.f32.mrf.mxu1  ;;  %v4427_v41 = vadd.f32 %v4426_v45, %v4217_v0  ;;  %v5532_v0 = vld [vmem:[#allocation2 + $0x71] sm:$0xff]  ;;  %v6667_v45 = vld [vmem:[#allocation8 + $0x468] sm:$0xff] }
 0x8da   :  { %5987 = vmatmul.f32.gmra.mxu3 %v5884_v39  ;;  %6672 = vmatpush.msra.mxu1 %v6667_v45 }
 0x8db   :  { %v10234_v25 = vpop.f32.mrf.mxu0 }
 0x8dc   :  { %12417 = vst [vmem:[#allocation75_spill] sm:$0xff] %v10234_v25  ;;  %5282 = vmatmul.f32.gmra.mxu1 %v5177_v15 }
 0x8dd   :  { %v4716_v59 = vpop.f32.mrf.mxu3  ;;  %5636 = vmatmul.f32.gmra.mxu2 %v5531_v57 }
 0x8de   :  { %v10236_v4 = vadd.f32 %v4716_v59, %v4427_v41  ;;  %6335 = vmatmul.f32.gmra.mxu0 %v5176_v16  ;;  %v5886_v16 = vld [vmem:[#allocation2 + $0x8f] sm:$0xff] }
 0x8e0   :  { %12418 = vst [vmem:[#allocation41_spill] sm:$0xff] %v10236_v4  ;;  %v4429_v27 = vpop.f32.mrf.mxu2 }
 0x8e1   :  { %v4223_v18 = vpop.f32.mrf.mxu1  ;;  %v4430_v37 = vadd.f32 %v4429_v27, %v4220_v63  ;;  %v5533_v27 = vld [vmem:[#allocation2 + $0x89] sm:$0xff] }
 0x8e2   :  { %5990 = vmatmul.f32.gmra.mxu3 %v5885_v31 }
 0x8e3   :  { %v10238_v50 = vpop.f32.mrf.mxu0 }
 0x8e4   :  { %12419 = vst [vmem:[#allocation77_spill] sm:$0xff] %v10238_v50  ;;  %5285 = vmatmul.f32.gmra.mxu1 %v5178_v40  ;;  %v5179_v50 = vld [vmem:[#allocation2 + $0x88] sm:$0xff] }
 0x8e5   :  { %v4719_v39 = vpop.f32.mrf.mxu3  ;;  %5639 = vmatmul.f32.gmra.mxu2 %v5532_v0 }
 0x8e6   :  { %v10240_v60 = vadd.f32 %v4719_v39, %v4430_v37  ;;  %6338 = vmatmul.f32.gmra.mxu0 %v5177_v15  ;;  %v5887_v15 = vld [vmem:[#allocation2 + $0xa7] sm:$0xff] }
 0x8e8   :  { %12420 = vst [vmem:[#allocation70_spill] sm:$0xff] %v10240_v60  ;;  %v4432_v41 = vpop.f32.mrf.mxu2  ;;  %v5180_v60 = vld [vmem:[#allocation2 + $0x90] sm:$0xff] }
 0x8e9   :  { %v4226_v59 = vpop.f32.mrf.mxu1  ;;  %v4433_v31 = vadd.f32 %v4432_v41, %v4223_v18  ;;  %v5534_v18 = vld [vmem:[#allocation2 + $0x91] sm:$0xff] }
 0x8ea   :  { %5993 = vmatmul.f32.gmra.mxu3 %v5886_v16 }
 0x8eb   :  { %v10242_v57 = vpop.f32.mrf.mxu0 }
 0x8ec   :  { %12421 = vst [vmem:[#allocation78_spill] sm:$0xff] %v10242_v57  ;;  %5288 = vmatmul.f32.gmra.mxu1 %v5179_v50 }
 0x8ed   :  { %v4722_v4 = vpop.f32.mrf.mxu3  ;;  %5642 = vmatmul.f32.gmra.mxu2 %v5533_v27 }
 0x8ee   :  { %v10244_v63 = vadd.f32 %v4722_v4, %v4433_v31  ;;  %6341 = vmatmul.f32.gmra.mxu0 %v5178_v40  ;;  %v5888_v4 = vld [vmem:[#allocation2 + $0xaf] sm:$0xff] }
 0x8f0   :  { %12422 = vst [vmem:[#allocation51_spill] sm:$0xff] %v10244_v63  ;;  %v4435_v37 = vpop.f32.mrf.mxu2  ;;  %v5181_v63 = vld [vmem:[#allocation2 + $0xa8] sm:$0xff] }
 0x8f1   :  { %v4229_v39 = vpop.f32.mrf.mxu1  ;;  %v4436_v45 = vadd.f32 %v4435_v37, %v4226_v59  ;;  %v5535_v59 = vld [vmem:[#allocation2 + $0xa9] sm:$0xff] }
 0x8f2   :  { %5996 = vmatmul.f32.gmra.mxu3 %v5887_v15  ;;  %v5889_v37 = vld [vmem:[#allocation2 + $0xc7] sm:$0xff] }
 0x8f3   :  { %v10246_v0 = vpop.f32.mrf.mxu0 }
 0x8f4   :  { %12423 = vst [vmem:[#allocation80_spill] sm:$0xff] %v10246_v0  ;;  %5291 = vmatmul.f32.gmra.mxu1 %v5180_v60 }
 0x8f5   :  { %v4725_v16 = vpop.f32.mrf.mxu3  ;;  %5645 = vmatmul.f32.gmra.mxu2 %v5534_v18 }
 0x8f6   :  { %v10248_v25 = vadd.f32 %v4725_v16, %v4436_v45  ;;  %6344 = vmatmul.f32.gmra.mxu0 %v5179_v50 }
 0x8f8   :  { %12424 = vst [vmem:[#allocation72_spill] sm:$0xff] %v10248_v25  ;;  %v4438_v40 = vpop.f32.mrf.mxu2  ;;  %v5182_v25 = vld [vmem:[#allocation2 + $0xb0] sm:$0xff] }
 0x8f9   :  { %v4232_v41 = vpop.f32.mrf.mxu1  ;;  %v4439_v27 = vadd.f32 %v4438_v40, %v4229_v39  ;;  %v5536_v39 = vld [vmem:[#allocation2 + $0xb1] sm:$0xff]  ;;  %v6666_v40 = vld [vmem:[#allocation8 + $0x460] sm:$0xff] }
 0x8fa   :  { %5999 = vmatmul.f32.gmra.mxu3 %v5888_v4  ;;  %6673 = vmatpush.msra.mxu1 %v6666_v40 }
 0x8fb   :  { %v10250_v31 = vpop.f32.mrf.mxu0 }
 0x8fc   :  { %12425 = vst [vmem:[#allocation82_spill] sm:$0xff] %v10250_v31  ;;  %5294 = vmatmul.f32.gmra.mxu1 %v5181_v63 }
 0x8fd   :  { %v4728_v15 = vpop.f32.mrf.mxu3  ;;  %5648 = vmatmul.f32.gmra.mxu2 %v5535_v59 }
 0x8fe   :  { %v10252_v57 = vadd.f32 %v4728_v15, %v4439_v27  ;;  %6347 = vmatmul.f32.gmra.mxu0 %v5180_v60  ;;  %v5890_v60 = vld [vmem:[#allocation2 + $0xcf] sm:$0xff] }
 0x900   :  { %12426 = vst [vmem:[#allocation44_spill] sm:$0xff] %v10252_v57  ;;  %v4441_v50 = vpop.f32.mrf.mxu2 }
 0x901   :  { %v4235_v45 = vpop.f32.mrf.mxu1  ;;  %v4442_v18 = vadd.f32 %v4441_v50, %v4232_v41  ;;  %v5537_v50 = vld [vmem:[#allocation2 + $0xc9] sm:$0xff] }
 0x902   :  { %6002 = vmatmul.f32.gmra.mxu3 %v5889_v37 }
 0x903   :  { %v10254_v16 = vpop.f32.mrf.mxu0 }
 0x904   :  { %12427 = vst [vmem:[#allocation85_spill] sm:$0xff] %v10254_v16  ;;  %5297 = vmatmul.f32.gmra.mxu1 %v5182_v25  ;;  %v5183_v16 = vld [vmem:[#allocation2 + $0xc8] sm:$0xff] }
 0x905   :  { %v4731_v4 = vpop.f32.mrf.mxu3  ;;  %5651 = vmatmul.f32.gmra.mxu2 %v5536_v39 }
 0x906   :  { %v10256_v0 = vadd.f32 %v4731_v4, %v4442_v18  ;;  %6350 = vmatmul.f32.gmra.mxu0 %v5181_v63  ;;  %v5891_v63 = vld [vmem:[#allocation2 + $0xe7] sm:$0xff] }
 0x908   :  { %12428 = vst [vmem:[#allocation74_spill] sm:$0xff] %v10256_v0  ;;  %v4444_v27 = vpop.f32.mrf.mxu2  ;;  %v5184_v0 = vld [vmem:[#allocation2 + $0xd0] sm:$0xff] }
 0x909   :  { %v4238_v15 = vpop.f32.mrf.mxu1  ;;  %v4445_v37 = vadd.f32 %v4444_v27, %v4235_v45  ;;  %v5538_v45 = vld [vmem:[#allocation2 + $0xd1] sm:$0xff] }
 0x90a   :  { %6005 = vmatmul.f32.gmra.mxu3 %v5890_v60 }
 0x90b   :  { %v10258_v59 = vpop.f32.mrf.mxu0 }
 0x90c   :  { %12429 = vst [vmem:[#allocation90_spill] sm:$0xff] %v10258_v59  ;;  %5300 = vmatmul.f32.gmra.mxu1 %v5183_v16 }
 0x90d   :  { %v4734_v57 = vpop.f32.mrf.mxu3  ;;  %5654 = vmatmul.f32.gmra.mxu2 %v5537_v50 }
 0x90e   :  { %v10260_v41 = vadd.f32 %v4734_v57, %v4445_v37  ;;  %6353 = vmatmul.f32.gmra.mxu0 %v5182_v25  ;;  %v5892_v57 = vld [vmem:[#allocation2 + $0xef] sm:$0xff] }
 0x910   :  { %12430 = vst [vmem:[#allocation84_spill] sm:$0xff] %v10260_v41  ;;  %v4447_v18 = vpop.f32.mrf.mxu2  ;;  %v5185_v41 = vld [vmem:[#allocation2 + $0xe8] sm:$0xff] }
 0x911   :  { %v4241_v4 = vpop.f32.mrf.mxu1  ;;  %v4448_v40 = vadd.f32 %v4447_v18, %v4238_v15  ;;  %v5539_v15 = vld [vmem:[#allocation2 + $0xe9] sm:$0xff] }
 0x912   :  { %6008 = vmatmul.f32.gmra.mxu3 %v5891_v63  ;;  %v5893_v18 = vld [vmem:[#allocation2 + $0x107] sm:$0xff] }
 0x913   :  { %v10262_v39 = vpop.f32.mrf.mxu0 }
 0x914   :  { %12431 = vst [vmem:[#allocation54_spill] sm:$0xff] %v10262_v39  ;;  %5303 = vmatmul.f32.gmra.mxu1 %v5184_v0 }
 0x915   :  { %v4737_v60 = vpop.f32.mrf.mxu3  ;;  %5657 = vmatmul.f32.gmra.mxu2 %v5538_v45 }
 0x916   :  { %v10264_v31 = vadd.f32 %v4737_v60, %v4448_v40  ;;  %6356 = vmatmul.f32.gmra.mxu0 %v5183_v16 }
 0x918   :  { %12432 = vst [vmem:[#allocation89_spill] sm:$0xff] %v10264_v31  ;;  %v4450_v25 = vpop.f32.mrf.mxu2  ;;  %v5186_v31 = vld [vmem:[#allocation2 + $0xf0] sm:$0xff] }
 0x919   :  { %v4244_v27 = vpop.f32.mrf.mxu1  ;;  %v4451_v50 = vadd.f32 %v4450_v25, %v4241_v4  ;;  %v5540_v4 = vld [vmem:[#allocation2 + $0xf1] sm:$0xff] }
 0x91a   :  { %6011 = vmatmul.f32.gmra.mxu3 %v5892_v57  ;;  %v6665_v25 = vld [vmem:[#allocation8 + $0x458] sm:$0xff] }
 0x91b   :  { %v10266_v37 = vpop.f32.mrf.mxu0  ;;  %6674 = vmatpush.msra.mxu1 %v6665_v25 }
 0x91c   :  { %12433 = vst [vmem:[#allocation76_spill] sm:$0xff] %v10266_v37  ;;  %5306 = vmatmul.f32.gmra.mxu1 %v5185_v41 }
 0x91d   :  { %v4740_v63 = vpop.f32.mrf.mxu3  ;;  %5660 = vmatmul.f32.gmra.mxu2 %v5539_v15 }
 0x91e   :  { %v10268_v59 = vadd.f32 %v4740_v63, %v4451_v50  ;;  %6359 = vmatmul.f32.gmra.mxu0 %v5184_v0  ;;  %v5894_v0 = vld [vmem:[#allocation2 + $0x10f] sm:$0xff] }
 0x920   :  { %12434 = vst [vmem:[#allocation87_spill] sm:$0xff] %v10268_v59  ;;  %v4453_v16 = vpop.f32.mrf.mxu2 }
 0x921   :  { %v4247_v40 = vpop.f32.mrf.mxu1  ;;  %v4454_v45 = vadd.f32 %v4453_v16, %v4244_v27  ;;  %v5541_v16 = vld [vmem:[#allocation2 + $0x109] sm:$0xff] }
 0x922   :  { %6014 = vmatmul.f32.gmra.mxu3 %v5893_v18 }
 0x923   :  { %v10270_v60 = vpop.f32.mrf.mxu0 }
 0x924   :  { %12435 = vst [vmem:[#allocation47_spill] sm:$0xff] %v10270_v60  ;;  %5309 = vmatmul.f32.gmra.mxu1 %v5186_v31  ;;  %v5187_v60 = vld [vmem:[#allocation2 + $0x108] sm:$0xff] }
 0x925   :  { %v4743_v57 = vpop.f32.mrf.mxu3  ;;  %5663 = vmatmul.f32.gmra.mxu2 %v5540_v4 }
 0x926   :  { %v10272_v39 = vadd.f32 %v4743_v57, %v4454_v45  ;;  %6362 = vmatmul.f32.gmra.mxu0 %v5185_v41  ;;  %v5895_v41 = vld [vmem:[#allocation2 + $0x127] sm:$0xff] }
 0x928   :  { %12436 = vst [vmem:[#allocation93_spill] sm:$0xff] %v10272_v39  ;;  %v4456_v50 = vpop.f32.mrf.mxu2  ;;  %v5188_v39 = vld [vmem:[#allocation2 + $0x110] sm:$0xff] }
 0x929   :  { %v4250_v63 = vpop.f32.mrf.mxu1  ;;  %v4457_v18 = vadd.f32 %v4456_v50, %v4247_v40  ;;  %v5542_v40 = vld [vmem:[#allocation2 + $0x111] sm:$0xff] }
 0x92a   :  { %6017 = vmatmul.f32.gmra.mxu3 %v5894_v0 }
 0x92b   :  { %v10274_v15 = vpop.f32.mrf.mxu0 }
 0x92c   :  { %12437 = vst [vmem:[#allocation79_spill] sm:$0xff] %v10274_v15  ;;  %5312 = vmatmul.f32.gmra.mxu1 %v5187_v60 }
 0x92d   :  { %v4746_v59 = vpop.f32.mrf.mxu3  ;;  %5666 = vmatmul.f32.gmra.mxu2 %v5541_v16 }
 0x92e   :  { %v10276_v27 = vadd.f32 %v4746_v59, %v4457_v18  ;;  %6365 = vmatmul.f32.gmra.mxu0 %v5186_v31  ;;  %v5896_v59 = vld [vmem:[#allocation2 + $0x12f] sm:$0xff] }
 0x930   :  { %12438 = vst [vmem:[#allocation91_spill] sm:$0xff] %v10276_v27  ;;  %v4459_v45 = vpop.f32.mrf.mxu2  ;;  %v5189_v27 = vld [vmem:[#allocation2 + $0x128] sm:$0xff] }
 0x931   :  { %v4253_v57 = vpop.f32.mrf.mxu1  ;;  %v4460_v25 = vadd.f32 %v4459_v45, %v4250_v63  ;;  %v5543_v63 = vld [vmem:[#allocation2 + $0x129] sm:$0xff]  ;;  %v5109_v45 = vadd.f32 %v10010_v13, %v10002_v29  ;;  %v5110_v29 = vadd.f32 %v10016_v38, %v10006_v17  ;;  %v5111_v17 = vadd.f32 %v10022_v51, %v10012_v20 }
 0x932   :  { %6020 = vmatmul.f32.gmra.mxu3 %v5895_v41  ;;  %v5898_v13 = vld [vmem:[#allocation2 + $0x14f] sm:$0xff]  ;;  %v5899_v38 = vld [vmem:[#allocation2 + $0x167] sm:$0xff] }
 0x933   :  { %v10278_v4 = vpop.f32.mrf.mxu0  ;;  %v5900_v20 = vld [vmem:[#allocation2 + $0x16f] sm:$0xff] }
 0x934   :  { %12439 = vst [vmem:[#allocation57_spill] sm:$0xff] %v10278_v4  ;;  %5315 = vmatmul.f32.gmra.mxu1 %v5188_v39 }
 0x935   :  { %v4749_v0 = vpop.f32.mrf.mxu3  ;;  %5669 = vmatmul.f32.gmra.mxu2 %v5542_v40 }
 0x936   :  { %v10280_v37 = vadd.f32 %v4749_v0, %v4460_v25  ;;  %6368 = vmatmul.f32.gmra.mxu0 %v5187_v60  ;;  %v5897_v60 = vld [vmem:[#allocation2 + $0x147] sm:$0xff] }
 0x938   :  { %12440 = vst [vmem:[#allocation83_spill] sm:$0xff] %v10280_v37  ;;  %v4462_v31 = vpop.f32.mrf.mxu2 }
 0x939   :  { %v5271_v50 = vpop.f32.mrf.mxu1  ;;  %v4463_v16 = vadd.f32 %v4462_v31, %v4253_v57  ;;  %v5190_v31 = vld [vmem:[#allocation2 + $0x130] sm:$0xff] }
 0x93a   :  { %6023 = vmatmul.f32.gmra.mxu3 %v5896_v59  ;;  %v5463_v25 = vadd.f32 %v5271_v50, %v5109_v45 }
 0x93b   :  { %v10282_v18 = vpop.f32.mrf.mxu0 }
 0x93c   :  { %12441 = vst [vmem:[#allocation94_spill] sm:$0xff] %v10282_v18  ;;  %5318 = vmatmul.f32.gmra.mxu1 %v5189_v27 }
 0x93d   :  { %v4752_v41 = vpop.f32.mrf.mxu3  ;;  %5672 = vmatmul.f32.gmra.mxu2 %v5543_v63 }
 0x93e   :  { %v10284_v15 = vadd.f32 %v4752_v41, %v4463_v16  ;;  %6371 = vmatmul.f32.gmra.mxu0 %v5188_v39  ;;  %v5544_v39 = vld [vmem:[#allocation2 + $0x131] sm:$0xff] }
 0x93f   :  { %v6664_v16 = vld [vmem:[#allocation8 + $0x450] sm:$0xff] }
 0x940   :  { %12442 = vst [vmem:[#allocation50_spill] sm:$0xff] %v10284_v15  ;;  %v5625_v0 = vpop.f32.mrf.mxu2  ;;  %6675 = vmatpush.msra.mxu1 %v6664_v16 }
 0x941   :  { %v5274_v40 = vpop.f32.mrf.mxu1  ;;  %v5817_v37 = vadd.f32 %v5625_v0, %v5463_v25 }
 0x942   :  { %6026 = vmatmul.f32.gmra.mxu3 %v5897_v60  ;;  %v5464_v50 = vadd.f32 %v5274_v40, %v5110_v29 }
 0x943   :  { %v10288_v59 = vpop.f32.mrf.mxu0 }
 0x944   :  { %12443 = vst [vmem:[#allocation86_spill] sm:$0xff] %v10288_v59  ;;  %5321 = vmatmul.f32.gmra.mxu1 %v5190_v31 }
 0x945   :  { %v5979_v57 = vpop.f32.mrf.mxu3  ;;  %5675 = vmatmul.f32.gmra.mxu2 %v5544_v39 }
 0x946   :  { %v10290_v18 = vadd.f32 %v5979_v57, %v5817_v37  ;;  %6374 = vmatmul.f32.gmra.mxu0 %v5189_v27  ;;  %v5191_v37 = vld [vmem:[#allocation2 + $0x148] sm:$0xff] }
 0x947   :  { %v5545_v27 = vld [vmem:[#allocation2 + $0x149] sm:$0xff] }
 0x948   :  { %v5628_v41 = vpop.f32.mrf.mxu2 }
 0x949   :  { %v5277_v63 = vpop.f32.mrf.mxu1  ;;  %v5818_v60 = vadd.f32 %v5628_v41, %v5464_v50  ;;  %v5192_v50 = vld [vmem:[#allocation2 + $0x150] sm:$0xff] }
 0x94a   :  { %6029 = vmatmul.f32.gmra.mxu3 %v5898_v13  ;;  %v5465_v57 = vadd.f32 %v5277_v63, %v5111_v17 }
 0x94b   :  { %v10294_v45 = vpop.f32.mrf.mxu0 }
 0x94c   :  { %12444 = vst [vmem:[#allocation60_spill] sm:$0xff] %v10294_v45  ;;  %5324 = vmatmul.f32.gmra.mxu1 %v5191_v37 }
 0x94d   :  { %v5982_v25 = vpop.f32.mrf.mxu3  ;;  %5678 = vmatmul.f32.gmra.mxu2 %v5545_v27 }
 0x94e   :  { %v10296_v0 = vadd.f32 %v5982_v25, %v5818_v60  ;;  %6377 = vmatmul.f32.gmra.mxu0 %v5190_v31  ;;  %v5546_v31 = vld [vmem:[#allocation2 + $0x151] sm:$0xff]  ;;  %v5112_v60 = vadd.f32 %v10028_v49, %v10018_v6  ;;  %v5901_v6 = vld [vmem:[#allocation2 + $0x187] sm:$0xff] }
 0x950   :  { %v5631_v40 = vpop.f32.mrf.mxu2 }
 0x951   :  { %v5280_v39 = vpop.f32.mrf.mxu1  ;;  %v5819_v29 = vadd.f32 %v5631_v40, %v5465_v57  ;;  %v5193_v57 = vld [vmem:[#allocation2 + $0x168] sm:$0xff] }
 0x952   :  { %6032 = vmatmul.f32.gmra.mxu3 %v5899_v38  ;;  %v5466_v51 = vadd.f32 %v5280_v39, %v5112_v60 }
 0x953   :  { %v10300_v16 = vpop.f32.mrf.mxu0 }
 0x954   :  { %5327 = vmatmul.f32.gmra.mxu1 %v5192_v50 }
 0x955   :  { %v5985_v13 = vpop.f32.mrf.mxu3  ;;  %5681 = vmatmul.f32.gmra.mxu2 %v5546_v31 }
 0x956   :  { %v10302_v41 = vadd.f32 %v5985_v13, %v5819_v29  ;;  %6380 = vmatmul.f32.gmra.mxu0 %v5191_v37  ;;  %v5547_v37 = vld [vmem:[#allocation2 + $0x169] sm:$0xff]  ;;  %v5113_v29 = vadd.f32 %v10034_v26, %v10024_v2  ;;  %v5114_v2 = vadd.f32 %v10040_v5, %v10030_v11  ;;  %v5115_v11 = vadd.f32 %v10046_v62, %v10036_v7 }
 0x957   :  { %v5902_v26 = vld [vmem:[#allocation2 + $0x18f] sm:$0xff]  ;;  %v5903_v5 = vld [vmem:[#allocation2 + $0x1a7] sm:$0xff] }
 0x958   :  { %v5634_v63 = vpop.f32.mrf.mxu2  ;;  %v5904_v7 = vld [vmem:[#allocation2 + $0x1af] sm:$0xff] }
 0x959   :  { %v5283_v25 = vpop.f32.mrf.mxu1  ;;  %v5820_v17 = vadd.f32 %v5634_v63, %v5466_v51  ;;  %v5194_v51 = vld [vmem:[#allocation2 + $0x170] sm:$0xff] }
 0x95a   :  { %6035 = vmatmul.f32.gmra.mxu3 %v5900_v20  ;;  %v5467_v49 = vadd.f32 %v5283_v25, %v5113_v29 }
 0x95b   :  { %v10306_v27 = vpop.f32.mrf.mxu0 }
 0x95c   :  { %5330 = vmatmul.f32.gmra.mxu1 %v5193_v57 }
 0x95d   :  { %v5988_v38 = vpop.f32.mrf.mxu3  ;;  %5684 = vmatmul.f32.gmra.mxu2 %v5547_v37 }
 0x95e   :  { %v10308_v40 = vadd.f32 %v5988_v38, %v5820_v17  ;;  %6383 = vmatmul.f32.gmra.mxu0 %v5192_v50  ;;  %v5548_v50 = vld [vmem:[#allocation2 + $0x171] sm:$0xff]  ;;  %v6663_v17 = vld [vmem:[#allocation8 + $0x448] sm:$0xff] }
 0x95f   :  { %6676 = vmatpush.msra.mxu1 %v6663_v17 }
 0x960   :  { %v5637_v39 = vpop.f32.mrf.mxu2 }
 0x961   :  { %v5286_v13 = vpop.f32.mrf.mxu1  ;;  %v5821_v60 = vadd.f32 %v5637_v39, %v5467_v49  ;;  %v5195_v39 = vld [vmem:[#allocation2 + $0x188] sm:$0xff] }
 0x962   :  { %6038 = vmatmul.f32.gmra.mxu3 %v5901_v6  ;;  %v5468_v25 = vadd.f32 %v5286_v13, %v5114_v2 }
 0x963   :  { %v10312_v31 = vpop.f32.mrf.mxu0 }
 0x964   :  { %5333 = vmatmul.f32.gmra.mxu1 %v5194_v51 }
 0x965   :  { %v5991_v20 = vpop.f32.mrf.mxu3  ;;  %5687 = vmatmul.f32.gmra.mxu2 %v5548_v50 }
 0x966   :  { %v10314_v63 = vadd.f32 %v5991_v20, %v5821_v60  ;;  %6386 = vmatmul.f32.gmra.mxu0 %v5193_v57  ;;  %v5549_v57 = vld [vmem:[#allocation2 + $0x189] sm:$0xff] }
 0x968   :  { %v5640_v38 = vpop.f32.mrf.mxu2 }
 0x969   :  { %v5289_v37 = vpop.f32.mrf.mxu1  ;;  %v5822_v6 = vadd.f32 %v5640_v38, %v5468_v25  ;;  %v5196_v25 = vld [vmem:[#allocation2 + $0x190] sm:$0xff] }
 0x96a   :  { %6041 = vmatmul.f32.gmra.mxu3 %v5902_v26  ;;  %v5469_v20 = vadd.f32 %v5289_v37, %v5115_v11 }
 0x96b   :  { %v10318_v29 = vpop.f32.mrf.mxu0 }
 0x96c   :  { %5336 = vmatmul.f32.gmra.mxu1 %v5195_v39 }
 0x96d   :  { %v5994_v49 = vpop.f32.mrf.mxu3  ;;  %5690 = vmatmul.f32.gmra.mxu2 %v5549_v57 }
 0x96e   :  { %v10320_v60 = vadd.f32 %v5994_v49, %v5822_v6  ;;  %6389 = vmatmul.f32.gmra.mxu0 %v5194_v51  ;;  %v5550_v51 = vld [vmem:[#allocation2 + $0x191] sm:$0xff]  ;;  %v5116_v6 = vadd.f32 %v10052_v56, %v10042_v43  ;;  %v5905_v43 = vld [vmem:[#allocation2 + $0x1c7] sm:$0xff] }
 0x970   :  { %v5643_v13 = vpop.f32.mrf.mxu2 }
 0x971   :  { %v5292_v50 = vpop.f32.mrf.mxu1  ;;  %v5823_v2 = vadd.f32 %v5643_v13, %v5469_v20  ;;  %v5197_v20 = vld [vmem:[#allocation2 + $0x1a8] sm:$0xff] }
 0x972   :  { %6044 = vmatmul.f32.gmra.mxu3 %v5903_v5  ;;  %v5470_v62 = vadd.f32 %v5292_v50, %v5116_v6 }
 0x973   :  { %v10324_v17 = vpop.f32.mrf.mxu0 }
 0x974   :  { %5339 = vmatmul.f32.gmra.mxu1 %v5196_v25 }
 0x975   :  { %v5997_v26 = vpop.f32.mrf.mxu3  ;;  %5693 = vmatmul.f32.gmra.mxu2 %v5550_v51 }
 0x976   :  { %v10326_v38 = vadd.f32 %v5997_v26, %v5823_v2  ;;  %6392 = vmatmul.f32.gmra.mxu0 %v5195_v39  ;;  %v5551_v39 = vld [vmem:[#allocation2 + $0x1a9] sm:$0xff]  ;;  %v5117_v2 = vadd.f32 %v10058_v46, %v10048_v28  ;;  %v5118_v28 = vadd.f32 %v10064_v54, %v10054_v14  ;;  %v5119_v14 = vadd.f32 %v10070_v3, %v10060_v52 }
 0x977   :  { %v5906_v46 = vld [vmem:[#allocation2 + $0x1cf] sm:$0xff]  ;;  %v5907_v54 = vld [vmem:[#allocation2 + $0x1e7] sm:$0xff] }
 0x978   :  { %v5646_v37 = vpop.f32.mrf.mxu2  ;;  %v5908_v52 = vld [vmem:[#allocation2 + $0x1ef] sm:$0xff] }
 0x979   :  { %v5295_v49 = vpop.f32.mrf.mxu1  ;;  %v5824_v11 = vadd.f32 %v5646_v37, %v5470_v62  ;;  %v5198_v62 = vld [vmem:[#allocation2 + $0x1b0] sm:$0xff] }
 0x97a   :  { %6047 = vmatmul.f32.gmra.mxu3 %v5904_v7  ;;  %v5471_v56 = vadd.f32 %v5295_v49, %v5117_v2 }
 0x97b   :  { %v10330_v57 = vpop.f32.mrf.mxu0 }
 0x97c   :  { %5342 = vmatmul.f32.gmra.mxu1 %v5197_v20 }
 0x97d   :  { %v6000_v5 = vpop.f32.mrf.mxu3  ;;  %5696 = vmatmul.f32.gmra.mxu2 %v5551_v39 }
 0x97e   :  { %v10332_v13 = vadd.f32 %v6000_v5, %v5824_v11  ;;  %6395 = vmatmul.f32.gmra.mxu0 %v5196_v25  ;;  %v5552_v25 = vld [vmem:[#allocation2 + $0x1b1] sm:$0xff]  ;;  %v6662_v11 = vld [vmem:[#allocation8 + $0x440] sm:$0xff] }
 0x97f   :  { %6677 = vmatpush.msra.mxu1 %v6662_v11 }
 0x980   :  { %v5649_v50 = vpop.f32.mrf.mxu2 }
 0x981   :  { %v5298_v26 = vpop.f32.mrf.mxu1  ;;  %v5825_v6 = vadd.f32 %v5649_v50, %v5471_v56  ;;  %v5199_v50 = vld [vmem:[#allocation2 + $0x1c8] sm:$0xff] }
 0x982   :  { %6050 = vmatmul.f32.gmra.mxu3 %v5905_v43  ;;  %v5472_v49 = vadd.f32 %v5298_v26, %v5118_v28 }
 0x983   :  { %v10336_v51 = vpop.f32.mrf.mxu0 }
 0x984   :  { %5345 = vmatmul.f32.gmra.mxu1 %v5198_v62 }
 0x985   :  { %v6003_v7 = vpop.f32.mrf.mxu3  ;;  %5699 = vmatmul.f32.gmra.mxu2 %v5552_v25 }
 0x986   :  { %v10338_v37 = vadd.f32 %v6003_v7, %v5825_v6  ;;  %6398 = vmatmul.f32.gmra.mxu0 %v5197_v20  ;;  %v5553_v20 = vld [vmem:[#allocation2 + $0x1c9] sm:$0xff] }
 0x988   :  { %v5652_v5 = vpop.f32.mrf.mxu2 }
 0x989   :  { %v5301_v39 = vpop.f32.mrf.mxu1  ;;  %v5826_v43 = vadd.f32 %v5652_v5, %v5472_v49  ;;  %v5200_v49 = vld [vmem:[#allocation2 + $0x1d0] sm:$0xff] }
 0x98a   :  { %6053 = vmatmul.f32.gmra.mxu3 %v5906_v46  ;;  %v5473_v7 = vadd.f32 %v5301_v39, %v5119_v14 }
 0x98b   :  { %v10342_v2 = vpop.f32.mrf.mxu0 }
 0x98c   :  { %5348 = vmatmul.f32.gmra.mxu1 %v5199_v50 }
 0x98d   :  { %v6006_v56 = vpop.f32.mrf.mxu3  ;;  %5702 = vmatmul.f32.gmra.mxu2 %v5553_v20 }
 0x98e   :  { %v10344_v6 = vadd.f32 %v6006_v56, %v5826_v43  ;;  %6401 = vmatmul.f32.gmra.mxu0 %v5198_v62  ;;  %v5554_v62 = vld [vmem:[#allocation2 + $0x1d1] sm:$0xff]  ;;  %v5120_v43 = vadd.f32 %v10076_v33, %v10066_v10  ;;  %v5909_v10 = vld [vmem:[#allocation2 + $0x207] sm:$0xff] }
 0x990   :  { %v5655_v26 = vpop.f32.mrf.mxu2 }
 0x991   :  { %v5304_v25 = vpop.f32.mrf.mxu1  ;;  %v5827_v28 = vadd.f32 %v5655_v26, %v5473_v7  ;;  %v5201_v7 = vld [vmem:[#allocation2 + $0x1e8] sm:$0xff] }
 0x992   :  { %6056 = vmatmul.f32.gmra.mxu3 %v5907_v54  ;;  %v5474_v3 = vadd.f32 %v5304_v25, %v5120_v43 }
 0x993   :  { %v10348_v11 = vpop.f32.mrf.mxu0 }
 0x994   :  { %5351 = vmatmul.f32.gmra.mxu1 %v5200_v49 }
 0x995   :  { %v6009_v46 = vpop.f32.mrf.mxu3  ;;  %5705 = vmatmul.f32.gmra.mxu2 %v5554_v62 }
 0x996   :  { %v10350_v5 = vadd.f32 %v6009_v46, %v5827_v28  ;;  %6404 = vmatmul.f32.gmra.mxu0 %v5199_v50  ;;  %v5555_v50 = vld [vmem:[#allocation2 + $0x1e9] sm:$0xff]  ;;  %v5121_v28 = vadd.f32 %v10082_v36, %v10072_v35  ;;  %v5122_v35 = vadd.f32 %v10088_v1, %v10078_v47  ;;  %v5123_v47 = vadd.f32 %v10093_v19, %v10084_v58 }
 0x997   :  { %v5910_v36 = vld [vmem:[#allocation2 + $0x20f] sm:$0xff] }
 0x998   :  { %v5658_v39 = vpop.f32.mrf.mxu2 }
 0x999   :  { %v5307_v56 = vpop.f32.mrf.mxu1  ;;  %v5828_v14 = vadd.f32 %v5658_v39, %v5474_v3  ;;  %v5202_v3 = vld [vmem:[#allocation2 + $0x1f0] sm:$0xff] }
 0x99a   :  { %6059 = vmatmul.f32.gmra.mxu3 %v5908_v52  ;;  %v5475_v33 = vadd.f32 %v5307_v56, %v5121_v28 }
 0x99b   :  { %v10354_v20 = vpop.f32.mrf.mxu0 }
 0x99c   :  { %5354 = vmatmul.f32.gmra.mxu1 %v5201_v7 }
 0x99d   :  { %v6012_v54 = vpop.f32.mrf.mxu3  ;;  %5708 = vmatmul.f32.gmra.mxu2 %v5555_v50 }
 0x99e   :  { %v10356_v26 = vadd.f32 %v6012_v54, %v5828_v14  ;;  %6407 = vmatmul.f32.gmra.mxu0 %v5200_v49  ;;  %v5556_v49 = vld [vmem:[#allocation2 + $0x1f1] sm:$0xff] }
 0x99f   :  { %v6661_v14 = vld [vmem:[#allocation8 + $0x438] sm:$0xff] }
 0x9a0   :  { %v5661_v25 = vpop.f32.mrf.mxu2  ;;  %6678 = vmatpush.msra.mxu1 %v6661_v14 }
 0x9a1   :  { %v5310_v46 = vpop.f32.mrf.mxu1  ;;  %v5829_v43 = vadd.f32 %v5661_v25, %v5475_v33  ;;  %v5203_v25 = vld [vmem:[#allocation2 + $0x208] sm:$0xff] }
 0x9a2   :  { %6062 = vmatmul.f32.gmra.mxu3 %v5909_v10  ;;  %v5476_v56 = vadd.f32 %v5310_v46, %v5122_v35 }
 0x9a3   :  { %v10360_v62 = vpop.f32.mrf.mxu0 }
 0x9a4   :  { %5357 = vmatmul.f32.gmra.mxu1 %v5202_v3 }
 0x9a5   :  { %v6015_v52 = vpop.f32.mrf.mxu3  ;;  %5711 = vmatmul.f32.gmra.mxu2 %v5556_v49 }
 0x9a6   :  { %v10362_v39 = vadd.f32 %v6015_v52, %v5829_v43  ;;  %6410 = vmatmul.f32.gmra.mxu0 %v5201_v7  ;;  %v5557_v7 = vld [vmem:[#allocation2 + $0x209] sm:$0xff] }
 0x9a7   :  { %v5911_v52 = vld [vmem:[#allocation2 + $0x227] sm:$0xff] }
 0x9a8   :  { %v5664_v54 = vpop.f32.mrf.mxu2 }
 0x9a9   :  { %v5313_v50 = vpop.f32.mrf.mxu1  ;;  %v5830_v10 = vadd.f32 %v5664_v54, %v5476_v56  ;;  %v5204_v56 = vld [vmem:[#allocation2 + $0x210] sm:$0xff] }
 0x9aa   :  { %6065 = vmatmul.f32.gmra.mxu3 %v5910_v36  ;;  %v5477_v1 = vadd.f32 %v5313_v50, %v5123_v47 }
 0x9ab   :  { %v10366_v28 = vpop.f32.mrf.mxu0 }
 0x9ac   :  { %5360 = vmatmul.f32.gmra.mxu1 %v5203_v25 }
 0x9ad   :  { %v6018_v33 = vpop.f32.mrf.mxu3  ;;  %5714 = vmatmul.f32.gmra.mxu2 %v5557_v7 }
 0x9ae   :  { %v10368_v43 = vadd.f32 %v6018_v33, %v5830_v10  ;;  %6413 = vmatmul.f32.gmra.mxu0 %v5202_v3  ;;  %v5558_v3 = vld [vmem:[#allocation2 + $0x211] sm:$0xff]  ;;  %v5124_v33 = vadd.f32 %v10098_v8, %v10090_v53  ;;  %v5913_v53 = vld [vmem:[#allocation2 + $0x287] sm:$0xff] }
 0x9af   :  { %v5912_v10 = vld [vmem:[#allocation2 + $0x22f] sm:$0xff] }
 0x9b0   :  { %v5667_v46 = vpop.f32.mrf.mxu2 }
 0x9b1   :  { %v5316_v49 = vpop.f32.mrf.mxu1  ;;  %v5831_v35 = vadd.f32 %v5667_v46, %v5477_v1  ;;  %v5205_v1 = vld [vmem:[#allocation2 + $0x268] sm:$0xff] }
 0x9b2   :  { %6068 = vmatmul.f32.gmra.mxu3 %v5911_v52  ;;  %v5478_v58 = vadd.f32 %v5316_v49, %v5124_v33 }
 0x9b3   :  { %v10372_v14 = vpop.f32.mrf.mxu0 }
 0x9b4   :  { %5363 = vmatmul.f32.gmra.mxu1 %v5204_v56 }
 0x9b5   :  { %v6021_v36 = vpop.f32.mrf.mxu3  ;;  %5717 = vmatmul.f32.gmra.mxu2 %v5558_v3 }
 0x9b6   :  { %v10374_v54 = vadd.f32 %v6021_v36, %v5831_v35  ;;  %6416 = vmatmul.f32.gmra.mxu0 %v5203_v25  ;;  %v5559_v25 = vld [vmem:[#allocation2 + $0x269] sm:$0xff]  ;;  %v5125_v35 = vadd.f32 %v10102_v42, %v10095_v9  ;;  %v5126_v42 = vadd.f32 %v10106_v24, %v10100_v44  ;;  %v5127_v44 = vadd.f32 %v10110_v61, %v10104_v22 }
 0x9b7   :  { %v6660_v9 = vld [vmem:[#allocation8 + $0x430] sm:$0xff]  ;;  %v5915_v24 = vld [vmem:[#allocation2 + $0x2a7] sm:$0xff] }
 0x9b8   :  { %12445 = vst [vmem:[#allocation95_spill] sm:$0xff] %v10374_v54  ;;  %v5670_v19 = vpop.f32.mrf.mxu2  ;;  %6679 = vmatpush.msra.mxu1 %v6660_v9  ;;  %v5916_v22 = vld [vmem:[#allocation2 + $0x2af] sm:$0xff] }
 0x9b9   :  { %v5319_v50 = vpop.f32.mrf.mxu1  ;;  %v5832_v52 = vadd.f32 %v5670_v19, %v5478_v58  ;;  %v5206_v58 = vld [vmem:[#allocation2 + $0x270] sm:$0xff] }
 0x9ba   :  { %6071 = vmatmul.f32.gmra.mxu3 %v5912_v10  ;;  %v5479_v8 = vadd.f32 %v5319_v50, %v5125_v35  ;;  %v5914_v50 = vld [vmem:[#allocation2 + $0x28f] sm:$0xff] }
 0x9bb   :  { %v10378_v7 = vpop.f32.mrf.mxu0 }
 0x9bc   :  { %12446 = vst [vmem:[#allocation96_spill] sm:$0xff] %v10378_v7  ;;  %5366 = vmatmul.f32.gmra.mxu1 %v5205_v1 }
 0x9bd   :  { %v6024_v47 = vpop.f32.mrf.mxu3  ;;  %5720 = vmatmul.f32.gmra.mxu2 %v5559_v25 }
 0x9be   :  { %v10380_v46 = vadd.f32 %v6024_v47, %v5832_v52  ;;  %6419 = vmatmul.f32.gmra.mxu0 %v5204_v56  ;;  %v10388_v52 = vld [vmem:[#allocation2 + $0x248] sm:$0xff]  ;;  %v5560_v56 = vld [vmem:[#allocation2 + $0x271] sm:$0xff] }
 0x9c0   :  { %12447 = vst [vmem:[#allocation97_spill] sm:$0xff] %v10380_v46  ;;  %v5673_v49 = vpop.f32.mrf.mxu2 }
 0x9c1   :  { %v5322_v36 = vpop.f32.mrf.mxu1  ;;  %v5833_v10 = vadd.f32 %v5673_v49, %v5479_v8  ;;  %v5207_v49 = vld [vmem:[#allocation2 + $0x288] sm:$0xff] }
 0x9c2   :  { %6074 = vmatmul.f32.gmra.mxu3 %v5913_v53  ;;  %v5480_v47 = vadd.f32 %v5322_v36, %v5126_v42 }
 0x9c3   :  { %v10384_v3 = vpop.f32.mrf.mxu0 }
 0x9c4   :  { %12448 = vst [vmem:[#allocation98_spill] sm:$0xff] %v10384_v3  ;;  %5369 = vmatmul.f32.gmra.mxu1 %v5206_v58  ;;  %v6590_v3 = vld [vmem:[#allocation2 + $0x51] sm:$0xff] }
 0x9c5   :  { %v6027_v33 = vpop.f32.mrf.mxu3  ;;  %5723 = vmatmul.f32.gmra.mxu2 %v5560_v56 }
 0x9c6   :  { %v10386_v19 = vadd.f32 %v6027_v33, %v5833_v10  ;;  %6422 = vmatmul.f32.gmra.mxu0 %v10388_v52  ;;  %v5561_v33 = vld [vmem:[#allocation2 + $0x289] sm:$0xff] }
 0x9c8   :  { %12449 = vst [vmem:[#allocation99_spill] sm:$0xff] %v10386_v19  ;;  %v5676_v1 = vpop.f32.mrf.mxu2 }
 0x9c9   :  { %v5325_v25 = vpop.f32.mrf.mxu1  ;;  %v5834_v53 = vadd.f32 %v5676_v1, %v5480_v47  ;;  %v5208_v47 = vld [vmem:[#allocation2 + $0x290] sm:$0xff] }
 0x9ca   :  { %6077 = vmatmul.f32.gmra.mxu3 %v5914_v50  ;;  %v5481_v36 = vadd.f32 %v5325_v25, %v5127_v44 }
 0x9cb   :  { %v10393_v35 = vpop.f32.mrf.mxu0 }
 0x9cc   :  { %12450 = vst [vmem:[#allocation100_spill] sm:$0xff] %v10393_v35  ;;  %5372 = vmatmul.f32.gmra.mxu1 %v5207_v49 }
 0x9cd   :  { %v6030_v8 = vpop.f32.mrf.mxu3  ;;  %5726 = vmatmul.f32.gmra.mxu2 %v5561_v33 }
 0x9ce   :  { %v10395_v10 = vadd.f32 %v6030_v8, %v5834_v53  ;;  %6425 = vmatmul.f32.gmra.mxu0 %v10388_v52  ;;  %v5562_v53 = vld [vmem:[#allocation2 + $0x291] sm:$0xff]  ;;  %v5128_v8 = vadd.f32 %v10114_v30, %v10108_v34  ;;  %v5917_v34 = vld [vmem:[#allocation2 + $0x2c7] sm:$0xff] }
 0x9d0   :  { %12451 = vst [vmem:[#allocation101_spill] sm:$0xff] %v10395_v10  ;;  %v5679_v58 = vpop.f32.mrf.mxu2  ;;  %v12546_v10 = vld [vmem:[#allocation42_spill] sm:$0xff] }
 0x9d1   :  { %v5328_v56 = vpop.f32.mrf.mxu1  ;;  %v5835_v42 = vadd.f32 %v5679_v58, %v5481_v36  ;;  %v5209_v58 = vld [vmem:[#allocation2 + $0x2a8] sm:$0xff] }
 0x9d2   :  { %6080 = vmatmul.f32.gmra.mxu3 %v5915_v24  ;;  %v5482_v61 = vadd.f32 %v5328_v56, %v5128_v8 }
 0x9d3   :  { %v10400_v9 = vpop.f32.mrf.mxu0 }
 0x9d4   :  { %12452 = vst [vmem:[#allocation102_spill] sm:$0xff] %v10400_v9  ;;  %5375 = vmatmul.f32.gmra.mxu1 %v5208_v47  ;;  %v12549_v9 = vld [vmem:[#allocation34_spill] sm:$0xff] }
 0x9d5   :  { %v6033_v50 = vpop.f32.mrf.mxu3  ;;  %5729 = vmatmul.f32.gmra.mxu2 %v5562_v53 }
 0x9d6   :  { %v10402_v1 = vadd.f32 %v6033_v50, %v5835_v42  ;;  %6428 = vmatmul.f32.gmra.mxu0 %v5207_v49  ;;  %v5563_v49 = vld [vmem:[#allocation2 + $0x2a9] sm:$0xff]  ;;  %v5129_v42 = vadd.f32 %v10118_v32, %v10112_v12  ;;  %v5130_v12 = vadd.f32 %v10122_v21, %v10116_v55 }
 0x9d7   :  { %v5918_v32 = vld [vmem:[#allocation2 + $0x2cf] sm:$0xff]  ;;  %v5919_v21 = vld [vmem:[#allocation2 + $0x2e7] sm:$0xff] }
 0x9d8   :  { %12453 = vst [vmem:[#allocation103_spill] sm:$0xff] %v10402_v1  ;;  %v5682_v25 = vpop.f32.mrf.mxu2 }
 0x9d9   :  { %v5331_v33 = vpop.f32.mrf.mxu1  ;;  %v5836_v24 = vadd.f32 %v5682_v25, %v5482_v61  ;;  %v5210_v61 = vld [vmem:[#allocation2 + $0x2b0] sm:$0xff] }
 0x9da   :  { %6083 = vmatmul.f32.gmra.mxu3 %v5916_v22  ;;  %v5483_v30 = vadd.f32 %v5331_v33, %v5129_v42 }
 0x9db   :  { %v10406_v44 = vpop.f32.mrf.mxu0 }
 0x9dc   :  { %12454 = vst [vmem:[#allocation104_spill] sm:$0xff] %v10406_v44  ;;  %5378 = vmatmul.f32.gmra.mxu1 %v5209_v58  ;;  %v5944_v44 = vld [vmem:[#allocation2 + $0x46f] sm:$0xff] }
 0x9dd   :  { %v6036_v36 = vpop.f32.mrf.mxu3  ;;  %5732 = vmatmul.f32.gmra.mxu2 %v5563_v49 }
 0x9de   :  { %v10408_v45 = vadd.f32 %v6036_v36, %v5836_v24  ;;  %6431 = vmatmul.f32.gmra.mxu0 %v5208_v47  ;;  %v5564_v47 = vld [vmem:[#allocation2 + $0x2b1] sm:$0xff]  ;;  %v6659_v24 = vld [vmem:[#allocation8 + $0x428] sm:$0xff] }
 0x9df   :  { %6680 = vmatpush.msra.mxu1 %v6659_v24 }
 0x9e0   :  { %12455 = vst [vmem:[#allocation105_spill] sm:$0xff] %v10408_v45  ;;  %v5685_v56 = vpop.f32.mrf.mxu2 }
 0x9e1   :  { %v5334_v50 = vpop.f32.mrf.mxu1  ;;  %v5837_v8 = vadd.f32 %v5685_v56, %v5483_v30  ;;  %v5211_v56 = vld [vmem:[#allocation2 + $0x2c8] sm:$0xff] }
 0x9e2   :  { %6086 = vmatmul.f32.gmra.mxu3 %v5917_v34  ;;  %v5484_v33 = vadd.f32 %v5334_v50, %v5130_v12 }
 0x9e3   :  { %v10412_v53 = vpop.f32.mrf.mxu0 }
 0x9e4   :  { %12456 = vst [vmem:[#allocation106_spill] sm:$0xff] %v10412_v53  ;;  %5381 = vmatmul.f32.gmra.mxu1 %v5210_v61  ;;  %v5943_v53 = vld [vmem:[#allocation2 + $0x467] sm:$0xff] }
 0x9e5   :  { %v6039_v22 = vpop.f32.mrf.mxu3  ;;  %5735 = vmatmul.f32.gmra.mxu2 %v5564_v47 }
 0x9e6   :  { %v10414_v25 = vadd.f32 %v6039_v22, %v5837_v8  ;;  %6434 = vmatmul.f32.gmra.mxu0 %v5209_v58  ;;  %v5565_v58 = vld [vmem:[#allocation2 + $0x2c9] sm:$0xff]  ;;  %v12460_v22 = vld [vmem:[#allocation53_spill] sm:$0xff] }
 0x9e7   :  { %v5131_v55 = vadd.f32 %v12460_v22, %v10120_v23  ;;  %v5920_v23 = vld [vmem:[#allocation2 + $0x2ef] sm:$0xff] }
 0x9e8   :  { %12457 = vst [vmem:[#allocation107_spill] sm:$0xff] %v10414_v25  ;;  %v5688_v36 = vpop.f32.mrf.mxu2 }
 0x9e9   :  { %v5337_v49 = vpop.f32.mrf.mxu1  ;;  %v5838_v34 = vadd.f32 %v5688_v36, %v5484_v33  ;;  %v5212_v36 = vld [vmem:[#allocation2 + $0x2d0] sm:$0xff] }
 0x9ea   :  { %6089 = vmatmul.f32.gmra.mxu3 %v5918_v32  ;;  %v5485_v47 = vadd.f32 %v5337_v49, %v5131_v55 }
 0x9eb   :  { %v10418_v42 = vpop.f32.mrf.mxu0 }
 0x9ec   :  { %12458 = vst [vmem:[#allocation108_spill] sm:$0xff] %v10418_v42  ;;  %5384 = vmatmul.f32.gmra.mxu1 %v5211_v56  ;;  %v12542_v42 = vld [vmem:[#allocation39_spill] sm:$0xff] }
 0x9ed   :  { %v6042_v30 = vpop.f32.mrf.mxu3  ;;  %5738 = vmatmul.f32.gmra.mxu2 %v5565_v58 }
 0x9ee   :  { %v10420_v8 = vadd.f32 %v6042_v30, %v5838_v34  ;;  %6437 = vmatmul.f32.gmra.mxu0 %v5210_v61  ;;  %v5566_v61 = vld [vmem:[#allocation2 + $0x2d1] sm:$0xff] }
 0x9ef   :  { %v12463_v34 = vld [vmem:[#allocation88_spill] sm:$0xff]  ;;  %v12464_v30 = vld [vmem:[#allocation63_spill] sm:$0xff] }
 0x9f0   :  { %12459 = vst [vmem:[#allocation109_spill] sm:$0xff] %v10420_v8  ;;  %v5691_v50 = vpop.f32.mrf.mxu2  ;;  %v5132_v59 = vadd.f32 %v12464_v30, %v12463_v34 }
 0x9f1   :  { %v5340_v24 = vpop.f32.mrf.mxu1  ;;  %v5839_v32 = vadd.f32 %v5691_v50, %v5485_v47  ;;  %v5213_v50 = vld [vmem:[#allocation2 + $0x2e8] sm:$0xff] }
 0x9f2   :  { %6092 = vmatmul.f32.gmra.mxu3 %v5919_v21  ;;  %v5486_v58 = vadd.f32 %v5340_v24, %v5132_v59 }
 0x9f3   :  { %v10424_v12 = vpop.f32.mrf.mxu0 }
 0x9f4   :  { %12461 = vst [vmem:[#allocation53_spill] sm:$0xff] %v10424_v12  ;;  %5387 = vmatmul.f32.gmra.mxu1 %v5212_v36  ;;  %v12540_v12 = vld [vmem:[#allocation32_spill] sm:$0xff] }
 0x9f5   :  { %v6045_v33 = vpop.f32.mrf.mxu3  ;;  %5741 = vmatmul.f32.gmra.mxu2 %v5566_v61  ;;  %v5921_v61 = vld [vmem:[#allocation2 + $0x307] sm:$0xff] }
 0x9f6   :  { %v10426_v15 = vadd.f32 %v6045_v33, %v5839_v32  ;;  %6440 = vmatmul.f32.gmra.mxu0 %v5211_v56  ;;  %v5567_v56 = vld [vmem:[#allocation2 + $0x2e9] sm:$0xff]  ;;  %v12467_v32 = vld [vmem:[#allocation92_spill] sm:$0xff]  ;;  %v12468_v33 = vld [vmem:[#allocation65_spill] sm:$0xff] }
 0x9f8   :  { %12462 = vst [vmem:[#allocation110_spill] sm:$0xff] %v10426_v15  ;;  %v5694_v49 = vpop.f32.mrf.mxu2  ;;  %v5133_v15 = vadd.f32 %v12468_v33, %v12467_v32 }
 0x9f9   :  { %v5343_v22 = vpop.f32.mrf.mxu1  ;;  %v5840_v21 = vadd.f32 %v5694_v49, %v5486_v58  ;;  %v5214_v49 = vld [vmem:[#allocation2 + $0x2f0] sm:$0xff] }
 0x9fa   :  { %6095 = vmatmul.f32.gmra.mxu3 %v5920_v23  ;;  %v5487_v34 = vadd.f32 %v5343_v22, %v5133_v15  ;;  %v5922_v15 = vld [vmem:[#allocation2 + $0x30f] sm:$0xff] }
 0x9fb   :  { %v10430_v55 = vpop.f32.mrf.mxu0 }
 0x9fc   :  { %12465 = vst [vmem:[#allocation88_spill] sm:$0xff] %v10430_v55  ;;  %5390 = vmatmul.f32.gmra.mxu1 %v5213_v50 }
 0x9fd   :  { %v6048_v47 = vpop.f32.mrf.mxu3  ;;  %5744 = vmatmul.f32.gmra.mxu2 %v5567_v56 }
 0x9fe   :  { %v10432_v4 = vadd.f32 %v6048_v47, %v5840_v21  ;;  %6443 = vmatmul.f32.gmra.mxu0 %v5212_v36  ;;  %v5568_v36 = vld [vmem:[#allocation2 + $0x2f1] sm:$0xff]  ;;  %v6658_v21 = vld [vmem:[#allocation8 + $0x420] sm:$0xff] }
 0x9ff   :  { %v12471_v47 = vld [vmem:[#allocation56_spill] sm:$0xff]  ;;  %6681 = vmatpush.msra.mxu1 %v6658_v21 }
 0xa00   :  { %12466 = vst [vmem:[#allocation63_spill] sm:$0xff] %v10432_v4  ;;  %v5697_v59 = vpop.f32.mrf.mxu2  ;;  %v12472_v4 = vld [vmem:[#allocation62_spill] sm:$0xff] }
 0xa01   :  { %v5346_v24 = vpop.f32.mrf.mxu1  ;;  %v5841_v23 = vadd.f32 %v5697_v59, %v5487_v34  ;;  %v5134_v32 = vadd.f32 %v12472_v4, %v12471_v47 }
 0xa02   :  { %6098 = vmatmul.f32.gmra.mxu3 %v5921_v61 }
 0xa03   :  { %v10436_v30 = vpop.f32.mrf.mxu0  ;;  %v5488_v22 = vadd.f32 %v5346_v24, %v5134_v32 }
 0xa04   :  { %12469 = vst [vmem:[#allocation92_spill] sm:$0xff] %v10436_v30  ;;  %5393 = vmatmul.f32.gmra.mxu1 %v5214_v49  ;;  %v12476_v30 = vld [vmem:[#allocation15_spill] sm:$0xff] }
 0xa05   :  { %v6051_v58 = vpop.f32.mrf.mxu3  ;;  %5747 = vmatmul.f32.gmra.mxu2 %v5568_v36  ;;  %v5923_v36 = vld [vmem:[#allocation2 + $0x327] sm:$0xff] }
 0xa06   :  { %v10438_v55 = vadd.f32 %v6051_v58, %v5841_v23  ;;  %6446 = vmatmul.f32.gmra.mxu0 %v5213_v50  ;;  %v5215_v23 = vld [vmem:[#allocation2 + $0x308] sm:$0xff] }
 0xa07   :  { %v5569_v50 = vld [vmem:[#allocation2 + $0x309] sm:$0xff] }
 0xa08   :  { %12470 = vst [vmem:[#allocation65_spill] sm:$0xff] %v10438_v55  ;;  %v5700_v56 = vpop.f32.mrf.mxu2  ;;  %v12475_v55 = vld [vmem:[#allocation59_spill] sm:$0xff] }
 0xa09   :  { %v5349_v33 = vpop.f32.mrf.mxu1  ;;  %v5842_v34 = vadd.f32 %v5700_v56, %v5488_v22  ;;  %v5135_v4 = vadd.f32 %v12476_v30, %v12475_v55  ;;  %v5216_v56 = vld [vmem:[#allocation2 + $0x310] sm:$0xff] }
 0xa0a   :  { %6101 = vmatmul.f32.gmra.mxu3 %v5922_v15  ;;  %v5924_v55 = vld [vmem:[#allocation2 + $0x32f] sm:$0xff] }
 0xa0b   :  { %v10442_v61 = vpop.f32.mrf.mxu0  ;;  %v5489_v21 = vadd.f32 %v5349_v33, %v5135_v4 }
 0xa0c   :  { %12473 = vst [vmem:[#allocation56_spill] sm:$0xff] %v10442_v61  ;;  %5396 = vmatmul.f32.gmra.mxu1 %v5215_v23 }
 0xa0d   :  { %v6054_v59 = vpop.f32.mrf.mxu3  ;;  %5750 = vmatmul.f32.gmra.mxu2 %v5569_v50 }
 0xa0e   :  { %v10444_v58 = vadd.f32 %v6054_v59, %v5842_v34  ;;  %6449 = vmatmul.f32.gmra.mxu0 %v5214_v49  ;;  %v5570_v49 = vld [vmem:[#allocation2 + $0x311] sm:$0xff]  ;;  %v12479_v34 = vld [vmem:[#allocation13_spill] sm:$0xff] }
 0xa0f   :  { %v12480_v59 = vld [vmem:[#allocation16_spill] sm:$0xff] }
 0xa10   :  { %12474 = vst [vmem:[#allocation62_spill] sm:$0xff] %v10444_v58  ;;  %v5703_v24 = vpop.f32.mrf.mxu2  ;;  %v5136_v58 = vadd.f32 %v12480_v59, %v12479_v34 }
 0xa11   :  { %v5352_v47 = vpop.f32.mrf.mxu1  ;;  %v5843_v15 = vadd.f32 %v5703_v24, %v5489_v21  ;;  %v5217_v24 = vld [vmem:[#allocation2 + $0x328] sm:$0xff] }
 0xa12   :  { %6104 = vmatmul.f32.gmra.mxu3 %v5923_v36  ;;  %v5490_v30 = vadd.f32 %v5352_v47, %v5136_v58 }
 0xa13   :  { %v10448_v32 = vpop.f32.mrf.mxu0 }
 0xa14   :  { %12477 = vst [vmem:[#allocation59_spill] sm:$0xff] %v10448_v32  ;;  %5399 = vmatmul.f32.gmra.mxu1 %v5216_v56 }
 0xa15   :  { %v6057_v22 = vpop.f32.mrf.mxu3  ;;  %5753 = vmatmul.f32.gmra.mxu2 %v5570_v49  ;;  %v5925_v49 = vld [vmem:[#allocation2 + $0x347] sm:$0xff] }
 0xa16   :  { %v10450_v61 = vadd.f32 %v6057_v22, %v5843_v15  ;;  %6452 = vmatmul.f32.gmra.mxu0 %v5215_v23  ;;  %v5571_v23 = vld [vmem:[#allocation2 + $0x329] sm:$0xff] }
 0xa17   :  { %v12483_v15 = vld [vmem:[#allocation14_spill] sm:$0xff] }
 0xa18   :  { %12478 = vst [vmem:[#allocation15_spill] sm:$0xff] %v10450_v61  ;;  %v5706_v33 = vpop.f32.mrf.mxu2  ;;  %v12484_v22 = vld [vmem:[#allocation18_spill] sm:$0xff] }
 0xa19   :  { %v5355_v50 = vpop.f32.mrf.mxu1  ;;  %v5844_v36 = vadd.f32 %v5706_v33, %v5490_v30  ;;  %v5137_v61 = vadd.f32 %v12484_v22, %v12483_v15  ;;  %v5218_v33 = vld [vmem:[#allocation2 + $0x330] sm:$0xff] }
 0xa1a   :  { %6107 = vmatmul.f32.gmra.mxu3 %v5924_v55 }
 0xa1b   :  { %v10454_v4 = vpop.f32.mrf.mxu0  ;;  %v5491_v34 = vadd.f32 %v5355_v50, %v5137_v61  ;;  %v5926_v61 = vld [vmem:[#allocation2 + $0x34f] sm:$0xff] }
 0xa1c   :  { %12481 = vst [vmem:[#allocation13_spill] sm:$0xff] %v10454_v4  ;;  %5402 = vmatmul.f32.gmra.mxu1 %v5217_v24 }
 0xa1d   :  { %v6060_v21 = vpop.f32.mrf.mxu3  ;;  %5756 = vmatmul.f32.gmra.mxu2 %v5571_v23 }
 0xa1e   :  { %v10456_v32 = vadd.f32 %v6060_v21, %v5844_v36  ;;  %6455 = vmatmul.f32.gmra.mxu0 %v5216_v56  ;;  %v5572_v56 = vld [vmem:[#allocation2 + $0x331] sm:$0xff]  ;;  %v12487_v21 = vld [vmem:[#allocation17_spill] sm:$0xff] }
 0xa1f   :  { %v6657_v36 = vld [vmem:[#allocation8 + $0x418] sm:$0xff] }
 0xa20   :  { %12482 = vst [vmem:[#allocation16_spill] sm:$0xff] %v10456_v32  ;;  %v5709_v58 = vpop.f32.mrf.mxu2  ;;  %v12488_v32 = vld [vmem:[#allocation20_spill] sm:$0xff]  ;;  %6682 = vmatpush.msra.mxu1 %v6657_v36 }
 0xa21   :  { %v5358_v47 = vpop.f32.mrf.mxu1  ;;  %v5845_v55 = vadd.f32 %v5709_v58, %v5491_v34  ;;  %v5138_v15 = vadd.f32 %v12488_v32, %v12487_v21 }
 0xa22   :  { %6110 = vmatmul.f32.gmra.mxu3 %v5925_v49 }
 0xa23   :  { %v10460_v59 = vpop.f32.mrf.mxu0  ;;  %v5492_v50 = vadd.f32 %v5358_v47, %v5138_v15 }
 0xa24   :  { %12485 = vst [vmem:[#allocation14_spill] sm:$0xff] %v10460_v59  ;;  %5405 = vmatmul.f32.gmra.mxu1 %v5218_v33  ;;  %v12492_v59 = vld [vmem:[#allocation22_spill] sm:$0xff] }
 0xa25   :  { %v6063_v30 = vpop.f32.mrf.mxu3  ;;  %5759 = vmatmul.f32.gmra.mxu2 %v5572_v56  ;;  %v5927_v56 = vld [vmem:[#allocation2 + $0x367] sm:$0xff] }
 0xa26   :  { %v10462_v4 = vadd.f32 %v6063_v30, %v5845_v55  ;;  %6458 = vmatmul.f32.gmra.mxu0 %v5217_v24  ;;  %v5219_v55 = vld [vmem:[#allocation2 + $0x348] sm:$0xff] }
 0xa27   :  { %v5573_v24 = vld [vmem:[#allocation2 + $0x349] sm:$0xff] }
 0xa28   :  { %12486 = vst [vmem:[#allocation18_spill] sm:$0xff] %v10462_v4  ;;  %v5712_v23 = vpop.f32.mrf.mxu2  ;;  %v12491_v4 = vld [vmem:[#allocation19_spill] sm:$0xff] }
 0xa29   :  { %v5361_v22 = vpop.f32.mrf.mxu1  ;;  %v5846_v34 = vadd.f32 %v5712_v23, %v5492_v50  ;;  %v5139_v32 = vadd.f32 %v12492_v59, %v12491_v4  ;;  %v5220_v23 = vld [vmem:[#allocation2 + $0x350] sm:$0xff] }
 0xa2a   :  { %6113 = vmatmul.f32.gmra.mxu3 %v5926_v61  ;;  %v5928_v4 = vld [vmem:[#allocation2 + $0x36f] sm:$0xff] }
 0xa2b   :  { %v10466_v49 = vpop.f32.mrf.mxu0  ;;  %v5493_v36 = vadd.f32 %v5361_v22, %v5139_v32 }
 0xa2c   :  { %12489 = vst [vmem:[#allocation17_spill] sm:$0xff] %v10466_v49  ;;  %5408 = vmatmul.f32.gmra.mxu1 %v5219_v55 }
 0xa2d   :  { %v6066_v58 = vpop.f32.mrf.mxu3  ;;  %5762 = vmatmul.f32.gmra.mxu2 %v5573_v24 }
 0xa2e   :  { %v10468_v30 = vadd.f32 %v6066_v58, %v5846_v34  ;;  %6461 = vmatmul.f32.gmra.mxu0 %v5218_v33  ;;  %v5574_v33 = vld [vmem:[#allocation2 + $0x351] sm:$0xff]  ;;  %v12495_v34 = vld [vmem:[#allocation21_spill] sm:$0xff] }
 0xa2f   :  { %v12496_v58 = vld [vmem:[#allocation24_spill] sm:$0xff] }
 0xa30   :  { %12490 = vst [vmem:[#allocation20_spill] sm:$0xff] %v10468_v30  ;;  %v5715_v47 = vpop.f32.mrf.mxu2  ;;  %v5140_v30 = vadd.f32 %v12496_v58, %v12495_v34 }
 0xa31   :  { %v5364_v21 = vpop.f32.mrf.mxu1  ;;  %v5847_v61 = vadd.f32 %v5715_v47, %v5493_v36  ;;  %v5221_v47 = vld [vmem:[#allocation2 + $0x368] sm:$0xff] }
 0xa32   :  { %6116 = vmatmul.f32.gmra.mxu3 %v5927_v56  ;;  %v5494_v59 = vadd.f32 %v5364_v21, %v5140_v30 }
 0xa33   :  { %v10472_v15 = vpop.f32.mrf.mxu0 }
 0xa34   :  { %12493 = vst [vmem:[#allocation19_spill] sm:$0xff] %v10472_v15  ;;  %5411 = vmatmul.f32.gmra.mxu1 %v5220_v23 }
 0xa35   :  { %v6069_v50 = vpop.f32.mrf.mxu3  ;;  %5765 = vmatmul.f32.gmra.mxu2 %v5574_v33  ;;  %v5929_v33 = vld [vmem:[#allocation2 + $0x387] sm:$0xff] }
 0xa36   :  { %v10474_v49 = vadd.f32 %v6069_v50, %v5847_v61  ;;  %6464 = vmatmul.f32.gmra.mxu0 %v5219_v55  ;;  %v5575_v55 = vld [vmem:[#allocation2 + $0x369] sm:$0xff] }
 0xa37   :  { %v12499_v61 = vld [vmem:[#allocation23_spill] sm:$0xff]  ;;  %v12500_v50 = vld [vmem:[#allocation26_spill] sm:$0xff] }
 0xa38   :  { %12494 = vst [vmem:[#allocation22_spill] sm:$0xff] %v10474_v49  ;;  %v5718_v22 = vpop.f32.mrf.mxu2  ;;  %v5141_v49 = vadd.f32 %v12500_v50, %v12499_v61 }
 0xa39   :  { %v5367_v24 = vpop.f32.mrf.mxu1  ;;  %v5848_v56 = vadd.f32 %v5718_v22, %v5494_v59  ;;  %v5222_v22 = vld [vmem:[#allocation2 + $0x370] sm:$0xff] }
 0xa3a   :  { %6119 = vmatmul.f32.gmra.mxu3 %v5928_v4  ;;  %v5495_v34 = vadd.f32 %v5367_v24, %v5141_v49  ;;  %v5930_v49 = vld [vmem:[#allocation2 + $0x38f] sm:$0xff] }
 0xa3b   :  { %v10478_v32 = vpop.f32.mrf.mxu0 }
 0xa3c   :  { %12497 = vst [vmem:[#allocation21_spill] sm:$0xff] %v10478_v32  ;;  %5414 = vmatmul.f32.gmra.mxu1 %v5221_v47 }
 0xa3d   :  { %v6072_v36 = vpop.f32.mrf.mxu3  ;;  %5768 = vmatmul.f32.gmra.mxu2 %v5575_v55 }
 0xa3e   :  { %v10480_v15 = vadd.f32 %v6072_v36, %v5848_v56  ;;  %6467 = vmatmul.f32.gmra.mxu0 %v5220_v23  ;;  %v5576_v23 = vld [vmem:[#allocation2 + $0x371] sm:$0xff]  ;;  %v12503_v36 = vld [vmem:[#allocation25_spill] sm:$0xff] }
 0xa3f   :  { %v6656_v56 = vld [vmem:[#allocation8 + $0x410] sm:$0xff] }
 0xa40   :  { %12498 = vst [vmem:[#allocation24_spill] sm:$0xff] %v10480_v15  ;;  %v5721_v30 = vpop.f32.mrf.mxu2  ;;  %v12504_v15 = vld [vmem:[#allocation28_spill] sm:$0xff]  ;;  %6683 = vmatpush.msra.mxu1 %v6656_v56 }
 0xa41   :  { %v5370_v21 = vpop.f32.mrf.mxu1  ;;  %v5849_v4 = vadd.f32 %v5721_v30, %v5495_v34  ;;  %v5142_v61 = vadd.f32 %v12504_v15, %v12503_v36 }
 0xa42   :  { %6122 = vmatmul.f32.gmra.mxu3 %v5929_v33 }
 0xa43   :  { %v10484_v58 = vpop.f32.mrf.mxu0  ;;  %v5496_v24 = vadd.f32 %v5370_v21, %v5142_v61 }
 0xa44   :  { %12501 = vst [vmem:[#allocation23_spill] sm:$0xff] %v10484_v58  ;;  %5417 = vmatmul.f32.gmra.mxu1 %v5222_v22  ;;  %v12508_v58 = vld [vmem:[#allocation30_spill] sm:$0xff] }
 0xa45   :  { %v6075_v59 = vpop.f32.mrf.mxu3  ;;  %5771 = vmatmul.f32.gmra.mxu2 %v5576_v23  ;;  %v5931_v23 = vld [vmem:[#allocation2 + $0x3a7] sm:$0xff] }
 0xa46   :  { %v10486_v32 = vadd.f32 %v6075_v59, %v5849_v4  ;;  %6470 = vmatmul.f32.gmra.mxu0 %v5221_v47  ;;  %v5223_v4 = vld [vmem:[#allocation2 + $0x388] sm:$0xff] }
 0xa47   :  { %v5577_v47 = vld [vmem:[#allocation2 + $0x389] sm:$0xff] }
 0xa48   :  { %12502 = vst [vmem:[#allocation26_spill] sm:$0xff] %v10486_v32  ;;  %v5724_v55 = vpop.f32.mrf.mxu2  ;;  %v12507_v32 = vld [vmem:[#allocation27_spill] sm:$0xff] }
 0xa49   :  { %v5373_v50 = vpop.f32.mrf.mxu1  ;;  %v5850_v34 = vadd.f32 %v5724_v55, %v5496_v24  ;;  %v5143_v15 = vadd.f32 %v12508_v58, %v12507_v32  ;;  %v5224_v55 = vld [vmem:[#allocation2 + $0x390] sm:$0xff] }
 0xa4a   :  { %6125 = vmatmul.f32.gmra.mxu3 %v5930_v49  ;;  %v5932_v32 = vld [vmem:[#allocation2 + $0x3af] sm:$0xff] }
 0xa4b   :  { %v10490_v33 = vpop.f32.mrf.mxu0  ;;  %v5497_v56 = vadd.f32 %v5373_v50, %v5143_v15 }
 0xa4c   :  { %12505 = vst [vmem:[#allocation25_spill] sm:$0xff] %v10490_v33  ;;  %5420 = vmatmul.f32.gmra.mxu1 %v5223_v4 }
 0xa4d   :  { %v6078_v30 = vpop.f32.mrf.mxu3  ;;  %5774 = vmatmul.f32.gmra.mxu2 %v5577_v47 }
 0xa4e   :  { %v10492_v59 = vadd.f32 %v6078_v30, %v5850_v34  ;;  %6473 = vmatmul.f32.gmra.mxu0 %v5222_v22  ;;  %v5578_v22 = vld [vmem:[#allocation2 + $0x391] sm:$0xff]  ;;  %v12511_v34 = vld [vmem:[#allocation29_spill] sm:$0xff] }
 0xa4f   :  { %v12512_v30 = vld [vmem:[#allocation33_spill] sm:$0xff] }
 0xa50   :  { %12506 = vst [vmem:[#allocation28_spill] sm:$0xff] %v10492_v59  ;;  %v5727_v21 = vpop.f32.mrf.mxu2  ;;  %v5144_v59 = vadd.f32 %v12512_v30, %v12511_v34 }
 0xa51   :  { %v5376_v36 = vpop.f32.mrf.mxu1  ;;  %v5851_v49 = vadd.f32 %v5727_v21, %v5497_v56  ;;  %v5225_v21 = vld [vmem:[#allocation2 + $0x3a8] sm:$0xff] }
 0xa52   :  { %6128 = vmatmul.f32.gmra.mxu3 %v5931_v23  ;;  %v5498_v58 = vadd.f32 %v5376_v36, %v5144_v59 }
 0xa53   :  { %v10496_v61 = vpop.f32.mrf.mxu0 }
 0xa54   :  { %12509 = vst [vmem:[#allocation27_spill] sm:$0xff] %v10496_v61  ;;  %5423 = vmatmul.f32.gmra.mxu1 %v5224_v55 }
 0xa55   :  { %v6081_v24 = vpop.f32.mrf.mxu3  ;;  %5777 = vmatmul.f32.gmra.mxu2 %v5578_v22  ;;  %v5933_v22 = vld [vmem:[#allocation2 + $0x3c7] sm:$0xff] }
 0xa56   :  { %v10498_v33 = vadd.f32 %v6081_v24, %v5851_v49  ;;  %6476 = vmatmul.f32.gmra.mxu0 %v5223_v4  ;;  %v5579_v4 = vld [vmem:[#allocation2 + $0x3a9] sm:$0xff]  ;;  %v12516_v24 = vld [vmem:[#allocation37_spill] sm:$0xff] }
 0xa57   :  { %v12515_v49 = vld [vmem:[#allocation31_spill] sm:$0xff] }
 0xa58   :  { %12510 = vst [vmem:[#allocation30_spill] sm:$0xff] %v10498_v33  ;;  %v5730_v50 = vpop.f32.mrf.mxu2  ;;  %v5145_v33 = vadd.f32 %v12516_v24, %v12515_v49 }
 0xa59   :  { %v5379_v47 = vpop.f32.mrf.mxu1  ;;  %v5852_v23 = vadd.f32 %v5730_v50, %v5498_v58  ;;  %v5226_v50 = vld [vmem:[#allocation2 + $0x3b0] sm:$0xff] }
 0xa5a   :  { %6131 = vmatmul.f32.gmra.mxu3 %v5932_v32  ;;  %v5499_v34 = vadd.f32 %v5379_v47, %v5145_v33  ;;  %v5934_v33 = vld [vmem:[#allocation2 + $0x3cf] sm:$0xff] }
 0xa5b   :  { %v10502_v15 = vpop.f32.mrf.mxu0 }
 0xa5c   :  { %12513 = vst [vmem:[#allocation29_spill] sm:$0xff] %v10502_v15  ;;  %5426 = vmatmul.f32.gmra.mxu1 %v5225_v21 }
 0xa5d   :  { %v6084_v56 = vpop.f32.mrf.mxu3  ;;  %5780 = vmatmul.f32.gmra.mxu2 %v5579_v4 }
 0xa5e   :  { %v10504_v61 = vadd.f32 %v6084_v56, %v5852_v23  ;;  %6479 = vmatmul.f32.gmra.mxu0 %v5224_v55  ;;  %v5580_v55 = vld [vmem:[#allocation2 + $0x3b1] sm:$0xff]  ;;  %v6655_v23 = vld [vmem:[#allocation8 + $0x408] sm:$0xff] }
 0xa5f   :  { %v12519_v56 = vld [vmem:[#allocation35_spill] sm:$0xff]  ;;  %6684 = vmatpush.msra.mxu1 %v6655_v23 }
 0xa60   :  { %12514 = vst [vmem:[#allocation33_spill] sm:$0xff] %v10504_v61  ;;  %v5733_v59 = vpop.f32.mrf.mxu2  ;;  %v12520_v61 = vld [vmem:[#allocation43_spill] sm:$0xff] }
 0xa61   :  { %v5382_v36 = vpop.f32.mrf.mxu1  ;;  %v5853_v32 = vadd.f32 %v5733_v59, %v5499_v34  ;;  %v5146_v49 = vadd.f32 %v12520_v61, %v12519_v56 }
 0xa62   :  { %6134 = vmatmul.f32.gmra.mxu3 %v5933_v22 }
 0xa63   :  { %v10508_v30 = vpop.f32.mrf.mxu0  ;;  %v5500_v47 = vadd.f32 %v5382_v36, %v5146_v49 }
 0xa64   :  { %12517 = vst [vmem:[#allocation31_spill] sm:$0xff] %v10508_v30  ;;  %5429 = vmatmul.f32.gmra.mxu1 %v5226_v50  ;;  %v12524_v30 = vld [vmem:[#allocation49_spill] sm:$0xff] }
 0xa65   :  { %v6087_v58 = vpop.f32.mrf.mxu3  ;;  %5783 = vmatmul.f32.gmra.mxu2 %v5580_v55  ;;  %v5935_v55 = vld [vmem:[#allocation2 + $0x3e7] sm:$0xff] }
 0xa66   :  { %v10510_v15 = vadd.f32 %v6087_v58, %v5853_v32  ;;  %6482 = vmatmul.f32.gmra.mxu0 %v5225_v21  ;;  %v5227_v32 = vld [vmem:[#allocation2 + $0x3c8] sm:$0xff] }
 0xa67   :  { %v5581_v21 = vld [vmem:[#allocation2 + $0x3c9] sm:$0xff] }
 0xa68   :  { %12518 = vst [vmem:[#allocation37_spill] sm:$0xff] %v10510_v15  ;;  %v5736_v4 = vpop.f32.mrf.mxu2  ;;  %v12523_v15 = vld [vmem:[#allocation40_spill] sm:$0xff] }
 0xa69   :  { %v5385_v24 = vpop.f32.mrf.mxu1  ;;  %v5854_v34 = vadd.f32 %v5736_v4, %v5500_v47  ;;  %v5147_v61 = vadd.f32 %v12524_v30, %v12523_v15  ;;  %v5228_v4 = vld [vmem:[#allocation2 + $0x3d0] sm:$0xff] }
 0xa6a   :  { %6137 = vmatmul.f32.gmra.mxu3 %v5934_v33  ;;  %v5936_v15 = vld [vmem:[#allocation2 + $0x3ef] sm:$0xff] }
 0xa6b   :  { %v10514_v22 = vpop.f32.mrf.mxu0  ;;  %v5501_v23 = vadd.f32 %v5385_v24, %v5147_v61 }
 0xa6c   :  { %12521 = vst [vmem:[#allocation35_spill] sm:$0xff] %v10514_v22  ;;  %5432 = vmatmul.f32.gmra.mxu1 %v5227_v32 }
 0xa6d   :  { %v6090_v59 = vpop.f32.mrf.mxu3  ;;  %5786 = vmatmul.f32.gmra.mxu2 %v5581_v21 }
 0xa6e   :  { %v10516_v58 = vadd.f32 %v6090_v59, %v5854_v34  ;;  %6485 = vmatmul.f32.gmra.mxu0 %v5226_v50  ;;  %v5582_v50 = vld [vmem:[#allocation2 + $0x3d1] sm:$0xff]  ;;  %v12527_v34 = vld [vmem:[#allocation46_spill] sm:$0xff] }
 0xa6f   :  { %v12528_v59 = vld [vmem:[#allocation55_spill] sm:$0xff] }
 0xa70   :  { %12522 = vst [vmem:[#allocation43_spill] sm:$0xff] %v10516_v58  ;;  %v5739_v36 = vpop.f32.mrf.mxu2  ;;  %v5148_v58 = vadd.f32 %v12528_v59, %v12527_v34 }
 0xa71   :  { %v5388_v56 = vpop.f32.mrf.mxu1  ;;  %v5855_v33 = vadd.f32 %v5739_v36, %v5501_v23  ;;  %v5229_v36 = vld [vmem:[#allocation2 + $0x3e8] sm:$0xff] }
 0xa72   :  { %6140 = vmatmul.f32.gmra.mxu3 %v5935_v55  ;;  %v5502_v30 = vadd.f32 %v5388_v56, %v5148_v58 }
 0xa73   :  { %v10520_v49 = vpop.f32.mrf.mxu0 }
 0xa74   :  { %12525 = vst [vmem:[#allocation40_spill] sm:$0xff] %v10520_v49  ;;  %5435 = vmatmul.f32.gmra.mxu1 %v5228_v4 }
 0xa75   :  { %v6093_v47 = vpop.f32.mrf.mxu3  ;;  %5789 = vmatmul.f32.gmra.mxu2 %v5582_v50  ;;  %v5937_v50 = vld [vmem:[#allocation2 + $0x407] sm:$0xff] }
 0xa76   :  { %v10522_v22 = vadd.f32 %v6093_v47, %v5855_v33  ;;  %6488 = vmatmul.f32.gmra.mxu0 %v5227_v32  ;;  %v5583_v32 = vld [vmem:[#allocation2 + $0x3e9] sm:$0xff]  ;;  %v12531_v33 = vld [vmem:[#allocation52_spill] sm:$0xff]  ;;  %v12532_v47 = vld [vmem:[#allocation61_spill] sm:$0xff] }
 0xa78   :  { %12526 = vst [vmem:[#allocation49_spill] sm:$0xff] %v10522_v22  ;;  %v5742_v24 = vpop.f32.mrf.mxu2  ;;  %v5149_v22 = vadd.f32 %v12532_v47, %v12531_v33 }
 0xa79   :  { %v5391_v21 = vpop.f32.mrf.mxu1  ;;  %v5856_v55 = vadd.f32 %v5742_v24, %v5502_v30  ;;  %v5230_v24 = vld [vmem:[#allocation2 + $0x3f0] sm:$0xff] }
 0xa7a   :  { %6143 = vmatmul.f32.gmra.mxu3 %v5936_v15  ;;  %v5503_v34 = vadd.f32 %v5391_v21, %v5149_v22 }
 0xa7b   :  { %v10526_v61 = vpop.f32.mrf.mxu0 }
 0xa7c   :  { %12529 = vst [vmem:[#allocation46_spill] sm:$0xff] %v10526_v61  ;;  %5438 = vmatmul.f32.gmra.mxu1 %v5229_v36 }
 0xa7d   :  { %v6096_v23 = vpop.f32.mrf.mxu3  ;;  %5792 = vmatmul.f32.gmra.mxu2 %v5583_v32  ;;  %v5938_v32 = vld [vmem:[#allocation2 + $0x40f] sm:$0xff] }
 0xa7e   :  { %v10528_v49 = vadd.f32 %v6096_v23, %v5856_v55  ;;  %6491 = vmatmul.f32.gmra.mxu0 %v5228_v4  ;;  %v5584_v55 = vld [vmem:[#allocation2 + $0x3f1] sm:$0xff]  ;;  %v6654_v4 = vld [vmem:[#allocation8 + $0x400] sm:$0xff]  ;;  %v12534_v23 = vld [vmem:[#allocation58_spill] sm:$0xff] }
 0xa7f   :  { %6685 = vmatpush.msra.mxu1 %v6654_v4 }
 0xa80   :  { %12530 = vst [vmem:[#allocation55_spill] sm:$0xff] %v10528_v49  ;;  %v5745_v58 = vpop.f32.mrf.mxu2  ;;  %v12535_v49 = vld [vmem:[#allocation66_spill] sm:$0xff] }
 0xa81   :  { %v5394_v56 = vpop.f32.mrf.mxu1  ;;  %v5857_v15 = vadd.f32 %v5745_v58, %v5503_v34  ;;  %v5150_v8 = vadd.f32 %v12535_v49, %v12534_v23  ;;  %v5231_v58 = vld [vmem:[#allocation2 + $0x408] sm:$0xff] }
 0xa82   :  { %6146 = vmatmul.f32.gmra.mxu3 %v5937_v50 }
 0xa83   :  { %v10532_v59 = vpop.f32.mrf.mxu0  ;;  %v5504_v22 = vadd.f32 %v5394_v56, %v5150_v8 }
 0xa84   :  { %12533 = vst [vmem:[#allocation52_spill] sm:$0xff] %v10532_v59  ;;  %5441 = vmatmul.f32.gmra.mxu1 %v5230_v24  ;;  %v12538_v59 = vld [vmem:[#allocation68_spill] sm:$0xff] }
 0xa85   :  { %v6099_v30 = vpop.f32.mrf.mxu3  ;;  %5795 = vmatmul.f32.gmra.mxu2 %v5584_v55  ;;  %v5939_v55 = vld [vmem:[#allocation2 + $0x427] sm:$0xff] }
 0xa86   :  { %v6211_v61 = vadd.f32 %v6099_v30, %v5857_v15  ;;  %6494 = vmatmul.f32.gmra.mxu0 %v5229_v36  ;;  %v10538_v36 = vld [vmem:[#allocation2 + $0x409] sm:$0xff]  ;;  %v12537_v30 = vld [vmem:[#allocation64_spill] sm:$0xff] }
 0xa87   :  { %v5151_v49 = vadd.f32 %v12538_v59, %v12537_v30 }
 0xa88   :  { %v5748_v21 = vpop.f32.mrf.mxu2 }
 0xa89   :  { %v5397_v33 = vpop.f32.mrf.mxu1  ;;  %v5858_v50 = vadd.f32 %v5748_v21, %v5504_v22 }
 0xa8a   :  { %6149 = vmatmul.f32.gmra.mxu3 %v5938_v32  ;;  %v5505_v8 = vadd.f32 %v5397_v33, %v5151_v49  ;;  %v5940_v33 = vld [vmem:[#allocation2 + $0x42f] sm:$0xff] }
 0xa8b   :  { %v10536_v47 = vpop.f32.mrf.mxu0 }
 0xa8c   :  { %12536 = vst [vmem:[#allocation61_spill] sm:$0xff] %v10536_v47  ;;  %5444 = vmatmul.f32.gmra.mxu1 %v5231_v58  ;;  %v12539_v47 = vld [vmem:[#allocation67_spill] sm:$0xff] }
 0xa8d   :  { %v6102_v34 = vpop.f32.mrf.mxu3  ;;  %5798 = vmatmul.f32.gmra.mxu2 %v10538_v36  ;;  %v5152_v59 = vadd.f32 %v10210_v48, %v12539_v47  ;;  %v12541_v48 = vld [vmem:[#allocation69_spill] sm:$0xff] }
 0xa8e   :  { %v6212_v15 = vadd.f32 %v6102_v34, %v5858_v50  ;;  %6497 = vmatmul.f32.gmra.mxu0 %v5230_v24  ;;  %v5232_v50 = vld [vmem:[#allocation2 + $0x410] sm:$0xff]  ;;  %v5153_v47 = vadd.f32 %v12541_v48, %v12540_v12  ;;  %v12543_v12 = vld [vmem:[#allocation73_spill] sm:$0xff] }
 0xa8f   :  { %v10545_v24 = vld [vmem:[#allocation2 + $0x411] sm:$0xff]  ;;  %v5154_v48 = vadd.f32 %v12543_v12, %v12542_v42 }
 0xa90   :  { %v5751_v56 = vpop.f32.mrf.mxu2  ;;  %v12544_v42 = vld [vmem:[#allocation71_spill] sm:$0xff]  ;;  %v12545_v12 = vld [vmem:[#allocation36_spill] sm:$0xff] }
 0xa91   :  { %v5400_v4 = vpop.f32.mrf.mxu1  ;;  %v5859_v32 = vadd.f32 %v5751_v56, %v5505_v8  ;;  %v5155_v1 = vadd.f32 %v12545_v12, %v12544_v42  ;;  %v12547_v42 = vld [vmem:[#allocation38_spill] sm:$0xff] }
 0xa92   :  { %6152 = vmatmul.f32.gmra.mxu3 %v5939_v55  ;;  %v5506_v30 = vadd.f32 %v5400_v4, %v5152_v59  ;;  %v5941_v4 = vld [vmem:[#allocation2 + $0x447] sm:$0xff]  ;;  %v5156_v12 = vadd.f32 %v12547_v42, %v12546_v10 }
 0xa93   :  { %v6453_v23 = vpop.f32.mrf.mxu0 }
 0xa94   :  { %v10543_v22 = vadd.f32 %v6453_v23, %v6211_v61  ;;  %5447 = vmatmul.f32.gmra.mxu1 %v5232_v50 }
 0xa95   :  { %v6105_v21 = vpop.f32.mrf.mxu3  ;;  %5801 = vmatmul.f32.gmra.mxu2 %v10545_v24 }
 0xa96   :  { %v6213_v34 = vadd.f32 %v6105_v21, %v5859_v32  ;;  %6500 = vmatmul.f32.gmra.mxu0 %v5231_v58  ;;  %v5233_v32 = vld [vmem:[#allocation2 + $0x428] sm:$0xff] }
 0xa97   :  { %v10552_v58 = vld [vmem:[#allocation2 + $0x429] sm:$0xff] }
 0xa98   :  { %v5754_v49 = vpop.f32.mrf.mxu2 }
 0xa99   :  { %v5403_v55 = vpop.f32.mrf.mxu1  ;;  %v5860_v61 = vadd.f32 %v5754_v49, %v5506_v30 }
 0xa9a   :  { %6155 = vmatmul.f32.gmra.mxu3 %v5940_v33  ;;  %v5507_v59 = vadd.f32 %v5403_v55, %v5153_v47  ;;  %v5942_v55 = vld [vmem:[#allocation2 + $0x44f] sm:$0xff] }
 0xa9b   :  { %v6456_v8 = vpop.f32.mrf.mxu0 }
 0xa9c   :  { %v10550_v56 = vadd.f32 %v6456_v8, %v6212_v15  ;;  %5450 = vmatmul.f32.gmra.mxu1 %v5233_v32 }
 0xa9d   :  { %v6108_v23 = vpop.f32.mrf.mxu3  ;;  %5804 = vmatmul.f32.gmra.mxu2 %v10552_v58 }
 0xa9e   :  { %v6214_v21 = vadd.f32 %v6108_v23, %v5860_v61  ;;  %6503 = vmatmul.f32.gmra.mxu0 %v5232_v50  ;;  %v5234_v61 = vld [vmem:[#allocation2 + $0x430] sm:$0xff] }
 0xa9f   :  { %v10559_v50 = vld [vmem:[#allocation2 + $0x431] sm:$0xff] }
 0xaa0   :  { %v5757_v33 = vpop.f32.mrf.mxu2 }
 0xaa1   :  { %v5406_v25 = vpop.f32.mrf.mxu1  ;;  %v5861_v15 = vadd.f32 %v5757_v33, %v5507_v59 }
 0xaa2   :  { %6158 = vmatmul.f32.gmra.mxu3 %v5941_v4  ;;  %v5508_v47 = vadd.f32 %v5406_v25, %v5154_v48 }
 0xaa3   :  { %v6459_v30 = vpop.f32.mrf.mxu0 }
 0xaa4   :  { %v10557_v49 = vadd.f32 %v6459_v30, %v6213_v34  ;;  %5453 = vmatmul.f32.gmra.mxu1 %v5234_v61 }
 0xaa5   :  { %v6111_v8 = vpop.f32.mrf.mxu3  ;;  %5807 = vmatmul.f32.gmra.mxu2 %v10559_v50 }
 0xaa6   :  { %v6215_v23 = vadd.f32 %v6111_v8, %v5861_v15  ;;  %6506 = vmatmul.f32.gmra.mxu0 %v5233_v32  ;;  %v5235_v15 = vld [vmem:[#allocation2 + $0x448] sm:$0xff] }
 0xaa7   :  { %v10566_v32 = vld [vmem:[#allocation2 + $0x449] sm:$0xff] }
 0xaa8   :  { %v5760_v4 = vpop.f32.mrf.mxu2 }
 0xaa9   :  { %v5409_v45 = vpop.f32.mrf.mxu1  ;;  %v5862_v34 = vadd.f32 %v5760_v4, %v5508_v47 }
 0xaaa   :  { %6161 = vmatmul.f32.gmra.mxu3 %v5942_v55  ;;  %v5509_v25 = vadd.f32 %v5409_v45, %v5155_v1 }
 0xaab   :  { %v6462_v59 = vpop.f32.mrf.mxu0 }
 0xaac   :  { %v10564_v33 = vadd.f32 %v6462_v59, %v6214_v21  ;;  %5456 = vmatmul.f32.gmra.mxu1 %v5235_v15 }
 0xaad   :  { %v6114_v30 = vpop.f32.mrf.mxu3  ;;  %5810 = vmatmul.f32.gmra.mxu2 %v10566_v32 }
 0xaae   :  { %v6216_v8 = vadd.f32 %v6114_v30, %v5862_v34  ;;  %6509 = vmatmul.f32.gmra.mxu0 %v5234_v61  ;;  %v5236_v34 = vld [vmem:[#allocation2 + $0x450] sm:$0xff] }
 0xaaf   :  { %v10573_v61 = vld [vmem:[#allocation2 + $0x451] sm:$0xff] }
 0xab0   :  { %v5763_v48 = vpop.f32.mrf.mxu2 }
 0xab1   :  { %v5412_v55 = vpop.f32.mrf.mxu1  ;;  %v5863_v21 = vadd.f32 %v5763_v48, %v5509_v25 }
 0xab2   :  { %6164 = vmatmul.f32.gmra.mxu3 %v5943_v53  ;;  %v5510_v45 = vadd.f32 %v5412_v55, %v5156_v12 }
 0xab3   :  { %v6465_v47 = vpop.f32.mrf.mxu0 }
 0xab4   :  { %v10571_v4 = vadd.f32 %v6465_v47, %v6215_v23  ;;  %5459 = vmatmul.f32.gmra.mxu1 %v5236_v34 }
 0xab5   :  { %v6117_v59 = vpop.f32.mrf.mxu3  ;;  %5813 = vmatmul.f32.gmra.mxu2 %v10573_v61 }
 0xab6   :  { %v6217_v30 = vadd.f32 %v6117_v59, %v5863_v21  ;;  %6512 = vmatmul.f32.gmra.mxu0 %v5235_v15  ;;  %v6589_v21 = vld [vmem:[#allocation2 + $0x49] sm:$0xff]  ;;  %v12548_v15 = vld [vmem:[#allocation45_spill] sm:$0xff] }
 0xab7   :  { %v5157_v19 = vadd.f32 %v12549_v9, %v12548_v15 }
 0xab8   :  { %v5766_v1 = vpop.f32.mrf.mxu2 }
 0xab9   :  { %v5415_v53 = vpop.f32.mrf.mxu1  ;;  %v5864_v23 = vadd.f32 %v5766_v1, %v5510_v45  ;;  %v12551_v1 = vld [vmem:[#allocation75_spill] sm:$0xff] }
 0xaba   :  { %6167 = vmatmul.f32.gmra.mxu3 %v5944_v44  ;;  %v5511_v35 = vadd.f32 %v5415_v53, %v5157_v19 }
 0xabb   :  { %v6468_v25 = vpop.f32.mrf.mxu0 }
 0xabc   :  { %v10578_v48 = vadd.f32 %v6468_v25, %v6216_v8  ;;  %6686 = vmatmul.f32.vlgmr.msra.gmra.mxu1 %v6589_v21  ;;  %v12550_v8 = vld [vmem:[#allocation48_spill] sm:$0xff] }
 0xabd   :  { %v6120_v47 = vpop.f32.mrf.mxu3  ;;  %v5158_v25 = vadd.f32 %v12551_v1, %v12550_v8 }
 0xabe   :  { %v6218_v59 = vadd.f32 %v6120_v47, %v5864_v23  ;;  %6515 = vmatmul.f32.gmra.mxu0 %v5236_v34 }
 0xac0   :  { %v5769_v10 = vpop.f32.mrf.mxu2 }
 0xac1   :  { %v5418_v42 = vpop.f32.mrf.mxu1  ;;  %v5865_v55 = vadd.f32 %v5769_v10, %v5511_v35  ;;  %v6591_v35 = vld [vmem:[#allocation2 + $0x69] sm:$0xff] }
 0xac2   :  { %v5512_v34 = vadd.f32 %v5418_v42, %v5158_v25 }
 0xac3   :  { %v6471_v46 = vpop.f32.mrf.mxu0 }
 0xac4   :  { %v10582_v44 = vadd.f32 %v6471_v46, %v6217_v30  ;;  %6689 = vmatmul.f32.gmra.mxu1 %v6590_v3  ;;  %v12552_v30 = vld [vmem:[#allocation81_spill] sm:$0xff] }
 0xac5   :  { %v6123_v12 = vpop.f32.mrf.mxu3  ;;  %v12553_v3 = vld [vmem:[#allocation77_spill] sm:$0xff] }
 0xac6   :  { %v6219_v45 = vadd.f32 %v6123_v12, %v5865_v55  ;;  %6518 = vmatmul.f32.gmra.mxu0 %v10388_v52  ;;  %v5159_v15 = vadd.f32 %v12553_v3, %v12552_v30  ;;  %v6593_v3 = vld [vmem:[#allocation2 + $0x89] sm:$0xff] }
 0xac8   :  { %v5772_v23 = vpop.f32.mrf.mxu2 }
 0xac9   :  { %v5421_v47 = vpop.f32.mrf.mxu1  ;;  %v5866_v19 = vadd.f32 %v5772_v23, %v5512_v34  ;;  %v6592_v34 = vld [vmem:[#allocation2 + $0x71] sm:$0xff]  ;;  %v12555_v23 = vld [vmem:[#allocation41_spill] sm:$0xff] }
 0xaca   :  { %v5513_v10 = vadd.f32 %v5421_v47, %v5159_v15 }
 0xacb   :  { %v6474_v9 = vpop.f32.mrf.mxu0 }
 0xacc   :  { %v10587_v53 = vadd.f32 %v6474_v9, %v6218_v59  ;;  %6692 = vmatmul.f32.gmra.mxu1 %v6591_v35  ;;  %v12556_v9 = vld [vmem:[#allocation78_spill] sm:$0xff] }
 0xacd   :  { %v6126_v21 = vpop.f32.mrf.mxu3 }
 0xace   :  { %v6220_v46 = vadd.f32 %v6126_v21, %v5866_v19  ;;  %6521 = vmatmul.f32.gmra.mxu0 %v10388_v52  ;;  %v5160_v19 = vadd.f32 %v12556_v9, %v12555_v23 }
 0xad0   :  { %v5775_v55 = vpop.f32.mrf.mxu2 }
 0xad1   :  { %v5424_v12 = vpop.f32.mrf.mxu1  ;;  %v5867_v42 = vadd.f32 %v5775_v55, %v5513_v10  ;;  %v12559_v10 = vld [vmem:[#allocation80_spill] sm:$0xff] }
 0xad2   :  { %v5514_v21 = vadd.f32 %v5424_v12, %v5160_v19  ;;  %v6594_v19 = vld [vmem:[#allocation2 + $0x91] sm:$0xff] }
 0xad3   :  { %v6477_v8 = vpop.f32.mrf.mxu0 }
 0xad4   :  { %v10592_v1 = vadd.f32 %v6477_v8, %v6219_v45  ;;  %6695 = vmatmul.f32.gmra.mxu1 %v6592_v34  ;;  %v12558_v45 = vld [vmem:[#allocation70_spill] sm:$0xff] }
 0xad5   :  { %v6129_v25 = vpop.f32.mrf.mxu3  ;;  %v5161_v55 = vadd.f32 %v12559_v10, %v12558_v45  ;;  %v6596_v45 = vld [vmem:[#allocation2 + $0xb1] sm:$0xff]  ;;  %v6597_v10 = vld [vmem:[#allocation2 + $0xc9] sm:$0xff] }
 0xad6   :  { %12554 = vst [vmem:[#allocation58_spill] sm:$0xff] %v10592_v1  ;;  %v6221_v59 = vadd.f32 %v6129_v25, %v5867_v42  ;;  %v6621_v1 = vld [vmem:[#allocation2 + $0x289] sm:$0xff] }
 0xad8   :  { %v5778_v35 = vpop.f32.mrf.mxu2 }
 0xad9   :  { %v5427_v52 = vpop.f32.mrf.mxu1  ;;  %v5868_v7 = vadd.f32 %v5778_v35, %v5514_v21  ;;  %v6595_v35 = vld [vmem:[#allocation2 + $0xa9] sm:$0xff] }
 0xada   :  { %v5515_v8 = vadd.f32 %v5427_v52, %v5161_v55 }
 0xadb   :  { %v6480_v54 = vpop.f32.mrf.mxu0 }
 0xadc   :  { %v10596_v30 = vadd.f32 %v6480_v54, %v6220_v46  ;;  %6698 = vmatmul.f32.gmra.mxu1 %v6593_v3 }
 0xadd   :  { %v6132_v47 = vpop.f32.mrf.mxu3 }
 0xade   :  { %12557 = vst [vmem:[#allocation66_spill] sm:$0xff] %v10596_v30  ;;  %v6222_v15 = vadd.f32 %v6132_v47, %v5868_v7  ;;  %v6620_v30 = vld [vmem:[#allocation2 + $0x231] sm:$0xff] }
 0xae0   :  { %v5781_v42 = vpop.f32.mrf.mxu2 }
 0xae1   :  { %v10600_v25 = vpop.f32.mrf.mxu1  ;;  %v5869_v23 = vadd.f32 %v5781_v42, %v5515_v8  ;;  %v6598_v8 = vld [vmem:[#allocation2 + $0xd1] sm:$0xff] }
 0xae2   :  { %12560 = vst [vmem:[#allocation64_spill] sm:$0xff] %v10600_v25  ;;  %v6616_v25 = vld [vmem:[#allocation2 + $0x1f1] sm:$0xff] }
 0xae3   :  { %v6483_v34 = vpop.f32.mrf.mxu0 }
 0xae4   :  { %v10602_v12 = vadd.f32 %v6483_v34, %v6221_v59  ;;  %6701 = vmatmul.f32.gmra.mxu1 %v6594_v19  ;;  %v6601_v19 = vld [vmem:[#allocation2 + $0x109] sm:$0xff] }
 0xae5   :  { %v6135_v9 = vpop.f32.mrf.mxu3 }
 0xae6   :  { %12561 = vst [vmem:[#allocation68_spill] sm:$0xff] %v10602_v12  ;;  %v6223_v21 = vadd.f32 %v6135_v9, %v5869_v23  ;;  %v6600_v23 = vld [vmem:[#allocation2 + $0xf1] sm:$0xff]  ;;  %v6619_v12 = vld [vmem:[#allocation2 + $0x229] sm:$0xff] }
 0xae9   :  { %v10604_v54 = vpop.f32.mrf.mxu1 }
 0xaea   :  { %12562 = vst [vmem:[#allocation67_spill] sm:$0xff] %v10604_v54  ;;  %v6615_v54 = vld [vmem:[#allocation2 + $0x1e9] sm:$0xff] }
 0xaeb   :  { %v6486_v46 = vpop.f32.mrf.mxu0 }
 0xaec   :  { %v10606_v7 = vadd.f32 %v6486_v46, %v6222_v15  ;;  %6704 = vmatmul.f32.gmra.mxu1 %v6595_v35  ;;  %v6599_v15 = vld [vmem:[#allocation2 + $0xe9] sm:$0xff]  ;;  %v6602_v46 = vld [vmem:[#allocation2 + $0x111] sm:$0xff] }
 0xaee   :  { %12563 = vst [vmem:[#allocation32_spill] sm:$0xff] %v10606_v7  ;;  %v6618_v7 = vld [vmem:[#allocation2 + $0x211] sm:$0xff] }
 0xaf1   :  { %v10608_v47 = vpop.f32.mrf.mxu1 }
 0xaf2   :  { %12564 = vst [vmem:[#allocation69_spill] sm:$0xff] %v10608_v47  ;;  %v6614_v47 = vld [vmem:[#allocation2 + $0x1d1] sm:$0xff] }
 0xaf3   :  { %v6489_v52 = vpop.f32.mrf.mxu0 }
 0xaf4   :  { %v10610_v3 = vadd.f32 %v6489_v52, %v6223_v21  ;;  %6707 = vmatmul.f32.gmra.mxu1 %v6596_v45  ;;  %v6603_v52 = vld [vmem:[#allocation2 + $0x129] sm:$0xff] }
 0xaf6   :  { %12565 = vst [vmem:[#allocation39_spill] sm:$0xff] %v10610_v3  ;;  %v6617_v3 = vld [vmem:[#allocation2 + $0x209] sm:$0xff] }
 0xaf9   :  { %v10612_v59 = vpop.f32.mrf.mxu1 }
 0xafa   :  { %12566 = vst [vmem:[#allocation73_spill] sm:$0xff] %v10612_v59  ;;  %v6613_v59 = vld [vmem:[#allocation2 + $0x1c9] sm:$0xff] }
 0xafc   :  { %6710 = vmatmul.f32.gmra.mxu1 %v6597_v10  ;;  %v6604_v10 = vld [vmem:[#allocation2 + $0x131] sm:$0xff] }
 0xb01   :  { %v10614_v55 = vpop.f32.mrf.mxu1 }
 0xb02   :  { %12567 = vst [vmem:[#allocation71_spill] sm:$0xff] %v10614_v55  ;;  %v6612_v55 = vld [vmem:[#allocation2 + $0x1b1] sm:$0xff] }
 0xb04   :  { %6713 = vmatmul.f32.gmra.mxu1 %v6598_v8 }
 0xb09   :  { %v10616_v42 = vpop.f32.mrf.mxu1 }
 0xb0a   :  { %12568 = vst [vmem:[#allocation36_spill] sm:$0xff] %v10616_v42  ;;  %v6611_v42 = vld [vmem:[#allocation2 + $0x1a9] sm:$0xff] }
 0xb0c   :  { %6716 = vmatmul.f32.gmra.mxu1 %v6599_v15  ;;  %v6605_v15 = vld [vmem:[#allocation2 + $0x149] sm:$0xff] }
 0xb11   :  { %v10618_v34 = vpop.f32.mrf.mxu1 }
 0xb12   :  { %12569 = vst [vmem:[#allocation42_spill] sm:$0xff] %v10618_v34  ;;  %v6610_v34 = vld [vmem:[#allocation2 + $0x191] sm:$0xff] }
 0xb14   :  { %6719 = vmatmul.f32.gmra.mxu1 %v6600_v23 }
 0xb19   :  { %v10620_v9 = vpop.f32.mrf.mxu1 }
 0xb1a   :  { %12570 = vst [vmem:[#allocation38_spill] sm:$0xff] %v10620_v9  ;;  %v6606_v9 = vld [vmem:[#allocation2 + $0x151] sm:$0xff] }
 0xb1c   :  { %6722 = vmatmul.f32.gmra.mxu1 %v6601_v19 }
 0xb21   :  { %v10622_v21 = vpop.f32.mrf.mxu1 }
 0xb22   :  { %12571 = vst [vmem:[#allocation45_spill] sm:$0xff] %v10622_v21  ;;  %v6607_v21 = vld [vmem:[#allocation2 + $0x169] sm:$0xff] }
 0xb24   :  { %6725 = vmatmul.f32.gmra.mxu1 %v6602_v46 }
 0xb29   :  { %v10624_v35 = vpop.f32.mrf.mxu1 }
 0xb2a   :  { %12572 = vst [vmem:[#allocation34_spill] sm:$0xff] %v10624_v35  ;;  %v6608_v35 = vld [vmem:[#allocation2 + $0x171] sm:$0xff] }
 0xb2c   :  { %6728 = vmatmul.f32.gmra.mxu1 %v6603_v52 }
 0xb31   :  { %v10626_v45 = vpop.f32.mrf.mxu1 }
 0xb32   :  { %12573 = vst [vmem:[#allocation48_spill] sm:$0xff] %v10626_v45  ;;  %v6609_v45 = vld [vmem:[#allocation2 + $0x189] sm:$0xff] }
 0xb34   :  { %6731 = vmatmul.f32.gmra.mxu1 %v6604_v10 }
 0xb39   :  { %v10628_v8 = vpop.f32.mrf.mxu1 }
 0xb3c   :  { %6734 = vmatmul.f32.gmra.mxu1 %v6605_v15 }
 0xb41   :  { %v10630_v23 = vpop.f32.mrf.mxu1 }
 0xb44   :  { %6737 = vmatmul.f32.gmra.mxu1 %v6606_v9 }
 0xb49   :  { %v10632_v19 = vpop.f32.mrf.mxu1 }
 0xb4c   :  { %6740 = vmatmul.f32.gmra.mxu1 %v6607_v21 }
 0xb51   :  { %v10634_v46 = vpop.f32.mrf.mxu1 }
 0xb54   :  { %6743 = vmatmul.f32.gmra.mxu1 %v6608_v35 }
 0xb59   :  { %v10636_v52 = vpop.f32.mrf.mxu1 }
 0xb5c   :  { %6746 = vmatmul.f32.gmra.mxu1 %v6609_v45 }
 0xb61   :  { %v10638_v10 = vpop.f32.mrf.mxu1 }
 0xb64   :  { %6749 = vmatmul.f32.gmra.mxu1 %v6610_v34 }
 0xb69   :  { %v10640_v15 = vpop.f32.mrf.mxu1 }
 0xb6c   :  { %6752 = vmatmul.f32.gmra.mxu1 %v6611_v42 }
 0xb71   :  { %v10642_v9 = vpop.f32.mrf.mxu1 }
 0xb74   :  { %6755 = vmatmul.f32.gmra.mxu1 %v6612_v55 }
 0xb79   :  { %v10644_v21 = vpop.f32.mrf.mxu1 }
 0xb7c   :  { %6758 = vmatmul.f32.gmra.mxu1 %v6613_v59 }
 0xb81   :  { %v10646_v35 = vpop.f32.mrf.mxu1 }
 0xb84   :  { %6761 = vmatmul.f32.gmra.mxu1 %v6614_v47 }
 0xb89   :  { %v10648_v45 = vpop.f32.mrf.mxu1 }
 0xb8c   :  { %6764 = vmatmul.f32.gmra.mxu1 %v6615_v54 }
 0xb91   :  { %v10650_v34 = vpop.f32.mrf.mxu1 }
 0xb94   :  { %6767 = vmatmul.f32.gmra.mxu1 %v6616_v25 }
 0xb99   :  { %v10652_v42 = vpop.f32.mrf.mxu1 }
 0xb9a   :  { %12574 = vst [vmem:[#allocation75_spill] sm:$0xff] %v10652_v42  ;;  %v6622_v42 = vld [vmem:[#allocation2 + $0x291] sm:$0xff] }
 0xb9c   :  { %6770 = vmatmul.f32.gmra.mxu1 %v6617_v3 }
 0xba1   :  { %v10654_v55 = vpop.f32.mrf.mxu1 }
 0xba2   :  { %12575 = vst [vmem:[#allocation81_spill] sm:$0xff] %v10654_v55  ;;  %v6623_v55 = vld [vmem:[#allocation2 + $0x2a9] sm:$0xff] }
 0xba4   :  { %6773 = vmatmul.f32.gmra.mxu1 %v6618_v7 }
 0xba9   :  { %v10656_v59 = vpop.f32.mrf.mxu1 }
 0xbaa   :  { %12576 = vst [vmem:[#allocation77_spill] sm:$0xff] %v10656_v59  ;;  %v6624_v59 = vld [vmem:[#allocation2 + $0x2b1] sm:$0xff] }
 0xbac   :  { %6776 = vmatmul.f32.gmra.mxu1 %v6619_v12 }
 0xbb1   :  { %v10658_v47 = vpop.f32.mrf.mxu1 }
 0xbb2   :  { %12577 = vst [vmem:[#allocation41_spill] sm:$0xff] %v10658_v47  ;;  %v6625_v47 = vld [vmem:[#allocation2 + $0x2c9] sm:$0xff] }
 0xbb4   :  { %6779 = vmatmul.f32.gmra.mxu1 %v6620_v30 }
 0xbb9   :  { %v10660_v54 = vpop.f32.mrf.mxu1 }
 0xbba   :  { %12578 = vst [vmem:[#allocation78_spill] sm:$0xff] %v10660_v54  ;;  %v6626_v54 = vld [vmem:[#allocation2 + $0x2d1] sm:$0xff] }
 0xbbc   :  { %6782 = vmatmul.f32.gmra.mxu1 %v6621_v1 }
 0xbc1   :  { %v10662_v25 = vpop.f32.mrf.mxu1 }
 0xbc2   :  { %12579 = vst [vmem:[#allocation70_spill] sm:$0xff] %v10662_v25  ;;  %v6627_v25 = vld [vmem:[#allocation2 + $0x2e9] sm:$0xff] }
 0xbc4   :  { %6785 = vmatmul.f32.gmra.mxu1 %v6622_v42 }
 0xbc9   :  { %v10664_v3 = vpop.f32.mrf.mxu1 }
 0xbca   :  { %12580 = vst [vmem:[#allocation80_spill] sm:$0xff] %v10664_v3  ;;  %v6628_v3 = vld [vmem:[#allocation2 + $0x2f1] sm:$0xff] }
 0xbcc   :  { %6788 = vmatmul.f32.gmra.mxu1 %v6623_v55 }
 0xbd1   :  { %v10666_v7 = vpop.f32.mrf.mxu1 }
 0xbd2   :  { %12581 = vst [vmem:[#allocation111_spill] sm:$0xff] %v10666_v7  ;;  %v6629_v7 = vld [vmem:[#allocation2 + $0x309] sm:$0xff] }
 0xbd4   :  { %6791 = vmatmul.f32.gmra.mxu1 %v6624_v59 }
 0xbd9   :  { %v10668_v12 = vpop.f32.mrf.mxu1 }
 0xbda   :  { %12582 = vst [vmem:[#allocation112_spill] sm:$0xff] %v10668_v12  ;;  %v6630_v12 = vld [vmem:[#allocation2 + $0x311] sm:$0xff] }
 0xbdc   :  { %6794 = vmatmul.f32.gmra.mxu1 %v6625_v47 }
 0xbe1   :  { %v10670_v30 = vpop.f32.mrf.mxu1 }
 0xbe2   :  { %12583 = vst [vmem:[#allocation113_spill] sm:$0xff] %v10670_v30  ;;  %v6631_v30 = vld [vmem:[#allocation2 + $0x329] sm:$0xff] }
 0xbe4   :  { %6797 = vmatmul.f32.gmra.mxu1 %v6626_v54 }
 0xbe9   :  { %v10672_v1 = vpop.f32.mrf.mxu1 }
 0xbea   :  { %12584 = vst [vmem:[#allocation114_spill] sm:$0xff] %v10672_v1  ;;  %v6632_v1 = vld [vmem:[#allocation2 + $0x331] sm:$0xff] }
 0xbec   :  { %6800 = vmatmul.f32.gmra.mxu1 %v6627_v25 }
 0xbf1   :  { %v10674_v42 = vpop.f32.mrf.mxu1 }
 0xbf2   :  { %12585 = vst [vmem:[#allocation115_spill] sm:$0xff] %v10674_v42  ;;  %v6633_v42 = vld [vmem:[#allocation2 + $0x349] sm:$0xff] }
 0xbf4   :  { %6803 = vmatmul.f32.gmra.mxu1 %v6628_v3 }
 0xbf9   :  { %v10676_v55 = vpop.f32.mrf.mxu1 }
 0xbfa   :  { %12586 = vst [vmem:[#allocation116_spill] sm:$0xff] %v10676_v55  ;;  %v6634_v55 = vld [vmem:[#allocation2 + $0x351] sm:$0xff] }
 0xbfc   :  { %6806 = vmatmul.f32.gmra.mxu1 %v6629_v7 }
 0xc01   :  { %v10678_v59 = vpop.f32.mrf.mxu1 }
 0xc02   :  { %12587 = vst [vmem:[#allocation117_spill] sm:$0xff] %v10678_v59  ;;  %v6635_v59 = vld [vmem:[#allocation2 + $0x369] sm:$0xff] }
 0xc04   :  { %6809 = vmatmul.f32.gmra.mxu1 %v6630_v12 }
 0xc09   :  { %v10680_v47 = vpop.f32.mrf.mxu1 }
 0xc0a   :  { %12588 = vst [vmem:[#allocation118_spill] sm:$0xff] %v10680_v47  ;;  %v6636_v47 = vld [vmem:[#allocation2 + $0x371] sm:$0xff] }
 0xc0c   :  { %6812 = vmatmul.f32.gmra.mxu1 %v6631_v30 }
 0xc11   :  { %v10682_v54 = vpop.f32.mrf.mxu1 }
 0xc12   :  { %12589 = vst [vmem:[#allocation119_spill] sm:$0xff] %v10682_v54  ;;  %v6637_v54 = vld [vmem:[#allocation2 + $0x389] sm:$0xff] }
 0xc14   :  { %6815 = vmatmul.f32.gmra.mxu1 %v6632_v1 }
 0xc19   :  { %v10684_v25 = vpop.f32.mrf.mxu1 }
 0xc1a   :  { %12590 = vst [vmem:[#allocation120_spill] sm:$0xff] %v10684_v25  ;;  %v6638_v25 = vld [vmem:[#allocation2 + $0x391] sm:$0xff] }
 0xc1c   :  { %6818 = vmatmul.f32.gmra.mxu1 %v6633_v42 }
 0xc21   :  { %v10686_v3 = vpop.f32.mrf.mxu1 }
 0xc22   :  { %12591 = vst [vmem:[#allocation121_spill] sm:$0xff] %v10686_v3  ;;  %v6639_v3 = vld [vmem:[#allocation2 + $0x3a9] sm:$0xff] }
 0xc24   :  { %6821 = vmatmul.f32.gmra.mxu1 %v6634_v55 }
 0xc29   :  { %v10688_v7 = vpop.f32.mrf.mxu1 }
 0xc2a   :  { %12592 = vst [vmem:[#allocation122_spill] sm:$0xff] %v10688_v7  ;;  %v6640_v7 = vld [vmem:[#allocation2 + $0x3b1] sm:$0xff] }
 0xc2c   :  { %6824 = vmatmul.f32.gmra.mxu1 %v6635_v59 }
 0xc31   :  { %v10690_v12 = vpop.f32.mrf.mxu1 }
 0xc32   :  { %12593 = vst [vmem:[#allocation123_spill] sm:$0xff] %v10690_v12  ;;  %v6641_v12 = vld [vmem:[#allocation2 + $0x3c9] sm:$0xff] }
 0xc34   :  { %6827 = vmatmul.f32.gmra.mxu1 %v6636_v47 }
 0xc39   :  { %v10692_v30 = vpop.f32.mrf.mxu1 }
 0xc3a   :  { %12594 = vst [vmem:[#allocation124_spill] sm:$0xff] %v10692_v30  ;;  %v6642_v30 = vld [vmem:[#allocation2 + $0x3d1] sm:$0xff] }
 0xc3c   :  { %6830 = vmatmul.f32.gmra.mxu1 %v6637_v54 }
 0xc41   :  { %v10694_v1 = vpop.f32.mrf.mxu1 }
 0xc42   :  { %12595 = vst [vmem:[#allocation125_spill] sm:$0xff] %v10694_v1  ;;  %v6643_v1 = vld [vmem:[#allocation2 + $0x3e9] sm:$0xff] }
 0xc44   :  { %6833 = vmatmul.f32.gmra.mxu1 %v6638_v25 }
 0xc49   :  { %v10696_v42 = vpop.f32.mrf.mxu1 }
 0xc4a   :  { %12596 = vst [vmem:[#allocation126_spill] sm:$0xff] %v10696_v42  ;;  %v6644_v42 = vld [vmem:[#allocation2 + $0x3f1] sm:$0xff] }
 0xc4c   :  { %6836 = vmatmul.f32.gmra.mxu1 %v6639_v3 }
 0xc51   :  { %v10698_v55 = vpop.f32.mrf.mxu1 }
 0xc52   :  { %12597 = vst [vmem:[#allocation127_spill] sm:$0xff] %v10698_v55 }
 0xc54   :  { %6839 = vmatmul.f32.gmra.mxu1 %v6640_v7 }
 0xc59   :  { %v10700_v59 = vpop.f32.mrf.mxu1 }
 0xc5c   :  { %6842 = vmatmul.f32.gmra.mxu1 %v6641_v12 }
 0xc61   :  { %v10702_v47 = vpop.f32.mrf.mxu1 }
 0xc64   :  { %6845 = vmatmul.f32.gmra.mxu1 %v6642_v30 }
 0xc69   :  { %v10704_v54 = vpop.f32.mrf.mxu1 }
 0xc6a   :  { %12598 = vst [vmem:[#allocation128_spill] sm:$0xff] %v10704_v54 }
 0xc6c   :  { %6848 = vmatmul.f32.gmra.mxu1 %v6643_v1 }
 0xc71   :  { %v10706_v25 = vpop.f32.mrf.mxu1 }
 0xc74   :  { %6851 = vmatmul.f32.gmra.mxu1 %v6644_v42 }
 0xc79   :  { %v6807_v3 = vpop.f32.mrf.mxu1 }
 0xc7a   :  { %v10709_v55 = vadd.f32 %v6807_v3, %v10543_v22 }
 0xc7c   :  { %12599 = vst [vmem:[#allocation129_spill] sm:$0xff] %v10709_v55  ;;  %6854 = vmatmul.f32.gmra.mxu1 %v10538_v36 }
 0xc81   :  { %v6810_v7 = vpop.f32.mrf.mxu1 }
 0xc82   :  { %v10713_v12 = vadd.f32 %v6810_v7, %v10550_v56 }
 0xc84   :  { %12600 = vst [vmem:[#allocation130_spill] sm:$0xff] %v10713_v12  ;;  %6857 = vmatmul.f32.gmra.mxu1 %v10545_v24  ;;  %v6526_v24 = vadd.f32 %v10306_v27, %v10296_v0  ;;  %v6530_v27 = vadd.f32 %v10330_v57, %v10320_v60  ;;  %v6532_v60 = vadd.f32 %v10342_v2, %v10332_v13 }
 0xc89   :  { %v6813_v30 = vpop.f32.mrf.mxu1 }
 0xc8a   :  { %v10717_v54 = vadd.f32 %v6813_v30, %v10557_v49  ;;  %v6525_v49 = vadd.f32 %v10300_v16, %v10290_v18  ;;  %v6529_v18 = vadd.f32 %v10324_v17, %v10314_v63  ;;  %v10766_v17 = vadd.f32 %v10638_v10, %v6530_v27  ;;  %v12608_v30 = vld [vmem:[#allocation98_spill] sm:$0xff] }
 0xc8b   :  { %v6535_v10 = vadd.f32 %v10360_v62, %v10350_v5  ;;  %v6537_v5 = vadd.f32 %v10372_v14, %v10362_v39  ;;  %v12609_v39 = vld [vmem:[#allocation81_spill] sm:$0xff]  ;;  %v12617_v27 = vld [vmem:[#allocation102_spill] sm:$0xff] }
 0xc8c   :  { %12601 = vst [vmem:[#allocation131_spill] sm:$0xff] %v10717_v54  ;;  %6860 = vmatmul.f32.gmra.mxu1 %v10552_v58  ;;  %v6527_v58 = vadd.f32 %v10312_v31, %v10302_v41  ;;  %v10760_v31 = vadd.f32 %v10636_v52, %v6529_v18  ;;  %v6652_v52 = vld [vmem:[#allocation2 + $0x471] sm:$0xff] }
 0xc8e   :  { %v10746_v0 = vadd.f32 %v10632_v19, %v6527_v58  ;;  %v10781_v19 = vadd.f32 %v10642_v9, %v6532_v60  ;;  %v10802_v9 = vadd.f32 %v10648_v45, %v6535_v10  ;;  %v12607_v45 = vld [vmem:[#allocation95_spill] sm:$0xff]  ;;  %v12621_v60 = vld [vmem:[#allocation104_spill] sm:$0xff] }
 0xc91   :  { %v6816_v1 = vpop.f32.mrf.mxu1 }
 0xc92   :  { %v10721_v42 = vadd.f32 %v6816_v1, %v10564_v33  ;;  %v10735_v33 = vadd.f32 %v10630_v23, %v6526_v24  ;;  %v6539_v1 = vadd.f32 %v12608_v30, %v12607_v45  ;;  %v12610_v24 = vld [vmem:[#allocation58_spill] sm:$0xff]  ;;  %v12632_v45 = vld [vmem:[#allocation80_spill] sm:$0xff] }
 0xc94   :  { %12602 = vst [vmem:[#allocation132_spill] sm:$0xff] %v10721_v42  ;;  %6863 = vmatmul.f32.gmra.mxu1 %v10559_v50 }
 0xc99   :  { %v6819_v22 = vpop.f32.mrf.mxu1 }
 0xc9a   :  { %v10725_v36 = vadd.f32 %v6819_v22, %v10571_v4  ;;  %v6528_v4 = vadd.f32 %v10318_v29, %v10308_v40 }
 0xc9c   :  { %12603 = vst [vmem:[#allocation133_spill] sm:$0xff] %v10725_v36  ;;  %6866 = vmatmul.f32.gmra.mxu1 %v10566_v32  ;;  %v10743_v32 = vadd.f32 %v10628_v8, %v6525_v49  ;;  %v10754_v41 = vadd.f32 %v10634_v46, %v6528_v4  ;;  %v12613_v49 = vld [vmem:[#allocation100_spill] sm:$0xff]  ;;  %v12614_v4 = vld [vmem:[#allocation77_spill] sm:$0xff] }
 0xc9d   :  { %v10829_v18 = vadd.f32 %v12614_v4, %v6539_v1  ;;  %v12634_v1 = vld [vmem:[#allocation107_spill] sm:$0xff] }
 0xc9e   :  { %v6943_v16 = vadd.f32 %v10735_v33, %v10743_v32 }
 0xca0   :  { %v6944_v40 = vadd.f32 %v6943_v16, %v10746_v0  ;;  %v12616_v16 = vld [vmem:[#allocation99_spill] sm:$0xff] }
 0xca1   :  { %v6822_v56 = vpop.f32.mrf.mxu1 }
 0xca2   :  { %v10738_v50 = vadd.f32 %v6822_v56, %v10578_v48  ;;  %v6651_v48 = vld [vmem:[#allocation2 + $0x469] sm:$0xff]  ;;  %v6945_v63 = vadd.f32 %v6944_v40, %v10754_v41  ;;  %v12612_v56 = vld [vmem:[#allocation97_spill] sm:$0xff]  ;;  %v6541_v40 = vadd.f32 %v12617_v27, %v12616_v16  ;;  %v10868_v16 = vpop.f32.mrf.mxu3 }
 0xca4   :  { %12604 = vst [vmem:[#allocation134_spill] sm:$0xff] %v10738_v50  ;;  %6869 = vmatmul.f32.gmra.mxu1 %v10573_v61  ;;  %v6531_v61 = vadd.f32 %v10336_v51, %v10326_v38  ;;  %v6946_v57 = vadd.f32 %v6945_v63, %v10760_v31  ;;  %v6533_v38 = vadd.f32 %v10348_v11, %v10338_v37  ;;  %v12620_v63 = vld [vmem:[#allocation101_spill] sm:$0xff] }
 0xca6   :  { %v10775_v23 = vadd.f32 %v10640_v15, %v6531_v61  ;;  %v6947_v51 = vadd.f32 %v6946_v57, %v10766_v17  ;;  %v10787_v13 = vadd.f32 %v10644_v21, %v6533_v38  ;;  %v6542_v57 = vadd.f32 %v12621_v60, %v12620_v63  ;;  %v12642_v60 = vld [vmem:[#allocation110_spill] sm:$0xff] }
 0xca8   :  { %v6948_v46 = vadd.f32 %v6947_v51, %v10775_v23  ;;  %v12622_v51 = vld [vmem:[#allocation78_spill] sm:$0xff] }
 0xca9   :  { %v6825_v29 = vpop.f32.mrf.mxu1 }
 0xcaa   :  { %v10769_v8 = vadd.f32 %v6825_v29, %v10582_v44  ;;  %v6534_v44 = vadd.f32 %v10354_v20, %v10344_v6  ;;  %v6949_v37 = vadd.f32 %v6948_v46, %v10781_v19  ;;  %v6536_v6 = vadd.f32 %v10366_v28, %v10356_v26  ;;  %v12606_v26 = vld [vmem:[#allocation75_spill] sm:$0xff] }
 0xcab   :  { %v10814_v28 = vadd.f32 %v12606_v26, %v6537_v5  ;;  %12615 = vst [vmem:[#allocation75_spill] sm:$0xff] %v10829_v18  ;;  %v12628_v5 = vld [vmem:[#allocation66_spill] sm:$0xff] }
 0xcac   :  { %6872 = vmatmul.f32.gmra.mxu1 %v6651_v48  ;;  %v10793_v11 = vadd.f32 %v10646_v35, %v6534_v44  ;;  %v6950_v20 = vadd.f32 %v6949_v37, %v10787_v13  ;;  %v10808_v21 = vadd.f32 %v10650_v34, %v6536_v6  ;;  %v12618_v48 = vld [vmem:[#allocation41_spill] sm:$0xff]  ;;  %v10841_v44 = vadd.f32 %v12622_v51, %v6541_v40  ;;  %v12626_v6 = vld [vmem:[#allocation70_spill] sm:$0xff]  ;;  %v12640_v40 = vld [vmem:[#allocation112_spill] sm:$0xff] }
 0xcae   :  { %v6951_v62 = vadd.f32 %v6950_v20, %v10793_v11  ;;  %12623 = vst [vmem:[#allocation98_spill] sm:$0xff] %v10841_v44  ;;  %v10847_v20 = vadd.f32 %v12626_v6, %v6542_v57  ;;  %v12643_v57 = vld [vmem:[#allocation92_spill] sm:$0xff] }
 0xcaf   :  { %v12648_v6 = vld [vmem:[#allocation56_spill] sm:$0xff] }
 0xcb0   :  { %v6952_v3 = vadd.f32 %v6951_v62, %v10802_v9  ;;  %12627 = vst [vmem:[#allocation81_spill] sm:$0xff] %v10847_v20 }
 0xcb1   :  { %v6828_v2 = vpop.f32.mrf.mxu1 }
 0xcb2   :  { %v10796_v15 = vadd.f32 %v6828_v2, %v10587_v53  ;;  %v12605_v53 = vld [vmem:[#allocation96_spill] sm:$0xff]  ;;  %v6953_v22 = vadd.f32 %v6952_v3, %v10808_v21  ;;  %v12624_v2 = vld [vmem:[#allocation103_spill] sm:$0xff] }
 0xcb3   :  { %v6538_v35 = vadd.f32 %v12605_v53, %v10368_v43  ;;  %v6540_v43 = vadd.f32 %v12613_v49, %v12612_v56  ;;  %v10852_v53 = vpop.f32.mrf.mxu2  ;;  %v12631_v3 = vld [vmem:[#allocation108_spill] sm:$0xff]  ;;  %v12636_v56 = vld [vmem:[#allocation111_spill] sm:$0xff] }
 0xcb4   :  { %6875 = vmatmul.f32.gmra.mxu1 %v6652_v52  ;;  %v6954_v58 = vadd.f32 %v6953_v22, %v10814_v28  ;;  %v12625_v52 = vld [vmem:[#allocation106_spill] sm:$0xff]  ;;  %v12635_v22 = vld [vmem:[#allocation53_spill] sm:$0xff] }
 0xcb5   :  { %v10820_v14 = vadd.f32 %v12609_v39, %v6538_v35  ;;  %v10835_v61 = vadd.f32 %v12618_v48, %v6540_v43  ;;  %v6543_v10 = vadd.f32 %v12625_v52, %v12624_v2  ;;  %v12630_v35 = vld [vmem:[#allocation105_spill] sm:$0xff]  ;;  %v6545_v39 = vadd.f32 %v12635_v22, %v12634_v1  ;;  %v10874_v48 = vpop.f32.mrf.mxu0  ;;  %v12646_v52 = vld [vmem:[#allocation68_spill] sm:$0xff]  ;;  %v12652_v1 = vld [vmem:[#allocation59_spill] sm:$0xff] }
 0xcb6   :  { %v6544_v26 = vadd.f32 %v12631_v3, %v12630_v35  ;;  %v12638_v43 = vld [vmem:[#allocation109_spill] sm:$0xff]  ;;  %v12649_v3 = vld [vmem:[#allocation114_spill] sm:$0xff] }
 0xcb7   :  { %v6955_v29 = vadd.f32 %v6954_v58, %v10820_v14  ;;  %12619 = vst [vmem:[#allocation95_spill] sm:$0xff] %v10835_v61  ;;  %v10858_v30 = vadd.f32 %v12632_v45, %v6543_v10  ;;  %v12639_v58 = vld [vmem:[#allocation88_spill] sm:$0xff]  ;;  %v12651_v45 = vld [vmem:[#allocation65_spill] sm:$0xff] }
 0xcb8   :  { %v10864_v49 = vadd.f32 %v12636_v56, %v6544_v26  ;;  %v6546_v4 = vadd.f32 %v12639_v58, %v12638_v43  ;;  %v6549_v22 = vadd.f32 %v12652_v1, %v12651_v45  ;;  %v12655_v43 = vld [vmem:[#allocation62_spill] sm:$0xff]  ;;  %v12656_v58 = vld [vmem:[#allocation13_spill] sm:$0xff]  ;;  %v12664_v45 = vld [vmem:[#allocation16_spill] sm:$0xff] }
 0xcb9   :  { %v6831_v7 = vpop.f32.mrf.mxu1  ;;  %v6956_v38 = vadd.f32 %v6955_v29, %v10829_v18  ;;  %12633 = vst [vmem:[#allocation97_spill] sm:$0xff] %v10858_v30  ;;  %v10872_v29 = vadd.f32 %v12640_v40, %v6545_v39  ;;  %v12657_v40 = vld [vmem:[#allocation116_spill] sm:$0xff]  ;;  %v12665_v1 = vld [vmem:[#allocation17_spill] sm:$0xff] }
 0xcba   :  { %v10823_v34 = vadd.f32 %v6831_v7, %v12610_v24  ;;  %12637 = vst [vmem:[#allocation100_spill] sm:$0xff] %v10864_v49 }
 0xcbb   :  { %v6957_v37 = vadd.f32 %v6956_v38, %v10835_v61  ;;  %12641 = vst [vmem:[#allocation77_spill] sm:$0xff] %v10872_v29  ;;  %v6547_v38 = vadd.f32 %v12643_v57, %v12642_v60  ;;  %v12659_v57 = vld [vmem:[#allocation15_spill] sm:$0xff] }
 0xcbc   :  { %12611 = vst [vmem:[#allocation96_spill] sm:$0xff] %v10823_v34 }
 0xcbd   :  { %v6958_v7 = vadd.f32 %v6957_v37, %v10841_v44  ;;  %v12647_v37 = vld [vmem:[#allocation63_spill] sm:$0xff]  ;;  %v10889_v26 = vadd.f32 %v12649_v3, %v6547_v38  ;;  %v12660_v38 = vld [vmem:[#allocation14_spill] sm:$0xff]  ;;  %v10916_v3 = vpop.f32.mrf.mxu0 }
 0xcbf   :  { %v6959_v24 = vadd.f32 %v6958_v7, %v10847_v20  ;;  %12650 = vst [vmem:[#allocation102_spill] sm:$0xff] %v10889_v26  ;;  %v10891_v7 = vpop.f32.mrf.mxu2 }
 0xcc1   :  { %v6834_v46 = vpop.f32.mrf.mxu1  ;;  %v6960_v27 = vadd.f32 %v6959_v24, %v10858_v30  ;;  %v12653_v24 = vld [vmem:[#allocation115_spill] sm:$0xff] }
 0xcc2   :  { %v10850_v62 = vadd.f32 %v6834_v46, %v12628_v5  ;;  %v12644_v46 = vld [vmem:[#allocation113_spill] sm:$0xff]  ;;  %v6548_v5 = vadd.f32 %v12648_v6, %v12647_v37 }
 0xcc3   :  { %v6961_v51 = vadd.f32 %v6960_v27, %v10864_v49  ;;  %v10880_v2 = vadd.f32 %v12644_v46, %v6546_v4  ;;  %v6550_v4 = vadd.f32 %v12656_v58, %v12655_v43  ;;  %v10907_v46 = vpop.f32.mrf.mxu3  ;;  %v12661_v37 = vld [vmem:[#allocation117_spill] sm:$0xff]  ;;  %v12668_v58 = vld [vmem:[#allocation18_spill] sm:$0xff]  ;;  %v12694_v49 = vld [vmem:[#allocation31_spill] sm:$0xff] }
 0xcc4   :  { %12629 = vst [vmem:[#allocation58_spill] sm:$0xff] %v10850_v62  ;;  %v10897_v56 = vadd.f32 %v12653_v24, %v6548_v5  ;;  %v12663_v5 = vld [vmem:[#allocation32_spill] sm:$0xff]  ;;  %v12666_v24 = vld [vmem:[#allocation118_spill] sm:$0xff] }
 0xcc5   :  { %12645 = vst [vmem:[#allocation99_spill] sm:$0xff] %v10880_v2  ;;  %v6962_v35 = vadd.f32 %v6961_v51, %v10872_v29  ;;  %v6551_v51 = vadd.f32 %v12660_v38, %v12659_v57  ;;  %v10911_v6 = vadd.f32 %v12661_v37, %v6550_v4  ;;  %v12670_v4 = vld [vmem:[#allocation119_spill] sm:$0xff]  ;;  %v12672_v37 = vld [vmem:[#allocation20_spill] sm:$0xff] }
 0xcc6   :  { %12654 = vst [vmem:[#allocation41_spill] sm:$0xff] %v10897_v56  ;;  %v12691_v29 = vld [vmem:[#allocation124_spill] sm:$0xff] }
 0xcc7   :  { %v6963_v39 = vadd.f32 %v6962_v35, %v10880_v2  ;;  %12662 = vst [vmem:[#allocation104_spill] sm:$0xff] %v10911_v6  ;;  %v10922_v43 = vadd.f32 %v12666_v24, %v6551_v51  ;;  %v12676_v24 = vld [vmem:[#allocation22_spill] sm:$0xff]  ;;  %v12682_v2 = vld [vmem:[#allocation25_spill] sm:$0xff] }
 0xcc9   :  { %v6837_v63 = vpop.f32.mrf.mxu1  ;;  %v6964_v27 = vadd.f32 %v6963_v39, %v10889_v26  ;;  %12667 = vst [vmem:[#allocation78_spill] sm:$0xff] %v10922_v43 }
 0xcca   :  { %v10883_v10 = vadd.f32 %v6837_v63, %v12646_v52  ;;  %v10903_v63 = vadd.f32 %v12657_v40, %v6549_v22  ;;  %v6552_v22 = vadd.f32 %v12665_v1, %v12664_v45  ;;  %v12669_v40 = vld [vmem:[#allocation19_spill] sm:$0xff]  ;;  %v12674_v1 = vld [vmem:[#allocation120_spill] sm:$0xff] }
 0xccb   :  { %v6965_v52 = vadd.f32 %v6964_v27, %v10897_v56  ;;  %v6553_v57 = vadd.f32 %v12669_v40, %v12668_v58 }
 0xccc   :  { %12658 = vst [vmem:[#allocation101_spill] sm:$0xff] %v10903_v63  ;;  %v10928_v38 = vadd.f32 %v12670_v4, %v6552_v22  ;;  %v12680_v22 = vld [vmem:[#allocation39_spill] sm:$0xff] }
 0xccd   :  { %v6966_v39 = vadd.f32 %v6965_v52, %v10903_v63  ;;  %v10936_v52 = vadd.f32 %v12674_v1, %v6553_v57  ;;  %v12677_v63 = vld [vmem:[#allocation23_spill] sm:$0xff] }
 0xcce   :  { %12671 = vst [vmem:[#allocation103_spill] sm:$0xff] %v10928_v38  ;;  %v6555_v26 = vadd.f32 %v12677_v63, %v12676_v24  ;;  %v12685_v63 = vld [vmem:[#allocation26_spill] sm:$0xff] }
 0xccf   :  { %v6967_v27 = vadd.f32 %v6966_v39, %v10911_v6  ;;  %12675 = vst [vmem:[#allocation106_spill] sm:$0xff] %v10936_v52  ;;  %v12678_v39 = vld [vmem:[#allocation121_spill] sm:$0xff]  ;;  %v12681_v6 = vld [vmem:[#allocation24_spill] sm:$0xff] }
 0xcd1   :  { %v6840_v60 = vpop.f32.mrf.mxu1  ;;  %v6968_v45 = vadd.f32 %v6967_v27, %v10922_v43  ;;  %v12683_v27 = vld [vmem:[#allocation122_spill] sm:$0xff]  ;;  %v10955_v43 = vpop.f32.mrf.mxu0 }
 0xcd2   :  { %v10914_v35 = vadd.f32 %v6840_v60, %v12663_v5  ;;  %v10930_v60 = vpop.f32.mrf.mxu2  ;;  %v12673_v5 = vld [vmem:[#allocation21_spill] sm:$0xff]  ;;  %v10953_v1 = vadd.f32 %v12683_v27, %v6555_v26 }
 0xcd3   :  { %v6554_v56 = vadd.f32 %v12673_v5, %v12672_v37  ;;  %v6969_v58 = vadd.f32 %v6968_v45, %v10928_v38  ;;  %v6556_v37 = vadd.f32 %v12682_v2, %v12681_v6  ;;  %v10949_v5 = vpop.f32.mrf.mxu3  ;;  %v12686_v45 = vld [vmem:[#allocation27_spill] sm:$0xff]  ;;  %v12690_v38 = vld [vmem:[#allocation29_spill] sm:$0xff] }
 0xcd4   :  { %12684 = vst [vmem:[#allocation66_spill] sm:$0xff] %v10953_v1  ;;  %v6557_v24 = vadd.f32 %v12686_v45, %v12685_v63  ;;  %v12695_v45 = vld [vmem:[#allocation125_spill] sm:$0xff] }
 0xcd5   :  { %v10942_v40 = vadd.f32 %v12678_v39, %v6554_v56  ;;  %v6970_v57 = vadd.f32 %v6969_v58, %v10936_v52  ;;  %v12687_v39 = vld [vmem:[#allocation123_spill] sm:$0xff]  ;;  %v12693_v52 = vld [vmem:[#allocation30_spill] sm:$0xff] }
 0xcd6   :  { %v10967_v58 = vadd.f32 %v12691_v29, %v6557_v24  ;;  %v6559_v63 = vadd.f32 %v12694_v49, %v12693_v52  ;;  %v12701_v24 = vld [vmem:[#allocation37_spill] sm:$0xff]  ;;  %v12703_v52 = vld [vmem:[#allocation127_spill] sm:$0xff] }
 0xcd7   :  { %12679 = vst [vmem:[#allocation70_spill] sm:$0xff] %v10942_v40  ;;  %v6971_v56 = vadd.f32 %v6970_v57, %v10942_v40  ;;  %v12698_v40 = vld [vmem:[#allocation35_spill] sm:$0xff] }
 0xcd8   :  { %12692 = vst [vmem:[#allocation108_spill] sm:$0xff] %v10967_v58 }
 0xcd9   :  { %v6843_v51 = vpop.f32.mrf.mxu1  ;;  %v6972_v6 = vadd.f32 %v6971_v56, %v10953_v1  ;;  %v12702_v1 = vld [vmem:[#allocation40_spill] sm:$0xff] }
 0xcda   :  { %v10945_v4 = vadd.f32 %v6843_v51, %v12680_v22  ;;  %v10961_v51 = vadd.f32 %v12687_v39, %v6556_v37  ;;  %v12689_v22 = vld [vmem:[#allocation28_spill] sm:$0xff]  ;;  %v10969_v26 = vpop.f32.mrf.mxu2  ;;  %v12697_v39 = vld [vmem:[#allocation33_spill] sm:$0xff]  ;;  %v6561_v30 = vadd.f32 %v12702_v1, %v12701_v24 }
 0xcdb   :  { %v6558_v2 = vadd.f32 %v12690_v38, %v12689_v22  ;;  %v6560_v38 = vadd.f32 %v12698_v40, %v12697_v39  ;;  %v12699_v22 = vld [vmem:[#allocation126_spill] sm:$0xff]  ;;  %v10987_v20 = vpop.f32.mrf.mxu3  ;;  %v12708_v1 = vld [vmem:[#allocation49_spill] sm:$0xff] }
 0xcdc   :  { %12688 = vst [vmem:[#allocation105_spill] sm:$0xff] %v10961_v51  ;;  %v6973_v57 = vadd.f32 %v6972_v6, %v10961_v51  ;;  %v10983_v29 = vadd.f32 %v12699_v22, %v6559_v63  ;;  %v12706_v51 = vld [vmem:[#allocation46_spill] sm:$0xff]  ;;  %v10999_v63 = vadd.f32 %v10700_v59, %v6561_v30  ;;  %v12709_v22 = vld [vmem:[#allocation52_spill] sm:$0xff] }
 0xcdd   :  { %v10977_v37 = vadd.f32 %v12695_v45, %v6558_v2  ;;  %v10991_v6 = vadd.f32 %v12703_v52, %v6560_v38  ;;  %v10993_v2 = vpop.f32.mrf.mxu0  ;;  %v12705_v45 = vld [vmem:[#allocation43_spill] sm:$0xff]  ;;  %v6563_v24 = vadd.f32 %v12709_v22, %v12708_v1 }
 0xcde   :  { %v6974_v56 = vadd.f32 %v6973_v57, %v10967_v58  ;;  %12700 = vst [vmem:[#allocation107_spill] sm:$0xff] %v10983_v29  ;;  %v6562_v40 = vadd.f32 %v12706_v51, %v12705_v45  ;;  %v12712_v58 = vld [vmem:[#allocation61_spill] sm:$0xff] }
 0xcdf   :  { %12696 = vst [vmem:[#allocation80_spill] sm:$0xff] %v10977_v37 }
 0xce0   :  { %v6975_v49 = vadd.f32 %v6974_v56, %v10977_v37  ;;  %12704 = vst [vmem:[#allocation53_spill] sm:$0xff] %v10991_v6  ;;  %v11007_v38 = vadd.f32 %v10702_v47, %v6562_v40  ;;  %v12711_v37 = vld [vmem:[#allocation55_spill] sm:$0xff] }
 0xce1   :  { %v10971_v27 = vpop.f32.mrf.mxu1  ;;  %12707 = vst [vmem:[#allocation111_spill] sm:$0xff] %v10999_v63  ;;  %v6564_v44 = vadd.f32 %v12712_v58, %v12711_v37 }
 0xce2   :  { %v6976_v57 = vadd.f32 %v6975_v49, %v10983_v29  ;;  %12710 = vst [vmem:[#allocation109_spill] sm:$0xff] %v11007_v38  ;;  %v5796_v52 = vpop.f32.mrf.mxu2  ;;  %v12713_v49 = vld [vmem:[#allocation128_spill] sm:$0xff] }
 0xce3   :  { %v11013_v45 = vadd.f32 %v12713_v49, %v6563_v24  ;;  %v11017_v30 = vadd.f32 %v10706_v25, %v6564_v44  ;;  %v6150_v1 = vpop.f32.mrf.mxu3  ;;  %v12720_v29 = vld [vmem:[#allocation64_spill] sm:$0xff] }
 0xce4   :  { %v6977_v56 = vadd.f32 %v6976_v57, %v10991_v6 }
 0xce5   :  { %12714 = vst [vmem:[#allocation88_spill] sm:$0xff] %v11013_v45  ;;  %v11020_v22 = vpop.f32.mrf.mxu0 }
 0xce6   :  { %v6978_v51 = vadd.f32 %v6977_v56, %v10999_v63  ;;  %12715 = vst [vmem:[#allocation112_spill] sm:$0xff] %v11017_v30 }
 0xce8   :  { %v6979_v59 = vadd.f32 %v6978_v51, %v11007_v38 }
 0xce9   :  { %v11001_v39 = vpop.f32.mrf.mxu1 }
 0xcea   :  { %v6980_v57 = vadd.f32 %v6979_v59, %v11013_v45  ;;  %v5799_v37 = vpop.f32.mrf.mxu2  ;;  %v12716_v59 = vld [vmem:[#allocation51_spill] sm:$0xff]  ;;  %v12717_v45 = vld [vmem:[#allocation82_spill] sm:$0xff] }
 0xceb   :  { %v6153_v51 = vpop.f32.mrf.mxu3  ;;  %v5162_v63 = vadd.f32 %v12717_v45, %v12716_v59  ;;  %v12724_v59 = vld [vmem:[#allocation69_spill] sm:$0xff] }
 0xcec   :  { %v6981_v40 = vadd.f32 %v6980_v57, %v11017_v30  ;;  %v12718_v57 = vld [vmem:[#allocation72_spill] sm:$0xff]  ;;  %v12719_v30 = vld [vmem:[#allocation85_spill] sm:$0xff] }
 0xced   :  { %v6507_v44 = vpop.f32.mrf.mxu0 }
 0xcee   :  { %v6982_v58 = vadd.f32 %v6981_v40, %v10709_v55  ;;  %v5163_v40 = vadd.f32 %v12719_v30, %v12718_v57  ;;  %v12725_v30 = vld [vmem:[#allocation74_spill] sm:$0xff] }
 0xcef   :  { %v12726_v57 = vld [vmem:[#allocation54_spill] sm:$0xff] }
 0xcf0   :  { %v6983_v56 = vadd.f32 %v6982_v58, %v10713_v12  ;;  %v5516_v58 = vadd.f32 %v12720_v29, %v5162_v63  ;;  %v12722_v12 = vld [vmem:[#allocation90_spill] sm:$0xff] }
 0xcf1   :  { %v6852_v47 = vpop.f32.mrf.mxu1 }
 0xcf2   :  { %v6984_v24 = vadd.f32 %v6983_v56, %v10717_v54  ;;  %v5802_v55 = vpop.f32.mrf.mxu2  ;;  %v12721_v54 = vld [vmem:[#allocation44_spill] sm:$0xff] }
 0xcf3   :  { %v5164_v61 = vadd.f32 %v12722_v12, %v12721_v54  ;;  %v6156_v29 = vpop.f32.mrf.mxu3  ;;  %v12727_v12 = vld [vmem:[#allocation84_spill] sm:$0xff] }
 0xcf4   :  { %v6985_v25 = vadd.f32 %v6984_v24, %v10721_v42  ;;  %v12723_v24 = vld [vmem:[#allocation67_spill] sm:$0xff] }
 0xcf5   :  { %v5517_v42 = vadd.f32 %v12723_v24, %v5163_v40  ;;  %v6510_v54 = vpop.f32.mrf.mxu0  ;;  %v12728_v40 = vld [vmem:[#allocation76_spill] sm:$0xff] }
 0xcf6   :  { %v6986_v38 = vadd.f32 %v6985_v25, %v10725_v36  ;;  %v5870_v25 = vadd.f32 %v10852_v53, %v5516_v58  ;;  %v5165_v36 = vadd.f32 %v12726_v57, %v12725_v30  ;;  %v5166_v24 = vadd.f32 %v12728_v40, %v12727_v12  ;;  %v12729_v58 = vld [vmem:[#allocation73_spill] sm:$0xff]  ;;  %v12733_v12 = vld [vmem:[#allocation87_spill] sm:$0xff] }
 0xcf7   :  { %v12734_v40 = vld [vmem:[#allocation79_spill] sm:$0xff] }
 0xcf8   :  { %v6987_v6 = vadd.f32 %v6986_v38, %v10738_v50  ;;  %v5871_v38 = vadd.f32 %v10891_v7, %v5517_v42  ;;  %v5518_v50 = vadd.f32 %v12724_v59, %v5164_v61  ;;  %v6224_v53 = vadd.f32 %v10868_v16, %v5870_v25  ;;  %v12730_v7 = vld [vmem:[#allocation89_spill] sm:$0xff]  ;;  %v12731_v61 = vld [vmem:[#allocation47_spill] sm:$0xff]  ;;  %v12735_v25 = vld [vmem:[#allocation36_spill] sm:$0xff] }
 0xcf9   :  { %v6855_v49 = vpop.f32.mrf.mxu1  ;;  %v5167_v59 = vadd.f32 %v12731_v61, %v12730_v7  ;;  %v5168_v16 = vadd.f32 %v12734_v40, %v12733_v12  ;;  %v12737_v61 = vld [vmem:[#allocation93_spill] sm:$0xff] }
 0xcfa   :  { %v6988_v56 = vadd.f32 %v6987_v6, %v10769_v8  ;;  %v5872_v63 = vadd.f32 %v10930_v60, %v5518_v50  ;;  %v6225_v30 = vadd.f32 %v10907_v46, %v5871_v38  ;;  %v6578_v57 = vadd.f32 %v10874_v48, %v6224_v53  ;;  %v12732_v50 = vld [vmem:[#allocation71_spill] sm:$0xff] }
 0xcfb   :  { %v5520_v60 = vadd.f32 %v12732_v50, %v5166_v24  ;;  %v12736_v24 = vld [vmem:[#allocation42_spill] sm:$0xff] }
 0xcfc   :  { %v6989_v45 = vadd.f32 %v6988_v56, %v10796_v15  ;;  %v5519_v56 = vadd.f32 %v12729_v58, %v5165_v36  ;;  %v6226_v36 = vadd.f32 %v10949_v5, %v5872_v63  ;;  %v5805_v58 = vpop.f32.mrf.mxu2  ;;  %v6579_v7 = vadd.f32 %v10916_v3, %v6225_v30  ;;  %v12738_v3 = vld [vmem:[#allocation57_spill] sm:$0xff]  ;;  %v6159_v30 = vpop.f32.mrf.mxu3  ;;  %v12739_v50 = vld [vmem:[#allocation38_spill] sm:$0xff] }
 0xcfd   :  { %v5874_v46 = vadd.f32 %v5796_v52, %v5520_v60  ;;  %v5522_v53 = vadd.f32 %v12736_v24, %v5168_v16  ;;  %v5169_v52 = vadd.f32 %v12738_v3, %v12737_v61  ;;  %v12743_v3 = vld [vmem:[#allocation83_spill] sm:$0xff] }
 0xcfe   :  { %v6990_v6 = vadd.f32 %v6989_v45, %v10823_v34  ;;  %v5873_v45 = vadd.f32 %v10969_v26, %v5519_v56  ;;  %v11065_v26 = vadd.f32 %v10971_v27, %v6578_v57  ;;  %v11072_v63 = vadd.f32 %v11001_v39, %v6579_v7  ;;  %v12741_v7 = vld [vmem:[#allocation94_spill] sm:$0xff] }
 0xcff   :  { %v5523_v60 = vadd.f32 %v12739_v50, %v5169_v52  ;;  %v12744_v52 = vld [vmem:[#allocation86_spill] sm:$0xff] }
 0xd00   :  { %v6991_v42 = vadd.f32 %v6990_v6, %v10850_v62  ;;  %v5521_v6 = vadd.f32 %v12735_v25, %v5167_v59  ;;  %v6227_v56 = vadd.f32 %v10987_v20, %v5873_v45  ;;  %v5876_v59 = vadd.f32 %v5802_v55, %v5522_v53  ;;  %v6513_v45 = vpop.f32.mrf.mxu0 }
 0xd01   :  { %v6858_v18 = vpop.f32.mrf.mxu1  ;;  %v5877_v16 = vadd.f32 %v5805_v58, %v5523_v60 }
 0xd02   :  { %v6992_v34 = vadd.f32 %v6991_v42, %v10883_v10  ;;  %v5875_v38 = vadd.f32 %v5799_v37, %v5521_v6  ;;  %v6580_v42 = vadd.f32 %v10955_v43, %v6226_v36  ;;  %v6581_v27 = vadd.f32 %v10993_v2, %v6227_v56 }
 0xd03   :  { %v6230_v40 = vadd.f32 %v6156_v29, %v5876_v59  ;;  %v5171_v59 = vadd.f32 %v12744_v52, %v12743_v3 }
 0xd04   :  { %v6993_v48 = vadd.f32 %v6992_v34, %v10914_v35  ;;  %v6228_v34 = vadd.f32 %v6150_v1, %v5874_v46  ;;  %v11078_v57 = vadd.f32 %v6852_v47, %v6580_v42  ;;  %v6229_v20 = vadd.f32 %v6153_v51, %v5875_v38  ;;  %v5808_v47 = vpop.f32.mrf.mxu2  ;;  %v12742_v38 = vld [vmem:[#allocation45_spill] sm:$0xff]  ;;  %v6162_v58 = vpop.f32.mrf.mxu3 }
 0xd05   :  { %v11083_v12 = vadd.f32 %v6855_v49, %v6581_v27  ;;  %v6584_v25 = vadd.f32 %v6510_v54, %v6230_v40  ;;  %v12745_v27 = vld [vmem:[#allocation34_spill] sm:$0xff] }
 0xd06   :  { %v6994_v5 = vadd.f32 %v6993_v48, %v10945_v4  ;;  %v6582_v43 = vadd.f32 %v11020_v22, %v6228_v34  ;;  %v6583_v1 = vadd.f32 %v6507_v44, %v6229_v20  ;;  %v12740_v22 = vld [vmem:[#allocation91_spill] sm:$0xff]  ;;  %v6231_v48 = vadd.f32 %v6159_v30, %v5877_v16  ;;  %v12746_v40 = vld [vmem:[#allocation50_spill] sm:$0xff] }
 0xd07   :  { %v5170_v46 = vadd.f32 %v12741_v7, %v12740_v22  ;;  %v5525_v30 = vadd.f32 %v12745_v27, %v5171_v59 }
 0xd08   :  { %v6995_v37 = vadd.f32 %v6994_v5, %v11065_v26  ;;  %v11086_v36 = vadd.f32 %v6858_v18, %v6582_v43  ;;  %v6585_v24 = vadd.f32 %v6513_v45, %v6231_v48  ;;  %v6516_v53 = vpop.f32.mrf.mxu0 }
 0xd09   :  { %v6861_v62 = vpop.f32.mrf.mxu1  ;;  %v5524_v44 = vadd.f32 %v12742_v38, %v5170_v46 }
 0xd0a   :  { %v6996_v39 = vadd.f32 %v6995_v37, %v11072_v63  ;;  %v11089_v6 = vadd.f32 %v6861_v62, %v6583_v1 }
 0xd0b   :  { %v5878_v54 = vadd.f32 %v5808_v47, %v5524_v44  ;;  %v12748_v47 = vld [vmem:[#allocation48_spill] sm:$0xff] }
 0xd0c   :  { %v6997_v2 = vadd.f32 %v6996_v39, %v11078_v57  ;;  %v5811_v61 = vpop.f32.mrf.mxu2  ;;  %v6165_v20 = vpop.f32.mrf.mxu3 }
 0xd0d   :  { %v6232_v34 = vadd.f32 %v6162_v58, %v5878_v54  ;;  %v5879_v50 = vadd.f32 %v5811_v61, %v5525_v30 }
 0xd0e   :  { %v6998_v51 = vadd.f32 %v6997_v2, %v11083_v12 }
 0xd0f   :  { %v6586_v37 = vadd.f32 %v6516_v53, %v6232_v34  ;;  %v6233_v16 = vadd.f32 %v6165_v20, %v5879_v50 }
 0xd10   :  { %v6999_v49 = vadd.f32 %v6998_v51, %v11086_v36  ;;  %v6519_v60 = vpop.f32.mrf.mxu0 }
 0xd11   :  { %v6864_v55 = vpop.f32.mrf.mxu1  ;;  %v6587_v51 = vadd.f32 %v6519_v60, %v6233_v16 }
 0xd12   :  { %v6938_v29 = vadd.f32 %v6864_v55, %v6584_v25  ;;  %v7000_v18 = vadd.f32 %v6999_v49, %v11089_v6  ;;  %v12747_v55 = vld [vmem:[#allocation60_spill] sm:$0xff] }
 0xd13   :  { %v5172_v1 = vadd.f32 %v12747_v55, %v12746_v40 }
 0xd14   :  { %v7001_v42 = vadd.f32 %v7000_v18, %v6938_v29  ;;  %v5814_v2 = vpop.f32.mrf.mxu2  ;;  %v6168_v48 = vpop.f32.mrf.mxu3 }
 0xd15   :  { %v5526_v25 = vadd.f32 %v12748_v47, %v5172_v1 }
 0xd17   :  { %v5880_v7 = vadd.f32 %v5814_v2, %v5526_v25 }
 0xd18   :  { %v6522_v38 = vpop.f32.mrf.mxu0 }
 0xd19   :  { %v6867_v56 = vpop.f32.mrf.mxu1  ;;  %v6234_v44 = vadd.f32 %v6168_v48, %v5880_v7 }
 0xd1a   :  { %v6939_v5 = vadd.f32 %v6867_v56, %v6585_v24 }
 0xd1b   :  { %v6588_v58 = vadd.f32 %v6522_v38, %v6234_v44 }
 0xd1c   :  { %v7002_v62 = vadd.f32 %v7001_v42, %v6939_v5 }
 0xd21   :  { %v6870_v43 = vpop.f32.mrf.mxu1 }
 0xd22   :  { %v6940_v45 = vadd.f32 %v6870_v43, %v6586_v37 }
 0xd24   :  { %v7003_v39 = vadd.f32 %v7002_v62, %v6940_v45 }
 0xd29   :  { %v6873_v22 = vpop.f32.mrf.mxu1 }
 0xd2a   :  { %v6941_v46 = vadd.f32 %v6873_v22, %v6587_v51 }
 0xd2c   :  { %v7004_v49 = vadd.f32 %v7003_v39, %v6941_v46 }
 0xd31   :  { %v6876_v24 = vpop.f32.mrf.mxu1 }
 0xd32   :  { %v6942_v18 = vadd.f32 %v6876_v24, %v6588_v58  ;;  %v12762_v24 = vld [vmem:[#allocation75_spill] sm:$0xff] }
 0xd34   :  { %v7005_v53 = vadd.f32 %v7004_v49, %v6942_v18 }
 0xd36   :  { %v7006_v56 = vrot.slane %v7005_v53, 4 }
 0xd38   :  { %v7007_v54 = vadd.f32 %v7006_v56, %v7005_v53  ;;  %v12764_v56 = vld [vmem:[#allocation95_spill] sm:$0xff] }
 0xd3a   :  { %v7008_v42 = vrot.slane %v7007_v54, 2 }
 0xd3c   :  { %v7009_v62 = vadd.f32 %v7008_v42, %v7007_v54 }
 0xd3e   :  { %v7010_v61 = vrot.slane %v7009_v62, 1 }
 0xd40   :  { %v7011_v3 = vadd.f32 %v7010_v61, %v7009_v62  ;;  %v12766_v62 = vld [vmem:[#allocation98_spill] sm:$0xff] }
 0xd42   :  { %v11102_v52 = vmul.f32 0.001953125, %v7011_v3 }
 0xd44   :  { %v11105_v59 = vsub.f32 %v6938_v29, %v11102_v52  ;;  %v11108_v34 = vsub.f32 %v6939_v5, %v11102_v52  ;;  %v11111_v27 = vsub.f32 %v6940_v45, %v11102_v52  ;;  %v11114_v30 = vsub.f32 %v6941_v46, %v11102_v52 }
 0xd45   :  { %v11117_v37 = vsub.f32 %v6942_v18, %v11102_v52  ;;  %v11121_v20 = vsub.f32 %v10743_v32, %v11102_v52  ;;  %v11125_v29 = vsub.f32 %v10735_v33, %v11102_v52  ;;  %v11129_v5 = vsub.f32 %v10746_v0, %v11102_v52 }
 0xd46   :  { %v11137_v45 = vsub.f32 %v10754_v41, %v11102_v52  ;;  %v11141_v32 = vsub.f32 %v10760_v31, %v11102_v52  ;;  %v11147_v0 = vsub.f32 %v10766_v17, %v11102_v52  ;;  %v11153_v41 = vsub.f32 %v10775_v23, %v11102_v52 }
 0xd47   :  { %12749 = vst [vmem:[#allocation110_spill] sm:$0xff] %v11125_v29  ;;  %v7077_v43 = vmul.f32 %v11121_v20, %v11121_v20  ;;  %v7078_v50 = vmul.f32 %v11125_v29, %v11125_v29  ;;  %v7079_v33 = vmul.f32 %v11129_v5, %v11129_v5  ;;  %v11159_v1 = vsub.f32 %v10781_v19, %v11102_v52 }
 0xd48   :  { %12750 = vst [vmem:[#allocation92_spill] sm:$0xff] %v11129_v5  ;;  %v7080_v39 = vmul.f32 %v11137_v45, %v11137_v45  ;;  %v7081_v31 = vmul.f32 %v11141_v32, %v11141_v32  ;;  %v7082_v17 = vmul.f32 %v11147_v0, %v11147_v0  ;;  %v11165_v2 = vsub.f32 %v10787_v13, %v11102_v52 }
 0xd49   :  { %12751 = vst [vmem:[#allocation113_spill] sm:$0xff] %v11137_v45  ;;  %v7141_v60 = vadd.f32 %v7078_v50, %v7077_v43  ;;  %v7083_v23 = vmul.f32 %v11153_v41, %v11153_v41  ;;  %v11171_v25 = vsub.f32 %v10793_v11, %v11102_v52  ;;  %v7084_v19 = vmul.f32 %v11159_v1, %v11159_v1  ;;  %v12768_v50 = vld [vmem:[#allocation81_spill] sm:$0xff] }
 0xd4a   :  { %12752 = vst [vmem:[#allocation68_spill] sm:$0xff] %v11141_v32  ;;  %v11177_v22 = vsub.f32 %v10802_v9, %v11102_v52  ;;  %v7085_v13 = vmul.f32 %v11165_v2, %v11165_v2  ;;  %v11183_v46 = vsub.f32 %v10808_v21, %v11102_v52  ;;  %v11189_v49 = vsub.f32 %v10814_v28, %v11102_v52 }
 0xd4b   :  { %12753 = vst [vmem:[#allocation63_spill] sm:$0xff] %v11147_v0  ;;  %v7142_v40 = vadd.f32 %v7141_v60, %v7079_v33  ;;  %v7086_v11 = vmul.f32 %v11171_v25, %v11171_v25  ;;  %v11195_v44 = vsub.f32 %v10820_v14, %v11102_v52  ;;  %v11201_v18 = vsub.f32 %v12762_v24, %v11102_v52 }
 0xd4c   :  { %12754 = vst [vmem:[#allocation56_spill] sm:$0xff] %v11153_v41  ;;  %v7087_v9 = vmul.f32 %v11177_v22, %v11177_v22  ;;  %v7088_v21 = vmul.f32 %v11183_v46, %v11183_v46  ;;  %v7089_v28 = vmul.f32 %v11189_v49, %v11189_v49  ;;  %v11207_v54 = vsub.f32 %v12764_v56, %v11102_v52  ;;  %v12778_v56 = vld [vmem:[#allocation41_spill] sm:$0xff] }
 0xd4d   :  { %v7143_v55 = vadd.f32 %v7142_v40, %v7080_v39  ;;  %12755 = vst [vmem:[#allocation114_spill] sm:$0xff] %v11159_v1  ;;  %v7090_v14 = vmul.f32 %v11195_v44, %v11195_v44  ;;  %v11213_v61 = vsub.f32 %v12766_v62, %v11102_v52  ;;  %v7091_v3 = vmul.f32 %v11201_v18, %v11201_v18  ;;  %v12770_v40 = vld [vmem:[#allocation97_spill] sm:$0xff] }
 0xd4e   :  { %12756 = vst [vmem:[#allocation65_spill] sm:$0xff] %v11165_v2  ;;  %v11219_v33 = vsub.f32 %v12768_v50, %v11102_v52  ;;  %v7092_v60 = vmul.f32 %v11207_v54, %v11207_v54  ;;  %v7136_v2 = vmul.f32 %v11105_v59, %v11105_v59 }
 0xd4f   :  { %v7144_v16 = vadd.f32 %v7143_v55, %v7081_v31  ;;  %12757 = vst [vmem:[#allocation59_spill] sm:$0xff] %v11171_v25  ;;  %v11225_v31 = vsub.f32 %v12770_v40, %v11102_v52  ;;  %v7093_v55 = vmul.f32 %v11213_v61, %v11213_v61 }
 0xd50   :  { %12758 = vst [vmem:[#allocation115_spill] sm:$0xff] %v11177_v22 }
 0xd51   :  { %v7145_v47 = vadd.f32 %v7144_v16, %v7082_v17  ;;  %12759 = vst [vmem:[#allocation62_spill] sm:$0xff] %v11183_v46  ;;  %v12772_v16 = vld [vmem:[#allocation100_spill] sm:$0xff] }
 0xd52   :  { %12760 = vst [vmem:[#allocation13_spill] sm:$0xff] %v11189_v49 }
 0xd53   :  { %v7146_v51 = vadd.f32 %v7145_v47, %v7083_v23  ;;  %12761 = vst [vmem:[#allocation116_spill] sm:$0xff] %v11195_v44  ;;  %v11231_v23 = vsub.f32 %v12772_v16, %v11102_v52  ;;  %v7094_v47 = vmul.f32 %v11219_v33, %v11219_v33  ;;  %v12781_v16 = vld [vmem:[#allocation78_spill] sm:$0xff] }
 0xd54   :  { %12763 = vst [vmem:[#allocation15_spill] sm:$0xff] %v11201_v18 }
 0xd55   :  { %v7147_v7 = vadd.f32 %v7146_v51, %v7084_v19  ;;  %12765 = vst [vmem:[#allocation14_spill] sm:$0xff] %v11207_v54  ;;  %v12774_v51 = vld [vmem:[#allocation77_spill] sm:$0xff] }
 0xd56   :  { %12767 = vst [vmem:[#allocation117_spill] sm:$0xff] %v11213_v61 }
 0xd57   :  { %v7148_v48 = vadd.f32 %v7147_v7, %v7085_v13  ;;  %12769 = vst [vmem:[#allocation32_spill] sm:$0xff] %v11219_v33  ;;  %v11237_v13 = vsub.f32 %v12774_v51, %v11102_v52  ;;  %v7095_v7 = vmul.f32 %v11225_v31, %v11225_v31 }
 0xd58   :  { %12771 = vst [vmem:[#allocation16_spill] sm:$0xff] %v11225_v31 }
 0xd59   :  { %v7149_v38 = vadd.f32 %v7148_v48, %v7086_v11  ;;  %12773 = vst [vmem:[#allocation17_spill] sm:$0xff] %v11231_v23  ;;  %v12776_v48 = vld [vmem:[#allocation99_spill] sm:$0xff] }
 0xd5a   :  { %12775 = vst [vmem:[#allocation118_spill] sm:$0xff] %v11237_v13 }
 0xd5b   :  { %v7150_v58 = vadd.f32 %v7149_v38, %v7087_v9  ;;  %v11243_v9 = vsub.f32 %v12776_v48, %v11102_v52  ;;  %v7096_v38 = vmul.f32 %v11231_v23, %v11231_v23 }
 0xd5d   :  { %v7151_v53 = vadd.f32 %v7150_v58, %v7088_v21  ;;  %v12777_v58 = vld [vmem:[#allocation102_spill] sm:$0xff] }
 0xd5e   :  { %v11249_v24 = vsub.f32 %v12777_v58, %v11102_v52 }
 0xd5f   :  { %v7152_v42 = vadd.f32 %v7151_v53, %v7089_v28  ;;  %v7097_v28 = vmul.f32 %v11237_v13, %v11237_v13 }
 0xd60   :  { %v7099_v50 = vmul.f32 %v11249_v24, %v11249_v24 }
 0xd61   :  { %v7153_v43 = vadd.f32 %v7152_v42, %v7090_v14  ;;  %v11255_v14 = vsub.f32 %v12778_v56, %v11102_v52  ;;  %v7098_v42 = vmul.f32 %v11243_v9, %v11243_v9  ;;  %v12784_v56 = vld [vmem:[#allocation70_spill] sm:$0xff] }
 0xd63   :  { %v7154_v39 = vadd.f32 %v7153_v43, %v7091_v3  ;;  %v12779_v3 = vld [vmem:[#allocation101_spill] sm:$0xff] }
 0xd64   :  { %v11261_v43 = vsub.f32 %v12779_v3, %v11102_v52 }
 0xd65   :  { %v7155_v17 = vadd.f32 %v7154_v39, %v7092_v60  ;;  %v12780_v39 = vld [vmem:[#allocation104_spill] sm:$0xff] }
 0xd66   :  { %v11267_v40 = vsub.f32 %v12780_v39, %v11102_v52 }
 0xd67   :  { %v7156_v19 = vadd.f32 %v7155_v17, %v7093_v55  ;;  %v7100_v55 = vmul.f32 %v11255_v14, %v11255_v14 }
 0xd68   :  { %v7102_v48 = vmul.f32 %v11267_v40, %v11267_v40 }
 0xd69   :  { %v7157_v11 = vadd.f32 %v7156_v19, %v7094_v47  ;;  %v11273_v47 = vsub.f32 %v12781_v16, %v11102_v52  ;;  %v7101_v19 = vmul.f32 %v11261_v43, %v11261_v43 }
 0xd6b   :  { %v7158_v21 = vadd.f32 %v7157_v11, %v7095_v7  ;;  %v12782_v7 = vld [vmem:[#allocation103_spill] sm:$0xff] }
 0xd6c   :  { %v11279_v11 = vsub.f32 %v12782_v7, %v11102_v52  ;;  %v12787_v7 = vld [vmem:[#allocation108_spill] sm:$0xff] }
 0xd6d   :  { %v7159_v53 = vadd.f32 %v7158_v21, %v7096_v38  ;;  %v12783_v21 = vld [vmem:[#allocation106_spill] sm:$0xff] }
 0xd6e   :  { %v11285_v58 = vsub.f32 %v12783_v21, %v11102_v52 }
 0xd6f   :  { %v7160_v62 = vadd.f32 %v7159_v53, %v7097_v28  ;;  %v7103_v28 = vmul.f32 %v11273_v47, %v11273_v47 }
 0xd70   :  { %v7105_v39 = vmul.f32 %v11285_v58, %v11285_v58 }
 0xd71   :  { %v7161_v60 = vadd.f32 %v7160_v62, %v7098_v42  ;;  %v11291_v42 = vsub.f32 %v12784_v56, %v11102_v52  ;;  %v7104_v62 = vmul.f32 %v11279_v11, %v11279_v11 }
 0xd73   :  { %v7162_v17 = vadd.f32 %v7161_v60, %v7099_v50  ;;  %v12785_v50 = vld [vmem:[#allocation66_spill] sm:$0xff] }
 0xd74   :  { %v11297_v60 = vsub.f32 %v12785_v50, %v11102_v52 }
 0xd75   :  { %v7163_v51 = vadd.f32 %v7162_v17, %v7100_v55  ;;  %v12786_v17 = vld [vmem:[#allocation105_spill] sm:$0xff] }
 0xd76   :  { %v11303_v16 = vsub.f32 %v12786_v17, %v11102_v52  ;;  %v12790_v17 = vld [vmem:[#allocation53_spill] sm:$0xff] }
 0xd77   :  { %v7164_v38 = vadd.f32 %v7163_v51, %v7101_v19  ;;  %v7106_v19 = vmul.f32 %v11291_v42, %v11291_v42 }
 0xd78   :  { %v7108_v56 = vmul.f32 %v11303_v16, %v11303_v16 }
 0xd79   :  { %v7165_v53 = vadd.f32 %v7164_v38, %v7102_v48  ;;  %v11309_v48 = vsub.f32 %v12787_v7, %v11102_v52  ;;  %v7107_v38 = vmul.f32 %v11297_v60, %v11297_v60  ;;  %v11327_v7 = vsub.f32 %v12790_v17, %v11102_v52  ;;  %v12793_v17 = vld [vmem:[#allocation88_spill] sm:$0xff] }
 0xd7a   :  { %v11345_v31 = vsub.f32 %v12793_v17, %v11102_v52  ;;  %v12796_v17 = vld [vmem:[#allocation130_spill] sm:$0xff] }
 0xd7b   :  { %v7166_v3 = vadd.f32 %v7165_v53, %v7103_v28  ;;  %v12788_v28 = vld [vmem:[#allocation80_spill] sm:$0xff]  ;;  %v11363_v54 = vsub.f32 %v12796_v17, %v11102_v52  ;;  %v12799_v17 = vld [vmem:[#allocation133_spill] sm:$0xff] }
 0xd7c   :  { %v11315_v53 = vsub.f32 %v12788_v28, %v11102_v52  ;;  %v12791_v28 = vld [vmem:[#allocation111_spill] sm:$0xff]  ;;  %v11381_v49 = vsub.f32 %v12799_v17, %v11102_v52  ;;  %v11399_v17 = vsub.f32 %v10796_v15, %v11102_v52 }
 0xd7d   :  { %v7167_v55 = vadd.f32 %v7166_v3, %v7104_v62  ;;  %v12789_v3 = vld [vmem:[#allocation107_spill] sm:$0xff]  ;;  %v11333_v13 = vsub.f32 %v12791_v28, %v11102_v52  ;;  %v12794_v28 = vld [vmem:[#allocation112_spill] sm:$0xff] }
 0xd7e   :  { %v11321_v50 = vsub.f32 %v12789_v3, %v11102_v52  ;;  %v12792_v3 = vld [vmem:[#allocation109_spill] sm:$0xff]  ;;  %v11351_v33 = vsub.f32 %v12794_v28, %v11102_v52  ;;  %v12797_v28 = vld [vmem:[#allocation131_spill] sm:$0xff]  ;;  %v7124_v15 = vmul.f32 %v11399_v17, %v11399_v17 }
 0xd7f   :  { %v7168_v51 = vadd.f32 %v7167_v55, %v7105_v39  ;;  %v7109_v39 = vmul.f32 %v11309_v48, %v11309_v48  ;;  %v11339_v23 = vsub.f32 %v12792_v3, %v11102_v52  ;;  %v12795_v3 = vld [vmem:[#allocation129_spill] sm:$0xff]  ;;  %v11369_v18 = vsub.f32 %v12797_v28, %v11102_v52  ;;  %v12800_v28 = vld [vmem:[#allocation134_spill] sm:$0xff] }
 0xd80   :  { %v11357_v61 = vsub.f32 %v12795_v3, %v11102_v52  ;;  %v12798_v3 = vld [vmem:[#allocation132_spill] sm:$0xff]  ;;  %v11387_v46 = vsub.f32 %v12800_v28, %v11102_v52 }
 0xd81   :  { %v7169_v21 = vadd.f32 %v7168_v51, %v7106_v19  ;;  %v7110_v19 = vmul.f32 %v11315_v53, %v11315_v53  ;;  %v11375_v44 = vsub.f32 %v12798_v3, %v11102_v52  ;;  %v11393_v3 = vsub.f32 %v10769_v8, %v11102_v52  ;;  %v12801_v28 = vld [vmem:[#allocation96_spill] sm:$0xff] }
 0xd82   :  { %v11405_v22 = vsub.f32 %v12801_v28, %v11102_v52  ;;  %v11423_v28 = vsub.f32 %v10914_v35, %v11102_v52 }
 0xd83   :  { %v7170_v62 = vadd.f32 %v7169_v21, %v7107_v38  ;;  %v7111_v38 = vmul.f32 %v11321_v50, %v11321_v50  ;;  %v7123_v8 = vmul.f32 %v11393_v3, %v11393_v3 }
 0xd84   :  { %v7128_v35 = vmul.f32 %v11423_v28, %v11423_v28 }
 0xd85   :  { %v7171_v55 = vadd.f32 %v7170_v62, %v7108_v56  ;;  %v7112_v56 = vmul.f32 %v11327_v7, %v11327_v7 }
 0xd87   :  { %v7172_v51 = vadd.f32 %v7171_v55, %v7109_v39  ;;  %v7113_v39 = vmul.f32 %v11333_v13, %v11333_v13 }
 0xd89   :  { %v7173_v21 = vadd.f32 %v7172_v51, %v7110_v19  ;;  %v7114_v19 = vmul.f32 %v11339_v23, %v11339_v23 }
 0xd8b   :  { %v7174_v62 = vadd.f32 %v7173_v21, %v7111_v38  ;;  %v7115_v38 = vmul.f32 %v11345_v31, %v11345_v31 }
 0xd8d   :  { %v7175_v55 = vadd.f32 %v7174_v62, %v7112_v56  ;;  %v7116_v56 = vmul.f32 %v11351_v33, %v11351_v33 }
 0xd8f   :  { %v7176_v51 = vadd.f32 %v7175_v55, %v7113_v39  ;;  %v7117_v39 = vmul.f32 %v11357_v61, %v11357_v61 }
 0xd91   :  { %v7177_v21 = vadd.f32 %v7176_v51, %v7114_v19  ;;  %v7118_v19 = vmul.f32 %v11363_v54, %v11363_v54 }
 0xd93   :  { %v7178_v62 = vadd.f32 %v7177_v21, %v7115_v38  ;;  %v7119_v38 = vmul.f32 %v11369_v18, %v11369_v18 }
 0xd95   :  { %v7179_v55 = vadd.f32 %v7178_v62, %v7116_v56  ;;  %v7120_v56 = vmul.f32 %v11375_v44, %v11375_v44 }
 0xd97   :  { %v7180_v51 = vadd.f32 %v7179_v55, %v7117_v39  ;;  %v7121_v39 = vmul.f32 %v11381_v49, %v11381_v49 }
 0xd99   :  { %v7181_v21 = vadd.f32 %v7180_v51, %v7118_v19  ;;  %v7122_v19 = vmul.f32 %v11387_v46, %v11387_v46 }
 0xd9b   :  { %v7182_v62 = vadd.f32 %v7181_v21, %v7119_v38  ;;  %v12802_v21 = vld [vmem:[#allocation58_spill] sm:$0xff] }
 0xd9c   :  { %v11411_v25 = vsub.f32 %v12802_v21, %v11102_v52  ;;  %v11429_v21 = vsub.f32 %v10945_v4, %v11102_v52 }
 0xd9d   :  { %v7183_v55 = vadd.f32 %v7182_v62, %v7120_v56  ;;  %v11417_v62 = vsub.f32 %v10883_v10, %v11102_v52 }
 0xd9e   :  { %v7129_v4 = vmul.f32 %v11429_v21, %v11429_v21 }
 0xd9f   :  { %v7184_v51 = vadd.f32 %v7183_v55, %v7121_v39  ;;  %v7125_v39 = vmul.f32 %v11405_v22, %v11405_v22  ;;  %v7127_v10 = vmul.f32 %v11417_v62, %v11417_v62 }
 0xda1   :  { %v7185_v38 = vadd.f32 %v7184_v51, %v7122_v19  ;;  %v7126_v19 = vmul.f32 %v11411_v25, %v11411_v25 }
 0xda3   :  { %v7186_v56 = vadd.f32 %v7185_v38, %v7123_v8  ;;  %v11435_v38 = vsub.f32 %v11065_v26, %v11102_v52 }
 0xda5   :  { %v7187_v55 = vadd.f32 %v7186_v56, %v7124_v15  ;;  %v11441_v56 = vsub.f32 %v11072_v63, %v11102_v52  ;;  %v7130_v26 = vmul.f32 %v11435_v38, %v11435_v38 }
 0xda7   :  { %v7188_v51 = vadd.f32 %v7187_v55, %v7125_v39  ;;  %v11447_v55 = vsub.f32 %v11078_v57, %v11102_v52  ;;  %v7131_v63 = vmul.f32 %v11441_v56, %v11441_v56 }
 0xda9   :  { %v7189_v8 = vadd.f32 %v7188_v51, %v7126_v19  ;;  %v11453_v51 = vsub.f32 %v11083_v12, %v11102_v52  ;;  %v7132_v57 = vmul.f32 %v11447_v55, %v11447_v55 }
 0xdab   :  { %v7190_v15 = vadd.f32 %v7189_v8, %v7127_v10  ;;  %v11459_v8 = vsub.f32 %v11086_v36, %v11102_v52  ;;  %v7133_v12 = vmul.f32 %v11453_v51, %v11453_v51 }
 0xdad   :  { %v7191_v39 = vadd.f32 %v7190_v15, %v7128_v35  ;;  %v11465_v15 = vsub.f32 %v11089_v6, %v11102_v52  ;;  %v7137_v6 = vmul.f32 %v11108_v34, %v11108_v34 }
 0xdaf   :  { %v7192_v19 = vadd.f32 %v7191_v39, %v7129_v4  ;;  %v7134_v39 = vmul.f32 %v11459_v8, %v11459_v8  ;;  %v7135_v36 = vmul.f32 %v11465_v15, %v11465_v15 }
 0xdb1   :  { %v7193_v10 = vadd.f32 %v7192_v19, %v7130_v26 }
 0xdb3   :  { %v7194_v35 = vadd.f32 %v7193_v10, %v7131_v63  ;;  %v7138_v10 = vmul.f32 %v11111_v27, %v11111_v27 }
 0xdb5   :  { %v7195_v4 = vadd.f32 %v7194_v35, %v7132_v57  ;;  %v7139_v35 = vmul.f32 %v11114_v30, %v11114_v30 }
 0xdb7   :  { %v7196_v26 = vadd.f32 %v7195_v4, %v7133_v12  ;;  %v7140_v4 = vmul.f32 %v11117_v37, %v11117_v37 }
 0xdb9   :  { %v7197_v19 = vadd.f32 %v7196_v26, %v7134_v39 }
 0xdbb   :  { %v7198_v63 = vadd.f32 %v7197_v19, %v7135_v36 }
 0xdbd   :  { %v7199_v52 = vadd.f32 %v7198_v63, %v7136_v2 }
 0xdbf   :  { %v7200_v57 = vadd.f32 %v7199_v52, %v7137_v6 }
 0xdc1   :  { %v7201_v12 = vadd.f32 %v7200_v57, %v7138_v10  ;;  %v7211_v10 = vld [vmem:[%s11822_s5] sm:$0x1]  ;;  %s7791_s5 = smov [#allocation9]  }
 0xdc3   :  { %v7202_v39 = vadd.f32 %v7201_v12, %v7139_v35  ;;  %v7422_v35 = vld [vmem:[#allocation3 + $0x1f8] sm:$0xff] }
 0xdc5   :  { %v7203_v26 = vadd.f32 %v7202_v39, %v7140_v4 }
 0xdc7   :  { %v7204_v1 = vrot.slane %v7203_v26, 4 }
 0xdc9   :  { %v7205_v41 = vadd.f32 %v7204_v1, %v7203_v26 }
 0xdcb   :  { %v7206_v36 = vrot.slane %v7205_v41, 2 }
 0xdcd   :  { %v7207_v19 = vadd.f32 %v7206_v36, %v7205_v41 }
 0xdcf   :  { %v7208_v0 = vrot.slane %v7207_v19, 1 }
 0xdd1   :  { %v7209_v32 = vadd.f32 %v7208_v0, %v7207_v19 }
 0xdd3   :  { %v7210_v2 = vmul.f32 0.001953125, %v7209_v32  ;;  %v11489_v32 = vld [vmem:[%s11823_s6] ss:$0 sm:$0xff]  ;;  %s7619_s6 = sshll.u32 %s7791_s5, 4  ;;  %s7620_s6 = int_to_ptr.vmem [resolvable:$true] %s7619_s6 }
 0xdd5   :  { %v7212_v63 = vadd.f32 1e-05, %v7210_v2 }
 0xdd7   :  { %7678 = vrsqrt.f32 %v7212_v63  ;;  %vm7219_vm4 = vweird.f32 %v7212_v63 }
 0xddd   :  { %v7679_v45 = vpop.eup %7678 }
 0xdde   :  { %v7214_v6 = vmul.f32 %v7679_v45, %v7212_v63  ;;  %vm7220_vm3 = vweird.f32 %v7679_v45 }
 0xddf   :  { %vm7221_vm5 = vmor %vm7219_vm4, %vm7220_vm3 }
 0xde0   :  { %v7215_v52 = vmul.f32 %v7679_v45, %v7214_v6 }
 0xde2   :  { %v7216_v5 = vmul.f32 0.5, %v7215_v52 }
 0xde4   :  { %v7217_v29 = vsub.f32 1.5, %v7216_v5 }
 0xde6   :  { %v7218_v57 = vmul.f32 %v7679_v45, %v7217_v29 }
 0xde8   :  { %v7222_v1 = vsel %vm7221_vm5, %v7679_v45, %v7218_v57 }
 0xde9   :  { %v7223_v41 = vmul.f32 %v7222_v1, %v7211_v10 }
 0xdeb   :  { %v11491_v0 = vperm.slane %v7223_v41, 0 }
 0xded   :  { %v7290_v5 = vmul.f32 %v11491_v0, %v11117_v37  ;;  %v7248_v29 = vmul.f32 %v11491_v0, %v11243_v9  ;;  %v7249_v45 = vmul.f32 %v11491_v0, %v11249_v24  ;;  %v7250_v26 = vmul.f32 %v11491_v0, %v11255_v14 }
 0xdee   :  { %v7251_v36 = vmul.f32 %v11491_v0, %v11261_v43  ;;  %v7252_v37 = vmul.f32 %v11491_v0, %v11267_v40  ;;  %v7253_v19 = vmul.f32 %v11491_v0, %v11273_v47  ;;  %v7254_v2 = vmul.f32 %v11491_v0, %v11279_v11 }
 0xdef   :  { %v7358_v12 = vadd.f32 %v11489_v32, %v7290_v5  ;;  %v7255_v9 = vmul.f32 %v11491_v0, %v11285_v58  ;;  %v7256_v24 = vmul.f32 %v11491_v0, %v11291_v42  ;;  %v7257_v14 = vmul.f32 %v11491_v0, %v11297_v60 }
 0xdf0   :  { %v7258_v43 = vmul.f32 %v11491_v0, %v11303_v16  ;;  %v7259_v40 = vmul.f32 %v11491_v0, %v11309_v48  ;;  %v7260_v47 = vmul.f32 %v11491_v0, %v11315_v53  ;;  %v7261_v11 = vmul.f32 %v11491_v0, %v11321_v50 }
 0xdf1   :  { %v7486_v4 = vadd.f32 %v7422_v35, %v7358_v12  ;;  %v7262_v58 = vmul.f32 %v11491_v0, %v11327_v7  ;;  %v7263_v42 = vmul.f32 %v11491_v0, %v11333_v13  ;;  %v7264_v60 = vmul.f32 %v11491_v0, %v11339_v23 }
 0xdf2   :  { %v7265_v16 = vmul.f32 %v11491_v0, %v11345_v31  ;;  %v7266_v48 = vmul.f32 %v11491_v0, %v11351_v33  ;;  %v7267_v53 = vmul.f32 %v11491_v0, %v11357_v61  ;;  %v7268_v50 = vmul.f32 %v11491_v0, %v11363_v54 }
 0xdf3   :  { %v7550_v39 = vmax.f32 %v7486_v4, 0.0  ;;  %v7269_v7 = vmul.f32 %v11491_v0, %v11369_v18  ;;  %v7270_v13 = vmul.f32 %v11491_v0, %v11375_v44  ;;  %v7271_v23 = vmul.f32 %v11491_v0, %v11381_v49 }
 0xdf4   :  { %v7272_v31 = vmul.f32 %v11491_v0, %v11387_v46  ;;  %v7273_v33 = vmul.f32 %v11491_v0, %v11393_v3  ;;  %v7274_v61 = vmul.f32 %v11491_v0, %v11399_v17  ;;  %v7275_v54 = vmul.f32 %v11491_v0, %v11405_v22 }
 0xdf5   :  { %7614 = vst [vmem:[#allocation9 + $0x1f8] sm:$0xff] %v7550_v39  ;;  %v7276_v18 = vmul.f32 %v11491_v0, %v11411_v25  ;;  %v7277_v44 = vmul.f32 %v11491_v0, %v11417_v62  ;;  %v7278_v49 = vmul.f32 %v11491_v0, %v11423_v28  ;;  %v7279_v46 = vmul.f32 %v11491_v0, %v11429_v21 }
 0xdf6   :  { %v7280_v3 = vmul.f32 %v11491_v0, %v11435_v38  ;;  %v7281_v17 = vmul.f32 %v11491_v0, %v11441_v56  ;;  %v7282_v22 = vmul.f32 %v11491_v0, %v11447_v55  ;;  %v7283_v25 = vmul.f32 %v11491_v0, %v11453_v51 }
 0xdf7   :  { %v7284_v62 = vmul.f32 %v11491_v0, %v11459_v8  ;;  %v7285_v28 = vmul.f32 %v11491_v0, %v11465_v15  ;;  %v7286_v21 = vmul.f32 %v11491_v0, %v11105_v59  ;;  %v7287_v38 = vmul.f32 %v11491_v0, %v11108_v34 }
 0xdf8   :  { %v7288_v56 = vmul.f32 %v11491_v0, %v11111_v27  ;;  %v7289_v55 = vmul.f32 %v11491_v0, %v11114_v30  ;;  %v11581_v51 = vadd.f32 %v11489_v32, %v7248_v29  ;;  %v11584_v8 = vadd.f32 %v11489_v32, %v7249_v45 }
 0xdf9   :  { %v11587_v15 = vadd.f32 %v11489_v32, %v7250_v26  ;;  %v11590_v59 = vadd.f32 %v11489_v32, %v7251_v36  ;;  %v11593_v34 = vadd.f32 %v11489_v32, %v7252_v37  ;;  %v11596_v27 = vadd.f32 %v11489_v32, %v7253_v19 }
 0xdfa   :  { %v11599_v30 = vadd.f32 %v11489_v32, %v7254_v2  ;;  %v11602_v63 = vadd.f32 %v11489_v32, %v7255_v9  ;;  %v11605_v6 = vadd.f32 %v11489_v32, %v7256_v24  ;;  %v11608_v52 = vadd.f32 %v11489_v32, %v7257_v14 }
 0xdfb   :  { %v11611_v10 = vadd.f32 %v11489_v32, %v7258_v43  ;;  %v11614_v57 = vadd.f32 %v11489_v32, %v7259_v40  ;;  %v11617_v1 = vadd.f32 %v11489_v32, %v7260_v47  ;;  %v11620_v41 = vadd.f32 %v11489_v32, %v7261_v11 }
 0xdfc   :  { %v11623_v5 = vadd.f32 %v11489_v32, %v7262_v58  ;;  %v11626_v35 = vadd.f32 %v11489_v32, %v7263_v42  ;;  %v11629_v12 = vadd.f32 %v11489_v32, %v7264_v60  ;;  %v11632_v4 = vadd.f32 %v11489_v32, %v7265_v16 }
 0xdfd   :  { %v11635_v39 = vadd.f32 %v11489_v32, %v7266_v48  ;;  %v11638_v29 = vadd.f32 %v11489_v32, %v7267_v53  ;;  %v11641_v45 = vadd.f32 %v11489_v32, %v7268_v50  ;;  %v11644_v26 = vadd.f32 %v11489_v32, %v7269_v7 }
 0xdfe   :  { %v11647_v36 = vadd.f32 %v11489_v32, %v7270_v13  ;;  %v11650_v37 = vadd.f32 %v11489_v32, %v7271_v23  ;;  %v11653_v19 = vadd.f32 %v11489_v32, %v7272_v31  ;;  %v11656_v2 = vadd.f32 %v11489_v32, %v7273_v33  ;;  %v12818_v31 = vld [vmem:[#allocation110_spill] sm:$0xff] }
 0xdff   :  { %v11659_v9 = vadd.f32 %v11489_v32, %v7274_v61  ;;  %v11662_v24 = vadd.f32 %v11489_v32, %v7275_v54  ;;  %v11665_v14 = vadd.f32 %v11489_v32, %v7276_v18  ;;  %v11668_v43 = vadd.f32 %v11489_v32, %v7277_v44  ;;  %v12819_v61 = vld [vmem:[#allocation92_spill] sm:$0xff]  ;;  %v12820_v18 = vld [vmem:[#allocation113_spill] sm:$0xff] }
 0xe00   :  { %v11671_v40 = vadd.f32 %v11489_v32, %v7278_v49  ;;  %v11674_v47 = vadd.f32 %v11489_v32, %v7279_v46  ;;  %v11677_v11 = vadd.f32 %v11489_v32, %v7280_v3  ;;  %v11680_v58 = vadd.f32 %v11489_v32, %v7281_v17  ;;  %v12821_v49 = vld [vmem:[#allocation68_spill] sm:$0xff]  ;;  %v12822_v3 = vld [vmem:[#allocation63_spill] sm:$0xff] }
 0xe01   :  { %12803 = vst [vmem:[#allocation18_spill] sm:$0xff] %v11662_v24  ;;  %v11683_v42 = vadd.f32 %v11489_v32, %v7282_v22  ;;  %v11686_v60 = vadd.f32 %v11489_v32, %v7283_v25  ;;  %v11689_v16 = vadd.f32 %v11489_v32, %v7284_v62  ;;  %v11692_v48 = vadd.f32 %v11489_v32, %v7285_v28  ;;  %v12823_v22 = vld [vmem:[#allocation56_spill] sm:$0xff] }
 0xe02   :  { %12804 = vst [vmem:[#allocation19_spill] sm:$0xff] %v11665_v14  ;;  %v11695_v53 = vadd.f32 %v11489_v32, %v7286_v21  ;;  %v11698_v50 = vadd.f32 %v11489_v32, %v7287_v38  ;;  %v11701_v7 = vadd.f32 %v11489_v32, %v7288_v56  ;;  %v11704_v13 = vadd.f32 %v11489_v32, %v7289_v55  ;;  %v7359_v21 = vld [vmem:[#allocation3] sm:$0xff]  ;;  %v7360_v38 = vld [vmem:[#allocation3 + $0x8] sm:$0xff]  ;;  %v7361_v56 = vld [vmem:[#allocation3 + $0x10] sm:$0xff] }
 0xe03   :  { %12805 = vst [vmem:[#allocation119_spill] sm:$0xff] %v11668_v43  ;;  %v7227_v23 = vmul.f32 %v11491_v0, %v11121_v20  ;;  %v7228_v33 = vmul.f32 %v11491_v0, %v12818_v31  ;;  %v7229_v54 = vmul.f32 %v11491_v0, %v12819_v61  ;;  %v7230_v44 = vmul.f32 %v11491_v0, %v12820_v18  ;;  %v12824_v55 = vld [vmem:[#allocation114_spill] sm:$0xff]  ;;  %v7362_v18 = vld [vmem:[#allocation3 + $0x18] sm:$0xff]  ;;  %v7369_v43 = vld [vmem:[#allocation3 + $0x50] sm:$0xff] }
 0xe04   :  { %12806 = vst [vmem:[#allocation20_spill] sm:$0xff] %v11671_v40  ;;  %v7231_v46 = vmul.f32 %v11491_v0, %v12821_v49  ;;  %v7232_v17 = vmul.f32 %v11491_v0, %v12822_v3  ;;  %v7233_v25 = vmul.f32 %v11491_v0, %v12823_v22  ;;  %v7234_v31 = vmul.f32 %v11491_v0, %v12824_v55  ;;  %v12825_v49 = vld [vmem:[#allocation65_spill] sm:$0xff]  ;;  %v12832_v14 = vld [vmem:[#allocation14_spill] sm:$0xff]  ;;  %v7370_v24 = vld [vmem:[#allocation3 + $0x58] sm:$0xff] }
 0xe05   :  { %12807 = vst [vmem:[#allocation21_spill] sm:$0xff] %v11674_v47  ;;  %v7295_v20 = vadd.f32 %v11489_v32, %v7227_v23  ;;  %v7296_v62 = vadd.f32 %v11489_v32, %v7228_v33  ;;  %v7297_v28 = vadd.f32 %v11489_v32, %v7229_v54  ;;  %v7298_v61 = vadd.f32 %v11489_v32, %v7230_v44  ;;  %v12826_v23 = vld [vmem:[#allocation59_spill] sm:$0xff] }
 0xe06   :  { %12808 = vst [vmem:[#allocation120_spill] sm:$0xff] %v11677_v11  ;;  %v7235_v3 = vmul.f32 %v11491_v0, %v12825_v49  ;;  %v7299_v22 = vadd.f32 %v11489_v32, %v7231_v46  ;;  %v7236_v33 = vmul.f32 %v11491_v0, %v12826_v23  ;;  %v7301_v55 = vadd.f32 %v11489_v32, %v7233_v25  ;;  %v7366_v11 = vld [vmem:[#allocation3 + $0x38] sm:$0xff]  ;;  %v12829_v23 = vld [vmem:[#allocation13_spill] sm:$0xff] }
 0xe07   :  { %12809 = vst [vmem:[#allocation22_spill] sm:$0xff] %v11680_v58  ;;  %v7424_v44 = vadd.f32 %v7360_v38, %v7296_v62  ;;  %v7302_v46 = vadd.f32 %v11489_v32, %v7234_v31  ;;  %v7426_v58 = vadd.f32 %v7362_v18, %v7298_v61  ;;  %v7239_v47 = vmul.f32 %v11491_v0, %v12829_v23  ;;  %v12831_v62 = vld [vmem:[#allocation15_spill] sm:$0xff] }
 0xe08   :  { %12810 = vst [vmem:[#allocation23_spill] sm:$0xff] %v11683_v42  ;;  %v12828_v42 = vld [vmem:[#allocation62_spill] sm:$0xff]  ;;  %v7303_v40 = vadd.f32 %v11489_v32, %v7235_v3 }
 0xe09   :  { %12811 = vst [vmem:[#allocation121_spill] sm:$0xff] %v11686_v60  ;;  %v7365_v60 = vld [vmem:[#allocation3 + $0x30] sm:$0xff]  ;;  %v7238_v49 = vmul.f32 %v11491_v0, %v12828_v42  ;;  %v7488_v18 = vmax.f32 %v7424_v44, 0.0  ;;  %v7430_v3 = vadd.f32 %v7366_v11, %v7302_v46  ;;  %v7372_v11 = vld [vmem:[#allocation3 + $0x68] sm:$0xff] }
 0xe0a   :  { %12812 = vst [vmem:[#allocation39_spill] sm:$0xff] %v11689_v16  ;;  %v7425_v16 = vadd.f32 %v7361_v56, %v7297_v28  ;;  %v7241_v28 = vmul.f32 %v11491_v0, %v12831_v62  ;;  %v7368_v56 = vld [vmem:[#allocation3 + $0x48] sm:$0xff]  ;;  %v7429_v31 = vadd.f32 %v7365_v60, %v7301_v55  ;;  %v12833_v62 = vld [vmem:[#allocation117_spill] sm:$0xff] }
 0xe0b   :  { %12813 = vst [vmem:[#allocation24_spill] sm:$0xff] %v11692_v48  ;;  %v7423_v48 = vadd.f32 %v7359_v21, %v7295_v20  ;;  %v7367_v20 = vld [vmem:[#allocation3 + $0x40] sm:$0xff]  ;;  %v7304_v21 = vadd.f32 %v11489_v32, %v7236_v33  ;;  %v7243_v33 = vmul.f32 %v11491_v0, %v12833_v62 }
 0xe0c   :  { %12814 = vst [vmem:[#allocation25_spill] sm:$0xff] %v11695_v53  ;;  %v7364_v53 = vld [vmem:[#allocation3 + $0x28] sm:$0xff]  ;;  %v7489_v23 = vmax.f32 %v7425_v16, 0.0  ;;  %v7371_v60 = vld [vmem:[#allocation3 + $0x60] sm:$0xff]  ;;  %v7309_v46 = vadd.f32 %v11489_v32, %v7241_v28 }
 0xe0d   :  { %12815 = vst [vmem:[#allocation122_spill] sm:$0xff] %v11698_v50  ;;  %v7300_v50 = vadd.f32 %v11489_v32, %v7232_v17  ;;  %v7487_v61 = vmax.f32 %v7423_v48, 0.0  ;;  %v12834_v48 = vld [vmem:[#allocation32_spill] sm:$0xff] }
 0xe0e   :  { %12816 = vst [vmem:[#allocation26_spill] sm:$0xff] %v11701_v7  ;;  %v12827_v7 = vld [vmem:[#allocation115_spill] sm:$0xff]  ;;  %v7244_v16 = vmul.f32 %v11491_v0, %v12834_v48 }
 0xe0f   :  { %12817 = vst [vmem:[#allocation27_spill] sm:$0xff] %v11704_v13  ;;  %v7363_v13 = vld [vmem:[#allocation3 + $0x20] sm:$0xff]  ;;  %v7237_v54 = vmul.f32 %v11491_v0, %v12827_v7  ;;  %v12830_v7 = vld [vmem:[#allocation116_spill] sm:$0xff]  ;;  %v7428_v38 = vadd.f32 %v7364_v53, %v7300_v50  ;;  %v7431_v53 = vadd.f32 %v7367_v20, %v7303_v40  ;;  %v7373_v40 = vld [vmem:[#allocation3 + $0x70] sm:$0xff] }
 0xe10   :  { %v7240_v17 = vmul.f32 %v11491_v0, %v12830_v7  ;;  %v7427_v25 = vadd.f32 %v7363_v13, %v7299_v22  ;;  %v7242_v7 = vmul.f32 %v11491_v0, %v12832_v14  ;;  %v7306_v13 = vadd.f32 %v11489_v32, %v7238_v49  ;;  %7551 = vst [vmem:[#allocation9] sm:$0xff] %v7487_v61 }
 0xe11   :  { %v7305_v42 = vadd.f32 %v11489_v32, %v7237_v54  ;;  %v7490_v22 = vmax.f32 %v7426_v58, 0.0  ;;  %v7307_v54 = vadd.f32 %v11489_v32, %v7239_v47  ;;  %v7432_v14 = vadd.f32 %v7368_v56, %v7304_v21  ;;  %7552 = vst [vmem:[#allocation9 + $0x8] sm:$0xff] %v7488_v18  ;;  %v12835_v58 = vld [vmem:[#allocation16_spill] sm:$0xff] }
 0xe12   :  { %v7491_v50 = vmax.f32 %v7427_v25, 0.0  ;;  %v7308_v55 = vadd.f32 %v11489_v32, %v7240_v17  ;;  %v7492_v44 = vmax.f32 %v7428_v38, 0.0  ;;  %v7245_v49 = vmul.f32 %v11491_v0, %v12835_v58  ;;  %7553 = vst [vmem:[#allocation9 + $0x10] sm:$0xff] %v7489_v23  ;;  %v12836_v25 = vld [vmem:[#allocation17_spill] sm:$0xff]  ;;  %v7374_v21 = vld [vmem:[#allocation3 + $0x78] sm:$0xff]  ;;  %v12837_v38 = vld [vmem:[#allocation118_spill] sm:$0xff] }
 0xe13   :  { %v7433_v62 = vadd.f32 %v7369_v43, %v7305_v42  ;;  %v7493_v47 = vmax.f32 %v7429_v31, 0.0  ;;  %v7246_v20 = vmul.f32 %v11491_v0, %v12836_v25  ;;  %v7310_v61 = vadd.f32 %v11489_v32, %v7242_v7  ;;  %7554 = vst [vmem:[#allocation9 + $0x18] sm:$0xff] %v7490_v22  ;;  %v7375_v43 = vld [vmem:[#allocation3 + $0x80] sm:$0xff]  ;;  %v7376_v25 = vld [vmem:[#allocation3 + $0x88] sm:$0xff] }
 0xe14   :  { %v7434_v48 = vadd.f32 %v7370_v24, %v7306_v13  ;;  %v7494_v17 = vmax.f32 %v7430_v3, 0.0  ;;  %v7247_v56 = vmul.f32 %v11491_v0, %v12837_v38  ;;  %v7311_v18 = vadd.f32 %v11489_v32, %v7243_v33  ;;  %7555 = vst [vmem:[#allocation9 + $0x20] sm:$0xff] %v7491_v50  ;;  %v7377_v3 = vld [vmem:[#allocation3 + $0x90] sm:$0xff] }
 0xe15   :  { %v7435_v58 = vadd.f32 %v7371_v60, %v7307_v54  ;;  %v7495_v28 = vmax.f32 %v7431_v53, 0.0  ;;  %v7312_v42 = vadd.f32 %v11489_v32, %v7244_v16  ;;  %v7436_v31 = vadd.f32 %v7372_v11, %v7308_v55  ;;  %7556 = vst [vmem:[#allocation9 + $0x28] sm:$0xff] %v7492_v44  ;;  %v7378_v54 = vld [vmem:[#allocation3 + $0x98] sm:$0xff]  ;;  %v7379_v16 = vld [vmem:[#allocation3 + $0xa0] sm:$0xff]  ;;  %v7380_v44 = vld [vmem:[#allocation3 + $0xa8] sm:$0xff] }
 0xe16   :  { %v7496_v23 = vmax.f32 %v7432_v14, 0.0  ;;  %v7313_v24 = vadd.f32 %v11489_v32, %v7245_v49  ;;  %v7437_v7 = vadd.f32 %v7373_v40, %v7309_v46  ;;  %v7497_v13 = vmax.f32 %v7433_v62, 0.0  ;;  %7557 = vst [vmem:[#allocation9 + $0x30] sm:$0xff] %v7493_v47  ;;  %v7381_v46 = vld [vmem:[#allocation3 + $0xb0] sm:$0xff]  ;;  %v7382_v40 = vld [vmem:[#allocation3 + $0xb8] sm:$0xff] }
 0xe17   :  { %v7314_v0 = vadd.f32 %v11489_v32, %v7246_v20  ;;  %v7438_v22 = vadd.f32 %v7374_v21, %v7310_v61  ;;  %v7498_v33 = vmax.f32 %v7434_v48, 0.0  ;;  %7558 = vst [vmem:[#allocation9 + $0x38] sm:$0xff] %v7494_v17  ;;  %v7315_v53 = vadd.f32 %v11489_v32, %v7247_v56  ;;  %v7383_v32 = vld [vmem:[#allocation3 + $0xc0] sm:$0xff]  ;;  %v7384_v21 = vld [vmem:[#allocation3 + $0xc8] sm:$0xff] }
 0xe18   :  { %v7439_v50 = vadd.f32 %v7375_v43, %v7311_v18  ;;  %v7499_v60 = vmax.f32 %v7435_v58, 0.0  ;;  %7559 = vst [vmem:[#allocation9 + $0x40] sm:$0xff] %v7495_v28  ;;  %v7440_v55 = vadd.f32 %v7376_v25, %v7312_v42  ;;  %v7500_v14 = vmax.f32 %v7436_v31, 0.0  ;;  %v7385_v18 = vld [vmem:[#allocation3 + $0xd0] sm:$0xff]  ;;  %v7386_v43 = vld [vmem:[#allocation3 + $0xd8] sm:$0xff] }
 0xe19   :  { %7560 = vst [vmem:[#allocation9 + $0x48] sm:$0xff] %v7496_v23  ;;  %v7441_v11 = vadd.f32 %v7377_v3, %v7313_v24  ;;  %v7501_v49 = vmax.f32 %v7437_v7, 0.0  ;;  %v7442_v62 = vadd.f32 %v7378_v54, %v7314_v0  ;;  %v7502_v47 = vmax.f32 %v7438_v22, 0.0  ;;  %v7387_v23 = vld [vmem:[#allocation3 + $0xe0] sm:$0xff]  ;;  %v7388_v24 = vld [vmem:[#allocation3 + $0xe8] sm:$0xff]  ;;  %v7390_v0 = vld [vmem:[#allocation3 + $0xf8] sm:$0xff] }
 0xe1a   :  { %7561 = vst [vmem:[#allocation9 + $0x50] sm:$0xff] %v7497_v13  ;;  %v7443_v20 = vadd.f32 %v7379_v16, %v7315_v53  ;;  %v7503_v61 = vmax.f32 %v7439_v50, 0.0  ;;  %v7444_v48 = vadd.f32 %v7380_v44, %v11581_v51  ;;  %v7504_v17 = vmax.f32 %v7440_v55, 0.0  ;;  %v7389_v13 = vld [vmem:[#allocation3 + $0xf0] sm:$0xff]  ;;  %v7392_v53 = vld [vmem:[#allocation3 + $0x108] sm:$0xff]  ;;  %v7394_v55 = vld [vmem:[#allocation3 + $0x118] sm:$0xff] }
 0xe1b   :  { %7562 = vst [vmem:[#allocation9 + $0x58] sm:$0xff] %v7498_v33  ;;  %v7445_v38 = vadd.f32 %v7381_v46, %v11584_v8  ;;  %v7505_v56 = vmax.f32 %v7441_v11, 0.0  ;;  %v7446_v58 = vadd.f32 %v7382_v40, %v11587_v15  ;;  %v7506_v28 = vmax.f32 %v7442_v62, 0.0  ;;  %v7391_v33 = vld [vmem:[#allocation3 + $0x100] sm:$0xff]  ;;  %v7397_v62 = vld [vmem:[#allocation3 + $0x130] sm:$0xff]  ;;  %v7398_v40 = vld [vmem:[#allocation3 + $0x138] sm:$0xff] }
 0xe1c   :  { %7563 = vst [vmem:[#allocation9 + $0x60] sm:$0xff] %v7499_v60  ;;  %v7447_v42 = vadd.f32 %v7383_v32, %v11590_v59  ;;  %v7507_v31 = vmax.f32 %v7443_v20, 0.0  ;;  %v7448_v51 = vadd.f32 %v7384_v21, %v11593_v34  ;;  %v7508_v25 = vmax.f32 %v7444_v48, 0.0  ;;  %v7393_v60 = vld [vmem:[#allocation3 + $0x110] sm:$0xff]  ;;  %v7395_v44 = vld [vmem:[#allocation3 + $0x120] sm:$0xff]  ;;  %v7400_v48 = vld [vmem:[#allocation3 + $0x148] sm:$0xff] }
 0xe1d   :  { %7564 = vst [vmem:[#allocation9 + $0x68] sm:$0xff] %v7500_v14  ;;  %v7449_v8 = vadd.f32 %v7385_v18, %v11596_v27  ;;  %v7509_v7 = vmax.f32 %v7445_v38, 0.0  ;;  %v7450_v15 = vadd.f32 %v7386_v43, %v11599_v30  ;;  %v7510_v3 = vmax.f32 %v7446_v58, 0.0  ;;  %v7401_v21 = vld [vmem:[#allocation3 + $0x150] sm:$0xff]  ;;  %v7403_v58 = vld [vmem:[#allocation3 + $0x160] sm:$0xff]  ;;  %v7404_v43 = vld [vmem:[#allocation3 + $0x168] sm:$0xff] }
 0xe1e   :  { %7565 = vst [vmem:[#allocation9 + $0x70] sm:$0xff] %v7501_v49  ;;  %v7451_v59 = vadd.f32 %v7387_v23, %v11602_v63  ;;  %v7511_v22 = vmax.f32 %v7447_v42, 0.0  ;;  %v7452_v34 = vadd.f32 %v7388_v24, %v11605_v6  ;;  %v7512_v54 = vmax.f32 %v7448_v51, 0.0  ;;  %v7396_v49 = vld [vmem:[#allocation3 + $0x128] sm:$0xff]  ;;  %v7406_v51 = vld [vmem:[#allocation3 + $0x178] sm:$0xff]  ;;  %v7407_v24 = vld [vmem:[#allocation3 + $0x180] sm:$0xff] }
 0xe1f   :  { %7566 = vst [vmem:[#allocation9 + $0x78] sm:$0xff] %v7502_v47  ;;  %v7453_v27 = vadd.f32 %v7389_v13, %v11608_v52  ;;  %v7513_v50 = vmax.f32 %v7449_v8, 0.0  ;;  %v7454_v30 = vadd.f32 %v7390_v0, %v11611_v10  ;;  %v7514_v16 = vmax.f32 %v7450_v15, 0.0  ;;  %v7409_v15 = vld [vmem:[#allocation3 + $0x190] sm:$0xff]  ;;  %v7410_v0 = vld [vmem:[#allocation3 + $0x198] sm:$0xff] }
 0xe20   :  { %7567 = vst [vmem:[#allocation9 + $0x80] sm:$0xff] %v7503_v61  ;;  %v7455_v63 = vadd.f32 %v7391_v33, %v11614_v57  ;;  %v7515_v14 = vmax.f32 %v7451_v59, 0.0  ;;  %v7456_v6 = vadd.f32 %v7392_v53, %v11617_v1  ;;  %v7516_v11 = vmax.f32 %v7452_v34, 0.0  ;;  %v7399_v61 = vld [vmem:[#allocation3 + $0x140] sm:$0xff]  ;;  %v12838_v59 = vld [vmem:[#allocation18_spill] sm:$0xff]  ;;  %v12839_v34 = vld [vmem:[#allocation19_spill] sm:$0xff] }
 0xe21   :  { %7568 = vst [vmem:[#allocation9 + $0x88] sm:$0xff] %v7504_v17  ;;  %v7457_v52 = vadd.f32 %v7393_v60, %v11620_v41  ;;  %v7517_v46 = vmax.f32 %v7453_v27, 0.0  ;;  %v7458_v10 = vadd.f32 %v7394_v55, %v11623_v5  ;;  %v7518_v47 = vmax.f32 %v7454_v30, 0.0  ;;  %v7411_v33 = vld [vmem:[#allocation3 + $0x1a0] sm:$0xff]  ;;  %v7412_v53 = vld [vmem:[#allocation3 + $0x1a8] sm:$0xff]  ;;  %v12840_v27 = vld [vmem:[#allocation119_spill] sm:$0xff] }
 0xe22   :  { %7569 = vst [vmem:[#allocation9 + $0x90] sm:$0xff] %v7505_v56  ;;  %v7459_v57 = vadd.f32 %v7395_v44, %v11626_v35  ;;  %v7519_v20 = vmax.f32 %v7455_v63, 0.0  ;;  %v7460_v1 = vadd.f32 %v7396_v49, %v11629_v12  ;;  %v7520_v32 = vmax.f32 %v7456_v6, 0.0  ;;  %v7402_v56 = vld [vmem:[#allocation3 + $0x158] sm:$0xff]  ;;  %v7413_v60 = vld [vmem:[#allocation3 + $0x1b0] sm:$0xff]  ;;  %v12842_v63 = vld [vmem:[#allocation21_spill] sm:$0xff] }
 0xe23   :  { %7570 = vst [vmem:[#allocation9 + $0x98] sm:$0xff] %v7506_v28  ;;  %v7461_v41 = vadd.f32 %v7397_v62, %v11632_v4  ;;  %v7521_v17 = vmax.f32 %v7457_v52, 0.0  ;;  %v7462_v5 = vadd.f32 %v7398_v40, %v11635_v39  ;;  %v7522_v38 = vmax.f32 %v7458_v10, 0.0  ;;  %v12841_v30 = vld [vmem:[#allocation20_spill] sm:$0xff]  ;;  %v7415_v6 = vld [vmem:[#allocation3 + $0x1c0] sm:$0xff]  ;;  %v12844_v62 = vld [vmem:[#allocation22_spill] sm:$0xff] }
 0xe24   :  { %7571 = vst [vmem:[#allocation9 + $0xa0] sm:$0xff] %v7507_v31  ;;  %v7463_v35 = vadd.f32 %v7399_v61, %v11638_v29  ;;  %v7523_v18 = vmax.f32 %v7459_v57, 0.0  ;;  %v7464_v12 = vadd.f32 %v7400_v48, %v11641_v45  ;;  %v7524_v28 = vmax.f32 %v7460_v1, 0.0  ;;  %v7405_v31 = vld [vmem:[#allocation3 + $0x170] sm:$0xff]  ;;  %v7414_v55 = vld [vmem:[#allocation3 + $0x1b8] sm:$0xff] }
 0xe25   :  { %7572 = vst [vmem:[#allocation9 + $0xa8] sm:$0xff] %v7508_v25  ;;  %v7465_v4 = vadd.f32 %v7401_v21, %v11644_v26  ;;  %v7525_v42 = vmax.f32 %v7461_v41, 0.0  ;;  %v7466_v39 = vadd.f32 %v7402_v56, %v11647_v36  ;;  %v7526_v23 = vmax.f32 %v7462_v5, 0.0  ;;  %v7417_v40 = vld [vmem:[#allocation3 + $0x1d0] sm:$0xff]  ;;  %v7418_v1 = vld [vmem:[#allocation3 + $0x1d8] sm:$0xff]  ;;  %v7420_v56 = vld [vmem:[#allocation3 + $0x1e8] sm:$0xff] }
 0xe26   :  { %7573 = vst [vmem:[#allocation9 + $0xb0] sm:$0xff] %v7509_v7  ;;  %v7467_v29 = vadd.f32 %v7403_v58, %v11650_v37  ;;  %v7527_v25 = vmax.f32 %v7463_v35, 0.0  ;;  %v7468_v45 = vadd.f32 %v7404_v43, %v11653_v19  ;;  %v7528_v8 = vmax.f32 %v7464_v12, 0.0  ;;  %v7408_v7 = vld [vmem:[#allocation3 + $0x188] sm:$0xff]  ;;  %v12845_v57 = vld [vmem:[#allocation23_spill] sm:$0xff]  ;;  %v12848_v35 = vld [vmem:[#allocation24_spill] sm:$0xff] }
 0xe27   :  { %7574 = vst [vmem:[#allocation9 + $0xb8] sm:$0xff] %v7510_v3  ;;  %v7469_v26 = vadd.f32 %v7405_v31, %v11656_v2  ;;  %v7529_v13 = vmax.f32 %v7465_v4, 0.0  ;;  %v7470_v36 = vadd.f32 %v7406_v51, %v11659_v9  ;;  %v7530_v3 = vmax.f32 %v7466_v39, 0.0  ;;  %v12847_v21 = vld [vmem:[#allocation39_spill] sm:$0xff] }
 0xe28   :  { %7575 = vst [vmem:[#allocation9 + $0xc0] sm:$0xff] %v7511_v22  ;;  %v7471_v37 = vadd.f32 %v7407_v24, %v12838_v59  ;;  %v7531_v22 = vmax.f32 %v7467_v29, 0.0  ;;  %v7472_v19 = vadd.f32 %v7408_v7, %v12839_v34  ;;  %v7473_v2 = vadd.f32 %v7409_v15, %v12840_v27  ;;  %v7421_v12 = vld [vmem:[#allocation3 + $0x1f0] sm:$0xff] }
 0xe29   :  { %7576 = vst [vmem:[#allocation9 + $0xc8] sm:$0xff] %v7512_v54  ;;  %v7532_v54 = vmax.f32 %v7468_v45, 0.0  ;;  %v7474_v9 = vadd.f32 %v7410_v0, %v12841_v30  ;;  %v7477_v10 = vadd.f32 %v7413_v60, %v12844_v62 }
 0xe2a   :  { %7577 = vst [vmem:[#allocation9 + $0xd0] sm:$0xff] %v7513_v50  ;;  %v7533_v50 = vmax.f32 %v7469_v26, 0.0  ;;  %v7535_v44 = vmax.f32 %v7471_v37, 0.0  ;;  %v7536_v52 = vmax.f32 %v7472_v19, 0.0 }
 0xe2b   :  { %7578 = vst [vmem:[#allocation9 + $0xd8] sm:$0xff] %v7514_v16  ;;  %v7534_v16 = vmax.f32 %v7470_v36, 0.0  ;;  %v7538_v61 = vmax.f32 %v7474_v9, 0.0  ;;  %v7541_v58 = vmax.f32 %v7477_v10, 0.0 }
 0xe2c   :  { %7579 = vst [vmem:[#allocation9 + $0xe0] sm:$0xff] %v7515_v14  ;;  %v7475_v14 = vadd.f32 %v7411_v33, %v12842_v63 }
 0xe2d   :  { %7580 = vst [vmem:[#allocation9 + $0xe8] sm:$0xff] %v7516_v11  ;;  %v12843_v11 = vld [vmem:[#allocation120_spill] sm:$0xff] }
 0xe2e   :  { %7581 = vst [vmem:[#allocation9 + $0xf0] sm:$0xff] %v7517_v46  ;;  %v7476_v49 = vadd.f32 %v7412_v53, %v12843_v11  ;;  %v7416_v46 = vld [vmem:[#allocation3 + $0x1c8] sm:$0xff]  ;;  %v7539_v41 = vmax.f32 %v7475_v14, 0.0 }
 0xe2f   :  { %7582 = vst [vmem:[#allocation9 + $0xf8] sm:$0xff] %v7518_v47  ;;  %v7537_v47 = vmax.f32 %v7473_v2, 0.0  ;;  %v7480_v5 = vadd.f32 %v7416_v46, %v12847_v21 }
 0xe30   :  { %7583 = vst [vmem:[#allocation9 + $0x100] sm:$0xff] %v7519_v20  ;;  %v7478_v20 = vadd.f32 %v7414_v55, %v12845_v57 }
 0xe31   :  { %7584 = vst [vmem:[#allocation9 + $0x108] sm:$0xff] %v7520_v32  ;;  %v12846_v32 = vld [vmem:[#allocation121_spill] sm:$0xff]  ;;  %v7544_v29 = vmax.f32 %v7480_v5, 0.0 }
 0xe32   :  { %7585 = vst [vmem:[#allocation9 + $0x110] sm:$0xff] %v7521_v17  ;;  %v7479_v48 = vadd.f32 %v7415_v6, %v12846_v32  ;;  %v7419_v17 = vld [vmem:[#allocation3 + $0x1e0] sm:$0xff]  ;;  %v7542_v4 = vmax.f32 %v7478_v20, 0.0 }
 0xe33   :  { %7586 = vst [vmem:[#allocation9 + $0x118] sm:$0xff] %v7522_v38  ;;  %v7540_v38 = vmax.f32 %v7476_v49, 0.0 }
 0xe34   :  { %7587 = vst [vmem:[#allocation9 + $0x120] sm:$0xff] %v7523_v18  ;;  %v7481_v18 = vadd.f32 %v7417_v40, %v12848_v35  ;;  %v7543_v39 = vmax.f32 %v7479_v48, 0.0 }
 0xe35   :  { %7588 = vst [vmem:[#allocation9 + $0x128] sm:$0xff] %v7524_v28  ;;  %v12849_v28 = vld [vmem:[#allocation25_spill] sm:$0xff] }
 0xe36   :  { %7589 = vst [vmem:[#allocation9 + $0x130] sm:$0xff] %v7525_v42  ;;  %v7482_v43 = vadd.f32 %v7418_v1, %v12849_v28  ;;  %v12850_v42 = vld [vmem:[#allocation122_spill] sm:$0xff]  ;;  %v7545_v45 = vmax.f32 %v7481_v18, 0.0 }
 0xe37   :  { %7590 = vst [vmem:[#allocation9 + $0x138] sm:$0xff] %v7526_v23  ;;  %v7483_v31 = vadd.f32 %v7419_v17, %v12850_v42  ;;  %v12851_v23 = vld [vmem:[#allocation26_spill] sm:$0xff] }
 0xe38   :  { %7591 = vst [vmem:[#allocation9 + $0x140] sm:$0xff] %v7527_v25  ;;  %v7484_v51 = vadd.f32 %v7420_v56, %v12851_v23  ;;  %v12852_v25 = vld [vmem:[#allocation27_spill] sm:$0xff] }
 0xe39   :  { %7592 = vst [vmem:[#allocation9 + $0x148] sm:$0xff] %v7528_v8  ;;  %v7485_v24 = vadd.f32 %v7421_v12, %v12852_v25  ;;  %v7546_v8 = vmax.f32 %v7482_v43, 0.0  ;;  %v7547_v7 = vmax.f32 %v7483_v31, 0.0 }
 0xe3a   :  { %7593 = vst [vmem:[#allocation9 + $0x150] sm:$0xff] %v7529_v13  ;;  %v7548_v26 = vmax.f32 %v7484_v51, 0.0 }
 0xe3b   :  { %7594 = vst [vmem:[#allocation9 + $0x158] sm:$0xff] %v7530_v3  ;;  %v7549_v13 = vmax.f32 %v7485_v24, 0.0 }
 0xe3c   :  { %7595 = vst [vmem:[#allocation9 + $0x160] sm:$0xff] %v7531_v22 }
 0xe3d   :  { %7596 = vst [vmem:[#allocation9 + $0x168] sm:$0xff] %v7532_v54 }
 0xe3e   :  { %7597 = vst [vmem:[#allocation9 + $0x170] sm:$0xff] %v7533_v50 }
 0xe3f   :  { %7598 = vst [vmem:[#allocation9 + $0x178] sm:$0xff] %v7534_v16 }
 0xe40   :  { %7599 = vst [vmem:[#allocation9 + $0x180] sm:$0xff] %v7535_v44 }
 0xe41   :  { %7600 = vst [vmem:[#allocation9 + $0x188] sm:$0xff] %v7536_v52 }
 0xe42   :  { %7601 = vst [vmem:[#allocation9 + $0x190] sm:$0xff] %v7537_v47 }
 0xe43   :  { %7602 = vst [vmem:[#allocation9 + $0x198] sm:$0xff] %v7538_v61 }
 0xe44   :  { %7603 = vst [vmem:[#allocation9 + $0x1a0] sm:$0xff] %v7539_v41 }
 0xe45   :  { %7604 = vst [vmem:[#allocation9 + $0x1a8] sm:$0xff] %v7540_v38 }
 0xe46   :  { %7605 = vst [vmem:[#allocation9 + $0x1b0] sm:$0xff] %v7541_v58 }
 0xe47   :  { %7606 = vst [vmem:[#allocation9 + $0x1b8] sm:$0xff] %v7542_v4 }
 0xe48   :  { %7607 = vst [vmem:[#allocation9 + $0x1c0] sm:$0xff] %v7543_v39 }
 0xe49   :  { %7608 = vst [vmem:[#allocation9 + $0x1c8] sm:$0xff] %v7544_v29 }
 0xe4a   :  { %7609 = vst [vmem:[#allocation9 + $0x1d0] sm:$0xff] %v7545_v45 }
 0xe4b   :  { %7610 = vst [vmem:[#allocation9 + $0x1d8] sm:$0xff] %v7546_v8 }
 0xe4c   :  { %7611 = vst [vmem:[#allocation9 + $0x1e0] sm:$0xff] %v7547_v7 }
 0xe4d   :  { %7612 = vst [vmem:[#allocation9 + $0x1e8] sm:$0xff] %v7548_v26 }
 0xe4e   :  { %7613 = vst [vmem:[#allocation9 + $0x1f0] sm:$0xff] %v7549_v13 }
 0xe4f   :  { %7627 = dma.vmem_to_hbm [thread:$0]  %s7620_s6, 8192, %s7622_s23, [#allocation5], %s7786_s9, %s7786_s9, %s7787_s10  }
 0xe50   :  { %7783 = dma.done.wait [#allocation5], 8192  }
 0xe51   :  { %7784 = vsyncadd [#allocation5], 4294959104 }
 0xe52   :  { %7632 = vsyncpa [#allocation4], 1 }
 0xe53   :  { %7633 = vsyncpa [#allocation7], 1 }
 0xe54   :  { %7634 = vsyncpa [#allocation5], 1 }

</bundles_post_ra>
